<compile_context>
chip_gen: v7x
topology: tpu7x:2x2x1
jax: 0.10.0
libtpu: 0.0.40
codegen_flags: <defaults>
</compile_context>

<pallas_src>
import jax
import jax.numpy as jnp
from jax.experimental import pallas as pl
from jax.experimental.pallas import tpu as pltpu


def _round_up(x, m):
    return (x + m - 1) // m * m


CH_IN = 1
CH = 2
# (ci, co, kernel, stride) mirroring layer1 of the PyTorch module
CONV_SPECS = [
    (CH_IN,   CH * 8,  7, 1),
    (CH * 8,  CH * 16, 5, 2),
    (CH * 16, CH * 32, 3, 2),
    (CH * 32, CH * 32, 3, 2),
    (CH * 32, CH * 64, 3, 2),
    (CH * 64, CH * 64, 3, 2),
]


# ----------------------------------------------------------------------------
# Pallas kernel: Y^T = relu(W^T @ P^T + b)   (lane-dense output, M on lanes)
#   w_ref: (Co, K) bf16, x_ref: (K, tm) bf16, b_ref: (Co, 1) f32
#   o_ref: (Co, tm) bf16
# ----------------------------------------------------------------------------
def _conv_gemm_kernel(w_ref, x_ref, b_ref, o_ref):
    y = jnp.dot(w_ref[...], x_ref[...], preferred_element_type=jnp.float32)
    y = y + b_ref[...]
    o_ref[...] = jnp.maximum(y, 0.0).astype(o_ref.dtype)


def conv_gemm_t(patches_t, w_t, b, *, two_blocks=False):
    """patches_t: (K, M) bf16, w_t: (Co, K) bf16, b: (Co, 1) f32 -> (Co, M) bf16."""
    K, M = patches_t.shape
    Co = w_t.shape[0]
    n_blocks = 2 if two_blocks else 1
    M_pad = _round_up(M, n_blocks * 128) if n_blocks > 1 else M
    if M_pad != M:
        patches_t = jnp.pad(patches_t, ((0, 0), (0, M_pad - M)))
    tm = M_pad // n_blocks

    flops = 2 * Co * K * M_pad
    bytes_acc = 2 * (Co * K + K * M_pad + Co * M_pad) + 4 * Co

    out = pl.pallas_call(
        _conv_gemm_kernel,
        out_shape=jax.ShapeDtypeStruct((Co, M_pad), jnp.bfloat16),
        grid=(n_blocks,),
        in_specs=[
            pl.BlockSpec((Co, K), lambda i: (0, 0)),   # weights resident
            pl.BlockSpec((K, tm), lambda i: (0, i)),   # patch columns, lane-dense
            pl.BlockSpec((Co, 1), lambda i: (0, 0)),   # bias
        ],
        out_specs=pl.BlockSpec((Co, tm), lambda i: (0, i)),
        compiler_params=pltpu.CompilerParams(
            dimension_semantics=("parallel",)),        # 2 blocks -> both v7x TCs
        cost_estimate=pl.CostEstimate(
            flops=flops, transcendentals=0, bytes_accessed=bytes_acc),
    )(w_t, patches_t, b)

    if M_pad != M:
        out = out[:, :M]
    return out


# ----------------------------------------------------------------------------
# Fused tail kernel: conv6 (as GEMM) + Linear(128,256)+ReLU + fc + head
#   p6: (1152, N) bf16 patches, weights bf16, biases f32 (Co, 1)
#   output: (3, N) f32 with row 0 tanh, rows 1-2 sigmoid
# ----------------------------------------------------------------------------
def _tail_kernel(p6_ref, w6_ref, b6_ref, wv_ref, bv_ref, wf_ref, bf_ref, o_ref):
    h = jnp.dot(w6_ref[...], p6_ref[...], preferred_element_type=jnp.float32)
    h = jnp.maximum(h + b6_ref[...], 0.0).astype(jnp.bfloat16)      # conv6 + ReLU
    h = jnp.dot(wv_ref[...], h, preferred_element_type=jnp.float32)
    h = jnp.maximum(h + bv_ref[...], 0.0).astype(jnp.bfloat16)      # v + ReLU
    y = jnp.dot(wf_ref[...], h, preferred_element_type=jnp.float32)
    y = y + bf_ref[...]                                             # fc
    row = jax.lax.broadcasted_iota(jnp.int32, y.shape, 0)
    sig = 0.5 * (jnp.tanh(0.5 * y) + 1.0)        # numerically-stable sigmoid
    o_ref[...] = jnp.where(row == 0, jnp.tanh(y), sig)


def tail_fused(p6, w6, b6, wv, bv, wf, bf):
    N = p6.shape[1]
    flops = 2 * N * (w6.shape[0] * w6.shape[1]
                     + wv.shape[0] * wv.shape[1]
                     + wf.shape[0] * wf.shape[1])
    bytes_acc = 2 * (p6.size + w6.size + wv.size + wf.size) \
        + 4 * (b6.size + bv.size + bf.size + 3 * N)
    return pl.pallas_call(
        _tail_kernel,
        out_shape=jax.ShapeDtypeStruct((3, N), jnp.float32),
        cost_estimate=pl.CostEstimate(
            flops=flops, transcendentals=6 * N, bytes_accessed=bytes_acc),
    )(p6, w6, b6, wv, bv, wf, bf)


# ----------------------------------------------------------------------------
# Plain-JAX glue: transposed im2col — builds (K, M) directly from (C, N, H, W)
# so the conv GEMM output (Co, M) is lane-dense and feeds the next layer as-is.
# ----------------------------------------------------------------------------
def im2col_t(x_cnhw, k, stride):
    C, N, H, W = x_cnhw.shape
    OH = (H - k) // stride + 1
    OW = (W - k) // stride + 1
    cols = []
    for i in range(k):
        for j in range(k):
            cols.append(x_cnhw[:, :,
                               i:i + stride * (OH - 1) + 1:stride,
                               j:j + stride * (OW - 1) + 1:stride])
    p = jnp.stack(cols, axis=0)                      # (k*k, C, N, OH, OW)
    return p.reshape(k * k * C, N * OH * OW), (N, OH, OW)


# ----------------------------------------------------------------------------
# Parameter construction (PyTorch-style init, re-laid-out for the TPU kernels)
# ----------------------------------------------------------------------------
def init_params(key):
    convs = []
    for (ci, co, k, stride) in CONV_SPECS:
        key, kw, kb = jax.random.split(key, 3)
        bound = 1.0 / float((ci * k * k) ** 0.5)
        w_pt = jax.random.uniform(kw, (co, ci, k, k), jnp.float32, -bound, bound)
        b = jax.random.uniform(kb, (co,), jnp.float32, -bound, bound)
        # (Co, Ci, KH, KW) -> (Co, KH, KW, Ci) -> (Co, KH*KW*Ci): matches im2col_t
        w_t = jnp.transpose(w_pt, (0, 2, 3, 1)).reshape(co, k * k * ci)
        convs.append((w_t.astype(jnp.bfloat16), b.reshape(co, 1)))

    def linear(key, n_in, n_out):
        key, kw, kb = jax.random.split(key, 3)
        bound = 1.0 / float(n_in ** 0.5)
        w = jax.random.uniform(kw, (n_out, n_in), jnp.float32, -bound, bound)
        b = jax.random.uniform(kb, (n_out,), jnp.float32, -bound, bound)
        return key, (w.astype(jnp.bfloat16), b.reshape(n_out, 1))

    key, v_p = linear(key, 64 * CH * 1 * 1, 256)    # Linear(128, 256)
    key, fc_p = linear(key, 256, 3)                  # Linear(256, 3)
    return {"convs": convs, "v": v_p, "fc": fc_p}


# ----------------------------------------------------------------------------
# Forward pass (matches BehavioralCloningModel.forward semantics)
# ----------------------------------------------------------------------------
def behavioral_cloning_forward(params, x_nchw):
    # NCHW -> CNHW; bf16 feeds the MXU, accumulation stays f32 in-kernel.
    x = jnp.transpose(x_nchw, (1, 0, 2, 3)).astype(jnp.bfloat16)

    # conv1 .. conv5 : transposed lane-dense GEMMs (+ fused bias/ReLU)
    for (ci, co, k, stride), (w_t, b) in zip(CONV_SPECS[:5], params["convs"][:5]):
        patches, (n, oh, ow) = im2col_t(x, k, stride)
        y = conv_gemm_t(patches, w_t, b, two_blocks=patches.shape[1] >= 2048)
        x = y.reshape(co, n, oh, ow)                 # stays in (C, N, H, W)

    # conv6: 3x3 stride-2 on a 4x4 map -> 1x1 output; only the top-left 3x3
    # window is read, so its im2col is a static slice (tiny, XLA-side).
    ci6, co6, k6, _ = CONV_SPECS[5]
    w6, b6 = params["convs"][5]
    n = x.shape[1]
    p6 = (x[:, :, :k6, :k6]
          .transpose(2, 3, 0, 1)
          .reshape(k6 * k6 * ci6, n))                # (1152, N) bf16

    wv, bv = params["v"]
    wf, bf = params["fc"]
    out_t = tail_fused(p6, w6, b6, wv, bv, wf, bf)   # (3, N) f32, head fused
    return out_t.T                                   # (N, 3)


if __name__ == "__main__":
    key = jax.random.PRNGKey(0)
    key, kx = jax.random.split(key)
    params = init_params(key)

    # batch=2, chIn=1, 96x96 (the architecture requires 96x96 -> 1x1 feature map)
    x = jax.random.uniform(kx, (2, CH_IN, 96, 96), jnp.float32)

    fwd = jax.jit(behavioral_cloning_forward)
    out = jax.block_until_ready(fwd(params, x))

    assert out.shape == (2, 3), out.shape
    assert bool(jnp.all(jnp.isfinite(out)))
    # col 0 in [-1, 1] (tanh), cols 1-2 in [0, 1] (sigmoid)
    assert bool(jnp.all(jnp.abs(out[:, 0]) <= 1.0))
    assert bool(jnp.all((out[:, 1:] >= 0.0) & (out[:, 1:] <= 1.0)))
    print("KERNEL_OK")
</pallas_src>

<mosaic_0001>
module attributes {stable_mosaic.version = 11 : i64} {
  func.func @_conv_gemm_kernel(%arg0: i32, %arg1: memref<16x49xbf16, #tpu.memory_space<vmem>>, %arg2: memref<49x8192xbf16, #tpu.memory_space<vmem>>, %arg3: memref<16x1xf32, #tpu.memory_space<vmem>>, %arg4: memref<16x8192xbf16, #tpu.memory_space<vmem>>) attributes {dimension_semantics = [#tpu.dimension_semantics<parallel>], iteration_bounds = array<i64: 2>, scalar_prefetch = 0 : i64, scratch_operands = 0 : i64, tpu.core_type = #tpu.core_type<tc>, window_params = [{pipeline_mode = #tpu.pipeline_mode<synchronous>, transform_indices = @transform_0, window_bounds = array<i64: 16, 49>}, {transform_indices = @transform_1, window_bounds = array<i64: 49, 8192>}, {pipeline_mode = #tpu.pipeline_mode<synchronous>, transform_indices = @transform_2, window_bounds = array<i64: 16, 1>}, {transform_indices = @transform_3, window_bounds = array<i64: 16, 8192>}]} {
    %c0 = arith.constant 0 : index
    %c0_0 = arith.constant 0 : index
    %0 = vector.load %arg1[%c0, %c0_0] : memref<16x49xbf16, #tpu.memory_space<vmem>>, vector<16x49xbf16>
    %c0_1 = arith.constant 0 : index
    %c0_2 = arith.constant 0 : index
    %1 = vector.load %arg2[%c0_1, %c0_2] : memref<49x8192xbf16, #tpu.memory_space<vmem>>, vector<49x8192xbf16>
    %cst = arith.constant dense<0.000000e+00> : vector<16x8192xf32>
    %2 = tpu.matmul %0, %1, %cst {dimension_numbers = #tpu.dot_dimension_numbers<[1], [0], [0], [1], [0, 0, 1, 1], [], []>} : vector<16x49xbf16>, vector<49x8192xbf16>, vector<16x8192xf32> -> vector<16x8192xf32>
    %c0_3 = arith.constant 0 : index
    %c0_4 = arith.constant 0 : index
    %3 = vector.load %arg3[%c0_3, %c0_4] : memref<16x1xf32, #tpu.memory_space<vmem>>, vector<16x1xf32>
    %4 = vector.broadcast %3 : vector<16x1xf32> to vector<16x8192xf32>
    %5 = arith.addf %2, %4 : vector<16x8192xf32>
    %cst_5 = arith.constant 0.000000e+00 : f32
    %6 = vector.broadcast %cst_5 : f32 to vector<16x8192xf32>
    %7 = arith.maximumf %5, %6 : vector<16x8192xf32>
    %8 = arith.truncf %7 : vector<16x8192xf32> to vector<16x8192xbf16>
    %c0_6 = arith.constant 0 : index
    %c0_7 = arith.constant 0 : index
    %9 = vector.load %arg4[%c0_6, %c0_7] : memref<16x8192xbf16, #tpu.memory_space<vmem>>, vector<16x8192xbf16>
    tpu.vector_store %arg4[%c0_6, %c0_7], %8 {strides = array<i32>} : memref<16x8192xbf16, #tpu.memory_space<vmem>>, vector<16x8192xbf16>,
    return
  }
  func.func @transform_0(%arg0: i32) -> (i32, i32) {
    %c0_i32 = arith.constant 0 : i32
    %c0_i32_0 = arith.constant 0 : i32
    %c0_i32_1 = arith.constant 0 : i32
    return %c0_i32, %c0_i32_0 : i32, i32
  }
  func.func @transform_1(%arg0: i32) -> (i32, i32) {
    %c0_i32 = arith.constant 0 : i32
    %c0_i32_0 = arith.constant 0 : i32
    return %c0_i32, %arg0 : i32, i32
  }
  func.func @transform_2(%arg0: i32) -> (i32, i32) {
    %c0_i32 = arith.constant 0 : i32
    %c0_i32_0 = arith.constant 0 : i32
    %c0_i32_1 = arith.constant 0 : i32
    return %c0_i32, %c0_i32_0 : i32, i32
  }
  func.func @transform_3(%arg0: i32) -> (i32, i32) {
    %c0_i32 = arith.constant 0 : i32
    %c0_i32_0 = arith.constant 0 : i32
    return %c0_i32, %arg0 : i32, i32
  }
}

module attributes {stable_mosaic.version = 11 : i64} {
  func.func @_conv_gemm_kernel(%arg0: i32, %arg1: memref<32x400xbf16, #tpu.memory_space<vmem>>, %arg2: memref<400x1920xbf16, #tpu.memory_space<vmem>>, %arg3: memref<32x1xf32, #tpu.memory_space<vmem>>, %arg4: memref<32x1920xbf16, #tpu.memory_space<vmem>>) attributes {dimension_semantics = [#tpu.dimension_semantics<parallel>], iteration_bounds = array<i64: 2>, scalar_prefetch = 0 : i64, scratch_operands = 0 : i64, tpu.core_type = #tpu.core_type<tc>, window_params = [{pipeline_mode = #tpu.pipeline_mode<synchronous>, transform_indices = @transform_0, window_bounds = array<i64: 32, 400>}, {transform_indices = @transform_1, window_bounds = array<i64: 400, 1920>}, {pipeline_mode = #tpu.pipeline_mode<synchronous>, transform_indices = @transform_2, window_bounds = array<i64: 32, 1>}, {transform_indices = @transform_3, window_bounds = array<i64: 32, 1920>}]} {
    %c0 = arith.constant 0 : index
    %c0_0 = arith.constant 0 : index
    %0 = vector.load %arg1[%c0, %c0_0] : memref<32x400xbf16, #tpu.memory_space<vmem>>, vector<32x400xbf16>
    %c0_1 = arith.constant 0 : index
    %c0_2 = arith.constant 0 : index
    %1 = vector.load %arg2[%c0_1, %c0_2] : memref<400x1920xbf16, #tpu.memory_space<vmem>>, vector<400x1920xbf16>
    %cst = arith.constant dense<0.000000e+00> : vector<32x1920xf32>
    %2 = tpu.matmul %0, %1, %cst {dimension_numbers = #tpu.dot_dimension_numbers<[1], [0], [0], [1], [0, 0, 1, 1], [], []>} : vector<32x400xbf16>, vector<400x1920xbf16>, vector<32x1920xf32> -> vector<32x1920xf32>
    %c0_3 = arith.constant 0 : index
    %c0_4 = arith.constant 0 : index
    %3 = vector.load %arg3[%c0_3, %c0_4] : memref<32x1xf32, #tpu.memory_space<vmem>>, vector<32x1xf32>
    %4 = vector.broadcast %3 : vector<32x1xf32> to vector<32x1920xf32>
    %5 = arith.addf %2, %4 : vector<32x1920xf32>
    %cst_5 = arith.constant 0.000000e+00 : f32
    %6 = vector.broadcast %cst_5 : f32 to vector<32x1920xf32>
    %7 = arith.maximumf %5, %6 : vector<32x1920xf32>
    %8 = arith.truncf %7 : vector<32x1920xf32> to vector<32x1920xbf16>
    %c0_6 = arith.constant 0 : index
    %c0_7 = arith.constant 0 : index
    %9 = vector.load %arg4[%c0_6, %c0_7] : memref<32x1920xbf16, #tpu.memory_space<vmem>>, vector<32x1920xbf16>
    tpu.vector_store %arg4[%c0_6, %c0_7], %8 {strides = array<i32>} : memref<32x1920xbf16, #tpu.memory_space<vmem>>, vector<32x1920xbf16>,
    return
  }
  func.func @transform_0(%arg0: i32) -> (i32, i32) {
    %c0_i32 = arith.constant 0 : i32
    %c0_i32_0 = arith.constant 0 : i32
    %c0_i32_1 = arith.constant 0 : i32
    return %c0_i32, %c0_i32_0 : i32, i32
  }
  func.func @transform_1(%arg0: i32) -> (i32, i32) {
    %c0_i32 = arith.constant 0 : i32
    %c0_i32_0 = arith.constant 0 : i32
    return %c0_i32, %arg0 : i32, i32
  }
  func.func @transform_2(%arg0: i32) -> (i32, i32) {
    %c0_i32 = arith.constant 0 : i32
    %c0_i32_0 = arith.constant 0 : i32
    %c0_i32_1 = arith.constant 0 : i32
    return %c0_i32, %c0_i32_0 : i32, i32
  }
  func.func @transform_3(%arg0: i32) -> (i32, i32) {
    %c0_i32 = arith.constant 0 : i32
    %c0_i32_0 = arith.constant 0 : i32
    return %c0_i32, %arg0 : i32, i32
  }
}

module attributes {stable_mosaic.version = 11 : i64} {
  func.func @_conv_gemm_kernel(%arg0: i32, %arg1: memref<64x288xbf16, #tpu.memory_space<vmem>>, %arg2: memref<288x882xbf16, #tpu.memory_space<vmem>>, %arg3: memref<64x1xf32, #tpu.memory_space<vmem>>, %arg4: memref<64x882xbf16, #tpu.memory_space<vmem>>) attributes {dimension_semantics = [#tpu.dimension_semantics<parallel>], iteration_bounds = array<i64: 1>, scalar_prefetch = 0 : i64, scratch_operands = 0 : i64, tpu.core_type = #tpu.core_type<tc>, window_params = [{pipeline_mode = #tpu.pipeline_mode<synchronous>, transform_indices = @transform_0, window_bounds = array<i64: 64, 288>}, {transform_indices = @transform_1, window_bounds = array<i64: 288, 882>}, {pipeline_mode = #tpu.pipeline_mode<synchronous>, transform_indices = @transform_2, window_bounds = array<i64: 64, 1>}, {transform_indices = @transform_3, window_bounds = array<i64: 64, 882>}]} {
    %c0 = arith.constant 0 : index
    %c0_0 = arith.constant 0 : index
    %0 = vector.load %arg1[%c0, %c0_0] : memref<64x288xbf16, #tpu.memory_space<vmem>>, vector<64x288xbf16>
    %c0_1 = arith.constant 0 : index
    %c0_2 = arith.constant 0 : index
    %1 = vector.load %arg2[%c0_1, %c0_2] : memref<288x882xbf16, #tpu.memory_space<vmem>>, vector<288x882xbf16>
    %cst = arith.constant dense<0.000000e+00> : vector<64x882xf32>
    %2 = tpu.matmul %0, %1, %cst {dimension_numbers = #tpu.dot_dimension_numbers<[1], [0], [0], [1], [0, 0, 1, 1], [], []>} : vector<64x288xbf16>, vector<288x882xbf16>, vector<64x882xf32> -> vector<64x882xf32>
    %c0_3 = arith.constant 0 : index
    %c0_4 = arith.constant 0 : index
    %3 = vector.load %arg3[%c0_3, %c0_4] : memref<64x1xf32, #tpu.memory_space<vmem>>, vector<64x1xf32>
    %4 = vector.broadcast %3 : vector<64x1xf32> to vector<64x882xf32>
    %5 = arith.addf %2, %4 : vector<64x882xf32>
    %cst_5 = arith.constant 0.000000e+00 : f32
    %6 = vector.broadcast %cst_5 : f32 to vector<64x882xf32>
    %7 = arith.maximumf %5, %6 : vector<64x882xf32>
    %8 = arith.truncf %7 : vector<64x882xf32> to vector<64x882xbf16>
    %c0_6 = arith.constant 0 : index
    %c0_7 = arith.constant 0 : index
    %9 = vector.load %arg4[%c0_6, %c0_7] : memref<64x882xbf16, #tpu.memory_space<vmem>>, vector<64x882xbf16>
    tpu.vector_store %arg4[%c0_6, %c0_7], %8 {strides = array<i32>} : memref<64x882xbf16, #tpu.memory_space<vmem>>, vector<64x882xbf16>,
    return
  }
  func.func @transform_0(%arg0: i32) -> (i32, i32) {
    %c0_i32 = arith.constant 0 : i32
    %c0_i32_0 = arith.constant 0 : i32
    %c0_i32_1 = arith.constant 0 : i32
    return %c0_i32, %c0_i32_0 : i32, i32
  }
  func.func @transform_1(%arg0: i32) -> (i32, i32) {
    %c0_i32 = arith.constant 0 : i32
    %c0_i32_0 = arith.constant 0 : i32
    return %c0_i32, %arg0 : i32, i32
  }
  func.func @transform_2(%arg0: i32) -> (i32, i32) {
    %c0_i32 = arith.constant 0 : i32
    %c0_i32_0 = arith.constant 0 : i32
    %c0_i32_1 = arith.constant 0 : i32
    return %c0_i32, %c0_i32_0 : i32, i32
  }
  func.func @transform_3(%arg0: i32) -> (i32, i32) {
    %c0_i32 = arith.constant 0 : i32
    %c0_i32_0 = arith.constant 0 : i32
    return %c0_i32, %arg0 : i32, i32
  }
}

module attributes {stable_mosaic.version = 11 : i64} {
  func.func @_conv_gemm_kernel(%arg0: i32, %arg1: memref<64x576xbf16, #tpu.memory_space<vmem>>, %arg2: memref<576x200xbf16, #tpu.memory_space<vmem>>, %arg3: memref<64x1xf32, #tpu.memory_space<vmem>>, %arg4: memref<64x200xbf16, #tpu.memory_space<vmem>>) attributes {dimension_semantics = [#tpu.dimension_semantics<parallel>], iteration_bounds = array<i64: 1>, scalar_prefetch = 0 : i64, scratch_operands = 0 : i64, tpu.core_type = #tpu.core_type<tc>, window_params = [{pipeline_mode = #tpu.pipeline_mode<synchronous>, transform_indices = @transform_0, window_bounds = array<i64: 64, 576>}, {transform_indices = @transform_1, window_bounds = array<i64: 576, 200>}, {pipeline_mode = #tpu.pipeline_mode<synchronous>, transform_indices = @transform_2, window_bounds = array<i64: 64, 1>}, {transform_indices = @transform_3, window_bounds = array<i64: 64, 200>}]} {
    %c0 = arith.constant 0 : index
    %c0_0 = arith.constant 0 : index
    %0 = vector.load %arg1[%c0, %c0_0] : memref<64x576xbf16, #tpu.memory_space<vmem>>, vector<64x576xbf16>
    %c0_1 = arith.constant 0 : index
    %c0_2 = arith.constant 0 : index
    %1 = vector.load %arg2[%c0_1, %c0_2] : memref<576x200xbf16, #tpu.memory_space<vmem>>, vector<576x200xbf16>
    %cst = arith.constant dense<0.000000e+00> : vector<64x200xf32>
    %2 = tpu.matmul %0, %1, %cst {dimension_numbers = #tpu.dot_dimension_numbers<[1], [0], [0], [1], [0, 0, 1, 1], [], []>} : vector<64x576xbf16>, vector<576x200xbf16>, vector<64x200xf32> -> vector<64x200xf32>
    %c0_3 = arith.constant 0 : index
    %c0_4 = arith.constant 0 : index
    %3 = vector.load %arg3[%c0_3, %c0_4] : memref<64x1xf32, #tpu.memory_space<vmem>>, vector<64x1xf32>
    %4 = vector.broadcast %3 : vector<64x1xf32> to vector<64x200xf32>
    %5 = arith.addf %2, %4 : vector<64x200xf32>
    %cst_5 = arith.constant 0.000000e+00 : f32
    %6 = vector.broadcast %cst_5 : f32 to vector<64x200xf32>
    %7 = arith.maximumf %5, %6 : vector<64x200xf32>
    %8 = arith.truncf %7 : vector<64x200xf32> to vector<64x200xbf16>
    %c0_6 = arith.constant 0 : index
    %c0_7 = arith.constant 0 : index
    %9 = vector.load %arg4[%c0_6, %c0_7] : memref<64x200xbf16, #tpu.memory_space<vmem>>, vector<64x200xbf16>
    tpu.vector_store %arg4[%c0_6, %c0_7], %8 {strides = array<i32>} : memref<64x200xbf16, #tpu.memory_space<vmem>>, vector<64x200xbf16>,
    return
  }
  func.func @transform_0(%arg0: i32) -> (i32, i32) {
    %c0_i32 = arith.constant 0 : i32
    %c0_i32_0 = arith.constant 0 : i32
    %c0_i32_1 = arith.constant 0 : i32
    return %c0_i32, %c0_i32_0 : i32, i32
  }
  func.func @transform_1(%arg0: i32) -> (i32, i32) {
    %c0_i32 = arith.constant 0 : i32
    %c0_i32_0 = arith.constant 0 : i32
    return %c0_i32, %arg0 : i32, i32
  }
  func.func @transform_2(%arg0: i32) -> (i32, i32) {
    %c0_i32 = arith.constant 0 : i32
    %c0_i32_0 = arith.constant 0 : i32
    %c0_i32_1 = arith.constant 0 : i32
    return %c0_i32, %c0_i32_0 : i32, i32
  }
  func.func @transform_3(%arg0: i32) -> (i32, i32) {
    %c0_i32 = arith.constant 0 : i32
    %c0_i32_0 = arith.constant 0 : i32
    return %c0_i32, %arg0 : i32, i32
  }
}

module attributes {stable_mosaic.version = 11 : i64} {
  func.func @_conv_gemm_kernel(%arg0: i32, %arg1: memref<128x576xbf16, #tpu.memory_space<vmem>>, %arg2: memref<576x32xbf16, #tpu.memory_space<vmem>>, %arg3: memref<128x1xf32, #tpu.memory_space<vmem>>, %arg4: memref<128x32xbf16, #tpu.memory_space<vmem>>) attributes {dimension_semantics = [#tpu.dimension_semantics<parallel>], iteration_bounds = array<i64: 1>, scalar_prefetch = 0 : i64, scratch_operands = 0 : i64, tpu.core_type = #tpu.core_type<tc>, window_params = [{pipeline_mode = #tpu.pipeline_mode<synchronous>, transform_indices = @transform_0, window_bounds = array<i64: 128, 576>}, {transform_indices = @transform_1, window_bounds = array<i64: 576, 32>}, {pipeline_mode = #tpu.pipeline_mode<synchronous>, transform_indices = @transform_2, window_bounds = array<i64: 128, 1>}, {transform_indices = @transform_3, window_bounds = array<i64: 128, 32>}]} {
    %c0 = arith.constant 0 : index
    %c0_0 = arith.constant 0 : index
    %0 = vector.load %arg1[%c0, %c0_0] : memref<128x576xbf16, #tpu.memory_space<vmem>>, vector<128x576xbf16>
    %c0_1 = arith.constant 0 : index
    %c0_2 = arith.constant 0 : index
    %1 = vector.load %arg2[%c0_1, %c0_2] : memref<576x32xbf16, #tpu.memory_space<vmem>>, vector<576x32xbf16>
    %cst = arith.constant dense<0.000000e+00> : vector<128x32xf32>
    %2 = tpu.matmul %0, %1, %cst {dimension_numbers = #tpu.dot_dimension_numbers<[1], [0], [0], [1], [0, 0, 1, 1], [], []>} : vector<128x576xbf16>, vector<576x32xbf16>, vector<128x32xf32> -> vector<128x32xf32>
    %c0_3 = arith.constant 0 : index
    %c0_4 = arith.constant 0 : index
    %3 = vector.load %arg3[%c0_3, %c0_4] : memref<128x1xf32, #tpu.memory_space<vmem>>, vector<128x1xf32>
    %4 = vector.broadcast %3 : vector<128x1xf32> to vector<128x32xf32>
    %5 = arith.addf %2, %4 : vector<128x32xf32>
    %cst_5 = arith.constant 0.000000e+00 : f32
    %6 = vector.broadcast %cst_5 : f32 to vector<128x32xf32>
    %7 = arith.maximumf %5, %6 : vector<128x32xf32>
    %8 = arith.truncf %7 : vector<128x32xf32> to vector<128x32xbf16>
    %c0_6 = arith.constant 0 : index
    %c0_7 = arith.constant 0 : index
    %9 = vector.load %arg4[%c0_6, %c0_7] : memref<128x32xbf16, #tpu.memory_space<vmem>>, vector<128x32xbf16>
    tpu.vector_store %arg4[%c0_6, %c0_7], %8 {strides = array<i32>} : memref<128x32xbf16, #tpu.memory_space<vmem>>, vector<128x32xbf16>,
    return
  }
  func.func @transform_0(%arg0: i32) -> (i32, i32) {
    %c0_i32 = arith.constant 0 : i32
    %c0_i32_0 = arith.constant 0 : i32
    %c0_i32_1 = arith.constant 0 : i32
    return %c0_i32, %c0_i32_0 : i32, i32
  }
  func.func @transform_1(%arg0: i32) -> (i32, i32) {
    %c0_i32 = arith.constant 0 : i32
    %c0_i32_0 = arith.constant 0 : i32
    return %c0_i32, %arg0 : i32, i32
  }
  func.func @transform_2(%arg0: i32) -> (i32, i32) {
    %c0_i32 = arith.constant 0 : i32
    %c0_i32_0 = arith.constant 0 : i32
    %c0_i32_1 = arith.constant 0 : i32
    return %c0_i32, %c0_i32_0 : i32, i32
  }
  func.func @transform_3(%arg0: i32) -> (i32, i32) {
    %c0_i32 = arith.constant 0 : i32
    %c0_i32_0 = arith.constant 0 : i32
    return %c0_i32, %arg0 : i32, i32
  }
}

module attributes {stable_mosaic.version = 11 : i64} {
  func.func @_tail_kernel(%arg0: memref<1152x2xbf16, #tpu.memory_space<vmem>>, %arg1: memref<128x1152xbf16, #tpu.memory_space<vmem>>, %arg2: memref<128x1xf32, #tpu.memory_space<vmem>>, %arg3: memref<256x128xbf16, #tpu.memory_space<vmem>>, %arg4: memref<256x1xf32, #tpu.memory_space<vmem>>, %arg5: memref<3x256xbf16, #tpu.memory_space<vmem>>, %arg6: memref<3x1xf32, #tpu.memory_space<vmem>>, %arg7: memref<3x2xf32, #tpu.memory_space<vmem>>) attributes {dimension_semantics = [], scalar_prefetch = 0 : i64, scratch_operands = 0 : i64, tpu.core_type = #tpu.core_type<tc>} {
    %c0 = arith.constant 0 : index
    %c0_0 = arith.constant 0 : index
    %0 = vector.load %arg1[%c0, %c0_0] : memref<128x1152xbf16, #tpu.memory_space<vmem>>, vector<128x1152xbf16>
    %c0_1 = arith.constant 0 : index
    %c0_2 = arith.constant 0 : index
    %1 = vector.load %arg0[%c0_1, %c0_2] : memref<1152x2xbf16, #tpu.memory_space<vmem>>, vector<1152x2xbf16>
    %cst = arith.constant dense<0.000000e+00> : vector<128x2xf32>
    %2 = tpu.matmul %0, %1, %cst {dimension_numbers = #tpu.dot_dimension_numbers<[1], [0], [0], [1], [0, 0, 1, 1], [], []>} : vector<128x1152xbf16>, vector<1152x2xbf16>, vector<128x2xf32> -> vector<128x2xf32>
    %c0_3 = arith.constant 0 : index
    %c0_4 = arith.constant 0 : index
    %3 = vector.load %arg2[%c0_3, %c0_4] : memref<128x1xf32, #tpu.memory_space<vmem>>, vector<128x1xf32>
    %4 = vector.broadcast %3 : vector<128x1xf32> to vector<128x2xf32>
    %5 = arith.addf %2, %4 : vector<128x2xf32>
    %cst_5 = arith.constant 0.000000e+00 : f32
    %6 = vector.broadcast %cst_5 : f32 to vector<128x2xf32>
    %7 = arith.maximumf %5, %6 : vector<128x2xf32>
    %8 = arith.truncf %7 : vector<128x2xf32> to vector<128x2xbf16>
    %c0_6 = arith.constant 0 : index
    %c0_7 = arith.constant 0 : index
    %9 = vector.load %arg3[%c0_6, %c0_7] : memref<256x128xbf16, #tpu.memory_space<vmem>>, vector<256x128xbf16>
    %cst_8 = arith.constant dense<0.000000e+00> : vector<256x2xf32>
    %10 = tpu.matmul %9, %8, %cst_8 {dimension_numbers = #tpu.dot_dimension_numbers<[1], [0], [0], [1], [0, 0, 1, 1], [], []>} : vector<256x128xbf16>, vector<128x2xbf16>, vector<256x2xf32> -> vector<256x2xf32>
    %c0_9 = arith.constant 0 : index
    %c0_10 = arith.constant 0 : index
    %11 = vector.load %arg4[%c0_9, %c0_10] : memref<256x1xf32, #tpu.memory_space<vmem>>, vector<256x1xf32>
    %12 = vector.broadcast %11 : vector<256x1xf32> to vector<256x2xf32>
    %13 = arith.addf %10, %12 : vector<256x2xf32>
    %cst_11 = arith.constant 0.000000e+00 : f32
    %14 = vector.broadcast %cst_11 : f32 to vector<256x2xf32>
    %15 = arith.maximumf %13, %14 : vector<256x2xf32>
    %16 = arith.truncf %15 : vector<256x2xf32> to vector<256x2xbf16>
    %c0_12 = arith.constant 0 : index
    %c0_13 = arith.constant 0 : index
    %17 = vector.load %arg5[%c0_12, %c0_13] : memref<3x256xbf16, #tpu.memory_space<vmem>>, vector<3x256xbf16>
    %cst_14 = arith.constant dense<0.000000e+00> : vector<3x2xf32>
    %18 = tpu.matmul %17, %16, %cst_14 {dimension_numbers = #tpu.dot_dimension_numbers<[1], [0], [0], [1], [0, 0, 1, 1], [], []>} : vector<3x256xbf16>, vector<256x2xbf16>, vector<3x2xf32> -> vector<3x2xf32>
    %c0_15 = arith.constant 0 : index
    %c0_16 = arith.constant 0 : index
    %19 = vector.load %arg6[%c0_15, %c0_16] : memref<3x1xf32, #tpu.memory_space<vmem>>, vector<3x1xf32>
    %20 = vector.broadcast %19 : vector<3x1xf32> to vector<3x2xf32>
    %21 = arith.addf %18, %20 : vector<3x2xf32>
    %22 = tpu.iota {dimensions = array<i32: 0>} : vector<3x2xi32>
    %cst_17 = arith.constant 5.000000e-01 : f32
    %23 = vector.broadcast %cst_17 : f32 to vector<3x2xf32>
    %24 = arith.mulf %23, %21 : vector<3x2xf32>
    %25 = math.tanh %24 : vector<3x2xf32>
    %cst_18 = arith.constant 1.000000e+00 : f32
    %26 = vector.broadcast %cst_18 : f32 to vector<3x2xf32>
    %27 = arith.addf %25, %26 : vector<3x2xf32>
    %cst_19 = arith.constant 5.000000e-01 : f32
    %28 = vector.broadcast %cst_19 : f32 to vector<3x2xf32>
    %29 = arith.mulf %28, %27 : vector<3x2xf32>
    %c0_i32 = arith.constant 0 : i32
    %30 = vector.broadcast %c0_i32 : i32 to vector<3x2xi32>
    %31 = arith.cmpi eq, %22, %30 : vector<3x2xi32>
    %32 = math.tanh %21 : vector<3x2xf32>
    %33 = arith.select %31, %32, %29 : vector<3x2xi1>, vector<3x2xf32>
    %c0_20 = arith.constant 0 : index
    %c0_21 = arith.constant 0 : index
    %34 = vector.load %arg7[%c0_20, %c0_21] : memref<3x2xf32, #tpu.memory_space<vmem>>, vector<3x2xf32>
    tpu.vector_store %arg7[%c0_20, %c0_21], %33 {strides = array<i32>} : memref<3x2xf32, #tpu.memory_space<vmem>>, vector<3x2xf32>,
    return
  }
}

</mosaic_0001>

<bundles_post_ra>
// kernel: behavioral_cloning_forward.6
= control target key start
LH: loop header
LB: loop body
LE: loop exit
PB: predicated region body
PF: predicated region fallthrough
CT: control target
= control target key end

     0   :  { %s4928_s12 = smov 0   ;;  %s4930_s13 = smov 0   ;;  %s6193_s0 = inlined_call_operand.vmem [shape: bf16[16,49], index: 0, kind: input, shape index: {}]   ;;  %s6194_s1 = inlined_call_operand.vmem [shape: bf16[49,16384], index: 1, kind: input, shape index: {}]   ;;  %s6195_s2 = inlined_call_operand.vmem [shape: f32[16,1], index: 2, kind: input, shape index: {}]   ;;  %s6196_s3 = inlined_call_operand.vmem [shape: bf16[16,16384], index: 3, kind: output, shape index: {}]  }
   0x1   :  { %s4932_s14 = smov 0  }
   0x2 LB: > { %s4357_s15 = sadd.s32 4294967295, %s4905_s14   ;;  %s4945_s16 = sadd.s32 1, %s4905_s14   ;;  %s4905_s14 = sphi %s4932_s14, %s6200_s14   ;;  %s4901_s13 = sphi %s4930_s13, %s6199_s13   ;;  %s4897_s12 = sphi %s4928_s12, %s6198_s12  }
   0x3   : > { %s38_s17 = ssub.s32 %s4905_s14, %s4945_s16  ;;  %s41_s18 = sadd.s32 1, %s4901_s13 }
   0x4   : > { %p39_p0 = scmp.eq.s32.totalorder %s38_s17, 0  ;;  %p48_p1 = scmp.ne.s32.totalorder %s4901_s13, %s4897_s12 }
   0x5   : > { %p49_p2 = scmp.eq.s32.totalorder %s4905_s14, 0  ;;  %p99_p3 = scmp.eq.s32.totalorder %s4357_s15, 1 }
   0x6   : > { %s4956_s19 = scalar_select %p39_p0, %s4901_s13, %s41_s18  }
   0x7   : > { %p50_p4 = por %p49_p2, %p48_p1  ;;  %p4958_p5 = por %p99_p3, %p48_p1 }
   0x8   : > { %p4360_p6 = scmp.ge.s32.totalorder %s4905_s14, 2 }
   0xa   : > { %127 = sbr.rel (%p4360_p6) target bundleno = 134 (0x86), region = 24 }
  0x11   : > { %130 = sbr.rel (!%p50_p4) target bundleno = 134 (0x86), region = 28  ;;  %s132_s21 = sand.u32 (%p50_p4), 1, %s4901_s13  }
  0x12   : > { %s4723_s22 = sshll.u32 (%p50_p4), %s4905_s14, 8  ;;  %s4789_s23 = smul.u32 (%p50_p4), 1792, %s132_s21 }
  0x13   : > { %s4968_s26 = scalar_lea.vmem (%p50_p4), %s6194_s1, %s4723_s22 }
  0x14   : > { %v150_v0 = vld [vmem:[%s4968_s26] sm:$0xff] (%p50_p4)  ;;  %v152_v1 = vld [vmem:[%s4968_s26 + $0x8] sm:$0xff] (%p50_p4)  ;;  %v154_v2 = vld [vmem:[%s4968_s26 + $0x10] sm:$0xff] (%p50_p4)  ;;  %s4976_s27 = scalar_lea.vmem (%p50_p4), [#allocation2], %s4789_s23 }
  0x15   : > { %v156_v3 = vld [vmem:[%s4968_s26 + $0x18] sm:$0xff] (%p50_p4)  ;;  %v158_v4 = vld [vmem:[%s4968_s26 + $0x20] sm:$0xff] (%p50_p4)  ;;  %v160_v5 = vld [vmem:[%s4968_s26 + $0x28] sm:$0xff] (%p50_p4)  ;;  %151 = vst [vmem:[%s4976_s27] sm:$0xff] (%p50_p4), %v150_v0 }
  0x16   : > { %153 = vst [vmem:[%s4976_s27 + $0x8] sm:$0xff] (%p50_p4), %v152_v1  ;;  %155 = vst [vmem:[%s4976_s27 + $0x10] sm:$0xff] (%p50_p4), %v154_v2  ;;  %v162_v6 = vld [vmem:[%s4968_s26 + $0x30] sm:$0xff] (%p50_p4)  ;;  %v164_v7 = vld [vmem:[%s4968_s26 + $0x38] sm:$0xff] (%p50_p4) }
  0x17   : > { %157 = vst [vmem:[%s4976_s27 + $0x18] sm:$0xff] (%p50_p4), %v156_v3  ;;  %159 = vst [vmem:[%s4976_s27 + $0x20] sm:$0xff] (%p50_p4), %v158_v4  ;;  %v166_v8 = vld [vmem:[%s4968_s26 + $0x40] sm:$0xff] (%p50_p4)  ;;  %v168_v9 = vld [vmem:[%s4968_s26 + $0x48] sm:$0xff] (%p50_p4) }
  0x18   : > { %161 = vst [vmem:[%s4976_s27 + $0x28] sm:$0xff] %v160_v5  ;;  %163 = vst [vmem:[%s4976_s27 + $0x30] sm:$0xff] %v162_v6  ;;  %v170_v10 = vld [vmem:[%s4968_s26 + $0x50] sm:$0xff]  ;;  %v172_v11 = vld [vmem:[%s4968_s26 + $0x58] sm:$0xff] }
  0x19   : > { %165 = vst [vmem:[%s4976_s27 + $0x38] sm:$0xff] %v164_v7  ;;  %167 = vst [vmem:[%s4976_s27 + $0x40] sm:$0xff] %v166_v8  ;;  %v174_v12 = vld [vmem:[%s4968_s26 + $0x60] sm:$0xff]  ;;  %v176_v13 = vld [vmem:[%s4968_s26 + $0x68] sm:$0xff] }
  0x1a   : > { %169 = vst [vmem:[%s4976_s27 + $0x48] sm:$0xff] %v168_v9  ;;  %171 = vst [vmem:[%s4976_s27 + $0x50] sm:$0xff] %v170_v10  ;;  %v178_v14 = vld [vmem:[%s4968_s26 + $0x70] sm:$0xff]  ;;  %v180_v15 = vld [vmem:[%s4968_s26 + $0x78] sm:$0xff] }
  0x1b   : > { %173 = vst [vmem:[%s4976_s27 + $0x58] sm:$0xff] %v172_v11  ;;  %175 = vst [vmem:[%s4976_s27 + $0x60] sm:$0xff] %v174_v12  ;;  %v182_v16 = vld [vmem:[%s4968_s26 + $0x80] sm:$0xff]  ;;  %v184_v17 = vld [vmem:[%s4968_s26 + $0x88] sm:$0xff] }
  0x1c   : > { %177 = vst [vmem:[%s4976_s27 + $0x68] sm:$0xff] %v176_v13  ;;  %179 = vst [vmem:[%s4976_s27 + $0x70] sm:$0xff] %v178_v14  ;;  %v186_v18 = vld [vmem:[%s4968_s26 + $0x90] sm:$0xff]  ;;  %v188_v19 = vld [vmem:[%s4968_s26 + $0x98] sm:$0xff] }
  0x1d   : > { %181 = vst [vmem:[%s4976_s27 + $0x78] sm:$0xff] %v180_v15  ;;  %183 = vst [vmem:[%s4976_s27 + $0x80] sm:$0xff] %v182_v16  ;;  %v190_v20 = vld [vmem:[%s4968_s26 + $0xa0] sm:$0xff]  ;;  %v192_v21 = vld [vmem:[%s4968_s26 + $0xa8] sm:$0xff] }
  0x1e   : > { %185 = vst [vmem:[%s4976_s27 + $0x88] sm:$0xff] %v184_v17  ;;  %187 = vst [vmem:[%s4976_s27 + $0x90] sm:$0xff] %v186_v18  ;;  %v194_v22 = vld [vmem:[%s4968_s26 + $0xb0] sm:$0xff]  ;;  %v196_v23 = vld [vmem:[%s4968_s26 + $0xb8] sm:$0xff] }
  0x1f   : > { %189 = vst [vmem:[%s4976_s27 + $0x98] sm:$0xff] %v188_v19  ;;  %191 = vst [vmem:[%s4976_s27 + $0xa0] sm:$0xff] %v190_v20  ;;  %v198_v24 = vld [vmem:[%s4968_s26 + $0xc0] sm:$0xff]  ;;  %v200_v25 = vld [vmem:[%s4968_s26 + $0xc8] sm:$0xff] }
  0x20   : > { %193 = vst [vmem:[%s4976_s27 + $0xa8] sm:$0xff] %v192_v21  ;;  %195 = vst [vmem:[%s4976_s27 + $0xb0] sm:$0xff] %v194_v22  ;;  %v202_v26 = vld [vmem:[%s4968_s26 + $0xd0] sm:$0xff]  ;;  %v204_v27 = vld [vmem:[%s4968_s26 + $0xd8] sm:$0xff] }
  0x21   : > { %197 = vst [vmem:[%s4976_s27 + $0xb8] sm:$0xff] %v196_v23  ;;  %199 = vst [vmem:[%s4976_s27 + $0xc0] sm:$0xff] %v198_v24  ;;  %v206_v28 = vld [vmem:[%s4968_s26 + $0xe0] sm:$0xff]  ;;  %v208_v29 = vld [vmem:[%s4968_s26 + $0xe8] sm:$0xff] }
  0x22   : > { %201 = vst [vmem:[%s4976_s27 + $0xc8] sm:$0xff] %v200_v25  ;;  %203 = vst [vmem:[%s4976_s27 + $0xd0] sm:$0xff] %v202_v26  ;;  %v210_v30 = vld [vmem:[%s4968_s26 + $0xf0] sm:$0xff]  ;;  %v212_v31 = vld [vmem:[%s4968_s26 + $0xf8] sm:$0xff] }
  0x23   : > { %205 = vst [vmem:[%s4976_s27 + $0xd8] sm:$0xff] %v204_v27  ;;  %207 = vst [vmem:[%s4976_s27 + $0xe0] sm:$0xff] %v206_v28  ;;  %v214_v32 = vld [vmem:[%s4968_s26 + $0x200] sm:$0xff]  ;;  %v216_v33 = vld [vmem:[%s4968_s26 + $0x208] sm:$0xff] }
  0x24   : > { %209 = vst [vmem:[%s4976_s27 + $0xe8] sm:$0xff] %v208_v29  ;;  %211 = vst [vmem:[%s4976_s27 + $0xf0] sm:$0xff] %v210_v30  ;;  %v218_v34 = vld [vmem:[%s4968_s26 + $0x210] sm:$0xff]  ;;  %v220_v35 = vld [vmem:[%s4968_s26 + $0x218] sm:$0xff] }
  0x25   : > { %213 = vst [vmem:[%s4976_s27 + $0xf8] sm:$0xff] %v212_v31  ;;  %215 = vst [vmem:[%s4976_s27 + $0x100] sm:$0xff] %v214_v32  ;;  %v222_v36 = vld [vmem:[%s4968_s26 + $0x220] sm:$0xff]  ;;  %v224_v37 = vld [vmem:[%s4968_s26 + $0x228] sm:$0xff] }
  0x26   : > { %217 = vst [vmem:[%s4976_s27 + $0x108] sm:$0xff] %v216_v33  ;;  %219 = vst [vmem:[%s4976_s27 + $0x110] sm:$0xff] %v218_v34  ;;  %v226_v38 = vld [vmem:[%s4968_s26 + $0x230] sm:$0xff]  ;;  %v228_v39 = vld [vmem:[%s4968_s26 + $0x238] sm:$0xff] }
  0x27   : > { %221 = vst [vmem:[%s4976_s27 + $0x118] sm:$0xff] %v220_v35  ;;  %223 = vst [vmem:[%s4976_s27 + $0x120] sm:$0xff] %v222_v36  ;;  %v230_v40 = vld [vmem:[%s4968_s26 + $0x240] sm:$0xff]  ;;  %v232_v41 = vld [vmem:[%s4968_s26 + $0x248] sm:$0xff] }
  0x28   : > { %225 = vst [vmem:[%s4976_s27 + $0x128] sm:$0xff] %v224_v37  ;;  %227 = vst [vmem:[%s4976_s27 + $0x130] sm:$0xff] %v226_v38  ;;  %v234_v42 = vld [vmem:[%s4968_s26 + $0x250] sm:$0xff]  ;;  %v236_v43 = vld [vmem:[%s4968_s26 + $0x258] sm:$0xff] }
  0x29   : > { %229 = vst [vmem:[%s4976_s27 + $0x138] sm:$0xff] %v228_v39  ;;  %231 = vst [vmem:[%s4976_s27 + $0x140] sm:$0xff] %v230_v40  ;;  %v238_v44 = vld [vmem:[%s4968_s26 + $0x260] sm:$0xff]  ;;  %v240_v45 = vld [vmem:[%s4968_s26 + $0x268] sm:$0xff] }
  0x2a   : > { %233 = vst [vmem:[%s4976_s27 + $0x148] sm:$0xff] %v232_v41  ;;  %235 = vst [vmem:[%s4976_s27 + $0x150] sm:$0xff] %v234_v42  ;;  %v242_v46 = vld [vmem:[%s4968_s26 + $0x270] sm:$0xff]  ;;  %v244_v47 = vld [vmem:[%s4968_s26 + $0x278] sm:$0xff] }
  0x2b   : > { %237 = vst [vmem:[%s4976_s27 + $0x158] sm:$0xff] %v236_v43  ;;  %239 = vst [vmem:[%s4976_s27 + $0x160] sm:$0xff] %v238_v44  ;;  %v246_v48 = vld [vmem:[%s4968_s26 + $0x280] sm:$0xff]  ;;  %v248_v49 = vld [vmem:[%s4968_s26 + $0x288] sm:$0xff] }
  0x2c   : > { %241 = vst [vmem:[%s4976_s27 + $0x168] sm:$0xff] %v240_v45  ;;  %243 = vst [vmem:[%s4976_s27 + $0x170] sm:$0xff] %v242_v46  ;;  %v250_v50 = vld [vmem:[%s4968_s26 + $0x290] sm:$0xff]  ;;  %v252_v51 = vld [vmem:[%s4968_s26 + $0x298] sm:$0xff] }
  0x2d   : > { %245 = vst [vmem:[%s4976_s27 + $0x178] sm:$0xff] %v244_v47  ;;  %247 = vst [vmem:[%s4976_s27 + $0x180] sm:$0xff] %v246_v48  ;;  %v254_v52 = vld [vmem:[%s4968_s26 + $0x2a0] sm:$0xff]  ;;  %v256_v53 = vld [vmem:[%s4968_s26 + $0x2a8] sm:$0xff] }
  0x2e   : > { %249 = vst [vmem:[%s4976_s27 + $0x188] sm:$0xff] %v248_v49  ;;  %251 = vst [vmem:[%s4976_s27 + $0x190] sm:$0xff] %v250_v50  ;;  %v258_v54 = vld [vmem:[%s4968_s26 + $0x2b0] sm:$0xff]  ;;  %v260_v55 = vld [vmem:[%s4968_s26 + $0x2b8] sm:$0xff] }
  0x2f   : > { %253 = vst [vmem:[%s4976_s27 + $0x198] sm:$0xff] %v252_v51  ;;  %255 = vst [vmem:[%s4976_s27 + $0x1a0] sm:$0xff] %v254_v52  ;;  %v262_v56 = vld [vmem:[%s4968_s26 + $0x2c0] sm:$0xff]  ;;  %v264_v57 = vld [vmem:[%s4968_s26 + $0x2c8] sm:$0xff] }
  0x30   : > { %257 = vst [vmem:[%s4976_s27 + $0x1a8] sm:$0xff] %v256_v53  ;;  %259 = vst [vmem:[%s4976_s27 + $0x1b0] sm:$0xff] %v258_v54  ;;  %v266_v58 = vld [vmem:[%s4968_s26 + $0x2d0] sm:$0xff]  ;;  %v268_v59 = vld [vmem:[%s4968_s26 + $0x2d8] sm:$0xff] }
  0x31   : > { %261 = vst [vmem:[%s4976_s27 + $0x1b8] sm:$0xff] %v260_v55  ;;  %263 = vst [vmem:[%s4976_s27 + $0x1c0] sm:$0xff] %v262_v56  ;;  %v270_v60 = vld [vmem:[%s4968_s26 + $0x2e0] sm:$0xff]  ;;  %v272_v61 = vld [vmem:[%s4968_s26 + $0x2e8] sm:$0xff] }
  0x32   : > { %265 = vst [vmem:[%s4976_s27 + $0x1c8] sm:$0xff] %v264_v57  ;;  %267 = vst [vmem:[%s4976_s27 + $0x1d0] sm:$0xff] %v266_v58  ;;  %v274_v62 = vld [vmem:[%s4968_s26 + $0x2f0] sm:$0xff]  ;;  %v276_v63 = vld [vmem:[%s4968_s26 + $0x2f8] sm:$0xff] }
  0x33   : > { %269 = vst [vmem:[%s4976_s27 + $0x1d8] sm:$0xff] %v268_v59  ;;  %271 = vst [vmem:[%s4976_s27 + $0x1e0] sm:$0xff] %v270_v60  ;;  %v278_v0 = vld [vmem:[%s4968_s26 + $0x400] sm:$0xff]  ;;  %v280_v1 = vld [vmem:[%s4968_s26 + $0x408] sm:$0xff] }
  0x34   : > { %273 = vst [vmem:[%s4976_s27 + $0x1e8] sm:$0xff] %v272_v61  ;;  %275 = vst [vmem:[%s4976_s27 + $0x1f0] sm:$0xff] %v274_v62  ;;  %v282_v2 = vld [vmem:[%s4968_s26 + $0x410] sm:$0xff]  ;;  %v284_v3 = vld [vmem:[%s4968_s26 + $0x418] sm:$0xff] }
  0x35   : > { %277 = vst [vmem:[%s4976_s27 + $0x1f8] sm:$0xff] %v276_v63  ;;  %279 = vst [vmem:[%s4976_s27 + $0x200] sm:$0xff] %v278_v0  ;;  %v286_v4 = vld [vmem:[%s4968_s26 + $0x420] sm:$0xff]  ;;  %v288_v5 = vld [vmem:[%s4968_s26 + $0x428] sm:$0xff] }
  0x36   : > { %281 = vst [vmem:[%s4976_s27 + $0x208] sm:$0xff] %v280_v1  ;;  %283 = vst [vmem:[%s4976_s27 + $0x210] sm:$0xff] %v282_v2  ;;  %v290_v6 = vld [vmem:[%s4968_s26 + $0x430] sm:$0xff]  ;;  %v292_v7 = vld [vmem:[%s4968_s26 + $0x438] sm:$0xff] }
  0x37   : > { %285 = vst [vmem:[%s4976_s27 + $0x218] sm:$0xff] %v284_v3  ;;  %287 = vst [vmem:[%s4976_s27 + $0x220] sm:$0xff] %v286_v4  ;;  %v294_v8 = vld [vmem:[%s4968_s26 + $0x440] sm:$0xff]  ;;  %v296_v9 = vld [vmem:[%s4968_s26 + $0x448] sm:$0xff] }
  0x38   : > { %289 = vst [vmem:[%s4976_s27 + $0x228] sm:$0xff] %v288_v5  ;;  %291 = vst [vmem:[%s4976_s27 + $0x230] sm:$0xff] %v290_v6  ;;  %v298_v10 = vld [vmem:[%s4968_s26 + $0x450] sm:$0xff]  ;;  %v300_v11 = vld [vmem:[%s4968_s26 + $0x458] sm:$0xff] }
  0x39   : > { %293 = vst [vmem:[%s4976_s27 + $0x238] sm:$0xff] %v292_v7  ;;  %295 = vst [vmem:[%s4976_s27 + $0x240] sm:$0xff] %v294_v8  ;;  %v302_v12 = vld [vmem:[%s4968_s26 + $0x460] sm:$0xff]  ;;  %v304_v13 = vld [vmem:[%s4968_s26 + $0x468] sm:$0xff] }
  0x3a   : > { %297 = vst [vmem:[%s4976_s27 + $0x248] sm:$0xff] %v296_v9  ;;  %299 = vst [vmem:[%s4976_s27 + $0x250] sm:$0xff] %v298_v10  ;;  %v306_v14 = vld [vmem:[%s4968_s26 + $0x470] sm:$0xff]  ;;  %v308_v15 = vld [vmem:[%s4968_s26 + $0x478] sm:$0xff] }
  0x3b   : > { %301 = vst [vmem:[%s4976_s27 + $0x258] sm:$0xff] %v300_v11  ;;  %303 = vst [vmem:[%s4976_s27 + $0x260] sm:$0xff] %v302_v12  ;;  %v310_v16 = vld [vmem:[%s4968_s26 + $0x480] sm:$0xff]  ;;  %v312_v17 = vld [vmem:[%s4968_s26 + $0x488] sm:$0xff] }
  0x3c   : > { %305 = vst [vmem:[%s4976_s27 + $0x268] sm:$0xff] %v304_v13  ;;  %307 = vst [vmem:[%s4976_s27 + $0x270] sm:$0xff] %v306_v14  ;;  %v314_v18 = vld [vmem:[%s4968_s26 + $0x490] sm:$0xff]  ;;  %v316_v19 = vld [vmem:[%s4968_s26 + $0x498] sm:$0xff] }
  0x3d   : > { %309 = vst [vmem:[%s4976_s27 + $0x278] sm:$0xff] %v308_v15  ;;  %311 = vst [vmem:[%s4976_s27 + $0x280] sm:$0xff] %v310_v16  ;;  %v318_v20 = vld [vmem:[%s4968_s26 + $0x4a0] sm:$0xff]  ;;  %v320_v21 = vld [vmem:[%s4968_s26 + $0x4a8] sm:$0xff] }
  0x3e   : > { %313 = vst [vmem:[%s4976_s27 + $0x288] sm:$0xff] %v312_v17  ;;  %315 = vst [vmem:[%s4976_s27 + $0x290] sm:$0xff] %v314_v18  ;;  %v322_v22 = vld [vmem:[%s4968_s26 + $0x4b0] sm:$0xff]  ;;  %v324_v23 = vld [vmem:[%s4968_s26 + $0x4b8] sm:$0xff] }
  0x3f   : > { %317 = vst [vmem:[%s4976_s27 + $0x298] sm:$0xff] %v316_v19  ;;  %319 = vst [vmem:[%s4976_s27 + $0x2a0] sm:$0xff] %v318_v20  ;;  %v326_v24 = vld [vmem:[%s4968_s26 + $0x4c0] sm:$0xff]  ;;  %v328_v25 = vld [vmem:[%s4968_s26 + $0x4c8] sm:$0xff] }
  0x40   : > { %321 = vst [vmem:[%s4976_s27 + $0x2a8] sm:$0xff] %v320_v21  ;;  %323 = vst [vmem:[%s4976_s27 + $0x2b0] sm:$0xff] %v322_v22  ;;  %v330_v26 = vld [vmem:[%s4968_s26 + $0x4d0] sm:$0xff]  ;;  %v332_v27 = vld [vmem:[%s4968_s26 + $0x4d8] sm:$0xff] }
  0x41   : > { %325 = vst [vmem:[%s4976_s27 + $0x2b8] sm:$0xff] %v324_v23  ;;  %327 = vst [vmem:[%s4976_s27 + $0x2c0] sm:$0xff] %v326_v24  ;;  %v334_v28 = vld [vmem:[%s4968_s26 + $0x4e0] sm:$0xff]  ;;  %v336_v29 = vld [vmem:[%s4968_s26 + $0x4e8] sm:$0xff] }
  0x42   : > { %329 = vst [vmem:[%s4976_s27 + $0x2c8] sm:$0xff] %v328_v25  ;;  %331 = vst [vmem:[%s4976_s27 + $0x2d0] sm:$0xff] %v330_v26  ;;  %v338_v30 = vld [vmem:[%s4968_s26 + $0x4f0] sm:$0xff]  ;;  %v340_v31 = vld [vmem:[%s4968_s26 + $0x4f8] sm:$0xff] }
  0x43   : > { %333 = vst [vmem:[%s4976_s27 + $0x2d8] sm:$0xff] %v332_v27  ;;  %335 = vst [vmem:[%s4976_s27 + $0x2e0] sm:$0xff] %v334_v28  ;;  %v342_v32 = vld [vmem:[%s4968_s26 + $0x600] sm:$0xff]  ;;  %v344_v33 = vld [vmem:[%s4968_s26 + $0x608] sm:$0xff] }
  0x44   : > { %337 = vst [vmem:[%s4976_s27 + $0x2e8] sm:$0xff] %v336_v29  ;;  %339 = vst [vmem:[%s4976_s27 + $0x2f0] sm:$0xff] %v338_v30  ;;  %v346_v34 = vld [vmem:[%s4968_s26 + $0x610] sm:$0xff]  ;;  %v348_v35 = vld [vmem:[%s4968_s26 + $0x618] sm:$0xff] }
  0x45   : > { %341 = vst [vmem:[%s4976_s27 + $0x2f8] sm:$0xff] %v340_v31  ;;  %343 = vst [vmem:[%s4976_s27 + $0x300] sm:$0xff] %v342_v32  ;;  %v350_v36 = vld [vmem:[%s4968_s26 + $0x620] sm:$0xff]  ;;  %v352_v37 = vld [vmem:[%s4968_s26 + $0x628] sm:$0xff] }
  0x46   : > { %345 = vst [vmem:[%s4976_s27 + $0x308] sm:$0xff] %v344_v33  ;;  %347 = vst [vmem:[%s4976_s27 + $0x310] sm:$0xff] %v346_v34  ;;  %v354_v38 = vld [vmem:[%s4968_s26 + $0x630] sm:$0xff]  ;;  %v356_v39 = vld [vmem:[%s4968_s26 + $0x638] sm:$0xff] }
  0x47   : > { %349 = vst [vmem:[%s4976_s27 + $0x318] sm:$0xff] %v348_v35  ;;  %351 = vst [vmem:[%s4976_s27 + $0x320] sm:$0xff] %v350_v36  ;;  %v358_v40 = vld [vmem:[%s4968_s26 + $0x640] sm:$0xff]  ;;  %v360_v41 = vld [vmem:[%s4968_s26 + $0x648] sm:$0xff] }
  0x48   : > { %353 = vst [vmem:[%s4976_s27 + $0x328] sm:$0xff] %v352_v37  ;;  %355 = vst [vmem:[%s4976_s27 + $0x330] sm:$0xff] %v354_v38  ;;  %v362_v42 = vld [vmem:[%s4968_s26 + $0x650] sm:$0xff]  ;;  %v364_v43 = vld [vmem:[%s4968_s26 + $0x658] sm:$0xff] }
  0x49   : > { %357 = vst [vmem:[%s4976_s27 + $0x338] sm:$0xff] %v356_v39  ;;  %359 = vst [vmem:[%s4976_s27 + $0x340] sm:$0xff] %v358_v40  ;;  %v366_v44 = vld [vmem:[%s4968_s26 + $0x660] sm:$0xff]  ;;  %v368_v45 = vld [vmem:[%s4968_s26 + $0x668] sm:$0xff] }
  0x4a   : > { %361 = vst [vmem:[%s4976_s27 + $0x348] sm:$0xff] %v360_v41  ;;  %363 = vst [vmem:[%s4976_s27 + $0x350] sm:$0xff] %v362_v42  ;;  %v370_v46 = vld [vmem:[%s4968_s26 + $0x670] sm:$0xff]  ;;  %v372_v47 = vld [vmem:[%s4968_s26 + $0x678] sm:$0xff] }
  0x4b   : > { %365 = vst [vmem:[%s4976_s27 + $0x358] sm:$0xff] %v364_v43  ;;  %367 = vst [vmem:[%s4976_s27 + $0x360] sm:$0xff] %v366_v44  ;;  %v374_v48 = vld [vmem:[%s4968_s26 + $0x680] sm:$0xff]  ;;  %v376_v49 = vld [vmem:[%s4968_s26 + $0x688] sm:$0xff] }
  0x4c   : > { %369 = vst [vmem:[%s4976_s27 + $0x368] sm:$0xff] %v368_v45  ;;  %371 = vst [vmem:[%s4976_s27 + $0x370] sm:$0xff] %v370_v46  ;;  %v378_v50 = vld [vmem:[%s4968_s26 + $0x690] sm:$0xff]  ;;  %v380_v51 = vld [vmem:[%s4968_s26 + $0x698] sm:$0xff] }
  0x4d   : > { %373 = vst [vmem:[%s4976_s27 + $0x378] sm:$0xff] %v372_v47  ;;  %375 = vst [vmem:[%s4976_s27 + $0x380] sm:$0xff] %v374_v48  ;;  %v382_v52 = vld [vmem:[%s4968_s26 + $0x6a0] sm:$0xff]  ;;  %v384_v53 = vld [vmem:[%s4968_s26 + $0x6a8] sm:$0xff] }
  0x4e   : > { %377 = vst [vmem:[%s4976_s27 + $0x388] sm:$0xff] %v376_v49  ;;  %379 = vst [vmem:[%s4976_s27 + $0x390] sm:$0xff] %v378_v50  ;;  %v386_v54 = vld [vmem:[%s4968_s26 + $0x6b0] sm:$0xff]  ;;  %v388_v55 = vld [vmem:[%s4968_s26 + $0x6b8] sm:$0xff] }
  0x4f   : > { %381 = vst [vmem:[%s4976_s27 + $0x398] sm:$0xff] %v380_v51  ;;  %383 = vst [vmem:[%s4976_s27 + $0x3a0] sm:$0xff] %v382_v52  ;;  %v390_v56 = vld [vmem:[%s4968_s26 + $0x6c0] sm:$0xff]  ;;  %v392_v57 = vld [vmem:[%s4968_s26 + $0x6c8] sm:$0xff] }
  0x50   : > { %385 = vst [vmem:[%s4976_s27 + $0x3a8] sm:$0xff] %v384_v53  ;;  %387 = vst [vmem:[%s4976_s27 + $0x3b0] sm:$0xff] %v386_v54  ;;  %v394_v58 = vld [vmem:[%s4968_s26 + $0x6d0] sm:$0xff]  ;;  %v396_v59 = vld [vmem:[%s4968_s26 + $0x6d8] sm:$0xff] }
  0x51   : > { %389 = vst [vmem:[%s4976_s27 + $0x3b8] sm:$0xff] %v388_v55  ;;  %391 = vst [vmem:[%s4976_s27 + $0x3c0] sm:$0xff] %v390_v56  ;;  %v398_v60 = vld [vmem:[%s4968_s26 + $0x6e0] sm:$0xff]  ;;  %v400_v61 = vld [vmem:[%s4968_s26 + $0x6e8] sm:$0xff] }
  0x52   : > { %393 = vst [vmem:[%s4976_s27 + $0x3c8] sm:$0xff] %v392_v57  ;;  %395 = vst [vmem:[%s4976_s27 + $0x3d0] sm:$0xff] %v394_v58  ;;  %v402_v62 = vld [vmem:[%s4968_s26 + $0x6f0] sm:$0xff]  ;;  %v404_v63 = vld [vmem:[%s4968_s26 + $0x6f8] sm:$0xff] }
  0x53   : > { %397 = vst [vmem:[%s4976_s27 + $0x3d8] sm:$0xff] %v396_v59  ;;  %399 = vst [vmem:[%s4976_s27 + $0x3e0] sm:$0xff] %v398_v60  ;;  %v406_v0 = vld [vmem:[%s4968_s26 + $0x800] sm:$0xff]  ;;  %v408_v1 = vld [vmem:[%s4968_s26 + $0x808] sm:$0xff] }
  0x54   : > { %401 = vst [vmem:[%s4976_s27 + $0x3e8] sm:$0xff] %v400_v61  ;;  %403 = vst [vmem:[%s4976_s27 + $0x3f0] sm:$0xff] %v402_v62  ;;  %v410_v2 = vld [vmem:[%s4968_s26 + $0x810] sm:$0xff]  ;;  %v412_v3 = vld [vmem:[%s4968_s26 + $0x818] sm:$0xff] }
  0x55   : > { %405 = vst [vmem:[%s4976_s27 + $0x3f8] sm:$0xff] %v404_v63  ;;  %407 = vst [vmem:[%s4976_s27 + $0x400] sm:$0xff] %v406_v0  ;;  %v414_v4 = vld [vmem:[%s4968_s26 + $0x820] sm:$0xff]  ;;  %v416_v5 = vld [vmem:[%s4968_s26 + $0x828] sm:$0xff] }
  0x56   : > { %409 = vst [vmem:[%s4976_s27 + $0x408] sm:$0xff] %v408_v1  ;;  %411 = vst [vmem:[%s4976_s27 + $0x410] sm:$0xff] %v410_v2  ;;  %v418_v6 = vld [vmem:[%s4968_s26 + $0x830] sm:$0xff]  ;;  %v420_v7 = vld [vmem:[%s4968_s26 + $0x838] sm:$0xff] }
  0x57   : > { %413 = vst [vmem:[%s4976_s27 + $0x418] sm:$0xff] %v412_v3  ;;  %415 = vst [vmem:[%s4976_s27 + $0x420] sm:$0xff] %v414_v4  ;;  %v422_v8 = vld [vmem:[%s4968_s26 + $0x840] sm:$0xff]  ;;  %v424_v9 = vld [vmem:[%s4968_s26 + $0x848] sm:$0xff] }
  0x58   : > { %417 = vst [vmem:[%s4976_s27 + $0x428] sm:$0xff] %v416_v5  ;;  %419 = vst [vmem:[%s4976_s27 + $0x430] sm:$0xff] %v418_v6  ;;  %v426_v10 = vld [vmem:[%s4968_s26 + $0x850] sm:$0xff]  ;;  %v428_v11 = vld [vmem:[%s4968_s26 + $0x858] sm:$0xff] }
  0x59   : > { %421 = vst [vmem:[%s4976_s27 + $0x438] sm:$0xff] %v420_v7  ;;  %423 = vst [vmem:[%s4976_s27 + $0x440] sm:$0xff] %v422_v8  ;;  %v430_v12 = vld [vmem:[%s4968_s26 + $0x860] sm:$0xff]  ;;  %v432_v13 = vld [vmem:[%s4968_s26 + $0x868] sm:$0xff] }
  0x5a   : > { %425 = vst [vmem:[%s4976_s27 + $0x448] sm:$0xff] %v424_v9  ;;  %427 = vst [vmem:[%s4976_s27 + $0x450] sm:$0xff] %v426_v10  ;;  %v434_v14 = vld [vmem:[%s4968_s26 + $0x870] sm:$0xff]  ;;  %v436_v15 = vld [vmem:[%s4968_s26 + $0x878] sm:$0xff] }
  0x5b   : > { %429 = vst [vmem:[%s4976_s27 + $0x458] sm:$0xff] %v428_v11  ;;  %431 = vst [vmem:[%s4976_s27 + $0x460] sm:$0xff] %v430_v12  ;;  %v438_v16 = vld [vmem:[%s4968_s26 + $0x880] sm:$0xff]  ;;  %v440_v17 = vld [vmem:[%s4968_s26 + $0x888] sm:$0xff] }
  0x5c   : > { %433 = vst [vmem:[%s4976_s27 + $0x468] sm:$0xff] %v432_v13  ;;  %435 = vst [vmem:[%s4976_s27 + $0x470] sm:$0xff] %v434_v14  ;;  %v442_v18 = vld [vmem:[%s4968_s26 + $0x890] sm:$0xff]  ;;  %v444_v19 = vld [vmem:[%s4968_s26 + $0x898] sm:$0xff] }
  0x5d   : > { %437 = vst [vmem:[%s4976_s27 + $0x478] sm:$0xff] %v436_v15  ;;  %439 = vst [vmem:[%s4976_s27 + $0x480] sm:$0xff] %v438_v16  ;;  %v446_v20 = vld [vmem:[%s4968_s26 + $0x8a0] sm:$0xff]  ;;  %v448_v21 = vld [vmem:[%s4968_s26 + $0x8a8] sm:$0xff] }
  0x5e   : > { %441 = vst [vmem:[%s4976_s27 + $0x488] sm:$0xff] %v440_v17  ;;  %443 = vst [vmem:[%s4976_s27 + $0x490] sm:$0xff] %v442_v18  ;;  %v450_v22 = vld [vmem:[%s4968_s26 + $0x8b0] sm:$0xff]  ;;  %v452_v23 = vld [vmem:[%s4968_s26 + $0x8b8] sm:$0xff] }
  0x5f   : > { %445 = vst [vmem:[%s4976_s27 + $0x498] sm:$0xff] %v444_v19  ;;  %447 = vst [vmem:[%s4976_s27 + $0x4a0] sm:$0xff] %v446_v20  ;;  %v454_v24 = vld [vmem:[%s4968_s26 + $0x8c0] sm:$0xff]  ;;  %v456_v25 = vld [vmem:[%s4968_s26 + $0x8c8] sm:$0xff] }
  0x60   : > { %449 = vst [vmem:[%s4976_s27 + $0x4a8] sm:$0xff] %v448_v21  ;;  %451 = vst [vmem:[%s4976_s27 + $0x4b0] sm:$0xff] %v450_v22  ;;  %v458_v26 = vld [vmem:[%s4968_s26 + $0x8d0] sm:$0xff]  ;;  %v460_v27 = vld [vmem:[%s4968_s26 + $0x8d8] sm:$0xff] }
  0x61   : > { %453 = vst [vmem:[%s4976_s27 + $0x4b8] sm:$0xff] %v452_v23  ;;  %455 = vst [vmem:[%s4976_s27 + $0x4c0] sm:$0xff] %v454_v24  ;;  %v462_v28 = vld [vmem:[%s4968_s26 + $0x8e0] sm:$0xff]  ;;  %v464_v29 = vld [vmem:[%s4968_s26 + $0x8e8] sm:$0xff] }
  0x62   : > { %457 = vst [vmem:[%s4976_s27 + $0x4c8] sm:$0xff] %v456_v25  ;;  %459 = vst [vmem:[%s4976_s27 + $0x4d0] sm:$0xff] %v458_v26  ;;  %v466_v30 = vld [vmem:[%s4968_s26 + $0x8f0] sm:$0xff]  ;;  %v468_v31 = vld [vmem:[%s4968_s26 + $0x8f8] sm:$0xff] }
  0x63   : > { %461 = vst [vmem:[%s4976_s27 + $0x4d8] sm:$0xff] %v460_v27  ;;  %463 = vst [vmem:[%s4976_s27 + $0x4e0] sm:$0xff] %v462_v28  ;;  %v470_v32 = vld [vmem:[%s4968_s26 + $0xa00] sm:$0xff]  ;;  %v472_v33 = vld [vmem:[%s4968_s26 + $0xa08] sm:$0xff] }
  0x64   : > { %465 = vst [vmem:[%s4976_s27 + $0x4e8] sm:$0xff] %v464_v29  ;;  %467 = vst [vmem:[%s4976_s27 + $0x4f0] sm:$0xff] %v466_v30  ;;  %v474_v34 = vld [vmem:[%s4968_s26 + $0xa10] sm:$0xff]  ;;  %v476_v35 = vld [vmem:[%s4968_s26 + $0xa18] sm:$0xff] }
  0x65   : > { %469 = vst [vmem:[%s4976_s27 + $0x4f8] sm:$0xff] %v468_v31  ;;  %471 = vst [vmem:[%s4976_s27 + $0x500] sm:$0xff] %v470_v32  ;;  %v478_v36 = vld [vmem:[%s4968_s26 + $0xa20] sm:$0xff]  ;;  %v480_v37 = vld [vmem:[%s4968_s26 + $0xa28] sm:$0xff] }
  0x66   : > { %473 = vst [vmem:[%s4976_s27 + $0x508] sm:$0xff] %v472_v33  ;;  %475 = vst [vmem:[%s4976_s27 + $0x510] sm:$0xff] %v474_v34  ;;  %v482_v38 = vld [vmem:[%s4968_s26 + $0xa30] sm:$0xff]  ;;  %v484_v39 = vld [vmem:[%s4968_s26 + $0xa38] sm:$0xff] }
  0x67   : > { %477 = vst [vmem:[%s4976_s27 + $0x518] sm:$0xff] %v476_v35  ;;  %479 = vst [vmem:[%s4976_s27 + $0x520] sm:$0xff] %v478_v36  ;;  %v486_v40 = vld [vmem:[%s4968_s26 + $0xa40] sm:$0xff]  ;;  %v488_v41 = vld [vmem:[%s4968_s26 + $0xa48] sm:$0xff] }
  0x68   : > { %481 = vst [vmem:[%s4976_s27 + $0x528] sm:$0xff] %v480_v37  ;;  %483 = vst [vmem:[%s4976_s27 + $0x530] sm:$0xff] %v482_v38  ;;  %v490_v42 = vld [vmem:[%s4968_s26 + $0xa50] sm:$0xff]  ;;  %v492_v43 = vld [vmem:[%s4968_s26 + $0xa58] sm:$0xff] }
  0x69   : > { %485 = vst [vmem:[%s4976_s27 + $0x538] sm:$0xff] %v484_v39  ;;  %487 = vst [vmem:[%s4976_s27 + $0x540] sm:$0xff] %v486_v40  ;;  %v494_v44 = vld [vmem:[%s4968_s26 + $0xa60] sm:$0xff]  ;;  %v496_v45 = vld [vmem:[%s4968_s26 + $0xa68] sm:$0xff] }
  0x6a   : > { %489 = vst [vmem:[%s4976_s27 + $0x548] sm:$0xff] %v488_v41  ;;  %491 = vst [vmem:[%s4976_s27 + $0x550] sm:$0xff] %v490_v42  ;;  %v498_v46 = vld [vmem:[%s4968_s26 + $0xa70] sm:$0xff]  ;;  %v500_v47 = vld [vmem:[%s4968_s26 + $0xa78] sm:$0xff] }
  0x6b   : > { %493 = vst [vmem:[%s4976_s27 + $0x558] sm:$0xff] %v492_v43  ;;  %495 = vst [vmem:[%s4976_s27 + $0x560] sm:$0xff] %v494_v44  ;;  %v502_v48 = vld [vmem:[%s4968_s26 + $0xa80] sm:$0xff]  ;;  %v504_v49 = vld [vmem:[%s4968_s26 + $0xa88] sm:$0xff] }
  0x6c   : > { %497 = vst [vmem:[%s4976_s27 + $0x568] sm:$0xff] %v496_v45  ;;  %499 = vst [vmem:[%s4976_s27 + $0x570] sm:$0xff] %v498_v46  ;;  %v506_v50 = vld [vmem:[%s4968_s26 + $0xa90] sm:$0xff]  ;;  %v508_v51 = vld [vmem:[%s4968_s26 + $0xa98] sm:$0xff] }
  0x6d   : > { %501 = vst [vmem:[%s4976_s27 + $0x578] sm:$0xff] %v500_v47  ;;  %503 = vst [vmem:[%s4976_s27 + $0x580] sm:$0xff] %v502_v48  ;;  %v510_v52 = vld [vmem:[%s4968_s26 + $0xaa0] sm:$0xff]  ;;  %v512_v53 = vld [vmem:[%s4968_s26 + $0xaa8] sm:$0xff] }
  0x6e   : > { %505 = vst [vmem:[%s4976_s27 + $0x588] sm:$0xff] %v504_v49  ;;  %507 = vst [vmem:[%s4976_s27 + $0x590] sm:$0xff] %v506_v50  ;;  %v514_v54 = vld [vmem:[%s4968_s26 + $0xab0] sm:$0xff]  ;;  %v516_v55 = vld [vmem:[%s4968_s26 + $0xab8] sm:$0xff] }
  0x6f   : > { %509 = vst [vmem:[%s4976_s27 + $0x598] sm:$0xff] %v508_v51  ;;  %511 = vst [vmem:[%s4976_s27 + $0x5a0] sm:$0xff] %v510_v52  ;;  %v518_v56 = vld [vmem:[%s4968_s26 + $0xac0] sm:$0xff]  ;;  %v520_v57 = vld [vmem:[%s4968_s26 + $0xac8] sm:$0xff] }
  0x70   : > { %513 = vst [vmem:[%s4976_s27 + $0x5a8] sm:$0xff] %v512_v53  ;;  %515 = vst [vmem:[%s4976_s27 + $0x5b0] sm:$0xff] %v514_v54  ;;  %v522_v58 = vld [vmem:[%s4968_s26 + $0xad0] sm:$0xff]  ;;  %v524_v59 = vld [vmem:[%s4968_s26 + $0xad8] sm:$0xff] }
  0x71   : > { %517 = vst [vmem:[%s4976_s27 + $0x5b8] sm:$0xff] %v516_v55  ;;  %519 = vst [vmem:[%s4976_s27 + $0x5c0] sm:$0xff] %v518_v56  ;;  %v526_v60 = vld [vmem:[%s4968_s26 + $0xae0] sm:$0xff]  ;;  %v528_v61 = vld [vmem:[%s4968_s26 + $0xae8] sm:$0xff] }
  0x72   : > { %521 = vst [vmem:[%s4976_s27 + $0x5c8] sm:$0xff] %v520_v57  ;;  %523 = vst [vmem:[%s4976_s27 + $0x5d0] sm:$0xff] %v522_v58  ;;  %v530_v62 = vld [vmem:[%s4968_s26 + $0xaf0] sm:$0xff]  ;;  %v532_v63 = vld [vmem:[%s4968_s26 + $0xaf8] sm:$0xff] }
  0x73   : > { %525 = vst [vmem:[%s4976_s27 + $0x5d8] sm:$0xff] %v524_v59  ;;  %527 = vst [vmem:[%s4976_s27 + $0x5e0] sm:$0xff] %v526_v60  ;;  %v534_v0 = vld [vmem:[%s4968_s26 + $0xc00] sm:$0xff]  ;;  %v536_v1 = vld [vmem:[%s4968_s26 + $0xc08] sm:$0xff] }
  0x74   : > { %529 = vst [vmem:[%s4976_s27 + $0x5e8] sm:$0xff] %v528_v61  ;;  %531 = vst [vmem:[%s4976_s27 + $0x5f0] sm:$0xff] %v530_v62  ;;  %v538_v2 = vld [vmem:[%s4968_s26 + $0xc10] sm:$0xff]  ;;  %v540_v3 = vld [vmem:[%s4968_s26 + $0xc18] sm:$0xff] }
  0x75   : > { %533 = vst [vmem:[%s4976_s27 + $0x5f8] sm:$0xff] %v532_v63  ;;  %535 = vst [vmem:[%s4976_s27 + $0x600] sm:$0xff] %v534_v0  ;;  %v542_v4 = vld [vmem:[%s4968_s26 + $0xc20] sm:$0xff]  ;;  %v544_v5 = vld [vmem:[%s4968_s26 + $0xc28] sm:$0xff] }
  0x76   : > { %537 = vst [vmem:[%s4976_s27 + $0x608] sm:$0xff] %v536_v1  ;;  %539 = vst [vmem:[%s4976_s27 + $0x610] sm:$0xff] %v538_v2  ;;  %v546_v6 = vld [vmem:[%s4968_s26 + $0xc30] sm:$0xff]  ;;  %v548_v7 = vld [vmem:[%s4968_s26 + $0xc38] sm:$0xff] }
  0x77   : > { %541 = vst [vmem:[%s4976_s27 + $0x618] sm:$0xff] %v540_v3  ;;  %543 = vst [vmem:[%s4976_s27 + $0x620] sm:$0xff] %v542_v4  ;;  %v550_v8 = vld [vmem:[%s4968_s26 + $0xc40] sm:$0xff]  ;;  %v552_v9 = vld [vmem:[%s4968_s26 + $0xc48] sm:$0xff] }
  0x78   : > { %545 = vst [vmem:[%s4976_s27 + $0x628] sm:$0xff] %v544_v5  ;;  %547 = vst [vmem:[%s4976_s27 + $0x630] sm:$0xff] %v546_v6  ;;  %v554_v10 = vld [vmem:[%s4968_s26 + $0xc50] sm:$0xff]  ;;  %v556_v11 = vld [vmem:[%s4968_s26 + $0xc58] sm:$0xff] }
  0x79   : > { %549 = vst [vmem:[%s4976_s27 + $0x638] sm:$0xff] %v548_v7  ;;  %551 = vst [vmem:[%s4976_s27 + $0x640] sm:$0xff] %v550_v8  ;;  %v558_v12 = vld [vmem:[%s4968_s26 + $0xc60] sm:$0xff]  ;;  %v560_v13 = vld [vmem:[%s4968_s26 + $0xc68] sm:$0xff] }
  0x7a   : > { %553 = vst [vmem:[%s4976_s27 + $0x648] sm:$0xff] %v552_v9  ;;  %555 = vst [vmem:[%s4976_s27 + $0x650] sm:$0xff] %v554_v10  ;;  %v562_v14 = vld [vmem:[%s4968_s26 + $0xc70] sm:$0xff]  ;;  %v564_v15 = vld [vmem:[%s4968_s26 + $0xc78] sm:$0xff] }
  0x7b   : > { %557 = vst [vmem:[%s4976_s27 + $0x658] sm:$0xff] %v556_v11  ;;  %559 = vst [vmem:[%s4976_s27 + $0x660] sm:$0xff] %v558_v12  ;;  %v566_v16 = vld [vmem:[%s4968_s26 + $0xc80] sm:$0xff]  ;;  %v568_v17 = vld [vmem:[%s4968_s26 + $0xc88] sm:$0xff] }
  0x7c   : > { %561 = vst [vmem:[%s4976_s27 + $0x668] sm:$0xff] %v560_v13  ;;  %563 = vst [vmem:[%s4976_s27 + $0x670] sm:$0xff] %v562_v14  ;;  %v570_v18 = vld [vmem:[%s4968_s26 + $0xc90] sm:$0xff]  ;;  %v572_v19 = vld [vmem:[%s4968_s26 + $0xc98] sm:$0xff] }
  0x7d   : > { %565 = vst [vmem:[%s4976_s27 + $0x678] sm:$0xff] %v564_v15  ;;  %567 = vst [vmem:[%s4976_s27 + $0x680] sm:$0xff] %v566_v16  ;;  %v574_v20 = vld [vmem:[%s4968_s26 + $0xca0] sm:$0xff]  ;;  %v576_v21 = vld [vmem:[%s4968_s26 + $0xca8] sm:$0xff] }
  0x7e   : > { %569 = vst [vmem:[%s4976_s27 + $0x688] sm:$0xff] %v568_v17  ;;  %571 = vst [vmem:[%s4976_s27 + $0x690] sm:$0xff] %v570_v18  ;;  %v578_v22 = vld [vmem:[%s4968_s26 + $0xcb0] sm:$0xff]  ;;  %v580_v23 = vld [vmem:[%s4968_s26 + $0xcb8] sm:$0xff] }
  0x7f   : > { %573 = vst [vmem:[%s4976_s27 + $0x698] sm:$0xff] %v572_v19  ;;  %575 = vst [vmem:[%s4976_s27 + $0x6a0] sm:$0xff] %v574_v20  ;;  %v582_v24 = vld [vmem:[%s4968_s26 + $0xcc0] sm:$0xff]  ;;  %v584_v25 = vld [vmem:[%s4968_s26 + $0xcc8] sm:$0xff] }
  0x80   : > { %577 = vst [vmem:[%s4976_s27 + $0x6a8] sm:$0xff] %v576_v21  ;;  %579 = vst [vmem:[%s4976_s27 + $0x6b0] sm:$0xff] %v578_v22  ;;  %v586_v26 = vld [vmem:[%s4968_s26 + $0xcd0] sm:$0xff]  ;;  %v588_v27 = vld [vmem:[%s4968_s26 + $0xcd8] sm:$0xff] }
  0x81   : > { %581 = vst [vmem:[%s4976_s27 + $0x6b8] sm:$0xff] %v580_v23  ;;  %583 = vst [vmem:[%s4976_s27 + $0x6c0] sm:$0xff] %v582_v24  ;;  %v590_v28 = vld [vmem:[%s4968_s26 + $0xce0] sm:$0xff]  ;;  %v592_v29 = vld [vmem:[%s4968_s26 + $0xce8] sm:$0xff] }
  0x82   : > { %585 = vst [vmem:[%s4976_s27 + $0x6c8] sm:$0xff] %v584_v25  ;;  %587 = vst [vmem:[%s4976_s27 + $0x6d0] sm:$0xff] %v586_v26  ;;  %v594_v30 = vld [vmem:[%s4968_s26 + $0xcf0] sm:$0xff]  ;;  %v596_v31 = vld [vmem:[%s4968_s26 + $0xcf8] sm:$0xff] }
  0x83   : > { %589 = vst [vmem:[%s4976_s27 + $0x6d8] sm:$0xff] %v588_v27  ;;  %591 = vst [vmem:[%s4976_s27 + $0x6e0] sm:$0xff] %v590_v28 }
  0x84   : > { %593 = vst [vmem:[%s4976_s27 + $0x6e8] sm:$0xff] %v592_v29  ;;  %595 = vst [vmem:[%s4976_s27 + $0x6f0] sm:$0xff] %v594_v30 }
  0x85   : > { %597 = vst [vmem:[%s4976_s27 + $0x6f8] sm:$0xff] %v596_v31 }
  0x86 PF: > { %p4363_p7 = scmp.ge.s32.totalorder %s4905_s14, 1  ;;  %p602_p8 = scmp.lt.s32.totalorder %s4905_s14, 3 }
  0x88   : > { %p603_p9 = pnand %p4363_p7, %p602_p8 }
  0x89   : > { %s609_s28 = sand.u32 (!%p603_p9), 1, %s4897_s12   ;;  %v4907_v32 = vmov (!%p603_p9), 0   ;;  %v860_v33 = vld [vmem:[%s6195_s2] sm:$0xff] (!%p603_p9)  ;;  %v861_v34 = vld [vmem:[%s6195_s2 + $0x8] sm:$0xff] (!%p603_p9)  ;;  %vm2001_vm0 = vcmask (!%p603_p9), 1040384   ;;  %vm1997_vm1 = vcmask (!%p603_p9), 400384  }
  0x8a   : > { %606 = sbr.rel (%p603_p9) target bundleno = 634 (0x27a), region = 51  ;;  %2228 = vmatprep.mubr.bf16.mxu0 (!%p603_p9), %v4907_v32  ;;  %2271 = vmatprep.mubr.bf16.mxu1 (!%p603_p9), %v4907_v32  ;;  %v5451_v60 = vsel (!%p603_p9), %vm2001_vm0, 65535, %v4907_v32  ;;  %v5466_v14 = vld [vmem:[%s6193_s0] sm:$0xff] (!%p603_p9)   ;;  %s5817_s17 = sshll.u32 (!%p603_p9), %s609_s28, 9 }
  0x8b   : > { %s4790_s29 = smul.u32 (!%p603_p9), 1792, %s609_s28  ;;  %4816 = vset.pattern.permute.xlu0 (!%p603_p9), %v4907_v32  ;;  %s5836_s12 = scalar_lea.vmem (!%p603_p9), [#allocation3], %s5817_s17 }
  0x8c   : > { %864 = vperm.xlu0 (!%p603_p9), %4816, %v860_v33  }
  0x8d   : > { %s5434_s7 = scalar_lea.vmem (!%p603_p9), [#allocation2], %s4790_s29 }
  0x8e   : > { %v636_v35 = vld [vmem:[%s5434_s7] sm:$0xff] (!%p603_p9)  ;;  %v637_v37 = vld [vmem:[%s5434_s7 + $0x8] sm:$0xff] (!%p603_p9)  ;;  %v638_v4 = vld [vmem:[%s5434_s7 + $0x10] sm:$0xff] (!%p603_p9) }
  0x8f   : > { %v668_v36 = vld [vmem:[%s5434_s7 + $0x100] sm:$0xff] (!%p603_p9)  ;;  %v669_v39 = vld [vmem:[%s5434_s7 + $0x108] sm:$0xff] (!%p603_p9)  ;;  %v670_v5 = vld [vmem:[%s5434_s7 + $0x110] sm:$0xff] (!%p603_p9) }
  0x90   : > { %v4367_v38 = vcombine.high (!%p603_p9), %v636_v35, %v668_v36  ;;  %v4366_v40 = vcombine.low (!%p603_p9), %v636_v35, %v668_v36  ;;  %v700_v41 = vld [vmem:[%s5434_s7 + $0x200] sm:$0xff] (!%p603_p9)  ;;  %v4369_v43 = vcombine.high (!%p603_p9), %v637_v37, %v669_v39  ;;  %v4368_v44 = vcombine.low (!%p603_p9), %v637_v37, %v669_v39  ;;  %v701_v46 = vld [vmem:[%s5434_s7 + $0x208] sm:$0xff] (!%p603_p9)  ;;  %869 = vperm.xlu0 (!%p603_p9), %4816, %v861_v34   ;;  %v639_v6 = vld [vmem:[%s5434_s7 + $0x18] sm:$0xff] (!%p603_p9) }
  0x91   : > { %v732_v42 = vld [vmem:[%s5434_s7 + $0x300] sm:$0xff]  ;;  %v733_v47 = vld [vmem:[%s5434_s7 + $0x308] sm:$0xff]  ;;  %v671_v7 = vld [vmem:[%s5434_s7 + $0x118] sm:$0xff]  ;;  %v4371_v10 = vcombine.high %v638_v4, %v670_v5  ;;  %v4370_v17 = vcombine.low %v638_v4, %v670_v5  ;;  %s4788_s18 = sshll.u32 (%p4958_p5), %s4357_s15, 8 }
  0x92   : > { %v4431_v45 = vcombine.high %v700_v41, %v732_v42  ;;  %v764_v48 = vld [vmem:[%s5434_s7 + $0x400] sm:$0xff]  ;;  %2196 = vmatprep.subr.bf16.mxu0 %v4367_v38  ;;  %v4433_v49 = vcombine.high %v701_v46, %v733_v47  ;;  %v765_v51 = vld [vmem:[%s5434_s7 + $0x408] sm:$0xff]  ;;  %2239 = vmatprep.subr.bf16.mxu1 %v4369_v43  ;;  %v4430_v53 = vcombine.low %v700_v41, %v732_v42  ;;  %v702_v12 = vld [vmem:[%s5434_s7 + $0x210] sm:$0xff]  ;;  %s6056_s20 = scalar_lea.vmem (%p4958_p5), %s6196_s3, %s4788_s18 }
  0x93   : > { %v796_v50 = vld [vmem:[%s5434_s7 + $0x500] sm:$0xff]  ;;  %v797_v52 = vld [vmem:[%s5434_s7 + $0x508] sm:$0xff]  ;;  %2197 = vmatpush1.bf16.msra.mxu0 %v4366_v40  ;;  %2240 = vmatpush1.bf16.msra.mxu1 %v4368_v44  ;;  %v4432_v56 = vcombine.low %v701_v46, %v733_v47  ;;  %v4373_v11 = vcombine.high %v639_v6, %v671_v7  ;;  %v734_v13 = vld [vmem:[%s5434_s7 + $0x310] sm:$0xff]  ;;  %v4372_v18 = vcombine.low %v639_v6, %v671_v7 }
  0x94   : > { %v828_v54 = vld [vmem:[%s5434_s7 + $0x600] sm:$0x11]  ;;  %v829_v55 = vld [vmem:[%s5434_s7 + $0x608] sm:$0x11]  ;;  %2198 = vmatprep.subr.bf16.mxu0 %v4431_v45  ;;  %v4495_v57 = vcombine.high %v764_v48, %v796_v50  ;;  %2241 = vmatprep.subr.bf16.mxu1 %v4433_v49  ;;  %v4497_v59 = vcombine.high %v765_v51, %v797_v52  ;;  %v4494_v62 = vcombine.low %v764_v48, %v796_v50  ;;  %v703_v15 = vld [vmem:[%s5434_s7 + $0x218] sm:$0xff] }
  0x95   : > { %v4559_v58 = vcombine.high %v828_v54, %v828_v54  ;;  %v4561_v61 = vcombine.high %v829_v55, %v829_v55  ;;  %v4558_v63 = vcombine.low %v828_v54, %v828_v54  ;;  %v4496_v0 = vcombine.low %v765_v51, %v797_v52  ;;  %v735_v16 = vld [vmem:[%s5434_s7 + $0x318] sm:$0xff]  ;;  %v766_v21 = vld [vmem:[%s5434_s7 + $0x410] sm:$0xff]  ;;  %v640_v40 = vld [vmem:[%s5434_s7 + $0x20] sm:$0xff] }
  0x96   : > { %v4560_v2 = vcombine.low %v829_v55, %v829_v55  ;;  %v4435_v19 = vcombine.high %v702_v12, %v734_v13  ;;  %v4437_v20 = vcombine.high %v703_v15, %v735_v16  ;;  %v798_v22 = vld [vmem:[%s5434_s7 + $0x510] sm:$0xff]  ;;  %v767_v24 = vld [vmem:[%s5434_s7 + $0x418] sm:$0xff]  ;;  %v4434_v27 = vcombine.low %v702_v12, %v734_v13  ;;  %v672_v41 = vld [vmem:[%s5434_s7 + $0x120] sm:$0xff] }
  0x97   : > { %2199 = vmatpush1.bf16.msra.mxu0 %v4430_v53  ;;  %2242 = vmatpush1.bf16.msra.mxu1 %v4432_v56  ;;  %v2008_v1 = vand.u32 %v4559_v58, %v5451_v60  ;;  %v2014_v3 = vand.u32 %v4561_v61, %v5451_v60  ;;  %v2005_v8 = vand.u32 %v4558_v63, %v5451_v60  ;;  %v830_v23 = vld [vmem:[%s5434_s7 + $0x610] sm:$0x11]  ;;  %v799_v25 = vld [vmem:[%s5434_s7 + $0x518] sm:$0xff]  ;;  %v641_v42 = vld [vmem:[%s5434_s7 + $0x28] sm:$0xff] }
  0x98   : > { %2200 = vmatprep.subr.bf16.mxu0 %v4495_v57  ;;  %2243 = vmatprep.subr.bf16.mxu1 %v4497_v59  ;;  %v2011_v9 = vand.u32 %v4560_v2, %v5451_v60  ;;  %v831_v26 = vld [vmem:[%s5434_s7 + $0x618] sm:$0x11]  ;;  %v4436_v28 = vcombine.low %v703_v15, %v735_v16  ;;  %v4499_v29 = vcombine.high %v766_v21, %v798_v22  ;;  %v673_v43 = vld [vmem:[%s5434_s7 + $0x128] sm:$0xff]  ;;  %v704_v48 = vld [vmem:[%s5434_s7 + $0x220] sm:$0xff] }
  0x99   : > { %v4563_v30 = vcombine.high %v830_v23, %v830_v23  ;;  %v4501_v31 = vcombine.high %v767_v24, %v799_v25  ;;  %v4565_v33 = vcombine.high %v831_v26, %v831_v26  ;;  %v4498_v34 = vcombine.low %v766_v21, %v798_v22  ;;  %v736_v49 = vld [vmem:[%s5434_s7 + $0x320] sm:$0xff]  ;;  %v705_v50 = vld [vmem:[%s5434_s7 + $0x228] sm:$0xff]  ;;  %v674_v12 = vld [vmem:[%s5434_s7 + $0x130] sm:$0xff] }
  0x9a   : > { %v4562_v35 = vcombine.low %v830_v23, %v830_v23  ;;  %v4500_v36 = vcombine.low %v767_v24, %v799_v25  ;;  %v4564_v38 = vcombine.low %v831_v26, %v831_v26  ;;  %v4375_v46 = vcombine.high %v640_v40, %v672_v41  ;;  %v737_v51 = vld [vmem:[%s5434_s7 + $0x328] sm:$0xff]  ;;  %v768_v56 = vld [vmem:[%s5434_s7 + $0x420] sm:$0xff]  ;;  %v643_v13 = vld [vmem:[%s5434_s7 + $0x38] sm:$0xff] }
  0x9b   : > { %2201 = vmatpush1.bf16.msra.mxu0 %v4494_v62  ;;  %2244 = vmatpush1.bf16.msra.mxu1 %v4496_v0  ;;  %v2020_v37 = vand.u32 %v4563_v30, %v5451_v60  ;;  %v2026_v39 = vand.u32 %v4565_v33, %v5451_v60  ;;  %v4377_v47 = vcombine.high %v641_v42, %v673_v43  ;;  %v800_v57 = vld [vmem:[%s5434_s7 + $0x520] sm:$0xff]  ;;  %v769_v59 = vld [vmem:[%s5434_s7 + $0x428] sm:$0xff]  ;;  %v675_v15 = vld [vmem:[%s5434_s7 + $0x138] sm:$0xff] }
  0x9c   : > { %2202 = vmatprep.subr.bf16.mxu0 %v2008_v1  ;;  %2245 = vmatprep.subr.bf16.mxu1 %v2014_v3  ;;  %v2017_v44 = vand.u32 %v4562_v35, %v5451_v60  ;;  %v2023_v45 = vand.u32 %v4564_v38, %v5451_v60  ;;  %v4374_v52 = vcombine.low %v640_v40, %v672_v41  ;;  %v832_v58 = vld [vmem:[%s5434_s7 + $0x620] sm:$0x11]  ;;  %v801_v61 = vld [vmem:[%s5434_s7 + $0x528] sm:$0xff]  ;;  %v738_v21 = vld [vmem:[%s5434_s7 + $0x330] sm:$0xff] }
  0x9d   : > { %v4376_v53 = vcombine.low %v641_v42, %v673_v43  ;;  %v4439_v54 = vcombine.high %v704_v48, %v736_v49  ;;  %v4441_v55 = vcombine.high %v705_v50, %v737_v51  ;;  %v833_v62 = vld [vmem:[%s5434_s7 + $0x628] sm:$0x11]  ;;  %v4438_v63 = vcombine.low %v704_v48, %v736_v49  ;;  %v707_v22 = vld [vmem:[%s5434_s7 + $0x238] sm:$0xff]  ;;  %v834_v30 = vld [vmem:[%s5434_s7 + $0x630] sm:$0x11] }
  0x9e   : > { %v4440_v0 = vcombine.low %v705_v50, %v737_v51  ;;  %v4503_v1 = vcombine.high %v768_v56, %v800_v57  ;;  %v4567_v2 = vcombine.high %v832_v58, %v832_v58  ;;  %v4505_v3 = vcombine.high %v769_v59, %v801_v61  ;;  %v739_v23 = vld [vmem:[%s5434_s7 + $0x338] sm:$0xff]  ;;  %v676_v48 = vld [vmem:[%s5434_s7 + $0x140] sm:$0xff]  ;;  %v645_v49 = vld [vmem:[%s5434_s7 + $0x48] sm:$0xff] }
  0x9f   : > { %2203 = vmatpush1.bf16.msra.mxu0 %v2005_v8  ;;  %2246 = vmatpush1.bf16.msra.mxu1 %v2011_v9  ;;  %v4569_v4 = vcombine.high %v833_v62, %v833_v62  ;;  %v4502_v5 = vcombine.low %v768_v56, %v800_v57  ;;  %v4566_v6 = vcombine.low %v832_v58, %v832_v58  ;;  %v803_v33 = vld [vmem:[%s5434_s7 + $0x538] sm:$0xff]  ;;  %v677_v50 = vld [vmem:[%s5434_s7 + $0x148] sm:$0xff]  ;;  %v740_v56 = vld [vmem:[%s5434_s7 + $0x340] sm:$0xff] }
  0xa0   : > { %2282 = vmatprep.subr.bf16.mxu0 %v4371_v10  ;;  %2325 = vmatprep.subr.bf16.mxu1 %v4373_v11  ;;  %v4504_v7 = vcombine.low %v769_v59, %v801_v61  ;;  %v2032_v8 = vand.u32 %v4567_v2, %v5451_v60  ;;  %v4568_v9 = vcombine.low %v833_v62, %v833_v62  ;;  %v642_v11 = vld [vmem:[%s5434_s7 + $0x30] sm:$0xff]  ;;  %v709_v57 = vld [vmem:[%s5434_s7 + $0x248] sm:$0xff]  ;;  %v836_v2 = vld [vmem:[%s5434_s7 + $0x640] sm:$0x11] }
  0xa1   : > { %v2038_v10 = vand.u32 %v4569_v4, %v5451_v60  ;;  %v2029_v16 = vand.u32 %v4566_v6, %v5451_v60  ;;  %v4378_v24 = vcombine.low %v642_v11, %v674_v12  ;;  %v4380_v25 = vcombine.low %v643_v13, %v675_v15  ;;  %v741_v58 = vld [vmem:[%s5434_s7 + $0x348] sm:$0xff] }
  0xa2   : > { %4622 = vmatmul.mubr.msk.bf16.vlgmr.msra.gmra.mrb[0].mxu0 %vm1997_vm1, %v5466_v14  ;;  %4623 = vmatmul.mubr.msk.bf16.vlgmr.msra.gmra.mrb[0].mxu1 %vm1997_vm1, %v5466_v14  ;;  %v4571_v38 = vcombine.high %v834_v30, %v834_v30  ;;  %v4570_v42 = vcombine.low %v834_v30, %v834_v30  ;;  %v4384_v61 = vcombine.low %v645_v49, %v677_v50  ;;  %v805_v4 = vld [vmem:[%s5434_s7 + $0x548] sm:$0xff]  ;;  %v743_v30 = vld [vmem:[%s5434_s7 + $0x358] sm:$0xff] }
  0xa3   : > { %2283 = vmatpush1.bf16.msra.mxu0 %v4370_v17  ;;  %2326 = vmatpush1.bf16.msra.mxu1 %v4372_v18  ;;  %v2035_v17 = vand.u32 %v4568_v9, %v5451_v60  ;;  %v4379_v18 = vcombine.high %v642_v11, %v674_v12  ;;  %v4575_v9 = vcombine.high %v836_v2, %v836_v2 }
  0xa4   : > { %2284 = vmatprep.subr.bf16.mxu0 %v4435_v19  ;;  %2327 = vmatprep.subr.bf16.mxu1 %v4437_v20  ;;  %v4381_v19 = vcombine.high %v643_v13, %v675_v15  ;;  %v706_v20 = vld [vmem:[%s5434_s7 + $0x230] sm:$0xff]  ;;  %v2041_v51 = vand.u32 %v4570_v42, %v5451_v60  ;;  %v4574_v13 = vcombine.low %v836_v2, %v836_v2  ;;  %v745_v2 = vld [vmem:[%s5434_s7 + $0x368] sm:$0xff] }
  0xa5   : > { %2314 = vmatprep.mubr.bf16.mxu0 %v4907_v32  ;;  %2357 = vmatprep.mubr.bf16.mxu1 %v4907_v32  ;;  %v4443_v26 = vcombine.high %v706_v20, %v738_v21  ;;  %v4442_v35 = vcombine.low %v706_v20, %v738_v21  ;;  %v678_v20 = vld [vmem:[%s5434_s7 + $0x150] sm:$0xff]  ;;  %v647_v21 = vld [vmem:[%s5434_s7 + $0x58] sm:$0xff] }
  0xa7   : > { %2285 = vmatpush1.bf16.msra.mxu0 %v4434_v27  ;;  %2328 = vmatpush1.bf16.msra.mxu1 %v4436_v28  ;;  %v4445_v27 = vcombine.high %v707_v22, %v739_v23  ;;  %v770_v28 = vld [vmem:[%s5434_s7 + $0x430] sm:$0xff] }
  0xa8   : > { %2286 = vmatprep.subr.bf16.mxu0 %v4499_v29  ;;  %2329 = vmatprep.subr.bf16.mxu1 %v4501_v31  ;;  %v802_v29 = vld [vmem:[%s5434_s7 + $0x530] sm:$0xff]  ;;  %v771_v31 = vld [vmem:[%s5434_s7 + $0x438] sm:$0xff] }
  0xa9   : > { %v4506_v41 = vcombine.low %v770_v28, %v802_v29  ;;  %v4508_v43 = vcombine.low %v771_v31, %v803_v33 }
  0xab   : > { %2287 = vmatpush1.bf16.msra.mxu0 %v4498_v34  ;;  %2330 = vmatpush1.bf16.msra.mxu1 %v4500_v36  ;;  %v835_v34 = vld [vmem:[%s5434_s7 + $0x638] sm:$0x11]  ;;  %v4444_v36 = vcombine.low %v707_v22, %v739_v23  ;;  %v2053_v23 = vand.u32 %v4574_v13, %v5451_v60 }
  0xac   : > { %2288 = vmatprep.subr.bf16.mxu0 %v2020_v37  ;;  %2331 = vmatprep.subr.bf16.mxu1 %v2026_v39  ;;  %v4507_v37 = vcombine.high %v770_v28, %v802_v29  ;;  %v4509_v39 = vcombine.high %v771_v31, %v803_v33  ;;  %v4573_v40 = vcombine.high %v835_v34, %v835_v34  ;;  %v679_v22 = vld [vmem:[%s5434_s7 + $0x158] sm:$0xff]  ;;  %v742_v28 = vld [vmem:[%s5434_s7 + $0x350] sm:$0xff] }
  0xad   : > { %v711_v29 = vld [vmem:[%s5434_s7 + $0x258] sm:$0xff]  ;;  %v4388_v33 = vcombine.low %v647_v21, %v679_v22 }
  0xaf   : > { %2289 = vmatpush1.bf16.msra.mxu0 %v2017_v44  ;;  %2332 = vmatpush1.bf16.msra.mxu1 %v2023_v45  ;;  %v2044_v44 = vand.u32 %v4571_v38, %v5451_v60  ;;  %v4572_v45 = vcombine.low %v835_v34, %v835_v34  ;;  %v838_v38 = vld [vmem:[%s5434_s7 + $0x650] sm:$0x11] }
  0xb0   : > { %2368 = vmatprep.subr.bf16.mxu0 %v4375_v46  ;;  %2411 = vmatprep.subr.bf16.mxu1 %v4377_v47  ;;  %v2050_v46 = vand.u32 %v4573_v40, %v5451_v60  ;;  %v644_v47 = vld [vmem:[%s5434_s7 + $0x40] sm:$0xff]  ;;  %v807_v40 = vld [vmem:[%s5434_s7 + $0x558] sm:$0xff] }
  0xb1   : > { %v4382_v59 = vcombine.low %v644_v47, %v676_v48 }
  0xb2   : > { %4624 = vmatmul.mubr.msk.bf16.vlgmr.msra.gmra.mrb[4].mxu0 %vm1997_vm1, %v5466_v14  ;;  %4625 = vmatmul.mubr.msk.bf16.vlgmr.msra.gmra.mrb[4].mxu1 %vm1997_vm1, %v5466_v14 }
  0xb3   : > { %2369 = vmatpush1.bf16.msra.mxu0 %v4374_v52  ;;  %2412 = vmatpush1.bf16.msra.mxu1 %v4376_v53  ;;  %v2047_v52 = vand.u32 %v4572_v45, %v5451_v60  ;;  %v4383_v53 = vcombine.high %v644_v47, %v676_v48  ;;  %v4579_v45 = vcombine.high %v838_v38, %v838_v38 }
  0xb4   : > { %2370 = vmatprep.subr.bf16.mxu0 %v4439_v54  ;;  %2413 = vmatprep.subr.bf16.mxu1 %v4441_v55  ;;  %v4385_v54 = vcombine.high %v645_v49, %v677_v50  ;;  %v708_v55 = vld [vmem:[%s5434_s7 + $0x240] sm:$0xff]  ;;  %v4578_v49 = vcombine.low %v838_v38, %v838_v38  ;;  %v747_v38 = vld [vmem:[%s5434_s7 + $0x378] sm:$0xff] }
  0xb5   : > { %2400 = vmatprep.mubr.bf16.mxu0 %v4907_v32  ;;  %2443 = vmatprep.mubr.bf16.mxu1 %v4907_v32  ;;  %v4447_v62 = vcombine.high %v708_v55, %v740_v56  ;;  %v4446_v6 = vcombine.low %v708_v55, %v740_v56  ;;  %v680_v55 = vld [vmem:[%s5434_s7 + $0x160] sm:$0xff]  ;;  %v649_v56 = vld [vmem:[%s5434_s7 + $0x68] sm:$0xff] }
  0xb7   : > { %2371 = vmatpush1.bf16.msra.mxu0 %v4438_v63  ;;  %2414 = vmatpush1.bf16.msra.mxu1 %v4440_v0  ;;  %v4449_v63 = vcombine.high %v709_v57, %v741_v58  ;;  %v772_v0 = vld [vmem:[%s5434_s7 + $0x440] sm:$0xff] }
  0xb8   : > { %2372 = vmatprep.subr.bf16.mxu0 %v4503_v1  ;;  %2415 = vmatprep.subr.bf16.mxu1 %v4505_v3  ;;  %v804_v1 = vld [vmem:[%s5434_s7 + $0x540] sm:$0xff]  ;;  %v773_v3 = vld [vmem:[%s5434_s7 + $0x448] sm:$0xff] }
  0xb9   : > { %v4510_v12 = vcombine.low %v772_v0, %v804_v1  ;;  %v4512_v15 = vcombine.low %v773_v3, %v805_v4 }
  0xbb   : > { %2373 = vmatpush1.bf16.msra.mxu0 %v4502_v5  ;;  %2416 = vmatpush1.bf16.msra.mxu1 %v4504_v7  ;;  %v837_v5 = vld [vmem:[%s5434_s7 + $0x648] sm:$0x11]  ;;  %v4448_v7 = vcombine.low %v709_v57, %v741_v58  ;;  %v2065_v58 = vand.u32 %v4578_v49, %v5451_v60 }
  0xbc   : > { %2374 = vmatprep.subr.bf16.mxu0 %v2032_v8  ;;  %2417 = vmatprep.subr.bf16.mxu1 %v2038_v10  ;;  %v4511_v8 = vcombine.high %v772_v0, %v804_v1  ;;  %v4513_v10 = vcombine.high %v773_v3, %v805_v4  ;;  %v4577_v11 = vcombine.high %v837_v5, %v837_v5  ;;  %v681_v57 = vld [vmem:[%s5434_s7 + $0x168] sm:$0xff]  ;;  %v744_v0 = vld [vmem:[%s5434_s7 + $0x360] sm:$0xff] }
  0xbd   : > { %v713_v1 = vld [vmem:[%s5434_s7 + $0x268] sm:$0xff]  ;;  %v4392_v4 = vcombine.low %v649_v56, %v681_v57 }
  0xbf   : > { %2375 = vmatpush1.bf16.msra.mxu0 %v2029_v16  ;;  %2418 = vmatpush1.bf16.msra.mxu1 %v2035_v17  ;;  %v2056_v16 = vand.u32 %v4575_v9, %v5451_v60  ;;  %v4576_v17 = vcombine.low %v837_v5, %v837_v5  ;;  %v840_v9 = vld [vmem:[%s5434_s7 + $0x660] sm:$0x11] }
  0xc0   : > { %2454 = vmatprep.subr.bf16.mxu0 %v4379_v18  ;;  %2497 = vmatprep.subr.bf16.mxu1 %v4381_v19  ;;  %v2062_v18 = vand.u32 %v4577_v11, %v5451_v60  ;;  %v646_v19 = vld [vmem:[%s5434_s7 + $0x50] sm:$0xff]  ;;  %v809_v11 = vld [vmem:[%s5434_s7 + $0x568] sm:$0xff] }
  0xc1   : > { %v4386_v31 = vcombine.low %v646_v19, %v678_v20 }
  0xc2   : > { %4626 = vmatmul.mubr.msk.bf16.vlgmr.msra.gmra.mrb[8].mxu0 %vm1997_vm1, %v5466_v14  ;;  %4627 = vmatmul.mubr.msk.bf16.vlgmr.msra.gmra.mrb[8].mxu1 %vm1997_vm1, %v5466_v14 }
  0xc3   : > { %2455 = vmatpush1.bf16.msra.mxu0 %v4378_v24  ;;  %2498 = vmatpush1.bf16.msra.mxu1 %v4380_v25  ;;  %v2059_v24 = vand.u32 %v4576_v17, %v5451_v60  ;;  %v4387_v25 = vcombine.high %v646_v19, %v678_v20  ;;  %v4583_v17 = vcombine.high %v840_v9, %v840_v9 }
  0xc4   : > { %2456 = vmatprep.subr.bf16.mxu0 %v4443_v26  ;;  %2499 = vmatprep.subr.bf16.mxu1 %v4445_v27  ;;  %v4389_v26 = vcombine.high %v647_v21, %v679_v22  ;;  %v710_v27 = vld [vmem:[%s5434_s7 + $0x250] sm:$0xff]  ;;  %v4582_v21 = vcombine.low %v840_v9, %v840_v9  ;;  %v749_v9 = vld [vmem:[%s5434_s7 + $0x388] sm:$0xff] }
  0xc5   : > { %2486 = vmatprep.mubr.bf16.mxu0 %v4907_v32  ;;  %2529 = vmatprep.mubr.bf16.mxu1 %v4907_v32  ;;  %v4451_v34 = vcombine.high %v710_v27, %v742_v28  ;;  %v4450_v42 = vcombine.low %v710_v27, %v742_v28  ;;  %v682_v27 = vld [vmem:[%s5434_s7 + $0x170] sm:$0xff]  ;;  %v651_v28 = vld [vmem:[%s5434_s7 + $0x78] sm:$0xff] }
  0xc7   : > { %2457 = vmatpush1.bf16.msra.mxu0 %v4442_v35  ;;  %2500 = vmatpush1.bf16.msra.mxu1 %v4444_v36  ;;  %v4453_v35 = vcombine.high %v711_v29, %v743_v30  ;;  %v774_v36 = vld [vmem:[%s5434_s7 + $0x450] sm:$0xff] }
  0xc8   : > { %2458 = vmatprep.subr.bf16.mxu0 %v4507_v37  ;;  %2501 = vmatprep.subr.bf16.mxu1 %v4509_v39  ;;  %v806_v37 = vld [vmem:[%s5434_s7 + $0x550] sm:$0xff]  ;;  %v775_v39 = vld [vmem:[%s5434_s7 + $0x458] sm:$0xff] }
  0xc9   : > { %v4514_v48 = vcombine.low %v774_v36, %v806_v37  ;;  %v4516_v50 = vcombine.low %v775_v39, %v807_v40 }
  0xcb   : > { %2459 = vmatpush1.bf16.msra.mxu0 %v4506_v41  ;;  %2502 = vmatpush1.bf16.msra.mxu1 %v4508_v43  ;;  %v839_v41 = vld [vmem:[%s5434_s7 + $0x658] sm:$0x11]  ;;  %v4452_v43 = vcombine.low %v711_v29, %v743_v30  ;;  %v2077_v30 = vand.u32 %v4582_v21, %v5451_v60 }
  0xcc   : > { %2460 = vmatprep.subr.bf16.mxu0 %v2044_v44  ;;  %2503 = vmatprep.subr.bf16.mxu1 %v2050_v46  ;;  %v4515_v44 = vcombine.high %v774_v36, %v806_v37  ;;  %v4517_v46 = vcombine.high %v775_v39, %v807_v40  ;;  %v4581_v47 = vcombine.high %v839_v41, %v839_v41  ;;  %v683_v29 = vld [vmem:[%s5434_s7 + $0x178] sm:$0xff]  ;;  %v746_v36 = vld [vmem:[%s5434_s7 + $0x370] sm:$0xff] }
  0xcd   : > { %v715_v37 = vld [vmem:[%s5434_s7 + $0x278] sm:$0xff]  ;;  %v4396_v40 = vcombine.low %v651_v28, %v683_v29 }
  0xcf   : > { %2461 = vmatpush1.bf16.msra.mxu0 %v2041_v51  ;;  %2504 = vmatpush1.bf16.msra.mxu1 %v2047_v52  ;;  %v2068_v51 = vand.u32 %v4579_v45, %v5451_v60  ;;  %v4580_v52 = vcombine.low %v839_v41, %v839_v41  ;;  %v842_v45 = vld [vmem:[%s5434_s7 + $0x670] sm:$0x11] }
  0xd0   : > { %2540 = vmatprep.subr.bf16.mxu0 %v4383_v53  ;;  %2583 = vmatprep.subr.bf16.mxu1 %v4385_v54  ;;  %v2074_v53 = vand.u32 %v4581_v47, %v5451_v60  ;;  %v648_v54 = vld [vmem:[%s5434_s7 + $0x60] sm:$0xff]  ;;  %v811_v47 = vld [vmem:[%s5434_s7 + $0x578] sm:$0xff] }
  0xd1   : > { %v4390_v3 = vcombine.low %v648_v54, %v680_v55 }
  0xd2   : > { %4628 = vmatmul.mubr.msk.bf16.vlgmr.msra.gmra.mrb[12].mxu0 %vm1997_vm1, %v5466_v14  ;;  %4629 = vmatmul.mubr.msk.bf16.vlgmr.msra.gmra.mrb[12].mxu1 %vm1997_vm1, %v5466_v14 }
  0xd3   : > { %2541 = vmatpush1.bf16.msra.mxu0 %v4382_v59  ;;  %2584 = vmatpush1.bf16.msra.mxu1 %v4384_v61  ;;  %v2071_v59 = vand.u32 %v4580_v52, %v5451_v60  ;;  %v4391_v61 = vcombine.high %v648_v54, %v680_v55  ;;  %v4587_v52 = vcombine.high %v842_v45, %v842_v45 }
  0xd4   : > { %2542 = vmatprep.subr.bf16.mxu0 %v4447_v62  ;;  %2585 = vmatprep.subr.bf16.mxu1 %v4449_v63  ;;  %v4393_v62 = vcombine.high %v649_v56, %v681_v57  ;;  %v712_v63 = vld [vmem:[%s5434_s7 + $0x260] sm:$0xff]  ;;  %v4586_v56 = vcombine.low %v842_v45, %v842_v45  ;;  %v751_v45 = vld [vmem:[%s5434_s7 + $0x398] sm:$0xff] }
  0xd5   : > { %2572 = vmatprep.mubr.bf16.mxu0 %v4907_v32  ;;  %2615 = vmatprep.mubr.bf16.mxu1 %v4907_v32  ;;  %v4455_v5 = vcombine.high %v712_v63, %v744_v0  ;;  %v4454_v13 = vcombine.low %v712_v63, %v744_v0  ;;  %v684_v63 = vld [vmem:[%s5434_s7 + $0x180] sm:$0xff]  ;;  %v653_v0 = vld [vmem:[%s5434_s7 + $0x88] sm:$0xff] }
  0xd7   : > { %2543 = vmatpush1.bf16.msra.mxu0 %v4446_v6  ;;  %2586 = vmatpush1.bf16.msra.mxu1 %v4448_v7  ;;  %v4457_v6 = vcombine.high %v713_v1, %v745_v2  ;;  %v776_v7 = vld [vmem:[%s5434_s7 + $0x460] sm:$0xff] }
  0xd8   : > { %2544 = vmatprep.subr.bf16.mxu0 %v4511_v8  ;;  %2587 = vmatprep.subr.bf16.mxu1 %v4513_v10  ;;  %v808_v8 = vld [vmem:[%s5434_s7 + $0x560] sm:$0xff]  ;;  %v777_v10 = vld [vmem:[%s5434_s7 + $0x468] sm:$0xff] }
  0xd9   : > { %v4518_v20 = vcombine.low %v776_v7, %v808_v8  ;;  %v4520_v22 = vcombine.low %v777_v10, %v809_v11 }
  0xdb   : > { %2545 = vmatpush1.bf16.msra.mxu0 %v4510_v12  ;;  %2588 = vmatpush1.bf16.msra.mxu1 %v4512_v15  ;;  %v841_v12 = vld [vmem:[%s5434_s7 + $0x668] sm:$0x11]  ;;  %v4456_v15 = vcombine.low %v713_v1, %v745_v2  ;;  %v2089_v2 = vand.u32 %v4586_v56, %v5451_v60 }
  0xdc   : > { %2546 = vmatprep.subr.bf16.mxu0 %v2056_v16  ;;  %2589 = vmatprep.subr.bf16.mxu1 %v2062_v18  ;;  %v4519_v16 = vcombine.high %v776_v7, %v808_v8  ;;  %v4521_v18 = vcombine.high %v777_v10, %v809_v11  ;;  %v4585_v19 = vcombine.high %v841_v12, %v841_v12  ;;  %v685_v1 = vld [vmem:[%s5434_s7 + $0x188] sm:$0xff]  ;;  %v748_v7 = vld [vmem:[%s5434_s7 + $0x380] sm:$0xff] }
  0xdd   : > { %v717_v8 = vld [vmem:[%s5434_s7 + $0x288] sm:$0xff]  ;;  %v4400_v11 = vcombine.low %v653_v0, %v685_v1 }
  0xdf   : > { %2547 = vmatpush1.bf16.msra.mxu0 %v2053_v23  ;;  %2590 = vmatpush1.bf16.msra.mxu1 %v2059_v24  ;;  %v2080_v23 = vand.u32 %v4583_v17, %v5451_v60  ;;  %v4584_v24 = vcombine.low %v841_v12, %v841_v12  ;;  %v844_v17 = vld [vmem:[%s5434_s7 + $0x680] sm:$0x11] }
  0xe0   : > { %2626 = vmatprep.subr.bf16.mxu0 %v4387_v25  ;;  %2669 = vmatprep.subr.bf16.mxu1 %v4389_v26  ;;  %v2086_v25 = vand.u32 %v4585_v19, %v5451_v60  ;;  %v650_v26 = vld [vmem:[%s5434_s7 + $0x70] sm:$0xff]  ;;  %v813_v19 = vld [vmem:[%s5434_s7 + $0x588] sm:$0xff] }
  0xe1   : > { %v4394_v39 = vcombine.low %v650_v26, %v682_v27 }
  0xe2   : > { %4630 = vmatmul.mubr.msk.bf16.vlgmr.msra.gmra.mrb[16].mxu0 %vm1997_vm1, %v5466_v14  ;;  %4631 = vmatmul.mubr.msk.bf16.vlgmr.msra.gmra.mrb[16].mxu1 %vm1997_vm1, %v5466_v14 }
  0xe3   : > { %2627 = vmatpush1.bf16.msra.mxu0 %v4386_v31  ;;  %2670 = vmatpush1.bf16.msra.mxu1 %v4388_v33  ;;  %v2083_v31 = vand.u32 %v4584_v24, %v5451_v60  ;;  %v4395_v33 = vcombine.high %v650_v26, %v682_v27  ;;  %v4591_v24 = vcombine.high %v844_v17, %v844_v17 }
  0xe4   : > { %2628 = vmatprep.subr.bf16.mxu0 %v4451_v34  ;;  %2671 = vmatprep.subr.bf16.mxu1 %v4453_v35  ;;  %v4397_v34 = vcombine.high %v651_v28, %v683_v29  ;;  %v714_v35 = vld [vmem:[%s5434_s7 + $0x270] sm:$0xff]  ;;  %v4590_v28 = vcombine.low %v844_v17, %v844_v17  ;;  %v753_v17 = vld [vmem:[%s5434_s7 + $0x3a8] sm:$0xff] }
  0xe5   : > { %2658 = vmatprep.mubr.bf16.mxu0 %v4907_v32  ;;  %2701 = vmatprep.mubr.bf16.mxu1 %v4907_v32  ;;  %v4459_v41 = vcombine.high %v714_v35, %v746_v36  ;;  %v4458_v49 = vcombine.low %v714_v35, %v746_v36  ;;  %v686_v35 = vld [vmem:[%s5434_s7 + $0x190] sm:$0xff]  ;;  %v655_v36 = vld [vmem:[%s5434_s7 + $0x98] sm:$0xff] }
  0xe7   : > { %2629 = vmatpush1.bf16.msra.mxu0 %v4450_v42  ;;  %2672 = vmatpush1.bf16.msra.mxu1 %v4452_v43  ;;  %v4461_v42 = vcombine.high %v715_v37, %v747_v38  ;;  %v778_v43 = vld [vmem:[%s5434_s7 + $0x470] sm:$0xff] }
  0xe8   : > { %2630 = vmatprep.subr.bf16.mxu0 %v4515_v44  ;;  %2673 = vmatprep.subr.bf16.mxu1 %v4517_v46  ;;  %v810_v44 = vld [vmem:[%s5434_s7 + $0x570] sm:$0xff]  ;;  %v779_v46 = vld [vmem:[%s5434_s7 + $0x478] sm:$0xff] }
  0xe9   : > { %v4522_v55 = vcombine.low %v778_v43, %v810_v44  ;;  %v4524_v57 = vcombine.low %v779_v46, %v811_v47 }
  0xeb   : > { %2631 = vmatpush1.bf16.msra.mxu0 %v4514_v48  ;;  %2674 = vmatpush1.bf16.msra.mxu1 %v4516_v50  ;;  %v843_v48 = vld [vmem:[%s5434_s7 + $0x678] sm:$0x11]  ;;  %v4460_v50 = vcombine.low %v715_v37, %v747_v38  ;;  %v2101_v38 = vand.u32 %v4590_v28, %v5451_v60 }
  0xec   : > { %2632 = vmatprep.subr.bf16.mxu0 %v2068_v51  ;;  %2675 = vmatprep.subr.bf16.mxu1 %v2074_v53  ;;  %v4523_v51 = vcombine.high %v778_v43, %v810_v44  ;;  %v4525_v53 = vcombine.high %v779_v46, %v811_v47  ;;  %v4589_v54 = vcombine.high %v843_v48, %v843_v48  ;;  %v687_v37 = vld [vmem:[%s5434_s7 + $0x198] sm:$0xff]  ;;  %v750_v43 = vld [vmem:[%s5434_s7 + $0x390] sm:$0xff] }
  0xed   : > { %v719_v44 = vld [vmem:[%s5434_s7 + $0x298] sm:$0xff]  ;;  %v4404_v47 = vcombine.low %v655_v36, %v687_v37 }
  0xef   : > { %2633 = vmatpush1.bf16.msra.mxu0 %v2065_v58  ;;  %2676 = vmatpush1.bf16.msra.mxu1 %v2071_v59  ;;  %v2092_v58 = vand.u32 %v4587_v52, %v5451_v60  ;;  %v4588_v59 = vcombine.low %v843_v48, %v843_v48  ;;  %v846_v52 = vld [vmem:[%s5434_s7 + $0x690] sm:$0x11] }
  0xf0   : > { %2712 = vmatprep.subr.bf16.mxu0 %v4391_v61  ;;  %2755 = vmatprep.subr.bf16.mxu1 %v4393_v62  ;;  %v2098_v61 = vand.u32 %v4589_v54, %v5451_v60  ;;  %v652_v62 = vld [vmem:[%s5434_s7 + $0x80] sm:$0xff]  ;;  %v815_v54 = vld [vmem:[%s5434_s7 + $0x598] sm:$0xff] }
  0xf1   : > { %v4398_v10 = vcombine.low %v652_v62, %v684_v63 }
  0xf2   : > { %4632 = vmatmul.mubr.msk.bf16.vlgmr.msra.gmra.mrb[20].mxu0 %vm1997_vm1, %v5466_v14  ;;  %4633 = vmatmul.mubr.msk.bf16.vlgmr.msra.gmra.mrb[20].mxu1 %vm1997_vm1, %v5466_v14 }
  0xf3   : > { %2713 = vmatpush1.bf16.msra.mxu0 %v4390_v3  ;;  %2756 = vmatpush1.bf16.msra.mxu1 %v4392_v4  ;;  %v2095_v3 = vand.u32 %v4588_v59, %v5451_v60  ;;  %v4399_v4 = vcombine.high %v652_v62, %v684_v63  ;;  %v4595_v59 = vcombine.high %v846_v52, %v846_v52 }
  0xf4   : > { %2714 = vmatprep.subr.bf16.mxu0 %v4455_v5  ;;  %2757 = vmatprep.subr.bf16.mxu1 %v4457_v6  ;;  %v4401_v5 = vcombine.high %v653_v0, %v685_v1  ;;  %v716_v6 = vld [vmem:[%s5434_s7 + $0x280] sm:$0xff]  ;;  %v4594_v0 = vcombine.low %v846_v52, %v846_v52 }
  0xf5   : > { %2744 = vmatprep.mubr.bf16.mxu0 %v4907_v32  ;;  %2787 = vmatprep.mubr.bf16.mxu1 %v4907_v32  ;;  %v4463_v12 = vcombine.high %v716_v6, %v748_v7  ;;  %v4462_v21 = vcombine.low %v716_v6, %v748_v7  ;;  %v688_v6 = vld [vmem:[%s5434_s7 + $0x1a0] sm:$0xff]  ;;  %v657_v7 = vld [vmem:[%s5434_s7 + $0xa8] sm:$0xff] }
  0xf7   : > { %2715 = vmatpush1.bf16.msra.mxu0 %v4454_v13  ;;  %2758 = vmatpush1.bf16.msra.mxu1 %v4456_v15  ;;  %v4465_v13 = vcombine.high %v717_v8, %v749_v9  ;;  %v780_v15 = vld [vmem:[%s5434_s7 + $0x480] sm:$0xff] }
  0xf8   : > { %2716 = vmatprep.subr.bf16.mxu0 %v4519_v16  ;;  %2759 = vmatprep.subr.bf16.mxu1 %v4521_v18  ;;  %v812_v16 = vld [vmem:[%s5434_s7 + $0x580] sm:$0xff]  ;;  %v781_v18 = vld [vmem:[%s5434_s7 + $0x488] sm:$0xff] }
  0xf9   : > { %v4526_v27 = vcombine.low %v780_v15, %v812_v16  ;;  %v4528_v29 = vcombine.low %v781_v18, %v813_v19 }
  0xfb   : > { %2717 = vmatpush1.bf16.msra.mxu0 %v4518_v20  ;;  %2760 = vmatpush1.bf16.msra.mxu1 %v4520_v22  ;;  %v845_v20 = vld [vmem:[%s5434_s7 + $0x688] sm:$0x11]  ;;  %v4464_v22 = vcombine.low %v717_v8, %v749_v9  ;;  %v2113_v9 = vand.u32 %v4594_v0, %v5451_v60 }
  0xfc   : > { %2718 = vmatprep.subr.bf16.mxu0 %v2080_v23  ;;  %2761 = vmatprep.subr.bf16.mxu1 %v2086_v25  ;;  %v4527_v23 = vcombine.high %v780_v15, %v812_v16  ;;  %v4529_v25 = vcombine.high %v781_v18, %v813_v19  ;;  %v4593_v26 = vcombine.high %v845_v20, %v845_v20  ;;  %v689_v8 = vld [vmem:[%s5434_s7 + $0x1a8] sm:$0xff]  ;;  %v752_v15 = vld [vmem:[%s5434_s7 + $0x3a0] sm:$0xff] }
  0xfd   : > { %v721_v16 = vld [vmem:[%s5434_s7 + $0x2a8] sm:$0xff]  ;;  %v4408_v19 = vcombine.low %v657_v7, %v689_v8 }
  0xff   : > { %2719 = vmatpush1.bf16.msra.mxu0 %v2077_v30  ;;  %2762 = vmatpush1.bf16.msra.mxu1 %v2083_v31  ;;  %v2104_v30 = vand.u32 %v4591_v24, %v5451_v60  ;;  %v4592_v31 = vcombine.low %v845_v20, %v845_v20  ;;  %v848_v24 = vld [vmem:[%s5434_s7 + $0x6a0] sm:$0x11] }
 0x100   : > { %2798 = vmatprep.subr.bf16.mxu0 %v4395_v33  ;;  %2841 = vmatprep.subr.bf16.mxu1 %v4397_v34  ;;  %v2110_v33 = vand.u32 %v4593_v26, %v5451_v60  ;;  %v654_v34 = vld [vmem:[%s5434_s7 + $0x90] sm:$0xff]  ;;  %v817_v26 = vld [vmem:[%s5434_s7 + $0x5a8] sm:$0xff] }
 0x101   : > { %v4402_v46 = vcombine.low %v654_v34, %v686_v35 }
 0x102   : > { %4634 = vmatmul.mubr.msk.bf16.vlgmr.msra.gmra.mrb[24].mxu0 %vm1997_vm1, %v5466_v14  ;;  %4635 = vmatmul.mubr.msk.bf16.vlgmr.msra.gmra.mrb[24].mxu1 %vm1997_vm1, %v5466_v14 }
 0x103   : > { %2799 = vmatpush1.bf16.msra.mxu0 %v4394_v39  ;;  %2842 = vmatpush1.bf16.msra.mxu1 %v4396_v40  ;;  %v2107_v39 = vand.u32 %v4592_v31, %v5451_v60  ;;  %v4403_v40 = vcombine.high %v654_v34, %v686_v35  ;;  %v4599_v31 = vcombine.high %v848_v24, %v848_v24 }
 0x104   : > { %2800 = vmatprep.subr.bf16.mxu0 %v4459_v41  ;;  %2843 = vmatprep.subr.bf16.mxu1 %v4461_v42  ;;  %v4405_v41 = vcombine.high %v655_v36, %v687_v37  ;;  %v718_v42 = vld [vmem:[%s5434_s7 + $0x290] sm:$0xff]  ;;  %v4598_v35 = vcombine.low %v848_v24, %v848_v24  ;;  %v757_v24 = vld [vmem:[%s5434_s7 + $0x3c8] sm:$0xff] }
 0x105   : > { %2830 = vmatprep.mubr.bf16.mxu0 %v4907_v32  ;;  %2873 = vmatprep.mubr.bf16.mxu1 %v4907_v32  ;;  %v4467_v48 = vcombine.high %v718_v42, %v750_v43  ;;  %v4466_v56 = vcombine.low %v718_v42, %v750_v43  ;;  %v2128_v37 = vand.u32 %v4599_v31, %v5451_v60  ;;  %v659_v42 = vld [vmem:[%s5434_s7 + $0xb8] sm:$0xff]  ;;  %v852_v31 = vld [vmem:[%s5434_s7 + $0x6c0] sm:$0x11] }
 0x106   : > { %v691_v43 = vld [vmem:[%s5434_s7 + $0x1b8] sm:$0xff] }
 0x107   : > { %2801 = vmatpush1.bf16.msra.mxu0 %v4458_v49  ;;  %2844 = vmatpush1.bf16.msra.mxu1 %v4460_v50  ;;  %v4469_v49 = vcombine.high %v719_v44, %v751_v45  ;;  %v782_v50 = vld [vmem:[%s5434_s7 + $0x490] sm:$0xff] }
 0x108   : > { %2802 = vmatprep.subr.bf16.mxu0 %v4523_v51  ;;  %2845 = vmatprep.subr.bf16.mxu1 %v4525_v53  ;;  %v814_v51 = vld [vmem:[%s5434_s7 + $0x590] sm:$0xff]  ;;  %v783_v53 = vld [vmem:[%s5434_s7 + $0x498] sm:$0xff] }
 0x109   : > { %v4530_v63 = vcombine.low %v782_v50, %v814_v51  ;;  %v4532_v1 = vcombine.low %v783_v53, %v815_v54 }
 0x10b   : > { %2803 = vmatpush1.bf16.msra.mxu0 %v4522_v55  ;;  %2846 = vmatpush1.bf16.msra.mxu1 %v4524_v57  ;;  %v847_v55 = vld [vmem:[%s5434_s7 + $0x698] sm:$0x11]  ;;  %v4468_v57 = vcombine.low %v719_v44, %v751_v45  ;;  %v2125_v44 = vand.u32 %v4598_v35, %v5451_v60 }
 0x10c   : > { %2804 = vmatprep.subr.bf16.mxu0 %v2092_v58  ;;  %2847 = vmatprep.subr.bf16.mxu1 %v2098_v61  ;;  %v4531_v58 = vcombine.high %v782_v50, %v814_v51  ;;  %v4533_v61 = vcombine.high %v783_v53, %v815_v54  ;;  %v4597_v62 = vcombine.high %v847_v55, %v847_v55  ;;  %v723_v50 = vld [vmem:[%s5434_s7 + $0x2b8] sm:$0xff] }
 0x10d   : > { %v755_v51 = vld [vmem:[%s5434_s7 + $0x3b8] sm:$0xff]  ;;  %v4412_v53 = vcombine.low %v659_v42, %v691_v43 }
 0x10f   : > { %2805 = vmatpush1.bf16.msra.mxu0 %v2089_v2  ;;  %2848 = vmatpush1.bf16.msra.mxu1 %v2095_v3  ;;  %v2116_v2 = vand.u32 %v4595_v59, %v5451_v60  ;;  %v4596_v3 = vcombine.low %v847_v55, %v847_v55  ;;  %v4477_v55 = vcombine.high %v723_v50, %v755_v51  ;;  %v5716_v59 = vld [vmem:[%s6193_s0] sm:$0xff]  }
 0x110   : > { %2884 = vmatprep.subr.bf16.mxu0 %v4399_v4  ;;  %2927 = vmatprep.subr.bf16.mxu1 %v4401_v5  ;;  %v2122_v4 = vand.u32 %v4597_v62, %v5451_v60  ;;  %v656_v5 = vld [vmem:[%s5434_s7 + $0xa0] sm:$0xff]  ;;  %v819_v62 = vld [vmem:[%s5434_s7 + $0x5b8] sm:$0xff] }
 0x111   : > { %v4406_v18 = vcombine.low %v656_v5, %v688_v6 }
 0x112   : > { %4636 = vmatmul.mubr.msk.bf16.vlgmr.msra.gmra.mrb[28].mxu0 %vm1997_vm1, %v5466_v14  ;;  %4637 = vmatmul.mubr.msk.bf16.vlgmr.msra.gmra.mrb[28].mxu1 %vm1997_vm1, %v5466_v14 }
 0x113   : > { %2885 = vmatpush1.bf16.msra.mxu0 %v4398_v10  ;;  %2928 = vmatpush1.bf16.msra.mxu1 %v4400_v11  ;;  %v2119_v10 = vand.u32 %v4596_v3, %v5451_v60  ;;  %v4407_v11 = vcombine.high %v656_v5, %v688_v6 }
 0x114   : > { %2886 = vmatprep.subr.bf16.mxu0 %v4463_v12  ;;  %2929 = vmatprep.subr.bf16.mxu1 %v4465_v13  ;;  %v4409_v12 = vcombine.high %v657_v7, %v689_v8  ;;  %v720_v13 = vld [vmem:[%s5434_s7 + $0x2a0] sm:$0xff] }
 0x115   : > { %2916 = vmatprep.mubr.bf16.mxu0 %v4907_v32  ;;  %2959 = vmatprep.mubr.bf16.mxu1 %v4907_v32  ;;  %v4471_v20 = vcombine.high %v720_v13, %v752_v15  ;;  %v4470_v28 = vcombine.low %v720_v13, %v752_v15  ;;  %v692_v13 = vld [vmem:[%s5434_s7 + $0x1c0] sm:$0xff]  ;;  %v661_v15 = vld [vmem:[%s5434_s7 + $0xc8] sm:$0xff] }
 0x117   : > { %2887 = vmatpush1.bf16.msra.mxu0 %v4462_v21  ;;  %2930 = vmatpush1.bf16.msra.mxu1 %v4464_v22  ;;  %v4473_v21 = vcombine.high %v721_v16, %v753_v17  ;;  %v784_v22 = vld [vmem:[%s5434_s7 + $0x4a0] sm:$0xff] }
 0x118   : > { %2888 = vmatprep.subr.bf16.mxu0 %v4527_v23  ;;  %2931 = vmatprep.subr.bf16.mxu1 %v4529_v25  ;;  %v816_v23 = vld [vmem:[%s5434_s7 + $0x5a0] sm:$0xff]  ;;  %v785_v25 = vld [vmem:[%s5434_s7 + $0x4a8] sm:$0xff] }
 0x119   : > { %v4536_v36 = vcombine.low %v785_v25, %v817_v26 }
 0x11b   : > { %2889 = vmatpush1.bf16.msra.mxu0 %v4526_v27  ;;  %2932 = vmatpush1.bf16.msra.mxu1 %v4528_v29  ;;  %v849_v27 = vld [vmem:[%s5434_s7 + $0x6a8] sm:$0x11]  ;;  %v4472_v29 = vcombine.low %v721_v16, %v753_v17 }
 0x11c   : > { %2890 = vmatprep.subr.bf16.mxu0 %v2104_v30  ;;  %2933 = vmatprep.subr.bf16.mxu1 %v2110_v33  ;;  %v4535_v30 = vcombine.high %v784_v22, %v816_v23  ;;  %v4537_v33 = vcombine.high %v785_v25, %v817_v26  ;;  %v4601_v34 = vcombine.high %v849_v27, %v849_v27  ;;  %v693_v16 = vld [vmem:[%s5434_s7 + $0x1c8] sm:$0xff] }
 0x11d   : > { %v4416_v26 = vcombine.low %v661_v15, %v693_v16 }
 0x11f   : > { %2891 = vmatpush1.bf16.msra.mxu0 %v2101_v38  ;;  %2934 = vmatpush1.bf16.msra.mxu1 %v2107_v39  ;;  %v4600_v38 = vcombine.low %v849_v27, %v849_v27  ;;  %v2134_v39 = vand.u32 %v4601_v34, %v5451_v60  ;;  %v821_v34 = vld [vmem:[%s5434_s7 + $0x5c8] sm:$0xff] }
 0x120   : > { %2970 = vmatprep.subr.bf16.mxu0 %v4403_v40  ;;  %3013 = vmatprep.subr.bf16.mxu1 %v4405_v41  ;;  %v658_v40 = vld [vmem:[%s5434_s7 + $0xb0] sm:$0xff] }
 0x121   : > { %v690_v41 = vld [vmem:[%s5434_s7 + $0x1b0] sm:$0xff]  ;;  %v2131_v45 = vand.u32 %v4600_v38, %v5451_v60  ;;  %v4607_v38 = vcombine.high %v852_v31, %v852_v31 }
 0x122   : > { %4638 = vmatmul.mubr.msk.bf16.vlgmr.msra.gmra.mrb[32].mxu0 %vm1997_vm1, %v5466_v14  ;;  %4639 = vmatmul.mubr.msk.bf16.vlgmr.msra.gmra.mrb[32].mxu1 %vm1997_vm1, %v5466_v14  ;;  %v4410_v52 = vcombine.low %v658_v40, %v690_v41 }
 0x123   : > { %2971 = vmatpush1.bf16.msra.mxu0 %v4402_v46  ;;  %3014 = vmatpush1.bf16.msra.mxu1 %v4404_v47  ;;  %v4411_v46 = vcombine.high %v658_v40, %v690_v41  ;;  %v4413_v47 = vcombine.high %v659_v42, %v691_v43  ;;  %v4606_v42 = vcombine.low %v852_v31, %v852_v31  ;;  %v761_v31 = vld [vmem:[%s5434_s7 + $0x3e8] sm:$0xff] }
 0x124   : > { %2972 = vmatprep.subr.bf16.mxu0 %v4467_v48  ;;  %3015 = vmatprep.subr.bf16.mxu1 %v4469_v49  ;;  %v722_v48 = vld [vmem:[%s5434_s7 + $0x2b0] sm:$0xff] }
 0x125   : > { %3002 = vmatprep.mubr.bf16.mxu0 %v4907_v32  ;;  %3045 = vmatprep.mubr.bf16.mxu1 %v4907_v32  ;;  %v754_v49 = vld [vmem:[%s5434_s7 + $0x3b0] sm:$0xff] }
 0x126   : > { %v4475_v54 = vcombine.high %v722_v48, %v754_v49  ;;  %v4474_v0 = vcombine.low %v722_v48, %v754_v49  ;;  %v694_v48 = vld [vmem:[%s5434_s7 + $0x1d0] sm:$0xff]  ;;  %v663_v49 = vld [vmem:[%s5434_s7 + $0xd8] sm:$0xff] }
 0x127   : > { %2973 = vmatpush1.bf16.msra.mxu0 %v4466_v56  ;;  %3016 = vmatpush1.bf16.msra.mxu1 %v4468_v57  ;;  %v786_v56 = vld [vmem:[%s5434_s7 + $0x4b0] sm:$0xff] }
 0x128   : > { %2974 = vmatprep.subr.bf16.mxu0 %v4531_v58  ;;  %3017 = vmatprep.subr.bf16.mxu1 %v4533_v61  ;;  %v818_v57 = vld [vmem:[%s5434_s7 + $0x5b0] sm:$0xff]  ;;  %v787_v61 = vld [vmem:[%s5434_s7 + $0x4b8] sm:$0xff] }
 0x129   : > { %v850_v58 = vld [vmem:[%s5434_s7 + $0x6b0] sm:$0x11]  ;;  %v4538_v6 = vcombine.low %v786_v56, %v818_v57  ;;  %v4540_v8 = vcombine.low %v787_v61, %v819_v62 }
 0x12a   : > { %v4603_v3 = vcombine.high %v850_v58, %v850_v58  ;;  %v4602_v7 = vcombine.low %v850_v58, %v850_v58  ;;  %v759_v58 = vld [vmem:[%s5434_s7 + $0x3d8] sm:$0xff] }
 0x12b   : > { %2975 = vmatpush1.bf16.msra.mxu0 %v4530_v63  ;;  %3018 = vmatpush1.bf16.msra.mxu1 %v4532_v1  ;;  %v851_v63 = vld [vmem:[%s5434_s7 + $0x6b8] sm:$0x11]  ;;  %v4476_v1 = vcombine.low %v723_v50, %v755_v51  ;;  %v2149_v51 = vand.u32 %v4606_v42, %v5451_v60  ;;  %v825_v42 = vld [vmem:[%s5434_s7 + $0x5e8] sm:$0xff] }
 0x12c   : > { %2976 = vmatprep.subr.bf16.mxu0 %v2116_v2  ;;  %3019 = vmatprep.subr.bf16.mxu1 %v2122_v4  ;;  %v4539_v2 = vcombine.high %v786_v56, %v818_v57  ;;  %v4541_v4 = vcombine.high %v787_v61, %v819_v62  ;;  %v4605_v5 = vcombine.high %v851_v63, %v851_v63  ;;  %v695_v50 = vld [vmem:[%s5434_s7 + $0x1d8] sm:$0xff]  ;;  %v758_v56 = vld [vmem:[%s5434_s7 + $0x3d0] sm:$0xff] }
 0x12d   : > { %v2137_v17 = vand.u32 %v4602_v7, %v5451_v60  ;;  %v727_v57 = vld [vmem:[%s5434_s7 + $0x2d8] sm:$0xff]  ;;  %v4420_v62 = vcombine.low %v663_v49, %v695_v50 }
 0x12f   : > { %2977 = vmatpush1.bf16.msra.mxu0 %v2113_v9  ;;  %3020 = vmatpush1.bf16.msra.mxu1 %v2119_v10  ;;  %v2140_v9 = vand.u32 %v4603_v3, %v5451_v60  ;;  %v4604_v10 = vcombine.low %v851_v63, %v851_v63  ;;  %v854_v3 = vld [vmem:[%s5434_s7 + $0x6d0] sm:$0x11] }
 0x130   : > { %3056 = vmatprep.subr.bf16.mxu0 %v4407_v11  ;;  %3099 = vmatprep.subr.bf16.mxu1 %v4409_v12  ;;  %v2146_v11 = vand.u32 %v4605_v5, %v5451_v60  ;;  %v660_v12 = vld [vmem:[%s5434_s7 + $0xc0] sm:$0xff]  ;;  %v823_v5 = vld [vmem:[%s5434_s7 + $0x5d8] sm:$0xff] }
 0x131   : > { %v4414_v25 = vcombine.low %v660_v12, %v692_v13 }
 0x132   : > { %4640 = vmatmul.mubr.msk.bf16.vlgmr.msra.gmra.mrb[36].mxu0 %vm1997_vm1, %v5466_v14  ;;  %4641 = vmatmul.mubr.msk.bf16.vlgmr.msra.gmra.mrb[36].mxu1 %vm1997_vm1, %v5466_v14  ;;  %v4534_v14 = vcombine.low %v784_v22, %v816_v23  ;;  %v756_v22 = vld [vmem:[%s5434_s7 + $0x3c0] sm:$0xff]  ;;  %v725_v23 = vld [vmem:[%s5434_s7 + $0x2c8] sm:$0xff] }
 0x133   : > { %3057 = vmatpush1.bf16.msra.mxu0 %v4406_v18  ;;  %3100 = vmatpush1.bf16.msra.mxu1 %v4408_v19  ;;  %v2143_v18 = vand.u32 %v4604_v10, %v5451_v60  ;;  %v4415_v19 = vcombine.high %v660_v12, %v692_v13  ;;  %v4611_v10 = vcombine.high %v854_v3, %v854_v3 }
 0x134   : > { %3058 = vmatprep.subr.bf16.mxu0 %v4471_v20  ;;  %3101 = vmatprep.subr.bf16.mxu1 %v4473_v21  ;;  %v4417_v20 = vcombine.high %v661_v15, %v693_v16  ;;  %v724_v21 = vld [vmem:[%s5434_s7 + $0x2c0] sm:$0xff]  ;;  %v4610_v15 = vcombine.low %v854_v3, %v854_v3 }
 0x135   : > { %3088 = vmatprep.mubr.bf16.mxu0 %v4907_v32  ;;  %3131 = vmatprep.mubr.bf16.mxu1 %v4907_v32  ;;  %v4479_v27 = vcombine.high %v724_v21, %v756_v22  ;;  %v4478_v35 = vcombine.low %v724_v21, %v756_v22  ;;  %v696_v21 = vld [vmem:[%s5434_s7 + $0x1e0] sm:$0xff]  ;;  %v665_v22 = vld [vmem:[%s5434_s7 + $0xe8] sm:$0xff] }
 0x137   : > { %3059 = vmatpush1.bf16.msra.mxu0 %v4470_v28  ;;  %3102 = vmatpush1.bf16.msra.mxu1 %v4472_v29  ;;  %v4481_v28 = vcombine.high %v725_v23, %v757_v24  ;;  %v788_v29 = vld [vmem:[%s5434_s7 + $0x4c0] sm:$0xff] }
 0x138   : > { %3060 = vmatprep.subr.bf16.mxu0 %v4535_v30  ;;  %3103 = vmatprep.subr.bf16.mxu1 %v4537_v33  ;;  %v820_v30 = vld [vmem:[%s5434_s7 + $0x5c0] sm:$0xff]  ;;  %v789_v33 = vld [vmem:[%s5434_s7 + $0x4c8] sm:$0xff] }
 0x139   : > { %v4542_v41 = vcombine.low %v788_v29, %v820_v30  ;;  %v4544_v43 = vcombine.low %v789_v33, %v821_v34 }
 0x13b   : > { %3061 = vmatpush1.bf16.msra.mxu0 %v4534_v14  ;;  %3104 = vmatpush1.bf16.msra.mxu1 %v4536_v36  ;;  %v853_v14 = vld [vmem:[%s5434_s7 + $0x6c8] sm:$0x11]  ;;  %v4480_v36 = vcombine.low %v725_v23, %v757_v24  ;;  %v2161_v24 = vand.u32 %v4610_v15, %v5451_v60 }
 0x13c   : > { %3062 = vmatprep.subr.bf16.mxu0 %v2128_v37  ;;  %3105 = vmatprep.subr.bf16.mxu1 %v2134_v39  ;;  %v4543_v37 = vcombine.high %v788_v29, %v820_v30  ;;  %v4545_v39 = vcombine.high %v789_v33, %v821_v34  ;;  %v4609_v40 = vcombine.high %v853_v14, %v853_v14  ;;  %v697_v23 = vld [vmem:[%s5434_s7 + $0x1e8] sm:$0xff]  ;;  %v760_v29 = vld [vmem:[%s5434_s7 + $0x3e0] sm:$0xff]  ;;  %v5787_v34 = vpop.permute.xlu0 %864 }
 0x13d   : > { %v729_v30 = vld [vmem:[%s5434_s7 + $0x2e8] sm:$0xff] }
 0x13f   : > { %3063 = vmatpush1.bf16.msra.mxu0 %v2125_v44  ;;  %3106 = vmatpush1.bf16.msra.mxu1 %v2131_v45  ;;  %v2152_v44 = vand.u32 %v4607_v38, %v5451_v60  ;;  %v4608_v45 = vcombine.low %v853_v14, %v853_v14  ;;  %v4424_v14 = vcombine.low %v665_v22, %v697_v23  ;;  %v792_v38 = vld [vmem:[%s5434_s7 + $0x4e0] sm:$0xff] }
 0x140   : > { %3142 = vmatprep.subr.bf16.mxu0 %v4411_v46  ;;  %3185 = vmatprep.subr.bf16.mxu1 %v4413_v47  ;;  %v2158_v46 = vand.u32 %v4609_v40, %v5451_v60  ;;  %v662_v47 = vld [vmem:[%s5434_s7 + $0xd0] sm:$0xff]  ;;  %v5795_v40 = vld [vmem:[%s5434_s7 + $0x6e8] sm:$0x11] }
 0x141   : > { %v4418_v61 = vcombine.low %v662_v47, %v694_v48 }
 0x142   : > { %4642 = vmatmul.mubr.msk.bf16.vlgmr.msra.gmra.mrb[40].mxu0 %vm1997_vm1, %v5716_v59  ;;  %4643 = vmatmul.mubr.msk.bf16.vlgmr.msra.gmra.mrb[40].mxu1 %vm1997_vm1, %v5716_v59 }
 0x143   : > { %3143 = vmatpush1.bf16.msra.mxu0 %v4410_v52  ;;  %3186 = vmatpush1.bf16.msra.mxu1 %v4412_v53  ;;  %v2155_v52 = vand.u32 %v4608_v45, %v5451_v60  ;;  %v4419_v53 = vcombine.high %v662_v47, %v694_v48  ;;  %v4488_v45 = vcombine.low %v729_v30, %v761_v31 }
 0x144   : > { %3144 = vmatprep.subr.bf16.mxu0 %v4475_v54  ;;  %3187 = vmatprep.subr.bf16.mxu1 %v4477_v55  ;;  %v4421_v54 = vcombine.high %v663_v49, %v695_v50  ;;  %v726_v55 = vld [vmem:[%s5434_s7 + $0x2d0] sm:$0xff]  ;;  %v4617_v47 = vcombine.high %v5795_v40, %v5795_v40  ;;  %v5807_v49 = vpop.permute.xlu0 %869 }
 0x145   : > { %3174 = vmatprep.mubr.bf16.mxu0 %v4907_v32  ;;  %3217 = vmatprep.mubr.bf16.mxu1 %v4907_v32  ;;  %v4483_v63 = vcombine.high %v726_v55, %v758_v56  ;;  %v4482_v7 = vcombine.low %v726_v55, %v758_v56 }
 0x147   : > { %3145 = vmatpush1.bf16.msra.mxu0 %v4474_v0  ;;  %3188 = vmatpush1.bf16.msra.mxu1 %v4476_v1  ;;  %v4485_v0 = vcombine.high %v727_v57, %v759_v58  ;;  %v790_v1 = vld [vmem:[%s5434_s7 + $0x4d0] sm:$0xff] }
 0x148   : > { %3146 = vmatprep.subr.bf16.mxu0 %v4539_v2  ;;  %3189 = vmatprep.subr.bf16.mxu1 %v4541_v4  ;;  %v822_v2 = vld [vmem:[%s5434_s7 + $0x5d0] sm:$0xff]  ;;  %v791_v4 = vld [vmem:[%s5434_s7 + $0x4d8] sm:$0xff] }
 0x149   : > { %v4546_v13 = vcombine.low %v790_v1, %v822_v2  ;;  %v4548_v16 = vcombine.low %v791_v4, %v823_v5 }
 0x14b   : > { %3147 = vmatpush1.bf16.msra.mxu0 %v4538_v6  ;;  %3190 = vmatpush1.bf16.msra.mxu1 %v4540_v8  ;;  %v855_v6 = vld [vmem:[%s5434_s7 + $0x6d8] sm:$0x11]  ;;  %v4484_v8 = vcombine.low %v727_v57, %v759_v58 }
 0x14c   : > { %3148 = vmatprep.subr.bf16.mxu0 %v2140_v9  ;;  %3191 = vmatprep.subr.bf16.mxu1 %v2146_v11  ;;  %v4547_v9 = vcombine.high %v790_v1, %v822_v2  ;;  %v4549_v11 = vcombine.high %v791_v4, %v823_v5  ;;  %v4613_v12 = vcombine.high %v855_v6, %v855_v6 }
 0x14f   : > { %3149 = vmatpush1.bf16.msra.mxu0 %v2137_v17  ;;  %3192 = vmatpush1.bf16.msra.mxu1 %v2143_v18  ;;  %v2164_v17 = vand.u32 %v4611_v10, %v5451_v60  ;;  %v4612_v18 = vcombine.low %v855_v6, %v855_v6  ;;  %v2182_v6 = vand.u32 %v4617_v47, %v5451_v60 }
 0x150   : > { %3228 = vmatprep.subr.bf16.mxu0 %v4415_v19  ;;  %3271 = vmatprep.subr.bf16.mxu1 %v4417_v20  ;;  %v2170_v19 = vand.u32 %v4613_v12, %v5451_v60  ;;  %v664_v20 = vld [vmem:[%s5434_s7 + $0xe0] sm:$0xff]  ;;  %v666_v12 = vld [vmem:[%s5434_s7 + $0xf0] sm:$0xff] }
 0x151   : > { %v4422_v33 = vcombine.low %v664_v20, %v696_v21 }
 0x152   : > { %4644 = vmatmul.mubr.msk.bf16.vlgmr.msra.gmra.mrb[44].mxu0 %vm1997_vm1, %v5716_v59  ;;  %4645 = vmatmul.mubr.msk.bf16.vlgmr.msra.gmra.mrb[44].mxu1 %vm1997_vm1, %v5716_v59 }
 0x153   : > { %3229 = vmatpush1.bf16.msra.mxu0 %v4414_v25  ;;  %3272 = vmatpush1.bf16.msra.mxu1 %v4416_v26  ;;  %v2167_v25 = vand.u32 %v4612_v18, %v5451_v60  ;;  %v4423_v26 = vcombine.high %v664_v20, %v696_v21  ;;  %v667_v18 = vld [vmem:[%s5434_s7 + $0xf8] sm:$0xff] }
 0x154   : > { %3230 = vmatprep.subr.bf16.mxu0 %v4479_v27  ;;  %3273 = vmatprep.subr.bf16.mxu1 %v4481_v28  ;;  %v4425_v27 = vcombine.high %v665_v22, %v697_v23  ;;  %v728_v28 = vld [vmem:[%s5434_s7 + $0x2e0] sm:$0xff] }
 0x155   : > { %3260 = vmatprep.mubr.bf16.mxu0 %v4907_v32  ;;  %3303 = vmatprep.mubr.bf16.mxu1 %v4907_v32 }
 0x157   : > { %3231 = vmatpush1.bf16.msra.mxu0 %v4478_v35  ;;  %3274 = vmatpush1.bf16.msra.mxu1 %v4480_v36  ;;  %v4487_v35 = vcombine.high %v728_v28, %v760_v29  ;;  %v5790_v36 = vld [vmem:[%s5434_s7 + $0x6e0] sm:$0x11] }
 0x158   : > { %3232 = vmatprep.subr.bf16.mxu0 %v4543_v37  ;;  %3275 = vmatprep.subr.bf16.mxu1 %v4545_v39  ;;  %v4489_v37 = vcombine.high %v729_v30, %v761_v31  ;;  %v824_v39 = vld [vmem:[%s5434_s7 + $0x5e0] sm:$0xff]  ;;  %v4614_v56 = vcombine.low %v5790_v36, %v5790_v36  ;;  %v730_v30 = vld [vmem:[%s5434_s7 + $0x2f0] sm:$0xff] }
 0x159   : > { %v762_v31 = vld [vmem:[%s5434_s7 + $0x3f0] sm:$0xff] }
 0x15a   : > { %v2173_v23 = vand.u32 %v4614_v56, %v5451_v60 }
 0x15b   : > { %3233 = vmatpush1.bf16.msra.mxu0 %v4542_v41  ;;  %3276 = vmatpush1.bf16.msra.mxu1 %v4544_v43  ;;  %v793_v41 = vld [vmem:[%s5434_s7 + $0x4e8] sm:$0xff]  ;;  %v4486_v43 = vcombine.low %v728_v28, %v760_v29 }
 0x15c   : > { %3234 = vmatprep.subr.bf16.mxu0 %v2152_v44  ;;  %3277 = vmatprep.subr.bf16.mxu1 %v2158_v46  ;;  %v4615_v44 = vcombine.high %v5790_v36, %v5790_v36  ;;  %v4551_v46 = vcombine.high %v792_v38, %v824_v39  ;;  %v4553_v50 = vcombine.high %v793_v41, %v825_v42 }
 0x15d   : > { %v4552_v55 = vcombine.low %v793_v41, %v825_v42  ;;  %v794_v41 = vld [vmem:[%s5434_s7 + $0x4f0] sm:$0xff] }
 0x15e   : > { %v826_v42 = vld [vmem:[%s5434_s7 + $0x5f0] sm:$0xff] }
 0x15f   : > { %3235 = vmatpush1.bf16.msra.mxu0 %v2149_v51  ;;  %3278 = vmatpush1.bf16.msra.mxu1 %v2155_v52 }
 0x160   : > { %3314 = vmatprep.subr.bf16.mxu0 %v4419_v53  ;;  %3357 = vmatprep.subr.bf16.mxu1 %v4421_v54  ;;  %v4550_v54 = vcombine.low %v792_v38, %v824_v39  ;;  %v4491_v38 = vcombine.high %v730_v30, %v762_v31  ;;  %v858_v39 = vld [vmem:[%s5434_s7 + $0x6f0] sm:$0x11] }
 0x161   : > { %v4619_v47 = vcombine.high %v858_v39, %v858_v39 }
 0x162   : > { %4646 = vmatmul.mubr.msk.bf16.vlgmr.msra.gmra.mrb[48].mxu0 %vm1997_vm1, %v5716_v59  ;;  %4647 = vmatmul.mubr.msk.bf16.vlgmr.msra.gmra.mrb[48].mxu1 %vm1997_vm1, %v5716_v59 }
 0x163   : > { %3315 = vmatpush1.bf16.msra.mxu0 %v4418_v61  ;;  %3358 = vmatpush1.bf16.msra.mxu1 %v4420_v62 }
 0x164   : > { %3316 = vmatprep.subr.bf16.mxu0 %v4483_v63  ;;  %3359 = vmatprep.subr.bf16.mxu1 %v4485_v0  ;;  %v2176_v63 = vand.u32 %v4615_v44, %v5451_v60  ;;  %v4616_v0 = vcombine.low %v5795_v40, %v5795_v40  ;;  %v795_v44 = vld [vmem:[%s5434_s7 + $0x4f8] sm:$0xff] }
 0x165   : > { %3346 = vmatprep.mubr.bf16.mxu0 %v4907_v32  ;;  %3389 = vmatprep.mubr.bf16.mxu1 %v4907_v32 }
 0x167   : > { %3317 = vmatpush1.bf16.msra.mxu0 %v4482_v7  ;;  %3360 = vmatpush1.bf16.msra.mxu1 %v4484_v8 }
 0x168   : > { %3318 = vmatprep.subr.bf16.mxu0 %v4547_v9  ;;  %3361 = vmatprep.subr.bf16.mxu1 %v4549_v11 }
 0x16b   : > { %3319 = vmatpush1.bf16.msra.mxu0 %v4546_v13  ;;  %3362 = vmatpush1.bf16.msra.mxu1 %v4548_v16  ;;  %v698_v13 = vld [vmem:[%s5434_s7 + $0x1f0] sm:$0xff] }
 0x16c   : > { %3320 = vmatprep.subr.bf16.mxu0 %v2164_v17  ;;  %3363 = vmatprep.subr.bf16.mxu1 %v2170_v19  ;;  %v699_v19 = vld [vmem:[%s5434_s7 + $0x1f8] sm:$0xff]  ;;  %v4426_v36 = vcombine.low %v666_v12, %v698_v13 }
 0x16d   : > { %v4429_v29 = vcombine.high %v667_v18, %v699_v19 }
 0x16f   : > { %3321 = vmatpush1.bf16.msra.mxu0 %v2161_v24  ;;  %3364 = vmatpush1.bf16.msra.mxu1 %v2167_v25 }
 0x170   : > { %3400 = vmatprep.subr.bf16.mxu0 %v4423_v26  ;;  %3443 = vmatprep.subr.bf16.mxu1 %v4425_v27  ;;  %v2179_v26 = vand.u32 %v4616_v0, %v5451_v60  ;;  %v4427_v27 = vcombine.high %v666_v12, %v698_v13 }
 0x172   : > { %4648 = vmatmul.mubr.msk.bf16.vlgmr.msra.gmra.mrb[52].mxu0 %vm1997_vm1, %v5716_v59  ;;  %4649 = vmatmul.mubr.msk.bf16.vlgmr.msra.gmra.mrb[52].mxu1 %vm1997_vm1, %v5716_v59 }
 0x173   : > { %3401 = vmatpush1.bf16.msra.mxu0 %v4422_v33  ;;  %3444 = vmatpush1.bf16.msra.mxu1 %v4424_v14  ;;  %v731_v14 = vld [vmem:[%s5434_s7 + $0x2f8] sm:$0xff] }
 0x174   : > { %3402 = vmatprep.subr.bf16.mxu0 %v4487_v35  ;;  %3445 = vmatprep.subr.bf16.mxu1 %v4489_v37  ;;  %v763_v35 = vld [vmem:[%s5434_s7 + $0x3f8] sm:$0xff]  ;;  %v4428_v37 = vcombine.low %v667_v18, %v699_v19 }
 0x175   : > { %v2230_v48 = vpop.f32.mrb[0].mxu0  ;;  %3432 = vmatprep.mubr.bf16.mxu0 %v4907_v32  ;;  %v2273_v52 = vpop.f32.mrb[0].mxu1  ;;  %3475 = vmatprep.mubr.bf16.mxu1 %v4907_v32  ;;  %v4493_v40 = vcombine.high %v731_v14, %v763_v35 }
 0x176   : > { %v2231_v51 = vadd.f32 %v2230_v48, %v5787_v34  ;;  %v2232_v53 = vpop.f32.mrb[1].mxu0  ;;  %v2274_v57 = vadd.f32 %v2273_v52, %v5787_v34  ;;  %v2275_v61 = vpop.f32.mrb[1].mxu1  ;;  %v4492_v48 = vcombine.low %v731_v14, %v763_v35 }
 0x177   : > { %v2233_v58 = vadd.f32 %v2232_v53, %v5787_v34  ;;  %v2234_v62 = vpop.f32.mrb[2].mxu0  ;;  %3403 = vmatpush1.bf16.msra.mxu0 %v4486_v43  ;;  %v2276_v2 = vadd.f32 %v2275_v61, %v5787_v34  ;;  %v2277_v4 = vpop.f32.mrb[2].mxu1  ;;  %3446 = vmatpush1.bf16.msra.mxu1 %v4488_v45  ;;  %v859_v43 = vld [vmem:[%s5434_s7 + $0x6f8] sm:$0x11]  ;;  %v4618_v61 = vcombine.low %v858_v39, %v858_v39 }
 0x178   : > { %v3572_v1 = vmax.f32 %v2231_v51, 0.0  ;;  %v2235_v3 = vadd.f32 %v2234_v62, %v5807_v49  ;;  %v2236_v5 = vpop.f32.mrb[3].mxu0  ;;  %3404 = vmatprep.subr.bf16.mxu0 %v4551_v46  ;;  %v3574_v7 = vmax.f32 %v2274_v57, 0.0  ;;  %v2278_v9 = vadd.f32 %v2277_v4, %v5807_v49  ;;  %v2279_v11 = vpop.f32.mrb[3].mxu1  ;;  %3447 = vmatprep.subr.bf16.mxu1 %v4553_v50  ;;  %v827_v45 = vld [vmem:[%s5434_s7 + $0x5f8] sm:$0xff] }
 0x179   : > { %v3573_v8 = vmax.f32 %v2233_v58, 0.0  ;;  %v2237_v10 = vadd.f32 %v2236_v5, %v5807_v49  ;;  %v3575_v15 = vmax.f32 %v2276_v2, 0.0  ;;  %v2280_v17 = vadd.f32 %v2279_v11, %v5807_v49 }
 0x17a   : > { %v3636_v16 = vmax.f32 %v2235_v3, 0.0  ;;  %v3638_v21 = vmax.f32 %v2278_v9, 0.0  ;;  %v4490_v46 = vcombine.low %v730_v30, %v762_v31  ;;  %v4555_v50 = vcombine.high %v794_v41, %v826_v42 }
 0x17b   : > { %v4724_v20 = vpack.c.bf16 %v3573_v8, %v3572_v1  ;;  %v3637_v22 = vmax.f32 %v2237_v10, 0.0  ;;  %3405 = vmatpush1.bf16.msra.mxu0 %v4550_v54  ;;  %v4725_v24 = vpack.c.bf16 %v3575_v15, %v3574_v7  ;;  %v3639_v25 = vmax.f32 %v2280_v17, 0.0  ;;  %3448 = vmatpush1.bf16.msra.mxu1 %v4552_v55 }
 0x17c   : > { %3406 = vmatprep.subr.bf16.mxu0 %v2176_v63  ;;  %3449 = vmatprep.subr.bf16.mxu1 %v2182_v6  ;;  %v4621_v51 = vcombine.high %v859_v43, %v859_v43  ;;  %v4557_v53 = vcombine.high %v795_v44, %v827_v45  ;;  %v4554_v57 = vcombine.low %v794_v41, %v826_v42 }
 0x17d   : > { %4084 = vst [vmem:[%s5836_s12] sm:$0xff] %v4724_v20  ;;  %v4756_v28 = vpack.c.bf16 %v3637_v22, %v3636_v16  ;;  %4085 = vst [vmem:[%s5836_s12 + $0x8] sm:$0xff] %v4725_v24  ;;  %v4757_v33 = vpack.c.bf16 %v3639_v25, %v3638_v21  ;;  %v4556_v58 = vcombine.low %v795_v44, %v827_v45 }
 0x17e   : > { %v2188_v2 = vand.u32 %v4619_v47, %v5451_v60  ;;  %v4620_v3 = vcombine.low %v859_v43, %v859_v43  ;;  %v2185_v21 = vand.u32 %v4618_v61, %v5451_v60 }
 0x17f   : > { %4116 = vst [vmem:[%s5836_s12 + $0x100] sm:$0xff] %v4756_v28  ;;  %3407 = vmatpush1.bf16.msra.mxu0 %v2173_v23  ;;  %4117 = vst [vmem:[%s5836_s12 + $0x108] sm:$0xff] %v4757_v33  ;;  %3450 = vmatpush1.bf16.msra.mxu1 %v2179_v26 }
 0x180   : > { %3486 = vmatprep.subr.bf16.mxu0 %v4427_v27  ;;  %3529 = vmatprep.subr.bf16.mxu1 %v4429_v29  ;;  %v2191_v24 = vand.u32 %v4620_v3, %v5451_v60 }
 0x182   : > { %4650 = vmatmul.mubr.msk.bf16.vlgmr.msra.gmra.mrb[56].mxu0 %vm1997_vm1, %v5716_v59  ;;  %4651 = vmatmul.mubr.msk.bf16.vlgmr.msra.gmra.mrb[56].mxu1 %vm1997_vm1, %v5716_v59 }
 0x183   : > { %3487 = vmatpush1.bf16.msra.mxu0 %v4426_v36  ;;  %3530 = vmatpush1.bf16.msra.mxu1 %v4428_v37 }
 0x184   : > { %3488 = vmatprep.subr.bf16.mxu0 %v4491_v38  ;;  %3531 = vmatprep.subr.bf16.mxu1 %v4493_v40 }
 0x185   : > { %v2316_v52 = vpop.f32.mrb[4].mxu0  ;;  %3518 = vmatprep.mubr.bf16.mxu0 %v4907_v32  ;;  %v2359_v55 = vpop.f32.mrb[4].mxu1  ;;  %3561 = vmatprep.mubr.bf16.mxu1 %v4907_v32  ;;  %v2194_v32 = vand.u32 %v4621_v51, %v5451_v60 }
 0x186   : > { %v2317_v54 = vadd.f32 %v2316_v52, %v5787_v34  ;;  %v2318_v56 = vpop.f32.mrb[5].mxu0  ;;  %v2360_v62 = vadd.f32 %v2359_v55, %v5787_v34  ;;  %v2361_v0 = vpop.f32.mrb[5].mxu1 }
 0x187   : > { %v2319_v63 = vadd.f32 %v2318_v56, %v5787_v34  ;;  %v2320_v1 = vpop.f32.mrb[6].mxu0  ;;  %3489 = vmatpush1.bf16.msra.mxu0 %v4490_v46  ;;  %v2362_v5 = vadd.f32 %v2361_v0, %v5787_v34  ;;  %v2363_v7 = vpop.f32.mrb[6].mxu1  ;;  %3532 = vmatpush1.bf16.msra.mxu1 %v4492_v48 }
 0x188   : > { %v3576_v4 = vmax.f32 %v2317_v54, 0.0  ;;  %v2321_v6 = vadd.f32 %v2320_v1, %v5807_v49  ;;  %v2322_v8 = vpop.f32.mrb[7].mxu0  ;;  %3490 = vmatprep.subr.bf16.mxu0 %v4555_v50  ;;  %v3578_v9 = vmax.f32 %v2360_v62, 0.0  ;;  %v2364_v11 = vadd.f32 %v2363_v7, %v5807_v49  ;;  %v2365_v13 = vpop.f32.mrb[7].mxu1  ;;  %3533 = vmatprep.subr.bf16.mxu1 %v4557_v53 }
 0x189   : > { %v3577_v10 = vmax.f32 %v2319_v63, 0.0  ;;  %v2323_v12 = vadd.f32 %v2322_v8, %v5807_v49  ;;  %v3579_v15 = vmax.f32 %v2362_v5, 0.0  ;;  %v2366_v17 = vadd.f32 %v2365_v13, %v5807_v49 }
 0x18a   : > { %v3640_v16 = vmax.f32 %v2321_v6, 0.0  ;;  %v3642_v19 = vmax.f32 %v2364_v11, 0.0 }
 0x18b   : > { %v4726_v18 = vpack.c.bf16 %v3577_v10, %v3576_v4  ;;  %v3641_v20 = vmax.f32 %v2323_v12, 0.0  ;;  %3491 = vmatpush1.bf16.msra.mxu0 %v4554_v57  ;;  %v4727_v22 = vpack.c.bf16 %v3579_v15, %v3578_v9  ;;  %v3643_v23 = vmax.f32 %v2366_v17, 0.0  ;;  %3534 = vmatpush1.bf16.msra.mxu1 %v4556_v58 }
 0x18c   : > { %3492 = vmatprep.subr.bf16.mxu0 %v2188_v2  ;;  %3535 = vmatprep.subr.bf16.mxu1 %v2194_v32 }
 0x18d   : > { %4086 = vst [vmem:[%s5836_s12 + $0x10] sm:$0xff] %v4726_v18  ;;  %v4758_v25 = vpack.c.bf16 %v3641_v20, %v3640_v16  ;;  %4087 = vst [vmem:[%s5836_s12 + $0x18] sm:$0xff] %v4727_v22  ;;  %v4759_v26 = vpack.c.bf16 %v3643_v23, %v3642_v19 }
 0x18f   : > { %4118 = vst [vmem:[%s5836_s12 + $0x110] sm:$0xff] %v4758_v25  ;;  %3493 = vmatpush1.bf16.msra.mxu0 %v2185_v21  ;;  %4119 = vst [vmem:[%s5836_s12 + $0x118] sm:$0xff] %v4759_v26  ;;  %3536 = vmatpush1.bf16.msra.mxu1 %v2191_v24 }
 0x192   : > { %4652 = vmatmul.mubr.msk.bf16.vlgmr.msra.gmra.mrb[60].mxu0 %vm1997_vm1, %v5716_v59  ;;  %4653 = vmatmul.mubr.msk.bf16.vlgmr.msra.gmra.mrb[60].mxu1 %vm1997_vm1, %v5716_v59 }
 0x195   : > { %v2402_v27 = vpop.f32.mrb[8].mxu0  ;;  %v2445_v29 = vpop.f32.mrb[8].mxu1 }
 0x196   : > { %v2403_v28 = vadd.f32 %v2402_v27, %v5787_v34  ;;  %v2404_v60 = vpop.f32.mrb[9].mxu0  ;;  %v2446_v30 = vadd.f32 %v2445_v29, %v5787_v34  ;;  %v2447_v33 = vpop.f32.mrb[9].mxu1 }
 0x197   : > { %v2405_v31 = vadd.f32 %v2404_v60, %v5787_v34  ;;  %v2406_v14 = vpop.f32.mrb[10].mxu0  ;;  %v2448_v36 = vadd.f32 %v2447_v33, %v5787_v34  ;;  %v2449_v38 = vpop.f32.mrb[10].mxu1 }
 0x198   : > { %v3580_v35 = vmax.f32 %v2403_v28, 0.0  ;;  %v2407_v37 = vadd.f32 %v2406_v14, %v5807_v49  ;;  %v2408_v39 = vpop.f32.mrb[11].mxu0  ;;  %v3582_v59 = vmax.f32 %v2446_v30, 0.0  ;;  %v2450_v41 = vadd.f32 %v2449_v38, %v5807_v49  ;;  %v2451_v43 = vpop.f32.mrb[11].mxu1 }
 0x199   : > { %v3581_v40 = vmax.f32 %v2405_v31, 0.0  ;;  %v2409_v42 = vadd.f32 %v2408_v39, %v5807_v49  ;;  %v3583_v44 = vmax.f32 %v2448_v36, 0.0  ;;  %v2452_v46 = vadd.f32 %v2451_v43, %v5807_v49 }
 0x19a   : > { %v3644_v45 = vmax.f32 %v2407_v37, 0.0  ;;  %v3646_v48 = vmax.f32 %v2450_v41, 0.0 }
 0x19b   : > { %v4728_v47 = vpack.c.bf16 %v3581_v40, %v3580_v35  ;;  %v3645_v50 = vmax.f32 %v2409_v42, 0.0  ;;  %v4729_v51 = vpack.c.bf16 %v3583_v44, %v3582_v59  ;;  %v3647_v52 = vmax.f32 %v2452_v46, 0.0 }
 0x19d   : > { %4088 = vst [vmem:[%s5836_s12 + $0x20] sm:$0xff] %v4728_v47  ;;  %v4760_v53 = vpack.c.bf16 %v3645_v50, %v3644_v45  ;;  %4089 = vst [vmem:[%s5836_s12 + $0x28] sm:$0xff] %v4729_v51  ;;  %v4761_v54 = vpack.c.bf16 %v3647_v52, %v3646_v48 }
 0x19f   : > { %4120 = vst [vmem:[%s5836_s12 + $0x120] sm:$0xff] %v4760_v53  ;;  %4121 = vst [vmem:[%s5836_s12 + $0x128] sm:$0xff] %v4761_v54 }
 0x1a5   : > { %v2488_v55 = vpop.f32.mrb[12].mxu0  ;;  %v2531_v57 = vpop.f32.mrb[12].mxu1 }
 0x1a6   : > { %v2489_v56 = vadd.f32 %v2488_v55, %v5787_v34  ;;  %v2490_v58 = vpop.f32.mrb[13].mxu0  ;;  %v2532_v61 = vadd.f32 %v2531_v57, %v5787_v34  ;;  %v2533_v63 = vpop.f32.mrb[13].mxu1 }
 0x1a7   : > { %v2491_v62 = vadd.f32 %v2490_v58, %v5787_v34  ;;  %v2492_v0 = vpop.f32.mrb[14].mxu0  ;;  %v2534_v2 = vadd.f32 %v2533_v63, %v5787_v34  ;;  %v2535_v4 = vpop.f32.mrb[14].mxu1 }
 0x1a8   : > { %v3584_v1 = vmax.f32 %v2489_v56, 0.0  ;;  %v2493_v3 = vadd.f32 %v2492_v0, %v5807_v49  ;;  %v2494_v5 = vpop.f32.mrb[15].mxu0  ;;  %v3586_v6 = vmax.f32 %v2532_v61, 0.0  ;;  %v2536_v8 = vadd.f32 %v2535_v4, %v5807_v49  ;;  %v2537_v9 = vpop.f32.mrb[15].mxu1 }
 0x1a9   : > { %v3585_v7 = vmax.f32 %v2491_v62, 0.0  ;;  %v2495_v32 = vadd.f32 %v2494_v5, %v5807_v49  ;;  %v3587_v10 = vmax.f32 %v2534_v2, 0.0  ;;  %v2538_v12 = vadd.f32 %v2537_v9, %v5807_v49 }
 0x1aa   : > { %v3648_v11 = vmax.f32 %v2493_v3, 0.0  ;;  %v3650_v15 = vmax.f32 %v2536_v8, 0.0 }
 0x1ab   : > { %v4730_v13 = vpack.c.bf16 %v3585_v7, %v3584_v1  ;;  %v3649_v16 = vmax.f32 %v2495_v32, 0.0  ;;  %v4731_v17 = vpack.c.bf16 %v3587_v10, %v3586_v6  ;;  %v3651_v18 = vmax.f32 %v2538_v12, 0.0 }
 0x1ad   : > { %4090 = vst [vmem:[%s5836_s12 + $0x30] sm:$0xff] %v4730_v13  ;;  %v4762_v19 = vpack.c.bf16 %v3649_v16, %v3648_v11  ;;  %4091 = vst [vmem:[%s5836_s12 + $0x38] sm:$0xff] %v4731_v17  ;;  %v4763_v20 = vpack.c.bf16 %v3651_v18, %v3650_v15 }
 0x1af   : > { %4122 = vst [vmem:[%s5836_s12 + $0x130] sm:$0xff] %v4762_v19  ;;  %4123 = vst [vmem:[%s5836_s12 + $0x138] sm:$0xff] %v4763_v20 }
 0x1b5   : > { %v2574_v21 = vpop.f32.mrb[16].mxu0  ;;  %v2617_v23 = vpop.f32.mrb[16].mxu1 }
 0x1b6   : > { %v2575_v22 = vadd.f32 %v2574_v21, %v5787_v34  ;;  %v2576_v24 = vpop.f32.mrb[17].mxu0  ;;  %v2618_v25 = vadd.f32 %v2617_v23, %v5787_v34  ;;  %v2619_v27 = vpop.f32.mrb[17].mxu1 }
 0x1b7   : > { %v2577_v26 = vadd.f32 %v2576_v24, %v5787_v34  ;;  %v2578_v28 = vpop.f32.mrb[18].mxu0  ;;  %v2620_v60 = vadd.f32 %v2619_v27, %v5787_v34  ;;  %v2621_v31 = vpop.f32.mrb[18].mxu1 }
 0x1b8   : > { %v3588_v29 = vmax.f32 %v2575_v22, 0.0  ;;  %v2579_v30 = vadd.f32 %v2578_v28, %v5807_v49  ;;  %v2580_v33 = vpop.f32.mrb[19].mxu0  ;;  %v3590_v14 = vmax.f32 %v2618_v25, 0.0  ;;  %v2622_v36 = vadd.f32 %v2621_v31, %v5807_v49  ;;  %v2623_v38 = vpop.f32.mrb[19].mxu1 }
 0x1b9   : > { %v3589_v35 = vmax.f32 %v2577_v26, 0.0  ;;  %v2581_v37 = vadd.f32 %v2580_v33, %v5807_v49  ;;  %v3591_v39 = vmax.f32 %v2620_v60, 0.0  ;;  %v2624_v40 = vadd.f32 %v2623_v38, %v5807_v49 }
 0x1ba   : > { %v3652_v59 = vmax.f32 %v2579_v30, 0.0  ;;  %v3654_v42 = vmax.f32 %v2622_v36, 0.0 }
 0x1bb   : > { %v4732_v41 = vpack.c.bf16 %v3589_v35, %v3588_v29  ;;  %v3653_v43 = vmax.f32 %v2581_v37, 0.0  ;;  %v4733_v44 = vpack.c.bf16 %v3591_v39, %v3590_v14  ;;  %v3655_v45 = vmax.f32 %v2624_v40, 0.0 }
 0x1bd   : > { %4092 = vst [vmem:[%s5836_s12 + $0x40] sm:$0xff] %v4732_v41  ;;  %v4764_v46 = vpack.c.bf16 %v3653_v43, %v3652_v59  ;;  %4093 = vst [vmem:[%s5836_s12 + $0x48] sm:$0xff] %v4733_v44  ;;  %v4765_v47 = vpack.c.bf16 %v3655_v45, %v3654_v42 }
 0x1bf   : > { %4124 = vst [vmem:[%s5836_s12 + $0x140] sm:$0xff] %v4764_v46  ;;  %4125 = vst [vmem:[%s5836_s12 + $0x148] sm:$0xff] %v4765_v47 }
 0x1c5   : > { %v2660_v48 = vpop.f32.mrb[20].mxu0  ;;  %v2703_v51 = vpop.f32.mrb[20].mxu1 }
 0x1c6   : > { %v2661_v50 = vadd.f32 %v2660_v48, %v5787_v34  ;;  %v2662_v52 = vpop.f32.mrb[21].mxu0  ;;  %v2704_v53 = vadd.f32 %v2703_v51, %v5787_v34  ;;  %v2705_v55 = vpop.f32.mrb[21].mxu1 }
 0x1c7   : > { %v2663_v54 = vadd.f32 %v2662_v52, %v5787_v34  ;;  %v2664_v56 = vpop.f32.mrb[22].mxu0  ;;  %v2706_v58 = vadd.f32 %v2705_v55, %v5787_v34  ;;  %v2707_v62 = vpop.f32.mrb[22].mxu1 }
 0x1c8   : > { %v3592_v57 = vmax.f32 %v2661_v50, 0.0  ;;  %v2665_v61 = vadd.f32 %v2664_v56, %v5807_v49  ;;  %v2666_v63 = vpop.f32.mrb[23].mxu0  ;;  %v3594_v0 = vmax.f32 %v2704_v53, 0.0  ;;  %v2708_v2 = vadd.f32 %v2707_v62, %v5807_v49  ;;  %v2709_v4 = vpop.f32.mrb[23].mxu1 }
 0x1c9   : > { %v3593_v1 = vmax.f32 %v2663_v54, 0.0  ;;  %v2667_v3 = vadd.f32 %v2666_v63, %v5807_v49  ;;  %v3595_v5 = vmax.f32 %v2706_v58, 0.0  ;;  %v2710_v7 = vadd.f32 %v2709_v4, %v5807_v49 }
 0x1ca   : > { %v3656_v6 = vmax.f32 %v2665_v61, 0.0  ;;  %v3658_v32 = vmax.f32 %v2708_v2, 0.0 }
 0x1cb   : > { %v4734_v8 = vpack.c.bf16 %v3593_v1, %v3592_v57  ;;  %v3657_v9 = vmax.f32 %v2667_v3, 0.0  ;;  %v4735_v10 = vpack.c.bf16 %v3595_v5, %v3594_v0  ;;  %v3659_v11 = vmax.f32 %v2710_v7, 0.0 }
 0x1cd   : > { %4094 = vst [vmem:[%s5836_s12 + $0x50] sm:$0xff] %v4734_v8  ;;  %v4766_v12 = vpack.c.bf16 %v3657_v9, %v3656_v6  ;;  %4095 = vst [vmem:[%s5836_s12 + $0x58] sm:$0xff] %v4735_v10  ;;  %v4767_v13 = vpack.c.bf16 %v3659_v11, %v3658_v32 }
 0x1cf   : > { %4126 = vst [vmem:[%s5836_s12 + $0x150] sm:$0xff] %v4766_v12  ;;  %4127 = vst [vmem:[%s5836_s12 + $0x158] sm:$0xff] %v4767_v13 }
 0x1d5   : > { %v2746_v15 = vpop.f32.mrb[24].mxu0  ;;  %v2789_v17 = vpop.f32.mrb[24].mxu1 }
 0x1d6   : > { %v2747_v16 = vadd.f32 %v2746_v15, %v5787_v34  ;;  %v2748_v18 = vpop.f32.mrb[25].mxu0  ;;  %v2790_v19 = vadd.f32 %v2789_v17, %v5787_v34  ;;  %v2791_v21 = vpop.f32.mrb[25].mxu1 }
 0x1d7   : > { %v2749_v20 = vadd.f32 %v2748_v18, %v5787_v34  ;;  %v2750_v22 = vpop.f32.mrb[26].mxu0  ;;  %v2792_v24 = vadd.f32 %v2791_v21, %v5787_v34  ;;  %v2793_v26 = vpop.f32.mrb[26].mxu1 }
 0x1d8   : > { %v3596_v23 = vmax.f32 %v2747_v16, 0.0  ;;  %v2751_v25 = vadd.f32 %v2750_v22, %v5807_v49  ;;  %v2752_v27 = vpop.f32.mrb[27].mxu0  ;;  %v3598_v28 = vmax.f32 %v2790_v19, 0.0  ;;  %v2794_v60 = vadd.f32 %v2793_v26, %v5807_v49  ;;  %v2795_v31 = vpop.f32.mrb[27].mxu1 }
 0x1d9   : > { %v3597_v29 = vmax.f32 %v2749_v20, 0.0  ;;  %v2753_v30 = vadd.f32 %v2752_v27, %v5807_v49  ;;  %v3599_v33 = vmax.f32 %v2792_v24, 0.0  ;;  %v2796_v35 = vadd.f32 %v2795_v31, %v5807_v49 }
 0x1da   : > { %v3660_v14 = vmax.f32 %v2751_v25, 0.0  ;;  %v3662_v37 = vmax.f32 %v2794_v60, 0.0 }
 0x1db   : > { %v4736_v36 = vpack.c.bf16 %v3597_v29, %v3596_v23  ;;  %v3661_v38 = vmax.f32 %v2753_v30, 0.0  ;;  %v4737_v39 = vpack.c.bf16 %v3599_v33, %v3598_v28  ;;  %v3663_v59 = vmax.f32 %v2796_v35, 0.0 }
 0x1dd   : > { %4096 = vst [vmem:[%s5836_s12 + $0x60] sm:$0xff] %v4736_v36  ;;  %v4768_v40 = vpack.c.bf16 %v3661_v38, %v3660_v14  ;;  %4097 = vst [vmem:[%s5836_s12 + $0x68] sm:$0xff] %v4737_v39  ;;  %v4769_v41 = vpack.c.bf16 %v3663_v59, %v3662_v37 }
 0x1df   : > { %4128 = vst [vmem:[%s5836_s12 + $0x160] sm:$0xff] %v4768_v40  ;;  %4129 = vst [vmem:[%s5836_s12 + $0x168] sm:$0xff] %v4769_v41 }
 0x1e5   : > { %v2832_v42 = vpop.f32.mrb[28].mxu0  ;;  %v2875_v44 = vpop.f32.mrb[28].mxu1 }
 0x1e6   : > { %v2833_v43 = vadd.f32 %v2832_v42, %v5787_v34  ;;  %v2834_v45 = vpop.f32.mrb[29].mxu0  ;;  %v2876_v46 = vadd.f32 %v2875_v44, %v5787_v34  ;;  %v2877_v48 = vpop.f32.mrb[29].mxu1 }
 0x1e7   : > { %v2835_v47 = vadd.f32 %v2834_v45, %v5787_v34  ;;  %v2836_v50 = vpop.f32.mrb[30].mxu0  ;;  %v2878_v52 = vadd.f32 %v2877_v48, %v5787_v34  ;;  %v2879_v54 = vpop.f32.mrb[30].mxu1 }
 0x1e8   : > { %v3600_v51 = vmax.f32 %v2833_v43, 0.0  ;;  %v2837_v53 = vadd.f32 %v2836_v50, %v5807_v49  ;;  %v2838_v55 = vpop.f32.mrb[31].mxu0  ;;  %v3602_v56 = vmax.f32 %v2876_v46, 0.0  ;;  %v2880_v58 = vadd.f32 %v2879_v54, %v5807_v49  ;;  %v2881_v62 = vpop.f32.mrb[31].mxu1 }
 0x1e9   : > { %v3601_v57 = vmax.f32 %v2835_v47, 0.0  ;;  %v2839_v61 = vadd.f32 %v2838_v55, %v5807_v49  ;;  %v3603_v63 = vmax.f32 %v2878_v52, 0.0  ;;  %v2882_v1 = vadd.f32 %v2881_v62, %v5807_v49 }
 0x1ea   : > { %v3664_v0 = vmax.f32 %v2837_v53, 0.0  ;;  %v3666_v3 = vmax.f32 %v2880_v58, 0.0 }
 0x1eb   : > { %v4738_v2 = vpack.c.bf16 %v3601_v57, %v3600_v51  ;;  %v3665_v4 = vmax.f32 %v2839_v61, 0.0  ;;  %v4739_v5 = vpack.c.bf16 %v3603_v63, %v3602_v56  ;;  %v3667_v6 = vmax.f32 %v2882_v1, 0.0 }
 0x1ed   : > { %4098 = vst [vmem:[%s5836_s12 + $0x70] sm:$0xff] %v4738_v2  ;;  %v4770_v7 = vpack.c.bf16 %v3665_v4, %v3664_v0  ;;  %4099 = vst [vmem:[%s5836_s12 + $0x78] sm:$0xff] %v4739_v5  ;;  %v4771_v8 = vpack.c.bf16 %v3667_v6, %v3666_v3 }
 0x1ef   : > { %4130 = vst [vmem:[%s5836_s12 + $0x170] sm:$0xff] %v4770_v7  ;;  %4131 = vst [vmem:[%s5836_s12 + $0x178] sm:$0xff] %v4771_v8 }
 0x1f5   : > { %v2918_v32 = vpop.f32.mrb[32].mxu0  ;;  %v2961_v10 = vpop.f32.mrb[32].mxu1 }
 0x1f6   : > { %v2919_v9 = vadd.f32 %v2918_v32, %v5787_v34  ;;  %v2920_v11 = vpop.f32.mrb[33].mxu0  ;;  %v2962_v12 = vadd.f32 %v2961_v10, %v5787_v34  ;;  %v2963_v15 = vpop.f32.mrb[33].mxu1 }
 0x1f7   : > { %v2921_v13 = vadd.f32 %v2920_v11, %v5787_v34  ;;  %v2922_v16 = vpop.f32.mrb[34].mxu0  ;;  %v2964_v18 = vadd.f32 %v2963_v15, %v5787_v34  ;;  %v2965_v20 = vpop.f32.mrb[34].mxu1 }
 0x1f8   : > { %v3604_v17 = vmax.f32 %v2919_v9, 0.0  ;;  %v2923_v19 = vadd.f32 %v2922_v16, %v5807_v49  ;;  %v2924_v21 = vpop.f32.mrb[35].mxu0  ;;  %v3606_v22 = vmax.f32 %v2962_v12, 0.0  ;;  %v2966_v24 = vadd.f32 %v2965_v20, %v5807_v49  ;;  %v2967_v26 = vpop.f32.mrb[35].mxu1 }
 0x1f9   : > { %v3605_v23 = vmax.f32 %v2921_v13, 0.0  ;;  %v2925_v25 = vadd.f32 %v2924_v21, %v5807_v49  ;;  %v3607_v27 = vmax.f32 %v2964_v18, 0.0  ;;  %v2968_v29 = vadd.f32 %v2967_v26, %v5807_v49 }
 0x1fa   : > { %v3668_v28 = vmax.f32 %v2923_v19, 0.0  ;;  %v3670_v30 = vmax.f32 %v2966_v24, 0.0 }
 0x1fb   : > { %v4740_v60 = vpack.c.bf16 %v3605_v23, %v3604_v17  ;;  %v3669_v31 = vmax.f32 %v2925_v25, 0.0  ;;  %v4741_v33 = vpack.c.bf16 %v3607_v27, %v3606_v22  ;;  %v3671_v14 = vmax.f32 %v2968_v29, 0.0 }
 0x1fd   : > { %4100 = vst [vmem:[%s5836_s12 + $0x80] sm:$0xff] %v4740_v60  ;;  %v4772_v35 = vpack.c.bf16 %v3669_v31, %v3668_v28  ;;  %4101 = vst [vmem:[%s5836_s12 + $0x88] sm:$0xff] %v4741_v33  ;;  %v4773_v36 = vpack.c.bf16 %v3671_v14, %v3670_v30 }
 0x1ff   : > { %4132 = vst [vmem:[%s5836_s12 + $0x180] sm:$0xff] %v4772_v35  ;;  %4133 = vst [vmem:[%s5836_s12 + $0x188] sm:$0xff] %v4773_v36 }
 0x205   : > { %v3004_v37 = vpop.f32.mrb[36].mxu0  ;;  %v3047_v39 = vpop.f32.mrb[36].mxu1 }
 0x206   : > { %v3005_v38 = vadd.f32 %v3004_v37, %v5787_v34  ;;  %v3006_v59 = vpop.f32.mrb[37].mxu0  ;;  %v3048_v40 = vadd.f32 %v3047_v39, %v5787_v34  ;;  %v3049_v42 = vpop.f32.mrb[37].mxu1 }
 0x207   : > { %v3007_v41 = vadd.f32 %v3006_v59, %v5787_v34  ;;  %v3008_v43 = vpop.f32.mrb[38].mxu0  ;;  %v3050_v45 = vadd.f32 %v3049_v42, %v5787_v34  ;;  %v3051_v47 = vpop.f32.mrb[38].mxu1 }
 0x208   : > { %v3608_v44 = vmax.f32 %v3005_v38, 0.0  ;;  %v3009_v46 = vadd.f32 %v3008_v43, %v5807_v49  ;;  %v3010_v48 = vpop.f32.mrb[39].mxu0  ;;  %v3610_v50 = vmax.f32 %v3048_v40, 0.0  ;;  %v3052_v52 = vadd.f32 %v3051_v47, %v5807_v49  ;;  %v3053_v54 = vpop.f32.mrb[39].mxu1 }
 0x209   : > { %v3609_v51 = vmax.f32 %v3007_v41, 0.0  ;;  %v3011_v53 = vadd.f32 %v3010_v48, %v5807_v49  ;;  %v3611_v55 = vmax.f32 %v3050_v45, 0.0  ;;  %v3054_v57 = vadd.f32 %v3053_v54, %v5807_v49 }
 0x20a   : > { %v3672_v56 = vmax.f32 %v3009_v46, 0.0  ;;  %v3674_v61 = vmax.f32 %v3052_v52, 0.0 }
 0x20b   : > { %v4742_v58 = vpack.c.bf16 %v3609_v51, %v3608_v44  ;;  %v3673_v62 = vmax.f32 %v3011_v53, 0.0  ;;  %v4743_v63 = vpack.c.bf16 %v3611_v55, %v3610_v50  ;;  %v3675_v0 = vmax.f32 %v3054_v57, 0.0 }
 0x20d   : > { %4102 = vst [vmem:[%s5836_s12 + $0x90] sm:$0xff] %v4742_v58  ;;  %v4774_v1 = vpack.c.bf16 %v3673_v62, %v3672_v56  ;;  %4103 = vst [vmem:[%s5836_s12 + $0x98] sm:$0xff] %v4743_v63  ;;  %v4775_v2 = vpack.c.bf16 %v3675_v0, %v3674_v61 }
 0x20f   : > { %4134 = vst [vmem:[%s5836_s12 + $0x190] sm:$0xff] %v4774_v1  ;;  %4135 = vst [vmem:[%s5836_s12 + $0x198] sm:$0xff] %v4775_v2 }
 0x215   : > { %v3090_v3 = vpop.f32.mrb[40].mxu0  ;;  %v3133_v5 = vpop.f32.mrb[40].mxu1 }
 0x216   : > { %v3091_v4 = vadd.f32 %v3090_v3, %v5787_v34  ;;  %v3092_v6 = vpop.f32.mrb[41].mxu0  ;;  %v3134_v7 = vadd.f32 %v3133_v5, %v5787_v34  ;;  %v3135_v32 = vpop.f32.mrb[41].mxu1 }
 0x217   : > { %v3093_v8 = vadd.f32 %v3092_v6, %v5787_v34  ;;  %v3094_v9 = vpop.f32.mrb[42].mxu0  ;;  %v3136_v11 = vadd.f32 %v3135_v32, %v5787_v34  ;;  %v3137_v13 = vpop.f32.mrb[42].mxu1 }
 0x218   : > { %v3612_v10 = vmax.f32 %v3091_v4, 0.0  ;;  %v3095_v12 = vadd.f32 %v3094_v9, %v5807_v49  ;;  %v3096_v15 = vpop.f32.mrb[43].mxu0  ;;  %v3614_v16 = vmax.f32 %v3134_v7, 0.0  ;;  %v3138_v18 = vadd.f32 %v3137_v13, %v5807_v49  ;;  %v3139_v20 = vpop.f32.mrb[43].mxu1 }
 0x219   : > { %v3613_v17 = vmax.f32 %v3093_v8, 0.0  ;;  %v3097_v19 = vadd.f32 %v3096_v15, %v5807_v49  ;;  %v3615_v21 = vmax.f32 %v3136_v11, 0.0  ;;  %v3140_v23 = vadd.f32 %v3139_v20, %v5807_v49 }
 0x21a   : > { %v3676_v22 = vmax.f32 %v3095_v12, 0.0  ;;  %v3678_v25 = vmax.f32 %v3138_v18, 0.0 }
 0x21b   : > { %v4744_v24 = vpack.c.bf16 %v3613_v17, %v3612_v10  ;;  %v3677_v26 = vmax.f32 %v3097_v19, 0.0  ;;  %v4745_v27 = vpack.c.bf16 %v3615_v21, %v3614_v16  ;;  %v3679_v28 = vmax.f32 %v3140_v23, 0.0 }
 0x21d   : > { %4104 = vst [vmem:[%s5836_s12 + $0xa0] sm:$0xff] %v4744_v24  ;;  %v4776_v29 = vpack.c.bf16 %v3677_v26, %v3676_v22  ;;  %4105 = vst [vmem:[%s5836_s12 + $0xa8] sm:$0xff] %v4745_v27  ;;  %v4777_v60 = vpack.c.bf16 %v3679_v28, %v3678_v25 }
 0x21f   : > { %4136 = vst [vmem:[%s5836_s12 + $0x1a0] sm:$0xff] %v4776_v29  ;;  %4137 = vst [vmem:[%s5836_s12 + $0x1a8] sm:$0xff] %v4777_v60 }
 0x225   : > { %v3176_v30 = vpop.f32.mrb[44].mxu0  ;;  %v3219_v33 = vpop.f32.mrb[44].mxu1 }
 0x226   : > { %v3177_v31 = vadd.f32 %v3176_v30, %v5787_v34  ;;  %v3178_v14 = vpop.f32.mrb[45].mxu0  ;;  %v3220_v35 = vadd.f32 %v3219_v33, %v5787_v34  ;;  %v3221_v37 = vpop.f32.mrb[45].mxu1 }
 0x227   : > { %v3179_v36 = vadd.f32 %v3178_v14, %v5787_v34  ;;  %v3180_v38 = vpop.f32.mrb[46].mxu0  ;;  %v3222_v59 = vadd.f32 %v3221_v37, %v5787_v34  ;;  %v3223_v41 = vpop.f32.mrb[46].mxu1 }
 0x228   : > { %v3616_v39 = vmax.f32 %v3177_v31, 0.0  ;;  %v3181_v40 = vadd.f32 %v3180_v38, %v5807_v49  ;;  %v3182_v42 = vpop.f32.mrb[47].mxu0  ;;  %v3618_v43 = vmax.f32 %v3220_v35, 0.0  ;;  %v3224_v45 = vadd.f32 %v3223_v41, %v5807_v49  ;;  %v3225_v47 = vpop.f32.mrb[47].mxu1 }
 0x229   : > { %v3617_v44 = vmax.f32 %v3179_v36, 0.0  ;;  %v3183_v46 = vadd.f32 %v3182_v42, %v5807_v49  ;;  %v3619_v48 = vmax.f32 %v3222_v59, 0.0  ;;  %v3226_v51 = vadd.f32 %v3225_v47, %v5807_v49 }
 0x22a   : > { %v3680_v50 = vmax.f32 %v3181_v40, 0.0  ;;  %v3682_v53 = vmax.f32 %v3224_v45, 0.0 }
 0x22b   : > { %v4746_v52 = vpack.c.bf16 %v3617_v44, %v3616_v39  ;;  %v3681_v54 = vmax.f32 %v3183_v46, 0.0  ;;  %v4747_v55 = vpack.c.bf16 %v3619_v48, %v3618_v43  ;;  %v3683_v56 = vmax.f32 %v3226_v51, 0.0 }
 0x22d   : > { %4106 = vst [vmem:[%s5836_s12 + $0xb0] sm:$0xff] %v4746_v52  ;;  %v4778_v57 = vpack.c.bf16 %v3681_v54, %v3680_v50  ;;  %4107 = vst [vmem:[%s5836_s12 + $0xb8] sm:$0xff] %v4747_v55  ;;  %v4779_v58 = vpack.c.bf16 %v3683_v56, %v3682_v53 }
 0x22f   : > { %4138 = vst [vmem:[%s5836_s12 + $0x1b0] sm:$0xff] %v4778_v57  ;;  %4139 = vst [vmem:[%s5836_s12 + $0x1b8] sm:$0xff] %v4779_v58 }
 0x235   : > { %v3262_v61 = vpop.f32.mrb[48].mxu0  ;;  %v3305_v63 = vpop.f32.mrb[48].mxu1 }
 0x236   : > { %v3263_v62 = vadd.f32 %v3262_v61, %v5787_v34  ;;  %v3264_v0 = vpop.f32.mrb[49].mxu0  ;;  %v3306_v1 = vadd.f32 %v3305_v63, %v5787_v34  ;;  %v3307_v3 = vpop.f32.mrb[49].mxu1 }
 0x237   : > { %v3265_v2 = vadd.f32 %v3264_v0, %v5787_v34  ;;  %v3266_v4 = vpop.f32.mrb[50].mxu0  ;;  %v3308_v6 = vadd.f32 %v3307_v3, %v5787_v34  ;;  %v3309_v8 = vpop.f32.mrb[50].mxu1 }
 0x238   : > { %v3620_v5 = vmax.f32 %v3263_v62, 0.0  ;;  %v3267_v7 = vadd.f32 %v3266_v4, %v5807_v49  ;;  %v3268_v32 = vpop.f32.mrb[51].mxu0  ;;  %v3622_v9 = vmax.f32 %v3306_v1, 0.0  ;;  %v3310_v11 = vadd.f32 %v3309_v8, %v5807_v49  ;;  %v3311_v13 = vpop.f32.mrb[51].mxu1 }
 0x239   : > { %v3621_v10 = vmax.f32 %v3265_v2, 0.0  ;;  %v3269_v12 = vadd.f32 %v3268_v32, %v5807_v49  ;;  %v3623_v15 = vmax.f32 %v3308_v6, 0.0  ;;  %v3312_v17 = vadd.f32 %v3311_v13, %v5807_v49 }
 0x23a   : > { %v3684_v16 = vmax.f32 %v3267_v7, 0.0  ;;  %v3686_v19 = vmax.f32 %v3310_v11, 0.0 }
 0x23b   : > { %v4748_v18 = vpack.c.bf16 %v3621_v10, %v3620_v5  ;;  %v3685_v20 = vmax.f32 %v3269_v12, 0.0  ;;  %v4749_v21 = vpack.c.bf16 %v3623_v15, %v3622_v9  ;;  %v3687_v22 = vmax.f32 %v3312_v17, 0.0 }
 0x23d   : > { %4108 = vst [vmem:[%s5836_s12 + $0xc0] sm:$0xff] %v4748_v18  ;;  %v4780_v23 = vpack.c.bf16 %v3685_v20, %v3684_v16  ;;  %4109 = vst [vmem:[%s5836_s12 + $0xc8] sm:$0xff] %v4749_v21  ;;  %v4781_v24 = vpack.c.bf16 %v3687_v22, %v3686_v19 }
 0x23f   : > { %4140 = vst [vmem:[%s5836_s12 + $0x1c0] sm:$0xff] %v4780_v23  ;;  %4141 = vst [vmem:[%s5836_s12 + $0x1c8] sm:$0xff] %v4781_v24 }
 0x245   : > { %v3348_v25 = vpop.f32.mrb[52].mxu0  ;;  %v3391_v27 = vpop.f32.mrb[52].mxu1 }
 0x246   : > { %v3349_v26 = vadd.f32 %v3348_v25, %v5787_v34  ;;  %v3350_v28 = vpop.f32.mrb[53].mxu0  ;;  %v3392_v29 = vadd.f32 %v3391_v27, %v5787_v34  ;;  %v3393_v30 = vpop.f32.mrb[53].mxu1 }
 0x247   : > { %v3351_v60 = vadd.f32 %v3350_v28, %v5787_v34  ;;  %v3352_v31 = vpop.f32.mrb[54].mxu0  ;;  %v3394_v14 = vadd.f32 %v3393_v30, %v5787_v34  ;;  %v3395_v36 = vpop.f32.mrb[54].mxu1 }
 0x248   : > { %v3624_v33 = vmax.f32 %v3349_v26, 0.0  ;;  %v3353_v35 = vadd.f32 %v3352_v31, %v5807_v49  ;;  %v3354_v37 = vpop.f32.mrb[55].mxu0  ;;  %v3626_v38 = vmax.f32 %v3392_v29, 0.0  ;;  %v3396_v59 = vadd.f32 %v3395_v36, %v5807_v49  ;;  %v3397_v41 = vpop.f32.mrb[55].mxu1 }
 0x249   : > { %v3625_v39 = vmax.f32 %v3351_v60, 0.0  ;;  %v3355_v40 = vadd.f32 %v3354_v37, %v5807_v49  ;;  %v3627_v42 = vmax.f32 %v3394_v14, 0.0  ;;  %v3398_v44 = vadd.f32 %v3397_v41, %v5807_v49 }
 0x24a   : > { %v3688_v43 = vmax.f32 %v3353_v35, 0.0  ;;  %v3690_v46 = vmax.f32 %v3396_v59, 0.0 }
 0x24b   : > { %v4750_v45 = vpack.c.bf16 %v3625_v39, %v3624_v33  ;;  %v3689_v47 = vmax.f32 %v3355_v40, 0.0  ;;  %v4751_v48 = vpack.c.bf16 %v3627_v42, %v3626_v38  ;;  %v3691_v50 = vmax.f32 %v3398_v44, 0.0 }
 0x24d   : > { %4110 = vst [vmem:[%s5836_s12 + $0xd0] sm:$0xff] %v4750_v45  ;;  %v4782_v51 = vpack.c.bf16 %v3689_v47, %v3688_v43  ;;  %4111 = vst [vmem:[%s5836_s12 + $0xd8] sm:$0xff] %v4751_v48  ;;  %v4783_v52 = vpack.c.bf16 %v3691_v50, %v3690_v46  ;;  %v4172_v45 = vld [vmem:[%s5836_s12 + $0x8] sm:$0xff] (%p4958_p5)  ;;  %v4174_v46 = vld [vmem:[%s5836_s12 + $0x10] sm:$0xff] (%p4958_p5) }
 0x24e   : > { %v4176_v47 = vld [vmem:[%s5836_s12 + $0x18] sm:$0xff] (%p4958_p5)  ;;  %v4178_v48 = vld [vmem:[%s5836_s12 + $0x20] sm:$0xff] (%p4958_p5)  ;;  %v4180_v50 = vld [vmem:[%s5836_s12 + $0x28] sm:$0xff] (%p4958_p5)  ;;  %4173 = vst [vmem:[%s6056_s20 + $0x8] sm:$0xff] (%p4958_p5), %v4172_v45 }
 0x24f   : > { %4142 = vst [vmem:[%s5836_s12 + $0x1d0] sm:$0xff] %v4782_v51  ;;  %4143 = vst [vmem:[%s5836_s12 + $0x1d8] sm:$0xff] %v4783_v52  ;;  %v4182_v51 = vld [vmem:[%s5836_s12 + $0x30] sm:$0xff] (%p4958_p5)  ;;  %v4184_v52 = vld [vmem:[%s5836_s12 + $0x38] sm:$0xff] (%p4958_p5) }
 0x250   : > { %4175 = vst [vmem:[%s6056_s20 + $0x10] sm:$0xff] (%p4958_p5), %v4174_v46  ;;  %4177 = vst [vmem:[%s6056_s20 + $0x18] sm:$0xff] (%p4958_p5), %v4176_v47 }
 0x251   : > { %4179 = vst [vmem:[%s6056_s20 + $0x20] sm:$0xff] (%p4958_p5), %v4178_v48  ;;  %4181 = vst [vmem:[%s6056_s20 + $0x28] sm:$0xff] (%p4958_p5), %v4180_v50 }
 0x252   : > { %4183 = vst [vmem:[%s6056_s20 + $0x30] sm:$0xff] (%p4958_p5), %v4182_v51  ;;  %4185 = vst [vmem:[%s6056_s20 + $0x38] sm:$0xff] (%p4958_p5), %v4184_v52 }
 0x255   : > { %v3434_v53 = vpop.f32.mrb[56].mxu0  ;;  %v3477_v55 = vpop.f32.mrb[56].mxu1 }
 0x256   : > { %v3435_v54 = vadd.f32 %v3434_v53, %v5787_v34  ;;  %v3436_v56 = vpop.f32.mrb[57].mxu0  ;;  %v3478_v57 = vadd.f32 %v3477_v55, %v5787_v34  ;;  %v3479_v61 = vpop.f32.mrb[57].mxu1  ;;  %v4186_v53 = vld [vmem:[%s5836_s12 + $0x40] sm:$0xff] (%p4958_p5)  ;;  %v4190_v55 = vld [vmem:[%s5836_s12 + $0x50] sm:$0xff] (%p4958_p5) }
 0x257   : > { %v3437_v58 = vadd.f32 %v3436_v56, %v5787_v34  ;;  %v3438_v62 = vpop.f32.mrb[58].mxu0  ;;  %v3480_v0 = vadd.f32 %v3479_v61, %v5787_v34  ;;  %v3481_v2 = vpop.f32.mrb[58].mxu1  ;;  %4187 = vst [vmem:[%s6056_s20 + $0x40] sm:$0xff] (%p4958_p5), %v4186_v53  ;;  %v4192_v56 = vld [vmem:[%s5836_s12 + $0x58] sm:$0xff] (%p4958_p5)  ;;  %4191 = vst [vmem:[%s6056_s20 + $0x50] sm:$0xff] (%p4958_p5), %v4190_v55  ;;  %v4198_v61 = vld [vmem:[%s5836_s12 + $0x70] sm:$0xff] (%p4958_p5) }
 0x258   : > { %v3628_v63 = vmax.f32 %v3435_v54, 0.0  ;;  %v3439_v1 = vadd.f32 %v3438_v62, %v5807_v49  ;;  %v3440_v3 = vpop.f32.mrb[59].mxu0  ;;  %v3630_v4 = vmax.f32 %v3478_v57, 0.0  ;;  %v3482_v6 = vadd.f32 %v3481_v2, %v5807_v49  ;;  %v3483_v8 = vpop.f32.mrb[59].mxu1  ;;  %v4188_v54 = vld [vmem:[%s5836_s12 + $0x48] sm:$0xff] (%p4958_p5)  ;;  %4193 = vst [vmem:[%s6056_s20 + $0x58] sm:$0xff] (%p4958_p5), %v4192_v56 }
 0x259   : > { %v3629_v5 = vmax.f32 %v3437_v58, 0.0  ;;  %v3441_v7 = vadd.f32 %v3440_v3, %v5807_v49  ;;  %v3631_v32 = vmax.f32 %v3480_v0, 0.0  ;;  %v3484_v10 = vadd.f32 %v3483_v8, %v5807_v49  ;;  %4189 = vst [vmem:[%s6056_s20 + $0x48] sm:$0xff] (%p4958_p5), %v4188_v54  ;;  %v4194_v57 = vld [vmem:[%s5836_s12 + $0x60] sm:$0xff] (%p4958_p5)  ;;  %v4196_v58 = vld [vmem:[%s5836_s12 + $0x68] sm:$0xff] (%p4958_p5)  ;;  %4199 = vst [vmem:[%s6056_s20 + $0x70] sm:$0xff] (%p4958_p5), %v4198_v61 }
 0x25a   : > { %v3692_v9 = vmax.f32 %v3439_v1, 0.0  ;;  %v3694_v12 = vmax.f32 %v3482_v6, 0.0  ;;  %4195 = vst [vmem:[%s6056_s20 + $0x60] sm:$0xff] (%p4958_p5), %v4194_v57  ;;  %4197 = vst [vmem:[%s6056_s20 + $0x68] sm:$0xff] (%p4958_p5), %v4196_v58  ;;  %v4200_v62 = vld [vmem:[%s5836_s12 + $0x78] sm:$0xff] (%p4958_p5)  ;;  %v4204_v0 = vld [vmem:[%s5836_s12 + $0x88] sm:$0xff] (%p4958_p5) }
 0x25b   : > { %v4752_v11 = vpack.c.bf16 %v3629_v5, %v3628_v63  ;;  %v3693_v13 = vmax.f32 %v3441_v7, 0.0  ;;  %v4753_v15 = vpack.c.bf16 %v3631_v32, %v3630_v4  ;;  %v3695_v16 = vmax.f32 %v3484_v10, 0.0  ;;  %v4202_v63 = vld [vmem:[%s5836_s12 + $0x80] sm:$0xff] (%p4958_p5)  ;;  %4201 = vst [vmem:[%s6056_s20 + $0x78] sm:$0xff] (%p4958_p5), %v4200_v62  ;;  %4205 = vst [vmem:[%s6056_s20 + $0x88] sm:$0xff] (%p4958_p5), %v4204_v0  ;;  %v4206_v1 = vld [vmem:[%s5836_s12 + $0x90] sm:$0xff] (%p4958_p5) }
 0x25c   : > { %4203 = vst [vmem:[%s6056_s20 + $0x80] sm:$0xff] (%p4958_p5), %v4202_v63  ;;  %v4208_v2 = vld [vmem:[%s5836_s12 + $0x98] sm:$0xff] (%p4958_p5)  ;;  %v4210_v3 = vld [vmem:[%s5836_s12 + $0xa0] sm:$0xff] (%p4958_p5)  ;;  %4207 = vst [vmem:[%s6056_s20 + $0x90] sm:$0xff] (%p4958_p5), %v4206_v1 }
 0x25d   : > { %4112 = vst [vmem:[%s5836_s12 + $0xe0] sm:$0xff] %v4752_v11  ;;  %v4784_v17 = vpack.c.bf16 %v3693_v13, %v3692_v9  ;;  %4113 = vst [vmem:[%s5836_s12 + $0xe8] sm:$0xff] %v4753_v15  ;;  %v4785_v18 = vpack.c.bf16 %v3695_v16, %v3694_v12  ;;  %v4212_v4 = vld [vmem:[%s5836_s12 + $0xa8] sm:$0xff] (%p4958_p5)  ;;  %v4214_v5 = vld [vmem:[%s5836_s12 + $0xb0] sm:$0xff] (%p4958_p5) }
 0x25e   : > { %4209 = vst [vmem:[%s6056_s20 + $0x98] sm:$0xff] (%p4958_p5), %v4208_v2  ;;  %4211 = vst [vmem:[%s6056_s20 + $0xa0] sm:$0xff] (%p4958_p5), %v4210_v3  ;;  %v4216_v6 = vld [vmem:[%s5836_s12 + $0xb8] sm:$0xff] (%p4958_p5)  ;;  %v4218_v7 = vld [vmem:[%s5836_s12 + $0xc0] sm:$0xff] (%p4958_p5) }
 0x25f   : > { %4144 = vst [vmem:[%s5836_s12 + $0x1e0] sm:$0xff] %v4784_v17  ;;  %4145 = vst [vmem:[%s5836_s12 + $0x1e8] sm:$0xff] %v4785_v18  ;;  %v4220_v8 = vld [vmem:[%s5836_s12 + $0xc8] sm:$0xff] (%p4958_p5)  ;;  %v4222_v32 = vld [vmem:[%s5836_s12 + $0xd0] sm:$0xff] (%p4958_p5) }
 0x260   : > { %4213 = vst [vmem:[%s6056_s20 + $0xa8] sm:$0xff] (%p4958_p5), %v4212_v4  ;;  %4215 = vst [vmem:[%s6056_s20 + $0xb0] sm:$0xff] (%p4958_p5), %v4214_v5  ;;  %v4224_v9 = vld [vmem:[%s5836_s12 + $0xd8] sm:$0xff] (%p4958_p5)  ;;  %v4234_v15 = vld [vmem:[%s5836_s12 + $0x100] sm:$0xff] (%p4958_p5) }
 0x261   : > { %4217 = vst [vmem:[%s6056_s20 + $0xb8] sm:$0xff] (%p4958_p5), %v4216_v6  ;;  %4219 = vst [vmem:[%s6056_s20 + $0xc0] sm:$0xff] (%p4958_p5), %v4218_v7  ;;  %v4236_v16 = vld [vmem:[%s5836_s12 + $0x108] sm:$0xff] (%p4958_p5)  ;;  %v4238_v17 = vld [vmem:[%s5836_s12 + $0x110] sm:$0xff] (%p4958_p5) }
 0x262   : > { %4221 = vst [vmem:[%s6056_s20 + $0xc8] sm:$0xff] (%p4958_p5), %v4220_v8  ;;  %4223 = vst [vmem:[%s6056_s20 + $0xd0] sm:$0xff] (%p4958_p5), %v4222_v32  ;;  %v4240_v18 = vld [vmem:[%s5836_s12 + $0x118] sm:$0xff] (%p4958_p5) }
 0x263   : > { %4225 = vst [vmem:[%s6056_s20 + $0xd8] sm:$0xff] (%p4958_p5), %v4224_v9  ;;  %4235 = vst [vmem:[%s6056_s20 + $0x200] sm:$0xff] (%p4958_p5), %v4234_v15 }
 0x264   : > { %v4226_v10 = vld [vmem:[%s5836_s12 + $0xe0] sm:$0xff] (%p4958_p5)  ;;  %v4228_v11 = vld [vmem:[%s5836_s12 + $0xe8] sm:$0xff] (%p4958_p5)  ;;  %4237 = vst [vmem:[%s6056_s20 + $0x208] sm:$0xff] (%p4958_p5), %v4236_v16  ;;  %4239 = vst [vmem:[%s6056_s20 + $0x210] sm:$0xff] (%p4958_p5), %v4238_v17 }
 0x265   : > { %v3520_v19 = vpop.f32.mrb[60].mxu0  ;;  %v3563_v21 = vpop.f32.mrb[60].mxu1  ;;  %4227 = vst [vmem:[%s6056_s20 + $0xe0] sm:$0xff] (%p4958_p5), %v4226_v10  ;;  %4229 = vst [vmem:[%s6056_s20 + $0xe8] sm:$0xff] (%p4958_p5), %v4228_v11 }
 0x266   : > { %v3521_v20 = vadd.f32 %v3520_v19, %v5787_v34  ;;  %v3522_v22 = vpop.f32.mrb[61].mxu0  ;;  %v3564_v23 = vadd.f32 %v3563_v21, %v5787_v34  ;;  %v3565_v25 = vpop.f32.mrb[61].mxu1  ;;  %4241 = vst [vmem:[%s6056_s20 + $0x218] sm:$0xff] (%p4958_p5), %v4240_v18  ;;  %v4242_v19 = vld [vmem:[%s5836_s12 + $0x120] sm:$0xff] (%p4958_p5)  ;;  %v4246_v21 = vld [vmem:[%s5836_s12 + $0x130] sm:$0xff] (%p4958_p5) }
 0x267   : > { %v3523_v24 = vadd.f32 %v3522_v22, %v5787_v34  ;;  %v3524_v26 = vpop.f32.mrb[62].mxu0  ;;  %v3566_v28 = vadd.f32 %v3565_v25, %v5787_v34  ;;  %v3567_v60 = vpop.f32.mrb[62].mxu1  ;;  %4243 = vst [vmem:[%s6056_s20 + $0x220] sm:$0xff] (%p4958_p5), %v4242_v19  ;;  %4247 = vst [vmem:[%s6056_s20 + $0x230] sm:$0xff] (%p4958_p5), %v4246_v21  ;;  %v4248_v22 = vld [vmem:[%s5836_s12 + $0x138] sm:$0xff] (%p4958_p5)  ;;  %v4254_v25 = vld [vmem:[%s5836_s12 + $0x150] sm:$0xff] (%p4958_p5) }
 0x268   : > { %v3632_v27 = vmax.f32 %v3521_v20, 0.0  ;;  %v3525_v29 = vadd.f32 %v3524_v26, %v5807_v49  ;;  %v3526_v30 = vpop.f32.mrb[63].mxu0  ;;  %v3634_v31 = vmax.f32 %v3564_v23, 0.0  ;;  %v3568_v14 = vadd.f32 %v3567_v60, %v5807_v49  ;;  %v3569_v36 = vpop.f32.mrb[63].mxu1  ;;  %v4244_v20 = vld [vmem:[%s5836_s12 + $0x128] sm:$0xff] (%p4958_p5)  ;;  %v4250_v23 = vld [vmem:[%s5836_s12 + $0x140] sm:$0xff] (%p4958_p5) }
 0x269   : > { %v3633_v33 = vmax.f32 %v3523_v24, 0.0  ;;  %v3527_v35 = vadd.f32 %v3526_v30, %v5807_v49  ;;  %v3635_v37 = vmax.f32 %v3566_v28, 0.0  ;;  %v3570_v39 = vadd.f32 %v3569_v36, %v5807_v49  ;;  %4154 = sbr.rel (!%p4958_p5) target bundleno = 634 (0x27a), region = 59  ;;  %v4170_v49 = vld [vmem:[%s5836_s12] sm:$0xff] (%p4958_p5)  ;;  %4245 = vst [vmem:[%s6056_s20 + $0x228] sm:$0xff] (%p4958_p5), %v4244_v20  ;;  %v4252_v24 = vld [vmem:[%s5836_s12 + $0x148] sm:$0xff] (%p4958_p5) }
 0x26a   : > { %v3696_v38 = vmax.f32 %v3525_v29, 0.0  ;;  %v3698_v59 = vmax.f32 %v3568_v14, 0.0  ;;  %4171 = vst [vmem:[%s6056_s20] sm:$0xff] (%p4958_p5), %v4170_v49  ;;  %4249 = vst [vmem:[%s6056_s20 + $0x238] sm:$0xff] (%p4958_p5), %v4248_v22  ;;  %v4256_v26 = vld [vmem:[%s5836_s12 + $0x158] sm:$0xff] (%p4958_p5)  ;;  %v4260_v28 = vld [vmem:[%s5836_s12 + $0x168] sm:$0xff] (%p4958_p5) }
 0x26b   : > { %v4754_v34 = vpack.c.bf16 %v3633_v33, %v3632_v27  ;;  %v3697_v40 = vmax.f32 %v3527_v35, 0.0  ;;  %v4755_v41 = vpack.c.bf16 %v3635_v37, %v3634_v31  ;;  %v3699_v42 = vmax.f32 %v3570_v39, 0.0  ;;  %4251 = vst [vmem:[%s6056_s20 + $0x240] sm:$0xff] (%p4958_p5), %v4250_v23  ;;  %4253 = vst [vmem:[%s6056_s20 + $0x248] sm:$0xff] (%p4958_p5), %v4252_v24  ;;  %v4258_v27 = vld [vmem:[%s5836_s12 + $0x160] sm:$0xff] (%p4958_p5)  ;;  %v4262_v29 = vld [vmem:[%s5836_s12 + $0x170] sm:$0xff] (%p4958_p5) }
 0x26c   : > { %4255 = vst [vmem:[%s6056_s20 + $0x250] sm:$0xff] (%p4958_p5), %v4254_v25  ;;  %4257 = vst [vmem:[%s6056_s20 + $0x258] sm:$0xff] (%p4958_p5), %v4256_v26  ;;  %v4264_v60 = vld [vmem:[%s5836_s12 + $0x178] sm:$0xff] (%p4958_p5)  ;;  %v4266_v30 = vld [vmem:[%s5836_s12 + $0x180] sm:$0xff] (%p4958_p5) }
 0x26d   : > { %4114 = vst [vmem:[%s5836_s12 + $0xf0] sm:$0xff] %v4754_v34  ;;  %v4786_v43 = vpack.c.bf16 %v3697_v40, %v3696_v38  ;;  %4115 = vst [vmem:[%s5836_s12 + $0xf8] sm:$0xff] %v4755_v41  ;;  %v4787_v44 = vpack.c.bf16 %v3699_v42, %v3698_v59  ;;  %v4268_v31 = vld [vmem:[%s5836_s12 + $0x188] sm:$0xff] (%p4958_p5)  ;;  %v4270_v33 = vld [vmem:[%s5836_s12 + $0x190] sm:$0xff] (%p4958_p5) }
 0x26e   : > { %4259 = vst [vmem:[%s6056_s20 + $0x260] sm:$0xff] (%p4958_p5), %v4258_v27  ;;  %4261 = vst [vmem:[%s6056_s20 + $0x268] sm:$0xff] (%p4958_p5), %v4260_v28  ;;  %v4272_v14 = vld [vmem:[%s5836_s12 + $0x198] sm:$0xff] (%p4958_p5)  ;;  %v4274_v35 = vld [vmem:[%s5836_s12 + $0x1a0] sm:$0xff] (%p4958_p5) }
 0x26f   : > { %4146 = vst [vmem:[%s5836_s12 + $0x1f0] sm:$0xff] %v4786_v43  ;;  %4147 = vst [vmem:[%s5836_s12 + $0x1f8] sm:$0xff] %v4787_v44  ;;  %v4276_v36 = vld [vmem:[%s5836_s12 + $0x1a8] sm:$0xff] (%p4958_p5)  ;;  %v4278_v37 = vld [vmem:[%s5836_s12 + $0x1b0] sm:$0xff] (%p4958_p5) }
 0x270   : > { %4263 = vst [vmem:[%s6056_s20 + $0x270] sm:$0xff] %v4262_v29  ;;  %4265 = vst [vmem:[%s6056_s20 + $0x278] sm:$0xff] %v4264_v60  ;;  %v4280_v38 = vld [vmem:[%s5836_s12 + $0x1b8] sm:$0xff]  ;;  %v4282_v39 = vld [vmem:[%s5836_s12 + $0x1c0] sm:$0xff] }
 0x271   : > { %4267 = vst [vmem:[%s6056_s20 + $0x280] sm:$0xff] %v4266_v30  ;;  %4269 = vst [vmem:[%s6056_s20 + $0x288] sm:$0xff] %v4268_v31  ;;  %v4284_v34 = vld [vmem:[%s5836_s12 + $0x1c8] sm:$0xff]  ;;  %v4286_v59 = vld [vmem:[%s5836_s12 + $0x1d0] sm:$0xff] }
 0x272   : > { %4271 = vst [vmem:[%s6056_s20 + $0x290] sm:$0xff] %v4270_v33  ;;  %4273 = vst [vmem:[%s6056_s20 + $0x298] sm:$0xff] %v4272_v14  ;;  %v4288_v40 = vld [vmem:[%s5836_s12 + $0x1d8] sm:$0xff]  ;;  %v4290_v41 = vld [vmem:[%s5836_s12 + $0x1e0] sm:$0xff] }
 0x273   : > { %4275 = vst [vmem:[%s6056_s20 + $0x2a0] sm:$0xff] %v4274_v35  ;;  %4277 = vst [vmem:[%s6056_s20 + $0x2a8] sm:$0xff] %v4276_v36  ;;  %v4292_v42 = vld [vmem:[%s5836_s12 + $0x1e8] sm:$0xff] }
 0x274   : > { %v4230_v12 = vld [vmem:[%s5836_s12 + $0xf0] sm:$0xff]  ;;  %v4232_v13 = vld [vmem:[%s5836_s12 + $0xf8] sm:$0xff]  ;;  %4279 = vst [vmem:[%s6056_s20 + $0x2b0] sm:$0xff] %v4278_v37  ;;  %4281 = vst [vmem:[%s6056_s20 + $0x2b8] sm:$0xff] %v4280_v38 }
 0x275   : > { %4231 = vst [vmem:[%s6056_s20 + $0xf0] sm:$0xff] %v4230_v12  ;;  %4233 = vst [vmem:[%s6056_s20 + $0xf8] sm:$0xff] %v4232_v13 }
 0x276   : > { %4283 = vst [vmem:[%s6056_s20 + $0x2c0] sm:$0xff] %v4282_v39  ;;  %4285 = vst [vmem:[%s6056_s20 + $0x2c8] sm:$0xff] %v4284_v34  ;;  %v4294_v43 = vld [vmem:[%s5836_s12 + $0x1f0] sm:$0xff]  ;;  %v4296_v44 = vld [vmem:[%s5836_s12 + $0x1f8] sm:$0xff] }
 0x277   : > { %4287 = vst [vmem:[%s6056_s20 + $0x2d0] sm:$0xff] %v4286_v59  ;;  %4289 = vst [vmem:[%s6056_s20 + $0x2d8] sm:$0xff] %v4288_v40 }
 0x278   : > { %4291 = vst [vmem:[%s6056_s20 + $0x2e0] sm:$0xff] %v4290_v41  ;;  %4293 = vst [vmem:[%s6056_s20 + $0x2e8] sm:$0xff] %v4292_v42 }
 0x279   : > { %4295 = vst [vmem:[%s6056_s20 + $0x2f0] sm:$0xff] %v4294_v43  ;;  %4297 = vst [vmem:[%s6056_s20 + $0x2f8] sm:$0xff] %v4296_v44 }
 0x27a PF: > { %p10_p10 = scmp.ge.s32.totalorder %s4945_s16, 4   ;;  %s6198_s12 = smov %s4901_s13 }
 0x27b   : > { %s6199_s13 = smov %s4956_s19  ;;  %s6200_s14 = smov %s4945_s16 }
 0x27c   :  { %12 = sbr.rel (!%p10_p10) target bundleno = 2 (0x2), region = 113 }

// kernel: behavioral_cloning_forward.7
= control target key start
LH: loop header
LB: loop body
LE: loop exit
PB: predicated region body
PF: predicated region fallthrough
CT: control target
= control target key end

     0   :  { %s6017_s12 = smov 0   ;;  %s6019_s13 = smov 0   ;;  %s7616_s0 = inlined_call_operand.vmem [shape: bf16[32,400], index: 0, kind: input, shape index: {}]   ;;  %s7617_s1 = inlined_call_operand.vmem [shape: bf16[400,3840], index: 1, kind: input, shape index: {}]   ;;  %s7618_s2 = inlined_call_operand.vmem [shape: f32[32,1], index: 2, kind: input, shape index: {}]   ;;  %s7619_s3 = inlined_call_operand.vmem [shape: bf16[32,3840], index: 3, kind: output, shape index: {}]  }
   0x1   :  { %s6021_s14 = smov 0  }
   0x2 LB: > { %s4650_s15 = sadd.s32 4294967295, %s5994_s14   ;;  %s6034_s16 = sadd.s32 1, %s5994_s14   ;;  %s5994_s14 = sphi %s6021_s14, %s7623_s14   ;;  %s5990_s13 = sphi %s6019_s13, %s7622_s13   ;;  %s5986_s12 = sphi %s6017_s12, %s7621_s12  }
   0x3   : > { %s38_s17 = ssub.s32 %s5994_s14, %s6034_s16  ;;  %s41_s18 = sadd.s32 1, %s5990_s13 }
   0x4   : > { %p39_p0 = scmp.eq.s32.totalorder %s38_s17, 0  ;;  %p48_p1 = scmp.ne.s32.totalorder %s5990_s13, %s5986_s12 }
   0x5   : > { %p49_p2 = scmp.eq.s32.totalorder %s5994_s14, 0  ;;  %p99_p3 = scmp.eq.s32.totalorder %s4650_s15, 1 }
   0x6   : > { %s6045_s19 = scalar_select %p39_p0, %s5990_s13, %s41_s18  }
   0x7   : > { %p50_p4 = por %p49_p2, %p48_p1  ;;  %p6047_p5 = por %p99_p3, %p48_p1 }
   0x8   : > { %p4653_p6 = scmp.ge.s32.totalorder %s5994_s14, 2 }
   0xa   : > { %127 = sbr.rel (%p4653_p6) target bundleno = 230 (0xe6), region = 24 }
  0x11   : > { %130 = sbr.rel (!%p50_p4) target bundleno = 230 (0xe6), region = 28  ;;  %s132_s21 = sand.u32 (%p50_p4), 1, %s5990_s13  }
  0x12   : > { %s5198_s22 = smul.u32 (%p50_p4), 60, %s5994_s14 }
  0x13   : > { %s5372_s23 = smul.u32 (%p50_p4), 3000, %s132_s21 }
  0x14   : > { %s6057_s26 = scalar_lea.vmem (%p50_p4), %s7617_s1, %s5198_s22 }
  0x15   : > { %v152_v0 = vld [vmem:[%s6057_s26] sm:$0xff] (%p50_p4)  ;;  %v154_v1 = vld [vmem:[%s6057_s26 + $0x8] sm:$0xff] (%p50_p4)  ;;  %v156_v2 = vld [vmem:[%s6057_s26 + $0x10] sm:$0xff] (%p50_p4)  ;;  %s6062_s27 = scalar_lea.vmem (%p50_p4), [#allocation2], %s5372_s23 }
  0x16   : > { %153 = vst [vmem:[%s6062_s27] sm:$0xff] (%p50_p4), %v152_v0  ;;  %155 = vst [vmem:[%s6062_s27 + $0x8] sm:$0xff] (%p50_p4), %v154_v1  ;;  %v158_v3 = vld [vmem:[%s6057_s26 + $0x18] sm:$0xff] (%p50_p4)  ;;  %v160_v4 = vld [vmem:[%s6057_s26 + $0x20] sm:$0xff] (%p50_p4) }
  0x17   : > { %157 = vst [vmem:[%s6062_s27 + $0x10] sm:$0xff] (%p50_p4), %v156_v2  ;;  %v162_v5 = vld [vmem:[%s6057_s26 + $0x28] sm:$0xff] (%p50_p4)  ;;  %159 = vst [vmem:[%s6062_s27 + $0x18] sm:$0xff] (%p50_p4), %v158_v3  ;;  %v164_v6 = vld [vmem:[%s6057_s26 + $0x30] sm:$0xff] (%p50_p4) }
  0x18   : > { %161 = vst [vmem:[%s6062_s27 + $0x20] sm:$0xff] %v160_v4  ;;  %163 = vst [vmem:[%s6062_s27 + $0x28] sm:$0xff] %v162_v5  ;;  %v166_v7 = vld [vmem:[%s6057_s26 + $0x78] sm:$0xff]  ;;  %v168_v8 = vld [vmem:[%s6057_s26 + $0x80] sm:$0xff] }
  0x19   : > { %165 = vst [vmem:[%s6062_s27 + $0x30] sm:$0xff] %v164_v6  ;;  %167 = vst [vmem:[%s6062_s27 + $0x3c] sm:$0xff] %v166_v7  ;;  %v170_v9 = vld [vmem:[%s6057_s26 + $0x88] sm:$0xff]  ;;  %v172_v10 = vld [vmem:[%s6057_s26 + $0x90] sm:$0xff] }
  0x1a   : > { %169 = vst [vmem:[%s6062_s27 + $0x44] sm:$0xff] %v168_v8  ;;  %v174_v11 = vld [vmem:[%s6057_s26 + $0x98] sm:$0xff]  ;;  %171 = vst [vmem:[%s6062_s27 + $0x4c] sm:$0xff] %v170_v9  ;;  %v176_v12 = vld [vmem:[%s6057_s26 + $0xa0] sm:$0xff] }
  0x1b   : > { %173 = vst [vmem:[%s6062_s27 + $0x54] sm:$0xff] %v172_v10  ;;  %175 = vst [vmem:[%s6062_s27 + $0x5c] sm:$0xff] %v174_v11  ;;  %v178_v13 = vld [vmem:[%s6057_s26 + $0xa8] sm:$0xff]  ;;  %v180_v14 = vld [vmem:[%s6057_s26 + $0xf0] sm:$0xff] }
  0x1c   : > { %177 = vst [vmem:[%s6062_s27 + $0x64] sm:$0xff] %v176_v12  ;;  %179 = vst [vmem:[%s6062_s27 + $0x6c] sm:$0xff] %v178_v13  ;;  %v182_v15 = vld [vmem:[%s6057_s26 + $0xf8] sm:$0xff]  ;;  %v184_v16 = vld [vmem:[%s6057_s26 + $0x100] sm:$0xff] }
  0x1d   : > { %181 = vst [vmem:[%s6062_s27 + $0x78] sm:$0xff] %v180_v14  ;;  %v186_v17 = vld [vmem:[%s6057_s26 + $0x108] sm:$0xff]  ;;  %183 = vst [vmem:[%s6062_s27 + $0x80] sm:$0xff] %v182_v15  ;;  %v188_v18 = vld [vmem:[%s6057_s26 + $0x110] sm:$0xff] }
  0x1e   : > { %185 = vst [vmem:[%s6062_s27 + $0x88] sm:$0xff] %v184_v16  ;;  %187 = vst [vmem:[%s6062_s27 + $0x90] sm:$0xff] %v186_v17  ;;  %v190_v19 = vld [vmem:[%s6057_s26 + $0x118] sm:$0xff]  ;;  %v192_v20 = vld [vmem:[%s6057_s26 + $0x120] sm:$0xff] }
  0x1f   : > { %189 = vst [vmem:[%s6062_s27 + $0x98] sm:$0xff] %v188_v18  ;;  %191 = vst [vmem:[%s6062_s27 + $0xa0] sm:$0xff] %v190_v19  ;;  %v194_v21 = vld [vmem:[%s6057_s26 + $0x168] sm:$0xff]  ;;  %v196_v22 = vld [vmem:[%s6057_s26 + $0x170] sm:$0xff] }
  0x20   : > { %193 = vst [vmem:[%s6062_s27 + $0xa8] sm:$0xff] %v192_v20  ;;  %v198_v23 = vld [vmem:[%s6057_s26 + $0x178] sm:$0xff]  ;;  %195 = vst [vmem:[%s6062_s27 + $0xb4] sm:$0xff] %v194_v21  ;;  %v200_v24 = vld [vmem:[%s6057_s26 + $0x180] sm:$0xff] }
  0x21   : > { %197 = vst [vmem:[%s6062_s27 + $0xbc] sm:$0xff] %v196_v22  ;;  %199 = vst [vmem:[%s6062_s27 + $0xc4] sm:$0xff] %v198_v23  ;;  %v202_v25 = vld [vmem:[%s6057_s26 + $0x188] sm:$0xff]  ;;  %v204_v26 = vld [vmem:[%s6057_s26 + $0x190] sm:$0xff] }
  0x22   : > { %201 = vst [vmem:[%s6062_s27 + $0xcc] sm:$0xff] %v200_v24  ;;  %203 = vst [vmem:[%s6062_s27 + $0xd4] sm:$0xff] %v202_v25  ;;  %v206_v27 = vld [vmem:[%s6057_s26 + $0x198] sm:$0xff]  ;;  %v208_v28 = vld [vmem:[%s6057_s26 + $0x1e0] sm:$0xff] }
  0x23   : > { %205 = vst [vmem:[%s6062_s27 + $0xdc] sm:$0xff] %v204_v26  ;;  %v210_v29 = vld [vmem:[%s6057_s26 + $0x1e8] sm:$0xff]  ;;  %207 = vst [vmem:[%s6062_s27 + $0xe4] sm:$0xff] %v206_v27  ;;  %v212_v30 = vld [vmem:[%s6057_s26 + $0x1f0] sm:$0xff] }
  0x24   : > { %209 = vst [vmem:[%s6062_s27 + $0xf0] sm:$0xff] %v208_v28  ;;  %211 = vst [vmem:[%s6062_s27 + $0xf8] sm:$0xff] %v210_v29  ;;  %v214_v31 = vld [vmem:[%s6057_s26 + $0x1f8] sm:$0xff]  ;;  %v216_v32 = vld [vmem:[%s6057_s26 + $0x200] sm:$0xff] }
  0x25   : > { %213 = vst [vmem:[%s6062_s27 + $0x100] sm:$0xff] %v212_v30  ;;  %215 = vst [vmem:[%s6062_s27 + $0x108] sm:$0xff] %v214_v31  ;;  %v218_v33 = vld [vmem:[%s6057_s26 + $0x208] sm:$0xff]  ;;  %v220_v34 = vld [vmem:[%s6057_s26 + $0x210] sm:$0xff] }
  0x26   : > { %217 = vst [vmem:[%s6062_s27 + $0x110] sm:$0xff] %v216_v32  ;;  %v222_v35 = vld [vmem:[%s6057_s26 + $0x258] sm:$0xff]  ;;  %219 = vst [vmem:[%s6062_s27 + $0x118] sm:$0xff] %v218_v33  ;;  %v224_v36 = vld [vmem:[%s6057_s26 + $0x260] sm:$0xff] }
  0x27   : > { %221 = vst [vmem:[%s6062_s27 + $0x120] sm:$0xff] %v220_v34  ;;  %223 = vst [vmem:[%s6062_s27 + $0x12c] sm:$0xff] %v222_v35  ;;  %v226_v37 = vld [vmem:[%s6057_s26 + $0x268] sm:$0xff]  ;;  %v228_v38 = vld [vmem:[%s6057_s26 + $0x270] sm:$0xff] }
  0x28   : > { %225 = vst [vmem:[%s6062_s27 + $0x134] sm:$0xff] %v224_v36  ;;  %227 = vst [vmem:[%s6062_s27 + $0x13c] sm:$0xff] %v226_v37  ;;  %v230_v39 = vld [vmem:[%s6057_s26 + $0x278] sm:$0xff]  ;;  %v232_v40 = vld [vmem:[%s6057_s26 + $0x280] sm:$0xff] }
  0x29   : > { %229 = vst [vmem:[%s6062_s27 + $0x144] sm:$0xff] %v228_v38  ;;  %v234_v41 = vld [vmem:[%s6057_s26 + $0x288] sm:$0xff]  ;;  %231 = vst [vmem:[%s6062_s27 + $0x14c] sm:$0xff] %v230_v39  ;;  %v236_v42 = vld [vmem:[%s6057_s26 + $0x2d0] sm:$0xff] }
  0x2a   : > { %233 = vst [vmem:[%s6062_s27 + $0x154] sm:$0xff] %v232_v40  ;;  %235 = vst [vmem:[%s6062_s27 + $0x15c] sm:$0xff] %v234_v41  ;;  %v238_v43 = vld [vmem:[%s6057_s26 + $0x2d8] sm:$0xff]  ;;  %v240_v44 = vld [vmem:[%s6057_s26 + $0x2e0] sm:$0xff] }
  0x2b   : > { %237 = vst [vmem:[%s6062_s27 + $0x168] sm:$0xff] %v236_v42  ;;  %239 = vst [vmem:[%s6062_s27 + $0x170] sm:$0xff] %v238_v43  ;;  %v242_v45 = vld [vmem:[%s6057_s26 + $0x2e8] sm:$0xff]  ;;  %v244_v46 = vld [vmem:[%s6057_s26 + $0x2f0] sm:$0xff] }
  0x2c   : > { %241 = vst [vmem:[%s6062_s27 + $0x178] sm:$0xff] %v240_v44  ;;  %v246_v47 = vld [vmem:[%s6057_s26 + $0x2f8] sm:$0xff]  ;;  %243 = vst [vmem:[%s6062_s27 + $0x180] sm:$0xff] %v242_v45  ;;  %v248_v48 = vld [vmem:[%s6057_s26 + $0x300] sm:$0xff] }
  0x2d   : > { %245 = vst [vmem:[%s6062_s27 + $0x188] sm:$0xff] %v244_v46  ;;  %247 = vst [vmem:[%s6062_s27 + $0x190] sm:$0xff] %v246_v47  ;;  %v250_v49 = vld [vmem:[%s6057_s26 + $0x348] sm:$0xff]  ;;  %v252_v50 = vld [vmem:[%s6057_s26 + $0x350] sm:$0xff] }
  0x2e   : > { %249 = vst [vmem:[%s6062_s27 + $0x198] sm:$0xff] %v248_v48  ;;  %251 = vst [vmem:[%s6062_s27 + $0x1a4] sm:$0xff] %v250_v49  ;;  %v254_v51 = vld [vmem:[%s6057_s26 + $0x358] sm:$0xff]  ;;  %v256_v52 = vld [vmem:[%s6057_s26 + $0x360] sm:$0xff] }
  0x2f   : > { %253 = vst [vmem:[%s6062_s27 + $0x1ac] sm:$0xff] %v252_v50  ;;  %v258_v53 = vld [vmem:[%s6057_s26 + $0x368] sm:$0xff]  ;;  %255 = vst [vmem:[%s6062_s27 + $0x1b4] sm:$0xff] %v254_v51  ;;  %v260_v54 = vld [vmem:[%s6057_s26 + $0x370] sm:$0xff] }
  0x30   : > { %257 = vst [vmem:[%s6062_s27 + $0x1bc] sm:$0xff] %v256_v52  ;;  %259 = vst [vmem:[%s6062_s27 + $0x1c4] sm:$0xff] %v258_v53  ;;  %v262_v55 = vld [vmem:[%s6057_s26 + $0x378] sm:$0xff]  ;;  %v264_v56 = vld [vmem:[%s6057_s26 + $0x3c0] sm:$0xff] }
  0x31   : > { %261 = vst [vmem:[%s6062_s27 + $0x1cc] sm:$0xff] %v260_v54  ;;  %263 = vst [vmem:[%s6062_s27 + $0x1d4] sm:$0xff] %v262_v55  ;;  %v266_v57 = vld [vmem:[%s6057_s26 + $0x3c8] sm:$0xff]  ;;  %v268_v58 = vld [vmem:[%s6057_s26 + $0x3d0] sm:$0xff] }
  0x32   : > { %265 = vst [vmem:[%s6062_s27 + $0x1e0] sm:$0xff] %v264_v56  ;;  %v270_v59 = vld [vmem:[%s6057_s26 + $0x3d8] sm:$0xff]  ;;  %267 = vst [vmem:[%s6062_s27 + $0x1e8] sm:$0xff] %v266_v57  ;;  %v272_v60 = vld [vmem:[%s6057_s26 + $0x3e0] sm:$0xff] }
  0x33   : > { %269 = vst [vmem:[%s6062_s27 + $0x1f0] sm:$0xff] %v268_v58  ;;  %271 = vst [vmem:[%s6062_s27 + $0x1f8] sm:$0xff] %v270_v59  ;;  %v274_v61 = vld [vmem:[%s6057_s26 + $0x3e8] sm:$0xff]  ;;  %v276_v62 = vld [vmem:[%s6057_s26 + $0x3f0] sm:$0xff] }
  0x34   : > { %273 = vst [vmem:[%s6062_s27 + $0x200] sm:$0xff] %v272_v60  ;;  %275 = vst [vmem:[%s6062_s27 + $0x208] sm:$0xff] %v274_v61  ;;  %v278_v63 = vld [vmem:[%s6057_s26 + $0x438] sm:$0xff]  ;;  %v280_v0 = vld [vmem:[%s6057_s26 + $0x440] sm:$0xff] }
  0x35   : > { %277 = vst [vmem:[%s6062_s27 + $0x210] sm:$0xff] %v276_v62  ;;  %v282_v1 = vld [vmem:[%s6057_s26 + $0x448] sm:$0xff]  ;;  %279 = vst [vmem:[%s6062_s27 + $0x21c] sm:$0xff] %v278_v63  ;;  %v284_v2 = vld [vmem:[%s6057_s26 + $0x450] sm:$0xff] }
  0x36   : > { %281 = vst [vmem:[%s6062_s27 + $0x224] sm:$0xff] %v280_v0  ;;  %283 = vst [vmem:[%s6062_s27 + $0x22c] sm:$0xff] %v282_v1  ;;  %v286_v3 = vld [vmem:[%s6057_s26 + $0x458] sm:$0xff]  ;;  %v288_v4 = vld [vmem:[%s6057_s26 + $0x460] sm:$0xff] }
  0x37   : > { %285 = vst [vmem:[%s6062_s27 + $0x234] sm:$0xff] %v284_v2  ;;  %287 = vst [vmem:[%s6062_s27 + $0x23c] sm:$0xff] %v286_v3  ;;  %v290_v5 = vld [vmem:[%s6057_s26 + $0x468] sm:$0xff]  ;;  %v292_v6 = vld [vmem:[%s6057_s26 + $0x4b0] sm:$0xff] }
  0x38   : > { %289 = vst [vmem:[%s6062_s27 + $0x244] sm:$0xff] %v288_v4  ;;  %v294_v7 = vld [vmem:[%s6057_s26 + $0x4b8] sm:$0xff]  ;;  %291 = vst [vmem:[%s6062_s27 + $0x24c] sm:$0xff] %v290_v5  ;;  %v296_v8 = vld [vmem:[%s6057_s26 + $0x4c0] sm:$0xff] }
  0x39   : > { %293 = vst [vmem:[%s6062_s27 + $0x258] sm:$0xff] %v292_v6  ;;  %295 = vst [vmem:[%s6062_s27 + $0x260] sm:$0xff] %v294_v7  ;;  %v298_v9 = vld [vmem:[%s6057_s26 + $0x4c8] sm:$0xff]  ;;  %v300_v10 = vld [vmem:[%s6057_s26 + $0x4d0] sm:$0xff] }
  0x3a   : > { %297 = vst [vmem:[%s6062_s27 + $0x268] sm:$0xff] %v296_v8  ;;  %299 = vst [vmem:[%s6062_s27 + $0x270] sm:$0xff] %v298_v9  ;;  %v302_v11 = vld [vmem:[%s6057_s26 + $0x4d8] sm:$0xff]  ;;  %v304_v12 = vld [vmem:[%s6057_s26 + $0x4e0] sm:$0xff] }
  0x3b   : > { %301 = vst [vmem:[%s6062_s27 + $0x278] sm:$0xff] %v300_v10  ;;  %v306_v13 = vld [vmem:[%s6057_s26 + $0x528] sm:$0xff]  ;;  %303 = vst [vmem:[%s6062_s27 + $0x280] sm:$0xff] %v302_v11  ;;  %v308_v14 = vld [vmem:[%s6057_s26 + $0x530] sm:$0xff] }
  0x3c   : > { %305 = vst [vmem:[%s6062_s27 + $0x288] sm:$0xff] %v304_v12  ;;  %307 = vst [vmem:[%s6062_s27 + $0x294] sm:$0xff] %v306_v13  ;;  %v310_v15 = vld [vmem:[%s6057_s26 + $0x538] sm:$0xff]  ;;  %v312_v16 = vld [vmem:[%s6057_s26 + $0x540] sm:$0xff] }
  0x3d   : > { %309 = vst [vmem:[%s6062_s27 + $0x29c] sm:$0xff] %v308_v14  ;;  %311 = vst [vmem:[%s6062_s27 + $0x2a4] sm:$0xff] %v310_v15  ;;  %v314_v17 = vld [vmem:[%s6057_s26 + $0x548] sm:$0xff]  ;;  %v316_v18 = vld [vmem:[%s6057_s26 + $0x550] sm:$0xff] }
  0x3e   : > { %313 = vst [vmem:[%s6062_s27 + $0x2ac] sm:$0xff] %v312_v16  ;;  %v318_v19 = vld [vmem:[%s6057_s26 + $0x558] sm:$0xff]  ;;  %315 = vst [vmem:[%s6062_s27 + $0x2b4] sm:$0xff] %v314_v17  ;;  %v320_v20 = vld [vmem:[%s6057_s26 + $0x5a0] sm:$0xff] }
  0x3f   : > { %317 = vst [vmem:[%s6062_s27 + $0x2bc] sm:$0xff] %v316_v18  ;;  %319 = vst [vmem:[%s6062_s27 + $0x2c4] sm:$0xff] %v318_v19  ;;  %v322_v21 = vld [vmem:[%s6057_s26 + $0x5a8] sm:$0xff]  ;;  %v324_v22 = vld [vmem:[%s6057_s26 + $0x5b0] sm:$0xff] }
  0x40   : > { %321 = vst [vmem:[%s6062_s27 + $0x2d0] sm:$0xff] %v320_v20  ;;  %323 = vst [vmem:[%s6062_s27 + $0x2d8] sm:$0xff] %v322_v21  ;;  %v326_v23 = vld [vmem:[%s6057_s26 + $0x5b8] sm:$0xff]  ;;  %v328_v24 = vld [vmem:[%s6057_s26 + $0x5c0] sm:$0xff] }
  0x41   : > { %325 = vst [vmem:[%s6062_s27 + $0x2e0] sm:$0xff] %v324_v22  ;;  %v330_v25 = vld [vmem:[%s6057_s26 + $0x5c8] sm:$0xff]  ;;  %327 = vst [vmem:[%s6062_s27 + $0x2e8] sm:$0xff] %v326_v23  ;;  %v332_v26 = vld [vmem:[%s6057_s26 + $0x5d0] sm:$0xff] }
  0x42   : > { %329 = vst [vmem:[%s6062_s27 + $0x2f0] sm:$0xff] %v328_v24  ;;  %331 = vst [vmem:[%s6062_s27 + $0x2f8] sm:$0xff] %v330_v25  ;;  %v334_v27 = vld [vmem:[%s6057_s26 + $0x618] sm:$0xff]  ;;  %v336_v28 = vld [vmem:[%s6057_s26 + $0x620] sm:$0xff] }
  0x43   : > { %333 = vst [vmem:[%s6062_s27 + $0x300] sm:$0xff] %v332_v26  ;;  %335 = vst [vmem:[%s6062_s27 + $0x30c] sm:$0xff] %v334_v27  ;;  %v338_v29 = vld [vmem:[%s6057_s26 + $0x628] sm:$0xff]  ;;  %v340_v30 = vld [vmem:[%s6057_s26 + $0x630] sm:$0xff] }
  0x44   : > { %337 = vst [vmem:[%s6062_s27 + $0x314] sm:$0xff] %v336_v28  ;;  %v342_v31 = vld [vmem:[%s6057_s26 + $0x638] sm:$0xff]  ;;  %339 = vst [vmem:[%s6062_s27 + $0x31c] sm:$0xff] %v338_v29  ;;  %v344_v32 = vld [vmem:[%s6057_s26 + $0x640] sm:$0xff] }
  0x45   : > { %341 = vst [vmem:[%s6062_s27 + $0x324] sm:$0xff] %v340_v30  ;;  %343 = vst [vmem:[%s6062_s27 + $0x32c] sm:$0xff] %v342_v31  ;;  %v346_v33 = vld [vmem:[%s6057_s26 + $0x648] sm:$0xff]  ;;  %v348_v34 = vld [vmem:[%s6057_s26 + $0x690] sm:$0xff] }
  0x46   : > { %345 = vst [vmem:[%s6062_s27 + $0x334] sm:$0xff] %v344_v32  ;;  %347 = vst [vmem:[%s6062_s27 + $0x33c] sm:$0xff] %v346_v33  ;;  %v350_v35 = vld [vmem:[%s6057_s26 + $0x698] sm:$0xff]  ;;  %v352_v36 = vld [vmem:[%s6057_s26 + $0x6a0] sm:$0xff] }
  0x47   : > { %349 = vst [vmem:[%s6062_s27 + $0x348] sm:$0xff] %v348_v34  ;;  %v354_v37 = vld [vmem:[%s6057_s26 + $0x6a8] sm:$0xff]  ;;  %351 = vst [vmem:[%s6062_s27 + $0x350] sm:$0xff] %v350_v35  ;;  %v356_v38 = vld [vmem:[%s6057_s26 + $0x6b0] sm:$0xff] }
  0x48   : > { %353 = vst [vmem:[%s6062_s27 + $0x358] sm:$0xff] %v352_v36  ;;  %355 = vst [vmem:[%s6062_s27 + $0x360] sm:$0xff] %v354_v37  ;;  %v358_v39 = vld [vmem:[%s6057_s26 + $0x6b8] sm:$0xff]  ;;  %v360_v40 = vld [vmem:[%s6057_s26 + $0x6c0] sm:$0xff] }
  0x49   : > { %357 = vst [vmem:[%s6062_s27 + $0x368] sm:$0xff] %v356_v38  ;;  %359 = vst [vmem:[%s6062_s27 + $0x370] sm:$0xff] %v358_v39  ;;  %v362_v41 = vld [vmem:[%s6057_s26 + $0x708] sm:$0xff]  ;;  %v364_v42 = vld [vmem:[%s6057_s26 + $0x710] sm:$0xff] }
  0x4a   : > { %361 = vst [vmem:[%s6062_s27 + $0x378] sm:$0xff] %v360_v40  ;;  %v366_v43 = vld [vmem:[%s6057_s26 + $0x718] sm:$0xff]  ;;  %363 = vst [vmem:[%s6062_s27 + $0x384] sm:$0xff] %v362_v41  ;;  %v368_v44 = vld [vmem:[%s6057_s26 + $0x720] sm:$0xff] }
  0x4b   : > { %365 = vst [vmem:[%s6062_s27 + $0x38c] sm:$0xff] %v364_v42  ;;  %367 = vst [vmem:[%s6062_s27 + $0x394] sm:$0xff] %v366_v43  ;;  %v370_v45 = vld [vmem:[%s6057_s26 + $0x728] sm:$0xff]  ;;  %v372_v46 = vld [vmem:[%s6057_s26 + $0x730] sm:$0xff] }
  0x4c   : > { %369 = vst [vmem:[%s6062_s27 + $0x39c] sm:$0xff] %v368_v44  ;;  %371 = vst [vmem:[%s6062_s27 + $0x3a4] sm:$0xff] %v370_v45  ;;  %v374_v47 = vld [vmem:[%s6057_s26 + $0x738] sm:$0xff]  ;;  %v376_v48 = vld [vmem:[%s6057_s26 + $0x780] sm:$0xff] }
  0x4d   : > { %373 = vst [vmem:[%s6062_s27 + $0x3ac] sm:$0xff] %v372_v46  ;;  %v378_v49 = vld [vmem:[%s6057_s26 + $0x788] sm:$0xff]  ;;  %375 = vst [vmem:[%s6062_s27 + $0x3b4] sm:$0xff] %v374_v47  ;;  %v380_v50 = vld [vmem:[%s6057_s26 + $0x790] sm:$0xff] }
  0x4e   : > { %377 = vst [vmem:[%s6062_s27 + $0x3c0] sm:$0xff] %v376_v48  ;;  %379 = vst [vmem:[%s6062_s27 + $0x3c8] sm:$0xff] %v378_v49  ;;  %v382_v51 = vld [vmem:[%s6057_s26 + $0x798] sm:$0xff]  ;;  %v384_v52 = vld [vmem:[%s6057_s26 + $0x7a0] sm:$0xff] }
  0x4f   : > { %381 = vst [vmem:[%s6062_s27 + $0x3d0] sm:$0xff] %v380_v50  ;;  %383 = vst [vmem:[%s6062_s27 + $0x3d8] sm:$0xff] %v382_v51  ;;  %v386_v53 = vld [vmem:[%s6057_s26 + $0x7a8] sm:$0xff]  ;;  %v388_v54 = vld [vmem:[%s6057_s26 + $0x7b0] sm:$0xff] }
  0x50   : > { %385 = vst [vmem:[%s6062_s27 + $0x3e0] sm:$0xff] %v384_v52  ;;  %v390_v55 = vld [vmem:[%s6057_s26 + $0x7f8] sm:$0xff]  ;;  %387 = vst [vmem:[%s6062_s27 + $0x3e8] sm:$0xff] %v386_v53  ;;  %v392_v56 = vld [vmem:[%s6057_s26 + $0x800] sm:$0xff] }
  0x51   : > { %389 = vst [vmem:[%s6062_s27 + $0x3f0] sm:$0xff] %v388_v54  ;;  %391 = vst [vmem:[%s6062_s27 + $0x3fc] sm:$0xff] %v390_v55  ;;  %v394_v57 = vld [vmem:[%s6057_s26 + $0x808] sm:$0xff]  ;;  %v396_v58 = vld [vmem:[%s6057_s26 + $0x810] sm:$0xff] }
  0x52   : > { %393 = vst [vmem:[%s6062_s27 + $0x404] sm:$0xff] %v392_v56  ;;  %395 = vst [vmem:[%s6062_s27 + $0x40c] sm:$0xff] %v394_v57  ;;  %v398_v59 = vld [vmem:[%s6057_s26 + $0x818] sm:$0xff]  ;;  %v400_v60 = vld [vmem:[%s6057_s26 + $0x820] sm:$0xff] }
  0x53   : > { %397 = vst [vmem:[%s6062_s27 + $0x414] sm:$0xff] %v396_v58  ;;  %v402_v61 = vld [vmem:[%s6057_s26 + $0x828] sm:$0xff]  ;;  %399 = vst [vmem:[%s6062_s27 + $0x41c] sm:$0xff] %v398_v59  ;;  %v404_v62 = vld [vmem:[%s6057_s26 + $0x870] sm:$0xff] }
  0x54   : > { %401 = vst [vmem:[%s6062_s27 + $0x424] sm:$0xff] %v400_v60  ;;  %403 = vst [vmem:[%s6062_s27 + $0x42c] sm:$0xff] %v402_v61  ;;  %v406_v63 = vld [vmem:[%s6057_s26 + $0x878] sm:$0xff]  ;;  %v408_v0 = vld [vmem:[%s6057_s26 + $0x880] sm:$0xff] }
  0x55   : > { %405 = vst [vmem:[%s6062_s27 + $0x438] sm:$0xff] %v404_v62  ;;  %407 = vst [vmem:[%s6062_s27 + $0x440] sm:$0xff] %v406_v63  ;;  %v410_v1 = vld [vmem:[%s6057_s26 + $0x888] sm:$0xff]  ;;  %v412_v2 = vld [vmem:[%s6057_s26 + $0x890] sm:$0xff] }
  0x56   : > { %409 = vst [vmem:[%s6062_s27 + $0x448] sm:$0xff] %v408_v0  ;;  %v414_v3 = vld [vmem:[%s6057_s26 + $0x898] sm:$0xff]  ;;  %411 = vst [vmem:[%s6062_s27 + $0x450] sm:$0xff] %v410_v1  ;;  %v416_v4 = vld [vmem:[%s6057_s26 + $0x8a0] sm:$0xff] }
  0x57   : > { %413 = vst [vmem:[%s6062_s27 + $0x458] sm:$0xff] %v412_v2  ;;  %415 = vst [vmem:[%s6062_s27 + $0x460] sm:$0xff] %v414_v3  ;;  %v418_v5 = vld [vmem:[%s6057_s26 + $0x8e8] sm:$0xff]  ;;  %v420_v6 = vld [vmem:[%s6057_s26 + $0x8f0] sm:$0xff] }
  0x58   : > { %417 = vst [vmem:[%s6062_s27 + $0x468] sm:$0xff] %v416_v4  ;;  %419 = vst [vmem:[%s6062_s27 + $0x474] sm:$0xff] %v418_v5  ;;  %v422_v7 = vld [vmem:[%s6057_s26 + $0x8f8] sm:$0xff]  ;;  %v424_v8 = vld [vmem:[%s6057_s26 + $0x900] sm:$0xff] }
  0x59   : > { %421 = vst [vmem:[%s6062_s27 + $0x47c] sm:$0xff] %v420_v6  ;;  %v426_v9 = vld [vmem:[%s6057_s26 + $0x908] sm:$0xff]  ;;  %423 = vst [vmem:[%s6062_s27 + $0x484] sm:$0xff] %v422_v7  ;;  %v428_v10 = vld [vmem:[%s6057_s26 + $0x910] sm:$0xff] }
  0x5a   : > { %425 = vst [vmem:[%s6062_s27 + $0x48c] sm:$0xff] %v424_v8  ;;  %427 = vst [vmem:[%s6062_s27 + $0x494] sm:$0xff] %v426_v9  ;;  %v430_v11 = vld [vmem:[%s6057_s26 + $0x918] sm:$0xff]  ;;  %v432_v12 = vld [vmem:[%s6057_s26 + $0x960] sm:$0xff] }
  0x5b   : > { %429 = vst [vmem:[%s6062_s27 + $0x49c] sm:$0xff] %v428_v10  ;;  %431 = vst [vmem:[%s6062_s27 + $0x4a4] sm:$0xff] %v430_v11  ;;  %v434_v13 = vld [vmem:[%s6057_s26 + $0x968] sm:$0xff]  ;;  %v436_v14 = vld [vmem:[%s6057_s26 + $0x970] sm:$0xff] }
  0x5c   : > { %433 = vst [vmem:[%s6062_s27 + $0x4b0] sm:$0xff] %v432_v12  ;;  %v438_v15 = vld [vmem:[%s6057_s26 + $0x978] sm:$0xff]  ;;  %435 = vst [vmem:[%s6062_s27 + $0x4b8] sm:$0xff] %v434_v13  ;;  %v440_v16 = vld [vmem:[%s6057_s26 + $0x980] sm:$0xff] }
  0x5d   : > { %437 = vst [vmem:[%s6062_s27 + $0x4c0] sm:$0xff] %v436_v14  ;;  %439 = vst [vmem:[%s6062_s27 + $0x4c8] sm:$0xff] %v438_v15  ;;  %v442_v17 = vld [vmem:[%s6057_s26 + $0x988] sm:$0xff]  ;;  %v444_v18 = vld [vmem:[%s6057_s26 + $0x990] sm:$0xff] }
  0x5e   : > { %441 = vst [vmem:[%s6062_s27 + $0x4d0] sm:$0xff] %v440_v16  ;;  %443 = vst [vmem:[%s6062_s27 + $0x4d8] sm:$0xff] %v442_v17  ;;  %v446_v19 = vld [vmem:[%s6057_s26 + $0x9d8] sm:$0xff]  ;;  %v448_v20 = vld [vmem:[%s6057_s26 + $0x9e0] sm:$0xff] }
  0x5f   : > { %445 = vst [vmem:[%s6062_s27 + $0x4e0] sm:$0xff] %v444_v18  ;;  %v450_v21 = vld [vmem:[%s6057_s26 + $0x9e8] sm:$0xff]  ;;  %447 = vst [vmem:[%s6062_s27 + $0x4ec] sm:$0xff] %v446_v19  ;;  %v452_v22 = vld [vmem:[%s6057_s26 + $0x9f0] sm:$0xff] }
  0x60   : > { %449 = vst [vmem:[%s6062_s27 + $0x4f4] sm:$0xff] %v448_v20  ;;  %451 = vst [vmem:[%s6062_s27 + $0x4fc] sm:$0xff] %v450_v21  ;;  %v454_v23 = vld [vmem:[%s6057_s26 + $0x9f8] sm:$0xff]  ;;  %v456_v24 = vld [vmem:[%s6057_s26 + $0xa00] sm:$0xff] }
  0x61   : > { %453 = vst [vmem:[%s6062_s27 + $0x504] sm:$0xff] %v452_v22  ;;  %455 = vst [vmem:[%s6062_s27 + $0x50c] sm:$0xff] %v454_v23  ;;  %v458_v25 = vld [vmem:[%s6057_s26 + $0xa08] sm:$0xff]  ;;  %v460_v26 = vld [vmem:[%s6057_s26 + $0xa50] sm:$0xff] }
  0x62   : > { %457 = vst [vmem:[%s6062_s27 + $0x514] sm:$0xff] %v456_v24  ;;  %v462_v27 = vld [vmem:[%s6057_s26 + $0xa58] sm:$0xff]  ;;  %459 = vst [vmem:[%s6062_s27 + $0x51c] sm:$0xff] %v458_v25  ;;  %v464_v28 = vld [vmem:[%s6057_s26 + $0xa60] sm:$0xff] }
  0x63   : > { %461 = vst [vmem:[%s6062_s27 + $0x528] sm:$0xff] %v460_v26  ;;  %463 = vst [vmem:[%s6062_s27 + $0x530] sm:$0xff] %v462_v27  ;;  %v466_v29 = vld [vmem:[%s6057_s26 + $0xa68] sm:$0xff]  ;;  %v468_v30 = vld [vmem:[%s6057_s26 + $0xa70] sm:$0xff] }
  0x64   : > { %465 = vst [vmem:[%s6062_s27 + $0x538] sm:$0xff] %v464_v28  ;;  %467 = vst [vmem:[%s6062_s27 + $0x540] sm:$0xff] %v466_v29  ;;  %v470_v31 = vld [vmem:[%s6057_s26 + $0xa78] sm:$0xff]  ;;  %v472_v32 = vld [vmem:[%s6057_s26 + $0xa80] sm:$0xff] }
  0x65   : > { %469 = vst [vmem:[%s6062_s27 + $0x548] sm:$0xff] %v468_v30  ;;  %v474_v33 = vld [vmem:[%s6057_s26 + $0xac8] sm:$0xff]  ;;  %471 = vst [vmem:[%s6062_s27 + $0x550] sm:$0xff] %v470_v31  ;;  %v476_v34 = vld [vmem:[%s6057_s26 + $0xad0] sm:$0xff] }
  0x66   : > { %473 = vst [vmem:[%s6062_s27 + $0x558] sm:$0xff] %v472_v32  ;;  %475 = vst [vmem:[%s6062_s27 + $0x564] sm:$0xff] %v474_v33  ;;  %v478_v35 = vld [vmem:[%s6057_s26 + $0xad8] sm:$0xff]  ;;  %v480_v36 = vld [vmem:[%s6057_s26 + $0xae0] sm:$0xff] }
  0x67   : > { %477 = vst [vmem:[%s6062_s27 + $0x56c] sm:$0xff] %v476_v34  ;;  %479 = vst [vmem:[%s6062_s27 + $0x574] sm:$0xff] %v478_v35  ;;  %v482_v37 = vld [vmem:[%s6057_s26 + $0xae8] sm:$0xff]  ;;  %v484_v38 = vld [vmem:[%s6057_s26 + $0xaf0] sm:$0xff] }
  0x68   : > { %481 = vst [vmem:[%s6062_s27 + $0x57c] sm:$0xff] %v480_v36  ;;  %v486_v39 = vld [vmem:[%s6057_s26 + $0xaf8] sm:$0xff]  ;;  %483 = vst [vmem:[%s6062_s27 + $0x584] sm:$0xff] %v482_v37  ;;  %v488_v40 = vld [vmem:[%s6057_s26 + $0xb40] sm:$0xff] }
  0x69   : > { %485 = vst [vmem:[%s6062_s27 + $0x58c] sm:$0xff] %v484_v38  ;;  %487 = vst [vmem:[%s6062_s27 + $0x594] sm:$0xff] %v486_v39  ;;  %v490_v41 = vld [vmem:[%s6057_s26 + $0xb48] sm:$0xff]  ;;  %v492_v42 = vld [vmem:[%s6057_s26 + $0xb50] sm:$0xff] }
  0x6a   : > { %489 = vst [vmem:[%s6062_s27 + $0x5a0] sm:$0xff] %v488_v40  ;;  %491 = vst [vmem:[%s6062_s27 + $0x5a8] sm:$0xff] %v490_v41  ;;  %v494_v43 = vld [vmem:[%s6057_s26 + $0xb58] sm:$0xff]  ;;  %v496_v44 = vld [vmem:[%s6057_s26 + $0xb60] sm:$0xff] }
  0x6b   : > { %493 = vst [vmem:[%s6062_s27 + $0x5b0] sm:$0xff] %v492_v42  ;;  %v498_v45 = vld [vmem:[%s6057_s26 + $0xb68] sm:$0xff]  ;;  %495 = vst [vmem:[%s6062_s27 + $0x5b8] sm:$0xff] %v494_v43  ;;  %v500_v46 = vld [vmem:[%s6057_s26 + $0xb70] sm:$0xff] }
  0x6c   : > { %497 = vst [vmem:[%s6062_s27 + $0x5c0] sm:$0xff] %v496_v44  ;;  %499 = vst [vmem:[%s6062_s27 + $0x5c8] sm:$0xff] %v498_v45  ;;  %v502_v47 = vld [vmem:[%s6057_s26 + $0xbb8] sm:$0xff]  ;;  %v504_v48 = vld [vmem:[%s6057_s26 + $0xbc0] sm:$0xff] }
  0x6d   : > { %501 = vst [vmem:[%s6062_s27 + $0x5d0] sm:$0xff] %v500_v46  ;;  %503 = vst [vmem:[%s6062_s27 + $0x5dc] sm:$0xff] %v502_v47  ;;  %v506_v49 = vld [vmem:[%s6057_s26 + $0xbc8] sm:$0xff]  ;;  %v508_v50 = vld [vmem:[%s6057_s26 + $0xbd0] sm:$0xff] }
  0x6e   : > { %505 = vst [vmem:[%s6062_s27 + $0x5e4] sm:$0xff] %v504_v48  ;;  %v510_v51 = vld [vmem:[%s6057_s26 + $0xbd8] sm:$0xff]  ;;  %507 = vst [vmem:[%s6062_s27 + $0x5ec] sm:$0xff] %v506_v49  ;;  %v512_v52 = vld [vmem:[%s6057_s26 + $0xbe0] sm:$0xff] }
  0x6f   : > { %509 = vst [vmem:[%s6062_s27 + $0x5f4] sm:$0xff] %v508_v50  ;;  %511 = vst [vmem:[%s6062_s27 + $0x5fc] sm:$0xff] %v510_v51  ;;  %v514_v53 = vld [vmem:[%s6057_s26 + $0xbe8] sm:$0xff]  ;;  %v516_v54 = vld [vmem:[%s6057_s26 + $0xc30] sm:$0xff] }
  0x70   : > { %513 = vst [vmem:[%s6062_s27 + $0x604] sm:$0xff] %v512_v52  ;;  %515 = vst [vmem:[%s6062_s27 + $0x60c] sm:$0xff] %v514_v53  ;;  %v518_v55 = vld [vmem:[%s6057_s26 + $0xc38] sm:$0xff]  ;;  %v520_v56 = vld [vmem:[%s6057_s26 + $0xc40] sm:$0xff] }
  0x71   : > { %517 = vst [vmem:[%s6062_s27 + $0x618] sm:$0xff] %v516_v54  ;;  %v522_v57 = vld [vmem:[%s6057_s26 + $0xc48] sm:$0xff]  ;;  %519 = vst [vmem:[%s6062_s27 + $0x620] sm:$0xff] %v518_v55  ;;  %v524_v58 = vld [vmem:[%s6057_s26 + $0xc50] sm:$0xff] }
  0x72   : > { %521 = vst [vmem:[%s6062_s27 + $0x628] sm:$0xff] %v520_v56  ;;  %523 = vst [vmem:[%s6062_s27 + $0x630] sm:$0xff] %v522_v57  ;;  %v526_v59 = vld [vmem:[%s6057_s26 + $0xc58] sm:$0xff]  ;;  %v528_v60 = vld [vmem:[%s6057_s26 + $0xc60] sm:$0xff] }
  0x73   : > { %525 = vst [vmem:[%s6062_s27 + $0x638] sm:$0xff] %v524_v58  ;;  %527 = vst [vmem:[%s6062_s27 + $0x640] sm:$0xff] %v526_v59  ;;  %v530_v61 = vld [vmem:[%s6057_s26 + $0xca8] sm:$0xff]  ;;  %v532_v62 = vld [vmem:[%s6057_s26 + $0xcb0] sm:$0xff] }
  0x74   : > { %529 = vst [vmem:[%s6062_s27 + $0x648] sm:$0xff] %v528_v60  ;;  %v534_v63 = vld [vmem:[%s6057_s26 + $0xcb8] sm:$0xff]  ;;  %531 = vst [vmem:[%s6062_s27 + $0x654] sm:$0xff] %v530_v61  ;;  %v536_v0 = vld [vmem:[%s6057_s26 + $0xcc0] sm:$0xff] }
  0x75   : > { %533 = vst [vmem:[%s6062_s27 + $0x65c] sm:$0xff] %v532_v62  ;;  %535 = vst [vmem:[%s6062_s27 + $0x664] sm:$0xff] %v534_v63  ;;  %v538_v1 = vld [vmem:[%s6057_s26 + $0xcc8] sm:$0xff]  ;;  %v540_v2 = vld [vmem:[%s6057_s26 + $0xcd0] sm:$0xff] }
  0x76   : > { %537 = vst [vmem:[%s6062_s27 + $0x66c] sm:$0xff] %v536_v0  ;;  %539 = vst [vmem:[%s6062_s27 + $0x674] sm:$0xff] %v538_v1  ;;  %v542_v3 = vld [vmem:[%s6057_s26 + $0xcd8] sm:$0xff]  ;;  %v544_v4 = vld [vmem:[%s6057_s26 + $0xd20] sm:$0xff] }
  0x77   : > { %541 = vst [vmem:[%s6062_s27 + $0x67c] sm:$0xff] %v540_v2  ;;  %v546_v5 = vld [vmem:[%s6057_s26 + $0xd28] sm:$0xff]  ;;  %543 = vst [vmem:[%s6062_s27 + $0x684] sm:$0xff] %v542_v3  ;;  %v548_v6 = vld [vmem:[%s6057_s26 + $0xd30] sm:$0xff] }
  0x78   : > { %545 = vst [vmem:[%s6062_s27 + $0x690] sm:$0xff] %v544_v4  ;;  %547 = vst [vmem:[%s6062_s27 + $0x698] sm:$0xff] %v546_v5  ;;  %v550_v7 = vld [vmem:[%s6057_s26 + $0xd38] sm:$0xff]  ;;  %v552_v8 = vld [vmem:[%s6057_s26 + $0xd40] sm:$0xff] }
  0x79   : > { %549 = vst [vmem:[%s6062_s27 + $0x6a0] sm:$0xff] %v548_v6  ;;  %551 = vst [vmem:[%s6062_s27 + $0x6a8] sm:$0xff] %v550_v7  ;;  %v554_v9 = vld [vmem:[%s6057_s26 + $0xd48] sm:$0xff]  ;;  %v556_v10 = vld [vmem:[%s6057_s26 + $0xd50] sm:$0xff] }
  0x7a   : > { %553 = vst [vmem:[%s6062_s27 + $0x6b0] sm:$0xff] %v552_v8  ;;  %v558_v11 = vld [vmem:[%s6057_s26 + $0xd98] sm:$0xff]  ;;  %555 = vst [vmem:[%s6062_s27 + $0x6b8] sm:$0xff] %v554_v9  ;;  %v560_v12 = vld [vmem:[%s6057_s26 + $0xda0] sm:$0xff] }
  0x7b   : > { %557 = vst [vmem:[%s6062_s27 + $0x6c0] sm:$0xff] %v556_v10  ;;  %559 = vst [vmem:[%s6062_s27 + $0x6cc] sm:$0xff] %v558_v11  ;;  %v562_v13 = vld [vmem:[%s6057_s26 + $0xda8] sm:$0xff]  ;;  %v564_v14 = vld [vmem:[%s6057_s26 + $0xdb0] sm:$0xff] }
  0x7c   : > { %561 = vst [vmem:[%s6062_s27 + $0x6d4] sm:$0xff] %v560_v12  ;;  %563 = vst [vmem:[%s6062_s27 + $0x6dc] sm:$0xff] %v562_v13  ;;  %v566_v15 = vld [vmem:[%s6057_s26 + $0xdb8] sm:$0xff]  ;;  %v568_v16 = vld [vmem:[%s6057_s26 + $0xdc0] sm:$0xff] }
  0x7d   : > { %565 = vst [vmem:[%s6062_s27 + $0x6e4] sm:$0xff] %v564_v14  ;;  %v570_v17 = vld [vmem:[%s6057_s26 + $0xdc8] sm:$0xff]  ;;  %567 = vst [vmem:[%s6062_s27 + $0x6ec] sm:$0xff] %v566_v15  ;;  %v572_v18 = vld [vmem:[%s6057_s26 + $0xe10] sm:$0xff] }
  0x7e   : > { %569 = vst [vmem:[%s6062_s27 + $0x6f4] sm:$0xff] %v568_v16  ;;  %571 = vst [vmem:[%s6062_s27 + $0x6fc] sm:$0xff] %v570_v17  ;;  %v574_v19 = vld [vmem:[%s6057_s26 + $0xe18] sm:$0xff]  ;;  %v576_v20 = vld [vmem:[%s6057_s26 + $0xe20] sm:$0xff] }
  0x7f   : > { %573 = vst [vmem:[%s6062_s27 + $0x708] sm:$0xff] %v572_v18  ;;  %575 = vst [vmem:[%s6062_s27 + $0x710] sm:$0xff] %v574_v19  ;;  %v578_v21 = vld [vmem:[%s6057_s26 + $0xe28] sm:$0xff]  ;;  %v580_v22 = vld [vmem:[%s6057_s26 + $0xe30] sm:$0xff] }
  0x80   : > { %577 = vst [vmem:[%s6062_s27 + $0x718] sm:$0xff] %v576_v20  ;;  %v582_v23 = vld [vmem:[%s6057_s26 + $0xe38] sm:$0xff]  ;;  %579 = vst [vmem:[%s6062_s27 + $0x720] sm:$0xff] %v578_v21  ;;  %v584_v24 = vld [vmem:[%s6057_s26 + $0xe40] sm:$0xff] }
  0x81   : > { %581 = vst [vmem:[%s6062_s27 + $0x728] sm:$0xff] %v580_v22  ;;  %583 = vst [vmem:[%s6062_s27 + $0x730] sm:$0xff] %v582_v23  ;;  %v586_v25 = vld [vmem:[%s6057_s26 + $0xe88] sm:$0xff]  ;;  %v588_v26 = vld [vmem:[%s6057_s26 + $0xe90] sm:$0xff] }
  0x82   : > { %585 = vst [vmem:[%s6062_s27 + $0x738] sm:$0xff] %v584_v24  ;;  %587 = vst [vmem:[%s6062_s27 + $0x744] sm:$0xff] %v586_v25  ;;  %v590_v27 = vld [vmem:[%s6057_s26 + $0xe98] sm:$0xff]  ;;  %v592_v28 = vld [vmem:[%s6057_s26 + $0xea0] sm:$0xff] }
  0x83   : > { %589 = vst [vmem:[%s6062_s27 + $0x74c] sm:$0xff] %v588_v26  ;;  %v594_v29 = vld [vmem:[%s6057_s26 + $0xea8] sm:$0xff]  ;;  %591 = vst [vmem:[%s6062_s27 + $0x754] sm:$0xff] %v590_v27  ;;  %v596_v30 = vld [vmem:[%s6057_s26 + $0xeb0] sm:$0xff] }
  0x84   : > { %593 = vst [vmem:[%s6062_s27 + $0x75c] sm:$0xff] %v592_v28  ;;  %595 = vst [vmem:[%s6062_s27 + $0x764] sm:$0xff] %v594_v29  ;;  %v598_v31 = vld [vmem:[%s6057_s26 + $0xeb8] sm:$0xff]  ;;  %v600_v32 = vld [vmem:[%s6057_s26 + $0xf00] sm:$0xff] }
  0x85   : > { %597 = vst [vmem:[%s6062_s27 + $0x76c] sm:$0xff] %v596_v30  ;;  %599 = vst [vmem:[%s6062_s27 + $0x774] sm:$0xff] %v598_v31  ;;  %v602_v33 = vld [vmem:[%s6057_s26 + $0xf08] sm:$0xff]  ;;  %v604_v34 = vld [vmem:[%s6057_s26 + $0xf10] sm:$0xff] }
  0x86   : > { %601 = vst [vmem:[%s6062_s27 + $0x780] sm:$0xff] %v600_v32  ;;  %v606_v35 = vld [vmem:[%s6057_s26 + $0xf18] sm:$0xff]  ;;  %603 = vst [vmem:[%s6062_s27 + $0x788] sm:$0xff] %v602_v33  ;;  %v608_v36 = vld [vmem:[%s6057_s26 + $0xf20] sm:$0xff] }
  0x87   : > { %605 = vst [vmem:[%s6062_s27 + $0x790] sm:$0xff] %v604_v34  ;;  %607 = vst [vmem:[%s6062_s27 + $0x798] sm:$0xff] %v606_v35  ;;  %v610_v37 = vld [vmem:[%s6057_s26 + $0xf28] sm:$0xff]  ;;  %v612_v38 = vld [vmem:[%s6057_s26 + $0xf30] sm:$0xff] }
  0x88   : > { %609 = vst [vmem:[%s6062_s27 + $0x7a0] sm:$0xff] %v608_v36  ;;  %611 = vst [vmem:[%s6062_s27 + $0x7a8] sm:$0xff] %v610_v37  ;;  %v614_v39 = vld [vmem:[%s6057_s26 + $0xf78] sm:$0xff]  ;;  %v616_v40 = vld [vmem:[%s6057_s26 + $0xf80] sm:$0xff] }
  0x89   : > { %613 = vst [vmem:[%s6062_s27 + $0x7b0] sm:$0xff] %v612_v38  ;;  %v618_v41 = vld [vmem:[%s6057_s26 + $0xf88] sm:$0xff]  ;;  %615 = vst [vmem:[%s6062_s27 + $0x7bc] sm:$0xff] %v614_v39  ;;  %v620_v42 = vld [vmem:[%s6057_s26 + $0xf90] sm:$0xff] }
  0x8a   : > { %617 = vst [vmem:[%s6062_s27 + $0x7c4] sm:$0xff] %v616_v40  ;;  %619 = vst [vmem:[%s6062_s27 + $0x7cc] sm:$0xff] %v618_v41  ;;  %v622_v43 = vld [vmem:[%s6057_s26 + $0xf98] sm:$0xff]  ;;  %v624_v44 = vld [vmem:[%s6057_s26 + $0xfa0] sm:$0xff] }
  0x8b   : > { %621 = vst [vmem:[%s6062_s27 + $0x7d4] sm:$0xff] %v620_v42  ;;  %623 = vst [vmem:[%s6062_s27 + $0x7dc] sm:$0xff] %v622_v43  ;;  %v626_v45 = vld [vmem:[%s6057_s26 + $0xfa8] sm:$0xff]  ;;  %v628_v46 = vld [vmem:[%s6057_s26 + $0xff0] sm:$0xff] }
  0x8c   : > { %625 = vst [vmem:[%s6062_s27 + $0x7e4] sm:$0xff] %v624_v44  ;;  %v630_v47 = vld [vmem:[%s6057_s26 + $0xff8] sm:$0xff]  ;;  %627 = vst [vmem:[%s6062_s27 + $0x7ec] sm:$0xff] %v626_v45  ;;  %v632_v48 = vld [vmem:[%s6057_s26 + $0x1000] sm:$0xff] }
  0x8d   : > { %629 = vst [vmem:[%s6062_s27 + $0x7f8] sm:$0xff] %v628_v46  ;;  %631 = vst [vmem:[%s6062_s27 + $0x800] sm:$0xff] %v630_v47  ;;  %v634_v49 = vld [vmem:[%s6057_s26 + $0x1008] sm:$0xff]  ;;  %v636_v50 = vld [vmem:[%s6057_s26 + $0x1010] sm:$0xff] }
  0x8e   : > { %633 = vst [vmem:[%s6062_s27 + $0x808] sm:$0xff] %v632_v48  ;;  %635 = vst [vmem:[%s6062_s27 + $0x810] sm:$0xff] %v634_v49  ;;  %v638_v51 = vld [vmem:[%s6057_s26 + $0x1018] sm:$0xff]  ;;  %v640_v52 = vld [vmem:[%s6057_s26 + $0x1020] sm:$0xff] }
  0x8f   : > { %637 = vst [vmem:[%s6062_s27 + $0x818] sm:$0xff] %v636_v50  ;;  %v642_v53 = vld [vmem:[%s6057_s26 + $0x1068] sm:$0xff]  ;;  %639 = vst [vmem:[%s6062_s27 + $0x820] sm:$0xff] %v638_v51  ;;  %v644_v54 = vld [vmem:[%s6057_s26 + $0x1070] sm:$0xff] }
  0x90   : > { %641 = vst [vmem:[%s6062_s27 + $0x828] sm:$0xff] %v640_v52  ;;  %643 = vst [vmem:[%s6062_s27 + $0x834] sm:$0xff] %v642_v53  ;;  %v646_v55 = vld [vmem:[%s6057_s26 + $0x1078] sm:$0xff]  ;;  %v648_v56 = vld [vmem:[%s6057_s26 + $0x1080] sm:$0xff] }
  0x91   : > { %645 = vst [vmem:[%s6062_s27 + $0x83c] sm:$0xff] %v644_v54  ;;  %647 = vst [vmem:[%s6062_s27 + $0x844] sm:$0xff] %v646_v55  ;;  %v650_v57 = vld [vmem:[%s6057_s26 + $0x1088] sm:$0xff]  ;;  %v652_v58 = vld [vmem:[%s6057_s26 + $0x1090] sm:$0xff] }
  0x92   : > { %649 = vst [vmem:[%s6062_s27 + $0x84c] sm:$0xff] %v648_v56  ;;  %v654_v59 = vld [vmem:[%s6057_s26 + $0x1098] sm:$0xff]  ;;  %651 = vst [vmem:[%s6062_s27 + $0x854] sm:$0xff] %v650_v57  ;;  %v656_v60 = vld [vmem:[%s6057_s26 + $0x10e0] sm:$0xff] }
  0x93   : > { %653 = vst [vmem:[%s6062_s27 + $0x85c] sm:$0xff] %v652_v58  ;;  %655 = vst [vmem:[%s6062_s27 + $0x864] sm:$0xff] %v654_v59  ;;  %v658_v61 = vld [vmem:[%s6057_s26 + $0x10e8] sm:$0xff]  ;;  %v660_v62 = vld [vmem:[%s6057_s26 + $0x10f0] sm:$0xff] }
  0x94   : > { %657 = vst [vmem:[%s6062_s27 + $0x870] sm:$0xff] %v656_v60  ;;  %659 = vst [vmem:[%s6062_s27 + $0x878] sm:$0xff] %v658_v61  ;;  %v662_v63 = vld [vmem:[%s6057_s26 + $0x10f8] sm:$0xff]  ;;  %v664_v0 = vld [vmem:[%s6057_s26 + $0x1100] sm:$0xff] }
  0x95   : > { %661 = vst [vmem:[%s6062_s27 + $0x880] sm:$0xff] %v660_v62  ;;  %v666_v1 = vld [vmem:[%s6057_s26 + $0x1108] sm:$0xff]  ;;  %663 = vst [vmem:[%s6062_s27 + $0x888] sm:$0xff] %v662_v63  ;;  %v668_v2 = vld [vmem:[%s6057_s26 + $0x1110] sm:$0xff] }
  0x96   : > { %665 = vst [vmem:[%s6062_s27 + $0x890] sm:$0xff] %v664_v0  ;;  %667 = vst [vmem:[%s6062_s27 + $0x898] sm:$0xff] %v666_v1  ;;  %v670_v3 = vld [vmem:[%s6057_s26 + $0x1158] sm:$0xff]  ;;  %v672_v4 = vld [vmem:[%s6057_s26 + $0x1160] sm:$0xff] }
  0x97   : > { %669 = vst [vmem:[%s6062_s27 + $0x8a0] sm:$0xff] %v668_v2  ;;  %671 = vst [vmem:[%s6062_s27 + $0x8ac] sm:$0xff] %v670_v3  ;;  %v674_v5 = vld [vmem:[%s6057_s26 + $0x1168] sm:$0xff]  ;;  %v676_v6 = vld [vmem:[%s6057_s26 + $0x1170] sm:$0xff] }
  0x98   : > { %673 = vst [vmem:[%s6062_s27 + $0x8b4] sm:$0xff] %v672_v4  ;;  %v678_v7 = vld [vmem:[%s6057_s26 + $0x1178] sm:$0xff]  ;;  %675 = vst [vmem:[%s6062_s27 + $0x8bc] sm:$0xff] %v674_v5  ;;  %v680_v8 = vld [vmem:[%s6057_s26 + $0x1180] sm:$0xff] }
  0x99   : > { %677 = vst [vmem:[%s6062_s27 + $0x8c4] sm:$0xff] %v676_v6  ;;  %679 = vst [vmem:[%s6062_s27 + $0x8cc] sm:$0xff] %v678_v7  ;;  %v682_v9 = vld [vmem:[%s6057_s26 + $0x1188] sm:$0xff]  ;;  %v684_v10 = vld [vmem:[%s6057_s26 + $0x11d0] sm:$0xff] }
  0x9a   : > { %681 = vst [vmem:[%s6062_s27 + $0x8d4] sm:$0xff] %v680_v8  ;;  %683 = vst [vmem:[%s6062_s27 + $0x8dc] sm:$0xff] %v682_v9  ;;  %v686_v11 = vld [vmem:[%s6057_s26 + $0x11d8] sm:$0xff]  ;;  %v688_v12 = vld [vmem:[%s6057_s26 + $0x11e0] sm:$0xff] }
  0x9b   : > { %685 = vst [vmem:[%s6062_s27 + $0x8e8] sm:$0xff] %v684_v10  ;;  %v690_v13 = vld [vmem:[%s6057_s26 + $0x11e8] sm:$0xff]  ;;  %687 = vst [vmem:[%s6062_s27 + $0x8f0] sm:$0xff] %v686_v11  ;;  %v692_v14 = vld [vmem:[%s6057_s26 + $0x11f0] sm:$0xff] }
  0x9c   : > { %689 = vst [vmem:[%s6062_s27 + $0x8f8] sm:$0xff] %v688_v12  ;;  %691 = vst [vmem:[%s6062_s27 + $0x900] sm:$0xff] %v690_v13  ;;  %v694_v15 = vld [vmem:[%s6057_s26 + $0x11f8] sm:$0xff]  ;;  %v696_v16 = vld [vmem:[%s6057_s26 + $0x1200] sm:$0xff] }
  0x9d   : > { %693 = vst [vmem:[%s6062_s27 + $0x908] sm:$0xff] %v692_v14  ;;  %695 = vst [vmem:[%s6062_s27 + $0x910] sm:$0xff] %v694_v15  ;;  %v698_v17 = vld [vmem:[%s6057_s26 + $0x1248] sm:$0xff]  ;;  %v700_v18 = vld [vmem:[%s6057_s26 + $0x1250] sm:$0xff] }
  0x9e   : > { %697 = vst [vmem:[%s6062_s27 + $0x918] sm:$0xff] %v696_v16  ;;  %v702_v19 = vld [vmem:[%s6057_s26 + $0x1258] sm:$0xff]  ;;  %699 = vst [vmem:[%s6062_s27 + $0x924] sm:$0xff] %v698_v17  ;;  %v704_v20 = vld [vmem:[%s6057_s26 + $0x1260] sm:$0xff] }
  0x9f   : > { %701 = vst [vmem:[%s6062_s27 + $0x92c] sm:$0xff] %v700_v18  ;;  %703 = vst [vmem:[%s6062_s27 + $0x934] sm:$0xff] %v702_v19  ;;  %v706_v21 = vld [vmem:[%s6057_s26 + $0x1268] sm:$0xff]  ;;  %v708_v22 = vld [vmem:[%s6057_s26 + $0x1270] sm:$0xff] }
  0xa0   : > { %705 = vst [vmem:[%s6062_s27 + $0x93c] sm:$0xff] %v704_v20  ;;  %707 = vst [vmem:[%s6062_s27 + $0x944] sm:$0xff] %v706_v21  ;;  %v710_v23 = vld [vmem:[%s6057_s26 + $0x1278] sm:$0xff]  ;;  %v712_v24 = vld [vmem:[%s6057_s26 + $0x12c0] sm:$0xff] }
  0xa1   : > { %709 = vst [vmem:[%s6062_s27 + $0x94c] sm:$0xff] %v708_v22  ;;  %v714_v25 = vld [vmem:[%s6057_s26 + $0x12c8] sm:$0xff]  ;;  %711 = vst [vmem:[%s6062_s27 + $0x954] sm:$0xff] %v710_v23  ;;  %v716_v26 = vld [vmem:[%s6057_s26 + $0x12d0] sm:$0xff] }
  0xa2   : > { %713 = vst [vmem:[%s6062_s27 + $0x960] sm:$0xff] %v712_v24  ;;  %715 = vst [vmem:[%s6062_s27 + $0x968] sm:$0xff] %v714_v25  ;;  %v718_v27 = vld [vmem:[%s6057_s26 + $0x12d8] sm:$0xff]  ;;  %v720_v28 = vld [vmem:[%s6057_s26 + $0x12e0] sm:$0xff] }
  0xa3   : > { %717 = vst [vmem:[%s6062_s27 + $0x970] sm:$0xff] %v716_v26  ;;  %719 = vst [vmem:[%s6062_s27 + $0x978] sm:$0xff] %v718_v27  ;;  %v722_v29 = vld [vmem:[%s6057_s26 + $0x12e8] sm:$0xff]  ;;  %v724_v30 = vld [vmem:[%s6057_s26 + $0x12f0] sm:$0xff] }
  0xa4   : > { %721 = vst [vmem:[%s6062_s27 + $0x980] sm:$0xff] %v720_v28  ;;  %v726_v31 = vld [vmem:[%s6057_s26 + $0x1338] sm:$0xff]  ;;  %723 = vst [vmem:[%s6062_s27 + $0x988] sm:$0xff] %v722_v29  ;;  %v728_v32 = vld [vmem:[%s6057_s26 + $0x1340] sm:$0xff] }
  0xa5   : > { %725 = vst [vmem:[%s6062_s27 + $0x990] sm:$0xff] %v724_v30  ;;  %727 = vst [vmem:[%s6062_s27 + $0x99c] sm:$0xff] %v726_v31  ;;  %v730_v33 = vld [vmem:[%s6057_s26 + $0x1348] sm:$0xff]  ;;  %v732_v34 = vld [vmem:[%s6057_s26 + $0x1350] sm:$0xff] }
  0xa6   : > { %729 = vst [vmem:[%s6062_s27 + $0x9a4] sm:$0xff] %v728_v32  ;;  %731 = vst [vmem:[%s6062_s27 + $0x9ac] sm:$0xff] %v730_v33  ;;  %v734_v35 = vld [vmem:[%s6057_s26 + $0x1358] sm:$0xff]  ;;  %v736_v36 = vld [vmem:[%s6057_s26 + $0x1360] sm:$0xff] }
  0xa7   : > { %733 = vst [vmem:[%s6062_s27 + $0x9b4] sm:$0xff] %v732_v34  ;;  %v738_v37 = vld [vmem:[%s6057_s26 + $0x1368] sm:$0xff]  ;;  %735 = vst [vmem:[%s6062_s27 + $0x9bc] sm:$0xff] %v734_v35  ;;  %v740_v38 = vld [vmem:[%s6057_s26 + $0x13b0] sm:$0xff] }
  0xa8   : > { %737 = vst [vmem:[%s6062_s27 + $0x9c4] sm:$0xff] %v736_v36  ;;  %739 = vst [vmem:[%s6062_s27 + $0x9cc] sm:$0xff] %v738_v37  ;;  %v742_v39 = vld [vmem:[%s6057_s26 + $0x13b8] sm:$0xff]  ;;  %v744_v40 = vld [vmem:[%s6057_s26 + $0x13c0] sm:$0xff] }
  0xa9   : > { %741 = vst [vmem:[%s6062_s27 + $0x9d8] sm:$0xff] %v740_v38  ;;  %743 = vst [vmem:[%s6062_s27 + $0x9e0] sm:$0xff] %v742_v39  ;;  %v746_v41 = vld [vmem:[%s6057_s26 + $0x13c8] sm:$0xff]  ;;  %v748_v42 = vld [vmem:[%s6057_s26 + $0x13d0] sm:$0xff] }
  0xaa   : > { %745 = vst [vmem:[%s6062_s27 + $0x9e8] sm:$0xff] %v744_v40  ;;  %v750_v43 = vld [vmem:[%s6057_s26 + $0x13d8] sm:$0xff]  ;;  %747 = vst [vmem:[%s6062_s27 + $0x9f0] sm:$0xff] %v746_v41  ;;  %v752_v44 = vld [vmem:[%s6057_s26 + $0x13e0] sm:$0xff] }
  0xab   : > { %749 = vst [vmem:[%s6062_s27 + $0x9f8] sm:$0xff] %v748_v42  ;;  %751 = vst [vmem:[%s6062_s27 + $0xa00] sm:$0xff] %v750_v43  ;;  %v754_v45 = vld [vmem:[%s6057_s26 + $0x1428] sm:$0xff]  ;;  %v756_v46 = vld [vmem:[%s6057_s26 + $0x1430] sm:$0xff] }
  0xac   : > { %753 = vst [vmem:[%s6062_s27 + $0xa08] sm:$0xff] %v752_v44  ;;  %755 = vst [vmem:[%s6062_s27 + $0xa14] sm:$0xff] %v754_v45  ;;  %v758_v47 = vld [vmem:[%s6057_s26 + $0x1438] sm:$0xff]  ;;  %v760_v48 = vld [vmem:[%s6057_s26 + $0x1440] sm:$0xff] }
  0xad   : > { %757 = vst [vmem:[%s6062_s27 + $0xa1c] sm:$0xff] %v756_v46  ;;  %v762_v49 = vld [vmem:[%s6057_s26 + $0x1448] sm:$0xff]  ;;  %759 = vst [vmem:[%s6062_s27 + $0xa24] sm:$0xff] %v758_v47  ;;  %v764_v50 = vld [vmem:[%s6057_s26 + $0x1450] sm:$0xff] }
  0xae   : > { %761 = vst [vmem:[%s6062_s27 + $0xa2c] sm:$0xff] %v760_v48  ;;  %763 = vst [vmem:[%s6062_s27 + $0xa34] sm:$0xff] %v762_v49  ;;  %v766_v51 = vld [vmem:[%s6057_s26 + $0x1458] sm:$0xff]  ;;  %v768_v52 = vld [vmem:[%s6057_s26 + $0x14a0] sm:$0xff] }
  0xaf   : > { %765 = vst [vmem:[%s6062_s27 + $0xa3c] sm:$0xff] %v764_v50  ;;  %767 = vst [vmem:[%s6062_s27 + $0xa44] sm:$0xff] %v766_v51  ;;  %v770_v53 = vld [vmem:[%s6057_s26 + $0x14a8] sm:$0xff]  ;;  %v772_v54 = vld [vmem:[%s6057_s26 + $0x14b0] sm:$0xff] }
  0xb0   : > { %769 = vst [vmem:[%s6062_s27 + $0xa50] sm:$0xff] %v768_v52  ;;  %v774_v55 = vld [vmem:[%s6057_s26 + $0x14b8] sm:$0xff]  ;;  %771 = vst [vmem:[%s6062_s27 + $0xa58] sm:$0xff] %v770_v53  ;;  %v776_v56 = vld [vmem:[%s6057_s26 + $0x14c0] sm:$0xff] }
  0xb1   : > { %773 = vst [vmem:[%s6062_s27 + $0xa60] sm:$0xff] %v772_v54  ;;  %775 = vst [vmem:[%s6062_s27 + $0xa68] sm:$0xff] %v774_v55  ;;  %v778_v57 = vld [vmem:[%s6057_s26 + $0x14c8] sm:$0xff]  ;;  %v780_v58 = vld [vmem:[%s6057_s26 + $0x14d0] sm:$0xff] }
  0xb2   : > { %777 = vst [vmem:[%s6062_s27 + $0xa70] sm:$0xff] %v776_v56  ;;  %779 = vst [vmem:[%s6062_s27 + $0xa78] sm:$0xff] %v778_v57  ;;  %v782_v59 = vld [vmem:[%s6057_s26 + $0x1518] sm:$0xff]  ;;  %v784_v60 = vld [vmem:[%s6057_s26 + $0x1520] sm:$0xff] }
  0xb3   : > { %781 = vst [vmem:[%s6062_s27 + $0xa80] sm:$0xff] %v780_v58  ;;  %v786_v61 = vld [vmem:[%s6057_s26 + $0x1528] sm:$0xff]  ;;  %783 = vst [vmem:[%s6062_s27 + $0xa8c] sm:$0xff] %v782_v59  ;;  %v788_v62 = vld [vmem:[%s6057_s26 + $0x1530] sm:$0xff] }
  0xb4   : > { %785 = vst [vmem:[%s6062_s27 + $0xa94] sm:$0xff] %v784_v60  ;;  %787 = vst [vmem:[%s6062_s27 + $0xa9c] sm:$0xff] %v786_v61  ;;  %v790_v63 = vld [vmem:[%s6057_s26 + $0x1538] sm:$0xff]  ;;  %v792_v0 = vld [vmem:[%s6057_s26 + $0x1540] sm:$0xff] }
  0xb5   : > { %789 = vst [vmem:[%s6062_s27 + $0xaa4] sm:$0xff] %v788_v62  ;;  %791 = vst [vmem:[%s6062_s27 + $0xaac] sm:$0xff] %v790_v63  ;;  %v794_v1 = vld [vmem:[%s6057_s26 + $0x1548] sm:$0xff]  ;;  %v796_v2 = vld [vmem:[%s6057_s26 + $0x1590] sm:$0xff] }
  0xb6   : > { %793 = vst [vmem:[%s6062_s27 + $0xab4] sm:$0xff] %v792_v0  ;;  %v798_v3 = vld [vmem:[%s6057_s26 + $0x1598] sm:$0xff]  ;;  %795 = vst [vmem:[%s6062_s27 + $0xabc] sm:$0xff] %v794_v1  ;;  %v800_v4 = vld [vmem:[%s6057_s26 + $0x15a0] sm:$0xff] }
  0xb7   : > { %797 = vst [vmem:[%s6062_s27 + $0xac8] sm:$0xff] %v796_v2  ;;  %799 = vst [vmem:[%s6062_s27 + $0xad0] sm:$0xff] %v798_v3  ;;  %v802_v5 = vld [vmem:[%s6057_s26 + $0x15a8] sm:$0xff]  ;;  %v804_v6 = vld [vmem:[%s6057_s26 + $0x15b0] sm:$0xff] }
  0xb8   : > { %801 = vst [vmem:[%s6062_s27 + $0xad8] sm:$0xff] %v800_v4  ;;  %803 = vst [vmem:[%s6062_s27 + $0xae0] sm:$0xff] %v802_v5  ;;  %v806_v7 = vld [vmem:[%s6057_s26 + $0x15b8] sm:$0xff]  ;;  %v808_v8 = vld [vmem:[%s6057_s26 + $0x15c0] sm:$0xff] }
  0xb9   : > { %805 = vst [vmem:[%s6062_s27 + $0xae8] sm:$0xff] %v804_v6  ;;  %v810_v9 = vld [vmem:[%s6057_s26 + $0x1608] sm:$0xff]  ;;  %807 = vst [vmem:[%s6062_s27 + $0xaf0] sm:$0xff] %v806_v7  ;;  %v812_v10 = vld [vmem:[%s6057_s26 + $0x1610] sm:$0xff] }
  0xba   : > { %809 = vst [vmem:[%s6062_s27 + $0xaf8] sm:$0xff] %v808_v8  ;;  %811 = vst [vmem:[%s6062_s27 + $0xb04] sm:$0xff] %v810_v9  ;;  %v814_v11 = vld [vmem:[%s6057_s26 + $0x1618] sm:$0xff]  ;;  %v816_v12 = vld [vmem:[%s6057_s26 + $0x1620] sm:$0xff] }
  0xbb   : > { %813 = vst [vmem:[%s6062_s27 + $0xb0c] sm:$0xff] %v812_v10  ;;  %815 = vst [vmem:[%s6062_s27 + $0xb14] sm:$0xff] %v814_v11  ;;  %v818_v13 = vld [vmem:[%s6057_s26 + $0x1628] sm:$0xff]  ;;  %v820_v14 = vld [vmem:[%s6057_s26 + $0x1630] sm:$0xff] }
  0xbc   : > { %817 = vst [vmem:[%s6062_s27 + $0xb1c] sm:$0xff] %v816_v12  ;;  %v822_v15 = vld [vmem:[%s6057_s26 + $0x1638] sm:$0xff]  ;;  %819 = vst [vmem:[%s6062_s27 + $0xb24] sm:$0xff] %v818_v13  ;;  %v824_v16 = vld [vmem:[%s6057_s26 + $0x1680] sm:$0xff] }
  0xbd   : > { %821 = vst [vmem:[%s6062_s27 + $0xb2c] sm:$0xff] %v820_v14  ;;  %823 = vst [vmem:[%s6062_s27 + $0xb34] sm:$0xff] %v822_v15  ;;  %v826_v17 = vld [vmem:[%s6057_s26 + $0x1688] sm:$0xff]  ;;  %v828_v18 = vld [vmem:[%s6057_s26 + $0x1690] sm:$0xff] }
  0xbe   : > { %825 = vst [vmem:[%s6062_s27 + $0xb40] sm:$0xff] %v824_v16  ;;  %827 = vst [vmem:[%s6062_s27 + $0xb48] sm:$0xff] %v826_v17  ;;  %v830_v19 = vld [vmem:[%s6057_s26 + $0x1698] sm:$0xff]  ;;  %v832_v20 = vld [vmem:[%s6057_s26 + $0x16a0] sm:$0xff] }
  0xbf   : > { %829 = vst [vmem:[%s6062_s27 + $0xb50] sm:$0xff] %v828_v18  ;;  %v834_v21 = vld [vmem:[%s6057_s26 + $0x16a8] sm:$0xff]  ;;  %831 = vst [vmem:[%s6062_s27 + $0xb58] sm:$0xff] %v830_v19  ;;  %v836_v22 = vld [vmem:[%s6057_s26 + $0x16b0] sm:$0xff] }
  0xc0   : > { %833 = vst [vmem:[%s6062_s27 + $0xb60] sm:$0xff] %v832_v20  ;;  %835 = vst [vmem:[%s6062_s27 + $0xb68] sm:$0xff] %v834_v21  ;;  %v838_v23 = vld [vmem:[%s6057_s26 + $0x16f8] sm:$0xff]  ;;  %v840_v24 = vld [vmem:[%s6057_s26 + $0x1700] sm:$0xff] }
  0xc1   : > { %837 = vst [vmem:[%s6062_s27 + $0xb70] sm:$0xff] %v836_v22  ;;  %839 = vst [vmem:[%s6062_s27 + $0xb7c] sm:$0xff] %v838_v23  ;;  %v842_v25 = vld [vmem:[%s6057_s26 + $0x1708] sm:$0xff]  ;;  %v844_v26 = vld [vmem:[%s6057_s26 + $0x1710] sm:$0xff] }
  0xc2   : > { %841 = vst [vmem:[%s6062_s27 + $0xb84] sm:$0xff] %v840_v24  ;;  %v846_v27 = vld [vmem:[%s6057_s26 + $0x1718] sm:$0xff]  ;;  %843 = vst [vmem:[%s6062_s27 + $0xb8c] sm:$0xff] %v842_v25  ;;  %v848_v28 = vld [vmem:[%s6057_s26 + $0x1720] sm:$0xff] }
  0xc3   : > { %845 = vst [vmem:[%s6062_s27 + $0xb94] sm:$0xff] %v844_v26  ;;  %847 = vst [vmem:[%s6062_s27 + $0xb9c] sm:$0xff] %v846_v27  ;;  %v850_v29 = vld [vmem:[%s6057_s26 + $0x1728] sm:$0xff]  ;;  %v4655_v30 = vld [vmem:[%s6057_s26 + $0x38] sm:$0xf] }
  0xc4   : > { %849 = vst [vmem:[%s6062_s27 + $0xba4] sm:$0xff] %v848_v28  ;;  %851 = vst [vmem:[%s6062_s27 + $0xbac] sm:$0xff] %v850_v29  ;;  %v4657_v31 = vld [vmem:[%s6057_s26 + $0xb0] sm:$0xf]  ;;  %v4659_v32 = vld [vmem:[%s6057_s26 + $0x128] sm:$0xf] }
  0xc5   : > { %4656 = vst [vmem:[%s6062_s27 + $0x38] sm:$0xf] %v4655_v30  ;;  %v4661_v33 = vld [vmem:[%s6057_s26 + $0x1a0] sm:$0xf]  ;;  %4658 = vst [vmem:[%s6062_s27 + $0x74] sm:$0xf] %v4657_v31 }
  0xc6   : > { %4660 = vst [vmem:[%s6062_s27 + $0xb0] sm:$0xf] %v4659_v32  ;;  %4662 = vst [vmem:[%s6062_s27 + $0xec] sm:$0xf] %v4661_v33  ;;  %v4663_v34 = vld [vmem:[%s6057_s26 + $0x218] sm:$0xf] }
  0xc7   : > { %v4665_v35 = vld [vmem:[%s6057_s26 + $0x290] sm:$0xf]  ;;  %v4667_v36 = vld [vmem:[%s6057_s26 + $0x308] sm:$0xf]  ;;  %4664 = vst [vmem:[%s6062_s27 + $0x128] sm:$0xf] %v4663_v34 }
  0xc8   : > { %4666 = vst [vmem:[%s6062_s27 + $0x164] sm:$0xf] %v4665_v35  ;;  %4668 = vst [vmem:[%s6062_s27 + $0x1a0] sm:$0xf] %v4667_v36  ;;  %v4669_v37 = vld [vmem:[%s6057_s26 + $0x380] sm:$0xf] }
  0xc9   : > { %v4671_v38 = vld [vmem:[%s6057_s26 + $0x3f8] sm:$0xf]  ;;  %v4673_v39 = vld [vmem:[%s6057_s26 + $0x470] sm:$0xf]  ;;  %4670 = vst [vmem:[%s6062_s27 + $0x1dc] sm:$0xf] %v4669_v37 }
  0xca   : > { %4672 = vst [vmem:[%s6062_s27 + $0x218] sm:$0xf] %v4671_v38  ;;  %4674 = vst [vmem:[%s6062_s27 + $0x254] sm:$0xf] %v4673_v39  ;;  %v4675_v40 = vld [vmem:[%s6057_s26 + $0x4e8] sm:$0xf] }
  0xcb   : > { %v4677_v41 = vld [vmem:[%s6057_s26 + $0x560] sm:$0xf]  ;;  %v4679_v42 = vld [vmem:[%s6057_s26 + $0x5d8] sm:$0xf]  ;;  %4676 = vst [vmem:[%s6062_s27 + $0x290] sm:$0xf] %v4675_v40 }
  0xcc   : > { %4678 = vst [vmem:[%s6062_s27 + $0x2cc] sm:$0xf] %v4677_v41  ;;  %4680 = vst [vmem:[%s6062_s27 + $0x308] sm:$0xf] %v4679_v42  ;;  %v4681_v43 = vld [vmem:[%s6057_s26 + $0x650] sm:$0xf] }
  0xcd   : > { %v4683_v44 = vld [vmem:[%s6057_s26 + $0x6c8] sm:$0xf]  ;;  %v4685_v45 = vld [vmem:[%s6057_s26 + $0x740] sm:$0xf]  ;;  %4682 = vst [vmem:[%s6062_s27 + $0x344] sm:$0xf] %v4681_v43 }
  0xce   : > { %4684 = vst [vmem:[%s6062_s27 + $0x380] sm:$0xf] %v4683_v44  ;;  %4686 = vst [vmem:[%s6062_s27 + $0x3bc] sm:$0xf] %v4685_v45  ;;  %v4687_v46 = vld [vmem:[%s6057_s26 + $0x7b8] sm:$0xf] }
  0xcf   : > { %v4689_v47 = vld [vmem:[%s6057_s26 + $0x830] sm:$0xf]  ;;  %v4691_v48 = vld [vmem:[%s6057_s26 + $0x8a8] sm:$0xf]  ;;  %4688 = vst [vmem:[%s6062_s27 + $0x3f8] sm:$0xf] %v4687_v46 }
  0xd0   : > { %4690 = vst [vmem:[%s6062_s27 + $0x434] sm:$0xf] %v4689_v47  ;;  %4692 = vst [vmem:[%s6062_s27 + $0x470] sm:$0xf] %v4691_v48  ;;  %v4693_v49 = vld [vmem:[%s6057_s26 + $0x920] sm:$0xf] }
  0xd1   : > { %v4695_v50 = vld [vmem:[%s6057_s26 + $0x998] sm:$0xf]  ;;  %v4697_v51 = vld [vmem:[%s6057_s26 + $0xa10] sm:$0xf]  ;;  %4694 = vst [vmem:[%s6062_s27 + $0x4ac] sm:$0xf] %v4693_v49 }
  0xd2   : > { %4696 = vst [vmem:[%s6062_s27 + $0x4e8] sm:$0xf] %v4695_v50  ;;  %4698 = vst [vmem:[%s6062_s27 + $0x524] sm:$0xf] %v4697_v51  ;;  %v4699_v52 = vld [vmem:[%s6057_s26 + $0xa88] sm:$0xf] }
  0xd3   : > { %v4701_v53 = vld [vmem:[%s6057_s26 + $0xb00] sm:$0xf]  ;;  %v4703_v54 = vld [vmem:[%s6057_s26 + $0xb78] sm:$0xf]  ;;  %4700 = vst [vmem:[%s6062_s27 + $0x560] sm:$0xf] %v4699_v52 }
  0xd4   : > { %4702 = vst [vmem:[%s6062_s27 + $0x59c] sm:$0xf] %v4701_v53  ;;  %4704 = vst [vmem:[%s6062_s27 + $0x5d8] sm:$0xf] %v4703_v54  ;;  %v4705_v55 = vld [vmem:[%s6057_s26 + $0xbf0] sm:$0xf] }
  0xd5   : > { %v4707_v56 = vld [vmem:[%s6057_s26 + $0xc68] sm:$0xf]  ;;  %v4709_v57 = vld [vmem:[%s6057_s26 + $0xce0] sm:$0xf]  ;;  %4706 = vst [vmem:[%s6062_s27 + $0x614] sm:$0xf] %v4705_v55 }
  0xd6   : > { %4708 = vst [vmem:[%s6062_s27 + $0x650] sm:$0xf] %v4707_v56  ;;  %4710 = vst [vmem:[%s6062_s27 + $0x68c] sm:$0xf] %v4709_v57  ;;  %v4711_v58 = vld [vmem:[%s6057_s26 + $0xd58] sm:$0xf] }
  0xd7   : > { %v4713_v59 = vld [vmem:[%s6057_s26 + $0xdd0] sm:$0xf]  ;;  %v4715_v60 = vld [vmem:[%s6057_s26 + $0xe48] sm:$0xf]  ;;  %4712 = vst [vmem:[%s6062_s27 + $0x6c8] sm:$0xf] %v4711_v58 }
  0xd8   : > { %4714 = vst [vmem:[%s6062_s27 + $0x704] sm:$0xf] %v4713_v59  ;;  %4716 = vst [vmem:[%s6062_s27 + $0x740] sm:$0xf] %v4715_v60  ;;  %v4717_v61 = vld [vmem:[%s6057_s26 + $0xec0] sm:$0xf] }
  0xd9   : > { %v4719_v62 = vld [vmem:[%s6057_s26 + $0xf38] sm:$0xf]  ;;  %v4721_v63 = vld [vmem:[%s6057_s26 + $0xfb0] sm:$0xf]  ;;  %4718 = vst [vmem:[%s6062_s27 + $0x77c] sm:$0xf] %v4717_v61 }
  0xda   : > { %4720 = vst [vmem:[%s6062_s27 + $0x7b8] sm:$0xf] %v4719_v62  ;;  %4722 = vst [vmem:[%s6062_s27 + $0x7f4] sm:$0xf] %v4721_v63  ;;  %v4723_v0 = vld [vmem:[%s6057_s26 + $0x1028] sm:$0xf] }
  0xdb   : > { %v4725_v1 = vld [vmem:[%s6057_s26 + $0x10a0] sm:$0xf]  ;;  %v4727_v2 = vld [vmem:[%s6057_s26 + $0x1118] sm:$0xf]  ;;  %4724 = vst [vmem:[%s6062_s27 + $0x830] sm:$0xf] %v4723_v0 }
  0xdc   : > { %4726 = vst [vmem:[%s6062_s27 + $0x86c] sm:$0xf] %v4725_v1  ;;  %4728 = vst [vmem:[%s6062_s27 + $0x8a8] sm:$0xf] %v4727_v2  ;;  %v4729_v3 = vld [vmem:[%s6057_s26 + $0x1190] sm:$0xf] }
  0xdd   : > { %v4731_v4 = vld [vmem:[%s6057_s26 + $0x1208] sm:$0xf]  ;;  %v4733_v5 = vld [vmem:[%s6057_s26 + $0x1280] sm:$0xf]  ;;  %4730 = vst [vmem:[%s6062_s27 + $0x8e4] sm:$0xf] %v4729_v3 }
  0xde   : > { %4732 = vst [vmem:[%s6062_s27 + $0x920] sm:$0xf] %v4731_v4  ;;  %4734 = vst [vmem:[%s6062_s27 + $0x95c] sm:$0xf] %v4733_v5  ;;  %v4735_v6 = vld [vmem:[%s6057_s26 + $0x12f8] sm:$0xf] }
  0xdf   : > { %v4737_v7 = vld [vmem:[%s6057_s26 + $0x1370] sm:$0xf]  ;;  %v4739_v8 = vld [vmem:[%s6057_s26 + $0x13e8] sm:$0xf]  ;;  %4736 = vst [vmem:[%s6062_s27 + $0x998] sm:$0xf] %v4735_v6 }
  0xe0   : > { %4738 = vst [vmem:[%s6062_s27 + $0x9d4] sm:$0xf] %v4737_v7  ;;  %4740 = vst [vmem:[%s6062_s27 + $0xa10] sm:$0xf] %v4739_v8  ;;  %v4741_v9 = vld [vmem:[%s6057_s26 + $0x1460] sm:$0xf] }
  0xe1   : > { %v4743_v10 = vld [vmem:[%s6057_s26 + $0x14d8] sm:$0xf]  ;;  %v4745_v11 = vld [vmem:[%s6057_s26 + $0x1550] sm:$0xf]  ;;  %4742 = vst [vmem:[%s6062_s27 + $0xa4c] sm:$0xf] %v4741_v9 }
  0xe2   : > { %4744 = vst [vmem:[%s6062_s27 + $0xa88] sm:$0xf] %v4743_v10  ;;  %4746 = vst [vmem:[%s6062_s27 + $0xac4] sm:$0xf] %v4745_v11  ;;  %v4747_v12 = vld [vmem:[%s6057_s26 + $0x15c8] sm:$0xf] }
  0xe3   : > { %v4749_v13 = vld [vmem:[%s6057_s26 + $0x1640] sm:$0xf]  ;;  %v4751_v14 = vld [vmem:[%s6057_s26 + $0x16b8] sm:$0xf]  ;;  %4748 = vst [vmem:[%s6062_s27 + $0xb00] sm:$0xf] %v4747_v12 }
  0xe4   : > { %4750 = vst [vmem:[%s6062_s27 + $0xb3c] sm:$0xf] %v4749_v13  ;;  %4752 = vst [vmem:[%s6062_s27 + $0xb78] sm:$0xf] %v4751_v14  ;;  %v4753_v15 = vld [vmem:[%s6057_s26 + $0x1730] sm:$0xf] }
  0xe5   : > { %4754 = vst [vmem:[%s6062_s27 + $0xbb4] sm:$0xf] %v4753_v15 }
  0xe6 PF: > { %p4755_p7 = scmp.ge.s32.totalorder %s5994_s14, 1  ;;  %p963_p8 = scmp.lt.s32.totalorder %s5994_s14, 3 }
  0xe8   : > { %p964_p9 = pnand %p4755_p7, %p963_p8 }
  0xe9   : > { %s970_s28 = sand.u32 (!%p964_p9), 1, %s5986_s12   ;;  %v6867_v16 = vld [vmem:[%s7616_s0 + $0x4] ss:$16 sps:$4 sm:$0xff] (!%p964_p9)   ;;  %v5996_v11 = vmov (!%p964_p9), 0   ;;  %vm3365_vm0 = vcmask (!%p964_p9), 130048  }
  0xea   : > { %967 = sbr.rel (%p964_p9) target bundleno = 877 (0x36d), region = 54  ;;  %3404 = vmatprep.mubr.bf16.mxu0 (!%p964_p9), %v6867_v16  ;;  %3510 = vmatprep.mubr.bf16.mxu1 (!%p964_p9), %v6867_v16 }
  0xeb   : > { %s5373_s4 = smul.u32 (!%p964_p9), 3000, %s970_s28  ;;  %5400 = vset.pattern.permute.xlu0 (!%p964_p9), %v5996_v11  ;;  %5401 = vset.pattern.permute.xlu1 (!%p964_p9), %v5996_v11 }
  0xec   : > { %s7352_s8 = smul.u32 (!%p964_p9), 240, %s970_s28 }
  0xed   : > { %s6873_s5 = scalar_lea.vmem (!%p964_p9), [#allocation2], %s5373_s4 }
  0xee   : > { %v5402_v17 = vld [vmem:[%s6873_s5 + $0x4] ss:$60 sps:$4 sm:$0xff] (!%p964_p9)   ;;  %v5404_v18 = vld [vmem:[%s6873_s5 + $0xc] ss:$60 sps:$4 sm:$0xff] (!%p964_p9)   ;;  %v5408_v21 = vld [vmem:[%s6873_s5 + $0x7c] ss:$60 sps:$4 sm:$0xff] (!%p964_p9)  }
  0xef   : > { %3372 = vmatprep.subr.bf16.mxu0 (!%p964_p9), %v5402_v17  ;;  %v5406_v19 = vld [vmem:[%s6873_s5] ss:$60 sps:$4 sm:$0xff] (!%p964_p9)   ;;  %v5407_v20 = vld [vmem:[%s6873_s5 + $0x8] ss:$60 sps:$4 sm:$0xff] (!%p964_p9)   ;;  %3478 = vmatprep.subr.bf16.mxu1 (!%p964_p9), %v5404_v18  ;;  %v5412_v23 = vld [vmem:[%s6873_s5 + $0x78] ss:$60 sps:$4 sm:$0xff] (!%p964_p9)  }
  0xf0   : > { %3373 = vmatpush1.bf16.msra.mxu0 (!%p964_p9), %v5406_v19  ;;  %3479 = vmatpush1.bf16.msra.mxu1 (!%p964_p9), %v5407_v20  ;;  %v5410_v22 = vld [vmem:[%s6873_s5 + $0x84] ss:$60 sps:$4 sm:$0xff] (!%p964_p9)   ;;  %v5414_v25 = vld [vmem:[%s6873_s5 + $0xf4] ss:$60 sps:$4 sm:$0xff] (!%p964_p9)   ;;  %v5416_v26 = vld [vmem:[%s6873_s5 + $0xfc] ss:$60 sps:$4 sm:$0xff] (!%p964_p9)  }
  0xf1   : > { %3374 = vmatprep.subr.bf16.mxu0 %v5408_v21  ;;  %v5413_v24 = vld [vmem:[%s6873_s5 + $0x80] ss:$60 sps:$4 sm:$0xff]   ;;  %3480 = vmatprep.subr.bf16.mxu1 %v5410_v22  ;;  %v5418_v27 = vld [vmem:[%s6873_s5 + $0xf0] ss:$60 sps:$4 sm:$0xff]   ;;  %v5419_v28 = vld [vmem:[%s6873_s5 + $0xf8] ss:$60 sps:$4 sm:$0xff]  }
  0xf2   : > { %v5420_v29 = vld [vmem:[%s6873_s5 + $0x16c] ss:$60 sps:$4 sm:$0xff]   ;;  %v5422_v30 = vld [vmem:[%s6873_s5 + $0x174] ss:$60 sps:$4 sm:$0xff]   ;;  %v5426_v33 = vld [vmem:[%s6873_s5 + $0x1e4] ss:$60 sps:$4 sm:$0xff]  }
  0xf3   : > { %v5424_v31 = vld [vmem:[%s6873_s5 + $0x168] ss:$60 sps:$4 sm:$0xff]   ;;  %v5425_v32 = vld [vmem:[%s6873_s5 + $0x170] ss:$60 sps:$4 sm:$0xff]   ;;  %v5430_v35 = vld [vmem:[%s6873_s5 + $0x1e0] ss:$60 sps:$4 sm:$0xff]  }
  0xf4   : > { %3375 = vmatpush1.bf16.msra.mxu0 %v5412_v23  ;;  %3481 = vmatpush1.bf16.msra.mxu1 %v5413_v24  ;;  %v5428_v34 = vld [vmem:[%s6873_s5 + $0x1ec] ss:$60 sps:$4 sm:$0xff]   ;;  %v5432_v37 = vld [vmem:[%s6873_s5 + $0x25c] ss:$60 sps:$4 sm:$0xff]   ;;  %v5434_v38 = vld [vmem:[%s6873_s5 + $0x264] ss:$60 sps:$4 sm:$0xff]  }
  0xf5   : > { %3376 = vmatprep.subr.bf16.mxu0 %v5414_v25  ;;  %3482 = vmatprep.subr.bf16.mxu1 %v5416_v26  ;;  %v5431_v36 = vld [vmem:[%s6873_s5 + $0x1e8] ss:$60 sps:$4 sm:$0xff]   ;;  %v5436_v39 = vld [vmem:[%s6873_s5 + $0x258] ss:$60 sps:$4 sm:$0xff]   ;;  %v5437_v40 = vld [vmem:[%s6873_s5 + $0x260] ss:$60 sps:$4 sm:$0xff]  }
  0xf6   : > { %v5438_v41 = vld [vmem:[%s6873_s5 + $0x2d4] ss:$60 sps:$4 sm:$0xff]   ;;  %v5440_v42 = vld [vmem:[%s6873_s5 + $0x2dc] ss:$60 sps:$4 sm:$0xff]   ;;  %v5444_v45 = vld [vmem:[%s6873_s5 + $0x34c] ss:$60 sps:$4 sm:$0xff]  }
  0xf7   : > { %v5442_v43 = vld [vmem:[%s6873_s5 + $0x2d0] ss:$60 sps:$4 sm:$0xff]   ;;  %v5443_v44 = vld [vmem:[%s6873_s5 + $0x2d8] ss:$60 sps:$4 sm:$0xff]   ;;  %v5448_v47 = vld [vmem:[%s6873_s5 + $0x348] ss:$60 sps:$4 sm:$0xff]  }
  0xf8   : > { %3377 = vmatpush1.bf16.msra.mxu0 %v5418_v27  ;;  %3483 = vmatpush1.bf16.msra.mxu1 %v5419_v28  ;;  %v5446_v46 = vld [vmem:[%s6873_s5 + $0x354] ss:$60 sps:$4 sm:$0xff]   ;;  %v5450_v49 = vld [vmem:[%s6873_s5 + $0x3c4] ss:$60 sps:$4 sm:$0xff]   ;;  %v5452_v50 = vld [vmem:[%s6873_s5 + $0x3cc] ss:$60 sps:$4 sm:$0xff]  }
  0xf9   : > { %3378 = vmatprep.subr.bf16.mxu0 %v5420_v29  ;;  %3484 = vmatprep.subr.bf16.mxu1 %v5422_v30  ;;  %v5449_v48 = vld [vmem:[%s6873_s5 + $0x350] ss:$60 sps:$4 sm:$0xff]   ;;  %v5454_v51 = vld [vmem:[%s6873_s5 + $0x3c0] ss:$60 sps:$4 sm:$0xff]   ;;  %v5455_v52 = vld [vmem:[%s6873_s5 + $0x3c8] ss:$60 sps:$4 sm:$0xff]  }
  0xfa   : > { %v5456_v53 = vld [vmem:[%s6873_s5 + $0x43c] ss:$60 sps:$4 sm:$0xff]   ;;  %v5458_v54 = vld [vmem:[%s6873_s5 + $0x444] ss:$60 sps:$4 sm:$0xff]   ;;  %v5462_v57 = vld [vmem:[%s6873_s5 + $0x4b4] ss:$60 sps:$4 sm:$0xff]  }
  0xfb   : > { %v5460_v55 = vld [vmem:[%s6873_s5 + $0x438] ss:$60 sps:$4 sm:$0xff]   ;;  %v5461_v56 = vld [vmem:[%s6873_s5 + $0x440] ss:$60 sps:$4 sm:$0xff]   ;;  %v5466_v59 = vld [vmem:[%s6873_s5 + $0x4b0] ss:$60 sps:$4 sm:$0xff]  }
  0xfc   : > { %3379 = vmatpush1.bf16.msra.mxu0 %v5424_v31  ;;  %3485 = vmatpush1.bf16.msra.mxu1 %v5425_v32  ;;  %v5464_v58 = vld [vmem:[%s6873_s5 + $0x4bc] ss:$60 sps:$4 sm:$0xff]   ;;  %v5468_v61 = vld [vmem:[%s6873_s5 + $0x52c] ss:$60 sps:$4 sm:$0xff]   ;;  %v5470_v62 = vld [vmem:[%s6873_s5 + $0x534] ss:$60 sps:$4 sm:$0xff]  }
  0xfd   : > { %3380 = vmatprep.subr.bf16.mxu0 %v5426_v33  ;;  %3486 = vmatprep.subr.bf16.mxu1 %v5428_v34  ;;  %v5467_v60 = vld [vmem:[%s6873_s5 + $0x4b8] ss:$60 sps:$4 sm:$0xff]   ;;  %v5472_v63 = vld [vmem:[%s6873_s5 + $0x528] ss:$60 sps:$4 sm:$0xff]   ;;  %v5473_v0 = vld [vmem:[%s6873_s5 + $0x530] ss:$60 sps:$4 sm:$0xff]  }
  0xfe   : > { %v5474_v1 = vld [vmem:[%s6873_s5 + $0x5a4] ss:$60 sps:$4 sm:$0xff]   ;;  %v5476_v2 = vld [vmem:[%s6873_s5 + $0x5ac] ss:$60 sps:$4 sm:$0xff]   ;;  %v5480_v5 = vld [vmem:[%s6873_s5 + $0x61c] ss:$60 sps:$4 sm:$0xff]  }
  0xff   : > { %v5478_v3 = vld [vmem:[%s6873_s5 + $0x5a0] ss:$60 sps:$4 sm:$0xff]   ;;  %v5479_v4 = vld [vmem:[%s6873_s5 + $0x5a8] ss:$60 sps:$4 sm:$0xff]   ;;  %v5484_v7 = vld [vmem:[%s6873_s5 + $0x618] ss:$60 sps:$4 sm:$0xff]  }
 0x100   : > { %3381 = vmatpush1.bf16.msra.mxu0 %v5430_v35  ;;  %3487 = vmatpush1.bf16.msra.mxu1 %v5431_v36  ;;  %v5482_v6 = vld [vmem:[%s6873_s5 + $0x624] ss:$60 sps:$4 sm:$0xff]   ;;  %v5486_v9 = vld [vmem:[%s6873_s5 + $0x694] ss:$60 sps:$4 sm:$0xff]   ;;  %v5488_v10 = vld [vmem:[%s6873_s5 + $0x69c] ss:$60 sps:$4 sm:$0xff]  }
 0x101   : > { %3382 = vmatprep.subr.bf16.mxu0 %v5432_v37  ;;  %3488 = vmatprep.subr.bf16.mxu1 %v5434_v38  ;;  %v5485_v8 = vld [vmem:[%s6873_s5 + $0x620] ss:$60 sps:$4 sm:$0xff]   ;;  %v5490_v12 = vld [vmem:[%s6873_s5 + $0x690] ss:$60 sps:$4 sm:$0xff]   ;;  %v5491_v13 = vld [vmem:[%s6873_s5 + $0x698] ss:$60 sps:$4 sm:$0xff]  }
 0x102   : > { %v5492_v14 = vld [vmem:[%s6873_s5 + $0x70c] ss:$60 sps:$4 sm:$0xff]   ;;  %v5494_v15 = vld [vmem:[%s6873_s5 + $0x714] ss:$60 sps:$4 sm:$0xff]   ;;  %v5502_v19 = vld [vmem:[%s6873_s5 + $0x784] ss:$60 sps:$4 sm:$0xff]  }
 0x103   : > { %v5496_v17 = vld [vmem:[%s6873_s5 + $0x708] ss:$60 sps:$4 sm:$0xff]   ;;  %v5497_v18 = vld [vmem:[%s6873_s5 + $0x710] ss:$60 sps:$4 sm:$0xff]   ;;  %v5500_v22 = vld [vmem:[%s6873_s5 + $0x780] ss:$60 sps:$4 sm:$0xff]  }
 0x104   : > { %3383 = vmatpush1.bf16.msra.mxu0 %v5436_v39  ;;  %3489 = vmatpush1.bf16.msra.mxu1 %v5437_v40  ;;  %v5505_v20 = vld [vmem:[%s6873_s5 + $0x78c] ss:$60 sps:$4 sm:$0xff]   ;;  %v5509_v24 = vld [vmem:[%s6873_s5 + $0x7fc] ss:$60 sps:$4 sm:$0xff]   ;;  %v5512_v25 = vld [vmem:[%s6873_s5 + $0x804] ss:$60 sps:$4 sm:$0xff]  }
 0x105   : > { %3384 = vmatprep.subr.bf16.mxu0 %v5438_v41  ;;  %3490 = vmatprep.subr.bf16.mxu1 %v5440_v42  ;;  %v6946_v21 = vld [vmem:[%s7616_s0] ss:$16 sps:$4 sm:$0xff]   ;;  %v6955_v26 = vld [vmem:[%s7616_s0 + $0x24] ss:$16 sps:$4 sm:$0xff]   ;;  %v6977_v36 = vld [vmem:[%s7616_s0 + $0xc] ss:$16 sps:$4 sm:$0xff]  }
 0x106   : > { %v5503_v23 = vld [vmem:[%s6873_s5 + $0x788] ss:$60 sps:$4 sm:$0xff]   ;;  %v5507_v27 = vld [vmem:[%s6873_s5 + $0x7f8] ss:$60 sps:$4 sm:$0xff]   ;;  %v5510_v28 = vld [vmem:[%s6873_s5 + $0x800] ss:$60 sps:$4 sm:$0xff]  }
 0x107   : > { %v5515_v29 = vld [vmem:[%s6873_s5 + $0x874] ss:$60 sps:$4 sm:$0xff]   ;;  %v5518_v30 = vld [vmem:[%s6873_s5 + $0x87c] ss:$60 sps:$4 sm:$0xff]   ;;  %v5521_v34 = vld [vmem:[%s6873_s5 + $0x8ec] ss:$60 sps:$4 sm:$0xff]  }
 0x108   : > { %3385 = vmatpush1.bf16.msra.mxu0 %v5442_v43  ;;  %3491 = vmatpush1.bf16.msra.mxu1 %v5443_v44  ;;  %v6968_v31 = vld [vmem:[%s7616_s0 + $0x20] ss:$16 sps:$4 sm:$0xff]   ;;  %s7371_s12 = scalar_lea.vmem [#allocation3], %s7352_s8  ;;  %s5231_s28 = smul.u32 (%p6047_p5), 60, %s4650_s15 }
 0x109   : > { %3386 = vmatprep.subr.bf16.mxu0 %v5444_v45  ;;  %3492 = vmatprep.subr.bf16.mxu1 %v5446_v46  ;;  %v5513_v32 = vld [vmem:[%s6873_s5 + $0x870] ss:$60 sps:$4 sm:$0xff]   ;;  %v5516_v33 = vld [vmem:[%s6873_s5 + $0x878] ss:$60 sps:$4 sm:$0xff]   ;;  %v5519_v37 = vld [vmem:[%s6873_s5 + $0x8e8] ss:$60 sps:$4 sm:$0xff]  }
 0x10a   : > { %v5524_v35 = vld [vmem:[%s6873_s5 + $0x8f4] ss:$60 sps:$4 sm:$0xff]   ;;  %v5527_v39 = vld [vmem:[%s6873_s5 + $0x964] ss:$60 sps:$4 sm:$0xff]   ;;  %v5530_v40 = vld [vmem:[%s6873_s5 + $0x96c] ss:$60 sps:$4 sm:$0xff]  }
 0x10b   : > { %v5522_v38 = vld [vmem:[%s6873_s5 + $0x8f0] ss:$60 sps:$4 sm:$0xff]   ;;  %v5525_v41 = vld [vmem:[%s6873_s5 + $0x960] ss:$60 sps:$4 sm:$0xff]   ;;  %v5528_v42 = vld [vmem:[%s6873_s5 + $0x968] ss:$60 sps:$4 sm:$0xff]  }
 0x10c   : > { %3387 = vmatpush1.bf16.msra.mxu0 %v5448_v47  ;;  %3493 = vmatpush1.bf16.msra.mxu1 %v5449_v48  ;;  %v5533_v43 = vld [vmem:[%s6873_s5 + $0x9dc] ss:$60 sps:$4 sm:$0xff]   ;;  %v5536_v44 = vld [vmem:[%s6873_s5 + $0x9e4] ss:$60 sps:$4 sm:$0xff]   ;;  %v5539_v47 = vld [vmem:[%s6873_s5 + $0xa54] ss:$60 sps:$4 sm:$0xff]  }
 0x10d   : > { %3388 = vmatprep.subr.bf16.mxu0 %v5450_v49  ;;  %3494 = vmatprep.subr.bf16.mxu1 %v5452_v50  ;;  %v5531_v45 = vld [vmem:[%s6873_s5 + $0x9d8] ss:$60 sps:$4 sm:$0xff]   ;;  %v5534_v46 = vld [vmem:[%s6873_s5 + $0x9e0] ss:$60 sps:$4 sm:$0xff]   ;;  %v5537_v49 = vld [vmem:[%s6873_s5 + $0xa50] ss:$60 sps:$4 sm:$0xff]  }
 0x10e   : > { %v5542_v48 = vld [vmem:[%s6873_s5 + $0xa5c] ss:$60 sps:$4 sm:$0xff]  }
 0x10f   : > { %v5540_v50 = vld [vmem:[%s6873_s5 + $0xa58] ss:$60 sps:$4 sm:$0xff]  }
 0x110   : > { %3389 = vmatpush1.bf16.msra.mxu0 %v5454_v51  ;;  %3495 = vmatpush1.bf16.msra.mxu1 %v5455_v52  ;;  %v5548_v51 = vld [vmem:[%s6873_s5 + $0xacc] ss:$60 sps:$4 sm:$0xff]   ;;  %v5551_v52 = vld [vmem:[%s6873_s5 + $0xad4] ss:$60 sps:$4 sm:$0xff]  }
 0x111   : > { %3390 = vmatprep.subr.bf16.mxu0 %v5456_v53  ;;  %3496 = vmatprep.subr.bf16.mxu1 %v5458_v54  ;;  %v5546_v53 = vld [vmem:[%s6873_s5 + $0xac8] ss:$60 sps:$4 sm:$0xff]   ;;  %v5549_v54 = vld [vmem:[%s6873_s5 + $0xad0] ss:$60 sps:$4 sm:$0xff]  }
 0x114   : > { %3391 = vmatpush1.bf16.msra.mxu0 %v5460_v55  ;;  %3497 = vmatpush1.bf16.msra.mxu1 %v5461_v56  ;;  %v5554_v55 = vld [vmem:[%s6873_s5 + $0xb44] ss:$60 sps:$4 sm:$0xff]   ;;  %v5557_v56 = vld [vmem:[%s6873_s5 + $0xb4c] ss:$60 sps:$4 sm:$0xff]  }
 0x115   : > { %3392 = vmatprep.subr.bf16.mxu0 %v5462_v57  ;;  %3498 = vmatprep.subr.bf16.mxu1 %v5464_v58  ;;  %v5552_v57 = vld [vmem:[%s6873_s5 + $0xb40] ss:$60 sps:$4 sm:$0xff]   ;;  %v5555_v58 = vld [vmem:[%s6873_s5 + $0xb48] ss:$60 sps:$4 sm:$0xff]  }
 0x118   : > { %3393 = vmatpush1.bf16.msra.mxu0 %v5466_v59  ;;  %3499 = vmatpush1.bf16.msra.mxu1 %v5467_v60  ;;  %v5563_v59 = vld [vmem:[%s6873_s5 + $0x14] ss:$60 sps:$4 sm:$0xff]   ;;  %v5566_v60 = vld [vmem:[%s6873_s5 + $0x1c] ss:$60 sps:$4 sm:$0xff]  }
 0x119   : > { %3394 = vmatprep.subr.bf16.mxu0 %v5468_v61  ;;  %3500 = vmatprep.subr.bf16.mxu1 %v5470_v62  ;;  %v7012_v61 = vld [vmem:[%s7616_s0 + $0x8] ss:$16 sps:$4 sm:$0xff]  }
 0x11a   : > { %v5561_v62 = vld [vmem:[%s6873_s5 + $0x10] ss:$60 sps:$4 sm:$0xff]  }
 0x11c   : > { %3395 = vmatpush1.bf16.msra.mxu0 %v5472_v63  ;;  %3501 = vmatpush1.bf16.msra.mxu1 %v5473_v0  ;;  %v5564_v63 = vld [vmem:[%s6873_s5 + $0x18] ss:$60 sps:$4 sm:$0xff]   ;;  %v5569_v0 = vld [vmem:[%s6873_s5 + $0x8c] ss:$60 sps:$4 sm:$0xff]  }
 0x11d   : > { %3396 = vmatprep.subr.bf16.mxu0 %v5474_v1  ;;  %3502 = vmatprep.subr.bf16.mxu1 %v5476_v2  ;;  %v5572_v1 = vld [vmem:[%s6873_s5 + $0x94] ss:$60 sps:$4 sm:$0xff]  }
 0x11e   : > { %v7021_v2 = vld [vmem:[%s7616_s0 + $0x2c] ss:$16 sps:$4 sm:$0xff]  }
 0x120   : > { %3397 = vmatpush1.bf16.msra.mxu0 %v5478_v3  ;;  %3503 = vmatpush1.bf16.msra.mxu1 %v5479_v4  ;;  %v5567_v3 = vld [vmem:[%s6873_s5 + $0x88] ss:$60 sps:$4 sm:$0xff]   ;;  %v5570_v4 = vld [vmem:[%s6873_s5 + $0x90] ss:$60 sps:$4 sm:$0xff]  }
 0x121   : > { %3398 = vmatprep.subr.bf16.mxu0 %v5480_v5  ;;  %3504 = vmatprep.subr.bf16.mxu1 %v5482_v6  ;;  %v5578_v5 = vld [vmem:[%s6873_s5 + $0x104] ss:$60 sps:$4 sm:$0xff]   ;;  %v5581_v6 = vld [vmem:[%s6873_s5 + $0x10c] ss:$60 sps:$4 sm:$0xff]  }
 0x124   : > { %3399 = vmatpush1.bf16.msra.mxu0 %v5484_v7  ;;  %3505 = vmatpush1.bf16.msra.mxu1 %v5485_v8  ;;  %v7034_v7 = vld [vmem:[%s7616_s0 + $0x28] ss:$16 sps:$4 sm:$0xff]  }
 0x125   : > { %3400 = vmatprep.subr.bf16.mxu0 %v5486_v9  ;;  %3506 = vmatprep.subr.bf16.mxu1 %v5488_v10  ;;  %v5576_v8 = vld [vmem:[%s6873_s5 + $0x100] ss:$60 sps:$4 sm:$0xff]   ;;  %v5579_v9 = vld [vmem:[%s6873_s5 + $0x108] ss:$60 sps:$4 sm:$0xff]  }
 0x126   : > { %v5584_v10 = vld [vmem:[%s6873_s5 + $0x17c] ss:$60 sps:$4 sm:$0xff]  }
 0x128   : > { %3401 = vmatpush1.bf16.msra.mxu0 %v5490_v12  ;;  %3507 = vmatpush1.bf16.msra.mxu1 %v5491_v13  ;;  %v5587_v12 = vld [vmem:[%s6873_s5 + $0x184] ss:$60 sps:$4 sm:$0xff]   ;;  %v5582_v13 = vld [vmem:[%s6873_s5 + $0x178] ss:$60 sps:$4 sm:$0xff]  }
 0x129   : > { %3402 = vmatprep.subr.bf16.mxu0 %v5492_v14  ;;  %3508 = vmatprep.subr.bf16.mxu1 %v5494_v15  ;;  %v5585_v14 = vld [vmem:[%s6873_s5 + $0x180] ss:$60 sps:$4 sm:$0xff]   ;;  %v5590_v15 = vld [vmem:[%s6873_s5 + $0x1f4] ss:$60 sps:$4 sm:$0xff]  }
 0x12c   : > { %3403 = vmatpush1.bf16.msra.mxu0 %v5496_v17  ;;  %3509 = vmatpush1.bf16.msra.mxu1 %v5497_v18  ;;  %v5593_v17 = vld [vmem:[%s6873_s5 + $0x1fc] ss:$60 sps:$4 sm:$0xff]   ;;  %v5588_v18 = vld [vmem:[%s6873_s5 + $0x1f0] ss:$60 sps:$4 sm:$0xff]  }
 0x12d   : > { %3425 = vmatprep.subr.bf16.mxu0 %v5502_v19  ;;  %3531 = vmatprep.subr.bf16.mxu1 %v5505_v20  ;;  %v5591_v19 = vld [vmem:[%s6873_s5 + $0x1f8] ss:$60 sps:$4 sm:$0xff]   ;;  %v5596_v20 = vld [vmem:[%s6873_s5 + $0x26c] ss:$60 sps:$4 sm:$0xff]  }
 0x12f   : > { %3405 = vmatmul.mubr.bf16.vlgmr.msra.gmra.mrb[0].mxu0 %v6946_v21  ;;  %3511 = vmatmul.mubr.bf16.vlgmr.msra.gmra.mrb[0].mxu1 %v6946_v21 }
 0x130   : > { %3426 = vmatpush1.bf16.msra.mxu0 %v5500_v22  ;;  %3532 = vmatpush1.bf16.msra.mxu1 %v5503_v23  ;;  %v5599_v22 = vld [vmem:[%s6873_s5 + $0x274] ss:$60 sps:$4 sm:$0xff]   ;;  %v5594_v23 = vld [vmem:[%s6873_s5 + $0x268] ss:$60 sps:$4 sm:$0xff]  }
 0x131   : > { %3427 = vmatprep.subr.bf16.mxu0 %v5509_v24  ;;  %3533 = vmatprep.subr.bf16.mxu1 %v5512_v25  ;;  %v5597_v24 = vld [vmem:[%s6873_s5 + $0x270] ss:$60 sps:$4 sm:$0xff]   ;;  %v5602_v25 = vld [vmem:[%s6873_s5 + $0x2e4] ss:$60 sps:$4 sm:$0xff]  }
 0x132   : > { %3414 = vmatprep.mubr.bf16.mxu0 %v6955_v26  ;;  %3520 = vmatprep.mubr.bf16.mxu1 %v6955_v26 }
 0x134   : > { %3428 = vmatpush1.bf16.msra.mxu0 %v5507_v27  ;;  %3534 = vmatpush1.bf16.msra.mxu1 %v5510_v28  ;;  %v5600_v27 = vld [vmem:[%s6873_s5 + $0x2e0] ss:$60 sps:$4 sm:$0xff]   ;;  %v5603_v28 = vld [vmem:[%s6873_s5 + $0x2e8] ss:$60 sps:$4 sm:$0xff]  }
 0x135   : > { %3429 = vmatprep.subr.bf16.mxu0 %v5515_v29  ;;  %3535 = vmatprep.subr.bf16.mxu1 %v5518_v30  ;;  %v1403_v29 = vld [vmem:[%s7618_s2] sm:$0xff]  ;;  %v5608_v30 = vld [vmem:[%s6873_s5 + $0x35c] ss:$60 sps:$4 sm:$0xff]  }
 0x136   : > { %1409 = vperm.xlu0 %5400, %v1403_v29   ;;  %v5684_v29 = vld [vmem:[%s6873_s5 + $0x970] ss:$60 sps:$4 sm:$0xff]  }
 0x137   : > { %3415 = vmatmul.mubr.bf16.gmra.mrb[4].mxu0 %v6968_v31  ;;  %3521 = vmatmul.mubr.bf16.gmra.mrb[4].mxu1 %v6968_v31 }
 0x138   : > { %3430 = vmatpush1.bf16.msra.mxu0 %v5513_v32  ;;  %3536 = vmatpush1.bf16.msra.mxu1 %v5516_v33  ;;  %v5611_v32 = vld [vmem:[%s6873_s5 + $0x364] ss:$60 sps:$4 sm:$0xff]   ;;  %v1404_v33 = vld [vmem:[%s7618_s2 + $0x8] sm:$0xff] }
 0x139   : > { %3431 = vmatprep.subr.bf16.mxu0 %v5521_v34  ;;  %3537 = vmatprep.subr.bf16.mxu1 %v5524_v35  ;;  %v5606_v34 = vld [vmem:[%s6873_s5 + $0x358] ss:$60 sps:$4 sm:$0xff]   ;;  %v5609_v35 = vld [vmem:[%s6873_s5 + $0x360] ss:$60 sps:$4 sm:$0xff]  }
 0x13a   : > { %5139 = vmatprep.mubr.msk.bf16.mxu0 %vm3365_vm0, %v6977_v36  ;;  %5141 = vmatprep.mubr.msk.bf16.mxu1 %vm3365_vm0, %v6977_v36 }
 0x13b   : > { %1414 = vperm.xlu0 %5400, %v1404_v33   ;;  %v5690_v33 = vld [vmem:[%s6873_s5 + $0x9e8] ss:$60 sps:$4 sm:$0xff]  }
 0x13c   : > { %3432 = vmatpush1.bf16.msra.mxu0 %v5519_v37  ;;  %3538 = vmatpush1.bf16.msra.mxu1 %v5522_v38  ;;  %v5614_v37 = vld [vmem:[%s6873_s5 + $0x3d4] ss:$60 sps:$4 sm:$0xff]   ;;  %v5617_v38 = vld [vmem:[%s6873_s5 + $0x3dc] ss:$60 sps:$4 sm:$0xff]  }
 0x13d   : > { %3433 = vmatprep.subr.bf16.mxu0 %v5527_v39  ;;  %3539 = vmatprep.subr.bf16.mxu1 %v5530_v40  ;;  %v1405_v39 = vld [vmem:[%s7618_s2 + $0x10] sm:$0xff] }
 0x13e   : > { %v5612_v40 = vld [vmem:[%s6873_s5 + $0x3d0] ss:$60 sps:$4 sm:$0xff]   ;;  %1419 = vperm.xlu1 %5401, %v1405_v39   ;;  %v5704_v39 = vld [vmem:[%s6873_s5 + $0xadc] ss:$60 sps:$4 sm:$0xff]  }
 0x140   : > { %3434 = vmatpush1.bf16.msra.mxu0 %v5525_v41  ;;  %3540 = vmatpush1.bf16.msra.mxu1 %v5528_v42  ;;  %v5615_v41 = vld [vmem:[%s6873_s5 + $0x3d8] ss:$60 sps:$4 sm:$0xff]   ;;  %v5620_v42 = vld [vmem:[%s6873_s5 + $0x44c] ss:$60 sps:$4 sm:$0xff]  }
 0x141   : > { %3435 = vmatprep.subr.bf16.mxu0 %v5533_v43  ;;  %3541 = vmatprep.subr.bf16.mxu1 %v5536_v44  ;;  %v5623_v43 = vld [vmem:[%s6873_s5 + $0x454] ss:$60 sps:$4 sm:$0xff]   ;;  %v1406_v44 = vld [vmem:[%s7618_s2 + $0x18] sm:$0xff] }
 0x142   : > { %1424 = vperm.xlu1 %5401, %v1406_v44   ;;  %v5713_v44 = vld [vmem:[%s6873_s5 + $0xb5c] ss:$60 sps:$4 sm:$0xff]  }
 0x144   : > { %3436 = vmatpush1.bf16.msra.mxu0 %v5531_v45  ;;  %3542 = vmatpush1.bf16.msra.mxu1 %v5534_v46  ;;  %v5618_v45 = vld [vmem:[%s6873_s5 + $0x448] ss:$60 sps:$4 sm:$0xff]   ;;  %v5621_v46 = vld [vmem:[%s6873_s5 + $0x450] ss:$60 sps:$4 sm:$0xff]  }
 0x145   : > { %3437 = vmatprep.subr.bf16.mxu0 %v5539_v47  ;;  %3543 = vmatprep.subr.bf16.mxu1 %v5542_v48  ;;  %v5626_v47 = vld [vmem:[%s6873_s5 + $0x4c4] ss:$60 sps:$4 sm:$0xff]   ;;  %v5629_v48 = vld [vmem:[%s6873_s5 + $0x4cc] ss:$60 sps:$4 sm:$0xff]  }
 0x148   : > { %3438 = vmatpush1.bf16.msra.mxu0 %v5537_v49  ;;  %3544 = vmatpush1.bf16.msra.mxu1 %v5540_v50  ;;  %v5624_v49 = vld [vmem:[%s6873_s5 + $0x4c0] ss:$60 sps:$4 sm:$0xff]   ;;  %v5627_v50 = vld [vmem:[%s6873_s5 + $0x4c8] ss:$60 sps:$4 sm:$0xff]  }
 0x149   : > { %3439 = vmatprep.subr.bf16.mxu0 %v5548_v51  ;;  %3545 = vmatprep.subr.bf16.mxu1 %v5551_v52  ;;  %v5632_v51 = vld [vmem:[%s6873_s5 + $0x53c] ss:$60 sps:$4 sm:$0xff]   ;;  %v5635_v52 = vld [vmem:[%s6873_s5 + $0x544] ss:$60 sps:$4 sm:$0xff]  }
 0x14c   : > { %3440 = vmatpush1.bf16.msra.mxu0 %v5546_v53  ;;  %3546 = vmatpush1.bf16.msra.mxu1 %v5549_v54  ;;  %v5630_v53 = vld [vmem:[%s6873_s5 + $0x538] ss:$60 sps:$4 sm:$0xff]   ;;  %v5633_v54 = vld [vmem:[%s6873_s5 + $0x540] ss:$60 sps:$4 sm:$0xff]  }
 0x14d   : > { %3441 = vmatprep.subr.bf16.mxu0 %v5554_v55  ;;  %3547 = vmatprep.subr.bf16.mxu1 %v5557_v56  ;;  %v5638_v55 = vld [vmem:[%s6873_s5 + $0x5b4] ss:$60 sps:$4 sm:$0xff]   ;;  %v5641_v56 = vld [vmem:[%s6873_s5 + $0x5bc] ss:$60 sps:$4 sm:$0xff]  }
 0x150   : > { %3442 = vmatpush1.bf16.msra.mxu0 %v5552_v57  ;;  %3548 = vmatpush1.bf16.msra.mxu1 %v5555_v58  ;;  %v5636_v57 = vld [vmem:[%s6873_s5 + $0x5b0] ss:$60 sps:$4 sm:$0xff]   ;;  %v5639_v58 = vld [vmem:[%s6873_s5 + $0x5b8] ss:$60 sps:$4 sm:$0xff]  }
 0x151   : > { %3584 = vmatprep.subr.bf16.mxu0 %v5563_v59  ;;  %3690 = vmatprep.subr.bf16.mxu1 %v5566_v60  ;;  %v5644_v59 = vld [vmem:[%s6873_s5 + $0x62c] ss:$60 sps:$4 sm:$0xff]   ;;  %v5647_v60 = vld [vmem:[%s6873_s5 + $0x634] ss:$60 sps:$4 sm:$0xff]  }
 0x153   : > { %3458 = vmatmul.mubr.bf16.vlgmr.msra.gmra.mrb[0].mxu0 %v7012_v61  ;;  %3564 = vmatmul.mubr.bf16.vlgmr.msra.gmra.mrb[0].mxu1 %v7012_v61 }
 0x154   : > { %3585 = vmatpush1.bf16.msra.mxu0 %v5561_v62  ;;  %3691 = vmatpush1.bf16.msra.mxu1 %v5564_v63  ;;  %v5642_v62 = vld [vmem:[%s6873_s5 + $0x628] ss:$60 sps:$4 sm:$0xff]   ;;  %v5645_v63 = vld [vmem:[%s6873_s5 + $0x630] ss:$60 sps:$4 sm:$0xff]  }
 0x155   : > { %3586 = vmatprep.subr.bf16.mxu0 %v5569_v0  ;;  %3692 = vmatprep.subr.bf16.mxu1 %v5572_v1  ;;  %v5650_v0 = vld [vmem:[%s6873_s5 + $0x6a4] ss:$60 sps:$4 sm:$0xff]   ;;  %v5653_v1 = vld [vmem:[%s6873_s5 + $0x6ac] ss:$60 sps:$4 sm:$0xff]  }
 0x156   : > { %5140 = vmatprep.mubr.msk.bf16.mxu0 %vm3365_vm0, %v7021_v2  ;;  %5142 = vmatprep.mubr.msk.bf16.mxu1 %vm3365_vm0, %v7021_v2 }
 0x158   : > { %3587 = vmatpush1.bf16.msra.mxu0 %v5567_v3  ;;  %3693 = vmatpush1.bf16.msra.mxu1 %v5570_v4  ;;  %v5648_v3 = vld [vmem:[%s6873_s5 + $0x6a0] ss:$60 sps:$4 sm:$0xff]   ;;  %v5651_v4 = vld [vmem:[%s6873_s5 + $0x6a8] ss:$60 sps:$4 sm:$0xff]  }
 0x159   : > { %3588 = vmatprep.subr.bf16.mxu0 %v5578_v5  ;;  %3694 = vmatprep.subr.bf16.mxu1 %v5581_v6  ;;  %v5656_v5 = vld [vmem:[%s6873_s5 + $0x71c] ss:$60 sps:$4 sm:$0xff]   ;;  %v5659_v6 = vld [vmem:[%s6873_s5 + $0x724] ss:$60 sps:$4 sm:$0xff]  }
 0x15b   : > { %3468 = vmatmul.mubr.bf16.gmra.mrb[4].mxu0 %v7034_v7  ;;  %3574 = vmatmul.mubr.bf16.gmra.mrb[4].mxu1 %v7034_v7 }
 0x15c   : > { %3589 = vmatpush1.bf16.msra.mxu0 %v5576_v8  ;;  %3695 = vmatpush1.bf16.msra.mxu1 %v5579_v9  ;;  %v5654_v8 = vld [vmem:[%s6873_s5 + $0x718] ss:$60 sps:$4 sm:$0xff]   ;;  %v5657_v9 = vld [vmem:[%s6873_s5 + $0x720] ss:$60 sps:$4 sm:$0xff]  }
 0x15d   : > { %3590 = vmatprep.subr.bf16.mxu0 %v5584_v10  ;;  %3696 = vmatprep.subr.bf16.mxu1 %v5587_v12  ;;  %v5662_v10 = vld [vmem:[%s6873_s5 + $0x794] ss:$60 sps:$4 sm:$0xff]   ;;  %v5665_v12 = vld [vmem:[%s6873_s5 + $0x79c] ss:$60 sps:$4 sm:$0xff]  }
 0x15e   : > { %3616 = vmatprep.mubr.bf16.mxu0 %v6867_v16  ;;  %3722 = vmatprep.mubr.bf16.mxu1 %v6867_v16  ;;  %v5605_v16 = vld [vmem:[%s6873_s5 + $0x2ec] ss:$60 sps:$4 sm:$0xff]  }
 0x160   : > { %3591 = vmatpush1.bf16.msra.mxu0 %v5582_v13  ;;  %3697 = vmatpush1.bf16.msra.mxu1 %v5585_v14  ;;  %v5660_v13 = vld [vmem:[%s6873_s5 + $0x790] ss:$60 sps:$4 sm:$0xff]   ;;  %v5663_v14 = vld [vmem:[%s6873_s5 + $0x798] ss:$60 sps:$4 sm:$0xff]  }
 0x161   : > { %3592 = vmatprep.subr.bf16.mxu0 %v5590_v15  ;;  %3698 = vmatprep.subr.bf16.mxu1 %v5593_v17  ;;  %v5668_v15 = vld [vmem:[%s6873_s5 + $0x80c] ss:$60 sps:$4 sm:$0xff]   ;;  %v5671_v17 = vld [vmem:[%s6873_s5 + $0x814] ss:$60 sps:$4 sm:$0xff]  }
 0x164   : > { %3593 = vmatpush1.bf16.msra.mxu0 %v5588_v18  ;;  %3699 = vmatpush1.bf16.msra.mxu1 %v5591_v19  ;;  %v5666_v18 = vld [vmem:[%s6873_s5 + $0x808] ss:$60 sps:$4 sm:$0xff]   ;;  %v5669_v19 = vld [vmem:[%s6873_s5 + $0x810] ss:$60 sps:$4 sm:$0xff]  }
 0x165   : > { %3594 = vmatprep.subr.bf16.mxu0 %v5596_v20  ;;  %3700 = vmatprep.subr.bf16.mxu1 %v5599_v22  ;;  %v5674_v20 = vld [vmem:[%s6873_s5 + $0x884] ss:$60 sps:$4 sm:$0xff]   ;;  %v5677_v22 = vld [vmem:[%s6873_s5 + $0x88c] ss:$60 sps:$4 sm:$0xff]  }
 0x168   : > { %3595 = vmatpush1.bf16.msra.mxu0 %v5594_v23  ;;  %3701 = vmatpush1.bf16.msra.mxu1 %v5597_v24  ;;  %v5672_v23 = vld [vmem:[%s6873_s5 + $0x880] ss:$60 sps:$4 sm:$0xff]   ;;  %v5675_v24 = vld [vmem:[%s6873_s5 + $0x888] ss:$60 sps:$4 sm:$0xff]  }
 0x169   : > { %3596 = vmatprep.subr.bf16.mxu0 %v5602_v25  ;;  %3702 = vmatprep.subr.bf16.mxu1 %v5605_v16  ;;  %v5683_v25 = vld [vmem:[%s6873_s5 + $0x904] ss:$60 sps:$4 sm:$0xff]   ;;  %v5678_v16 = vld [vmem:[%s6873_s5 + $0x8f8] ss:$60 sps:$4 sm:$0xff]  }
 0x16c   : > { %3597 = vmatpush1.bf16.msra.mxu0 %v5600_v27  ;;  %3703 = vmatpush1.bf16.msra.mxu1 %v5603_v28  ;;  %v5681_v27 = vld [vmem:[%s6873_s5 + $0x900] ss:$60 sps:$4 sm:$0xff]  }
 0x16d   : > { %3598 = vmatprep.subr.bf16.mxu0 %v5608_v30  ;;  %3704 = vmatprep.subr.bf16.mxu1 %v5611_v32  ;;  %v5689_v28 = vld [vmem:[%s6873_s5 + $0x97c] ss:$60 sps:$4 sm:$0xff]   ;;  %v5692_v30 = vld [vmem:[%s6873_s5 + $0x9ec] ss:$60 sps:$4 sm:$0xff]   ;;  %v5695_v32 = vld [vmem:[%s6873_s5 + $0x9f4] ss:$60 sps:$4 sm:$0xff]  }
 0x170   : > { %3599 = vmatpush1.bf16.msra.mxu0 %v5606_v34  ;;  %3705 = vmatpush1.bf16.msra.mxu1 %v5609_v35  ;;  %v5693_v34 = vld [vmem:[%s6873_s5 + $0x9f0] ss:$60 sps:$4 sm:$0xff]  }
 0x171   : > { %3600 = vmatprep.subr.bf16.mxu0 %v5614_v37  ;;  %3706 = vmatprep.subr.bf16.mxu1 %v5617_v38  ;;  %v5701_v35 = vld [vmem:[%s6873_s5 + $0xa6c] ss:$60 sps:$4 sm:$0xff]   ;;  %v5696_v37 = vld [vmem:[%s6873_s5 + $0xa60] ss:$60 sps:$4 sm:$0xff]  }
 0x172   : > { %v5699_v38 = vld [vmem:[%s6873_s5 + $0xa68] ss:$60 sps:$4 sm:$0xff]  }
 0x174   : > { %3601 = vmatpush1.bf16.msra.mxu0 %v5612_v40  ;;  %3707 = vmatpush1.bf16.msra.mxu1 %v5615_v41  ;;  %v5707_v40 = vld [vmem:[%s6873_s5 + $0xae4] ss:$60 sps:$4 sm:$0xff]   ;;  %v5702_v41 = vld [vmem:[%s6873_s5 + $0xad8] ss:$60 sps:$4 sm:$0xff]  }
 0x175   : > { %3602 = vmatprep.subr.bf16.mxu0 %v5620_v42  ;;  %3708 = vmatprep.subr.bf16.mxu1 %v5623_v43  ;;  %v5705_v42 = vld [vmem:[%s6873_s5 + $0xae0] ss:$60 sps:$4 sm:$0xff]   ;;  %v5710_v43 = vld [vmem:[%s6873_s5 + $0xb54] ss:$60 sps:$4 sm:$0xff]  }
 0x178   : > { %3603 = vmatpush1.bf16.msra.mxu0 %v5618_v45  ;;  %3709 = vmatpush1.bf16.msra.mxu1 %v5621_v46  ;;  %v5708_v45 = vld [vmem:[%s6873_s5 + $0xb50] ss:$60 sps:$4 sm:$0xff]   ;;  %v5711_v46 = vld [vmem:[%s6873_s5 + $0xb58] ss:$60 sps:$4 sm:$0xff]  }
 0x179   : > { %3604 = vmatprep.subr.bf16.mxu0 %v5626_v47  ;;  %3710 = vmatprep.subr.bf16.mxu1 %v5629_v48  ;;  %v5716_v47 = vld [vmem:[%s6873_s5 + $0x24] ss:$60 sps:$4 sm:$0xff]   ;;  %v5719_v48 = vld [vmem:[%s6873_s5 + $0x2c] ss:$60 sps:$4 sm:$0xff]  }
 0x17c   : > { %3605 = vmatpush1.bf16.msra.mxu0 %v5624_v49  ;;  %3711 = vmatpush1.bf16.msra.mxu1 %v5627_v50  ;;  %v5714_v49 = vld [vmem:[%s6873_s5 + $0x20] ss:$60 sps:$4 sm:$0xff]   ;;  %v5717_v50 = vld [vmem:[%s6873_s5 + $0x28] ss:$60 sps:$4 sm:$0xff]  }
 0x17d   : > { %3606 = vmatprep.subr.bf16.mxu0 %v5632_v51  ;;  %3712 = vmatprep.subr.bf16.mxu1 %v5635_v52  ;;  %v5722_v51 = vld [vmem:[%s6873_s5 + $0x9c] ss:$60 sps:$4 sm:$0xff]   ;;  %v5725_v52 = vld [vmem:[%s6873_s5 + $0xa4] ss:$60 sps:$4 sm:$0xff]  }
 0x180   : > { %3607 = vmatpush1.bf16.msra.mxu0 %v5630_v53  ;;  %3713 = vmatpush1.bf16.msra.mxu1 %v5633_v54  ;;  %v5720_v53 = vld [vmem:[%s6873_s5 + $0x98] ss:$60 sps:$4 sm:$0xff]   ;;  %v5723_v54 = vld [vmem:[%s6873_s5 + $0xa0] ss:$60 sps:$4 sm:$0xff]  }
 0x181   : > { %3608 = vmatprep.subr.bf16.mxu0 %v5638_v55  ;;  %3714 = vmatprep.subr.bf16.mxu1 %v5641_v56  ;;  %v5728_v55 = vld [vmem:[%s6873_s5 + $0x114] ss:$60 sps:$4 sm:$0xff]   ;;  %v5731_v56 = vld [vmem:[%s6873_s5 + $0x11c] ss:$60 sps:$4 sm:$0xff]  }
 0x184   : > { %3609 = vmatpush1.bf16.msra.mxu0 %v5636_v57  ;;  %3715 = vmatpush1.bf16.msra.mxu1 %v5639_v58  ;;  %v5726_v57 = vld [vmem:[%s6873_s5 + $0x110] ss:$60 sps:$4 sm:$0xff]  }
 0x185   : > { %3610 = vmatprep.subr.bf16.mxu0 %v5644_v59  ;;  %3716 = vmatprep.subr.bf16.mxu1 %v5647_v60  ;;  %v5734_v58 = vld [vmem:[%s6873_s5 + $0x18c] ss:$60 sps:$4 sm:$0xff]   ;;  %v5737_v59 = vld [vmem:[%s6873_s5 + $0x194] ss:$60 sps:$4 sm:$0xff]  }
 0x186   : > { %v5732_v60 = vld [vmem:[%s6873_s5 + $0x188] ss:$60 sps:$4 sm:$0xff]  }
 0x188   : > { %3611 = vmatpush1.bf16.msra.mxu0 %v5642_v62  ;;  %3717 = vmatpush1.bf16.msra.mxu1 %v5645_v63  ;;  %v5740_v62 = vld [vmem:[%s6873_s5 + $0x204] ss:$60 sps:$4 sm:$0xff]   ;;  %v5743_v63 = vld [vmem:[%s6873_s5 + $0x20c] ss:$60 sps:$4 sm:$0xff]  }
 0x189   : > { %3612 = vmatprep.subr.bf16.mxu0 %v5650_v0  ;;  %3718 = vmatprep.subr.bf16.mxu1 %v5653_v1  ;;  %v5738_v0 = vld [vmem:[%s6873_s5 + $0x200] ss:$60 sps:$4 sm:$0xff]  }
 0x18a   : > { %v7184_v1 = vld [vmem:[%s7616_s0 + $0x4] ss:$16 sps:$4 sm:$0xff]  }
 0x18c   : > { %3613 = vmatpush1.bf16.msra.mxu0 %v5648_v3  ;;  %3719 = vmatpush1.bf16.msra.mxu1 %v5651_v4  ;;  %v5746_v3 = vld [vmem:[%s6873_s5 + $0x27c] ss:$60 sps:$4 sm:$0xff]   ;;  %v5749_v4 = vld [vmem:[%s6873_s5 + $0x284] ss:$60 sps:$4 sm:$0xff]  }
 0x18d   : > { %3614 = vmatprep.subr.bf16.mxu0 %v5656_v5  ;;  %3720 = vmatprep.subr.bf16.mxu1 %v5659_v6  ;;  %v5744_v5 = vld [vmem:[%s6873_s5 + $0x278] ss:$60 sps:$4 sm:$0xff]   ;;  %v5747_v6 = vld [vmem:[%s6873_s5 + $0x280] ss:$60 sps:$4 sm:$0xff]  }
 0x190   : > { %3615 = vmatpush1.bf16.msra.mxu0 %v5654_v8  ;;  %3721 = vmatpush1.bf16.msra.mxu1 %v5657_v9  ;;  %v5752_v8 = vld [vmem:[%s6873_s5 + $0x2f4] ss:$60 sps:$4 sm:$0xff]   ;;  %v5755_v9 = vld [vmem:[%s6873_s5 + $0x2fc] ss:$60 sps:$4 sm:$0xff]  }
 0x191   : > { %3637 = vmatprep.subr.bf16.mxu0 %v5662_v10  ;;  %3743 = vmatprep.subr.bf16.mxu1 %v5665_v12  ;;  %v5750_v10 = vld [vmem:[%s6873_s5 + $0x2f0] ss:$60 sps:$4 sm:$0xff]   ;;  %v5753_v12 = vld [vmem:[%s6873_s5 + $0x2f8] ss:$60 sps:$4 sm:$0xff]  }
 0x193   : > { %3617 = vmatmul.mubr.bf16.vlgmr.msra.gmra.mrb[8].mxu0 %v6946_v21  ;;  %3723 = vmatmul.mubr.bf16.vlgmr.msra.gmra.mrb[8].mxu1 %v6946_v21  ;;  %v5680_v21 = vld [vmem:[%s6873_s5 + $0x8fc] ss:$60 sps:$4 sm:$0xff]  }
 0x194   : > { %3638 = vmatpush1.bf16.msra.mxu0 %v5660_v13  ;;  %3744 = vmatpush1.bf16.msra.mxu1 %v5663_v14  ;;  %v5758_v13 = vld [vmem:[%s6873_s5 + $0x36c] ss:$60 sps:$4 sm:$0xff]   ;;  %v5761_v14 = vld [vmem:[%s6873_s5 + $0x374] ss:$60 sps:$4 sm:$0xff]  }
 0x195   : > { %3639 = vmatprep.subr.bf16.mxu0 %v5668_v15  ;;  %3745 = vmatprep.subr.bf16.mxu1 %v5671_v17  ;;  %v5756_v15 = vld [vmem:[%s6873_s5 + $0x368] ss:$60 sps:$4 sm:$0xff]   ;;  %v5759_v17 = vld [vmem:[%s6873_s5 + $0x370] ss:$60 sps:$4 sm:$0xff]  }
 0x196   : > { %3626 = vmatprep.mubr.bf16.mxu0 %v6955_v26  ;;  %3732 = vmatprep.mubr.bf16.mxu1 %v6955_v26  ;;  %v5686_v26 = vld [vmem:[%s6873_s5 + $0x974] ss:$60 sps:$4 sm:$0xff]  }
 0x198   : > { %3640 = vmatpush1.bf16.msra.mxu0 %v5666_v18  ;;  %3746 = vmatpush1.bf16.msra.mxu1 %v5669_v19  ;;  %v5764_v18 = vld [vmem:[%s6873_s5 + $0x3e4] ss:$60 sps:$4 sm:$0xff]   ;;  %v5767_v19 = vld [vmem:[%s6873_s5 + $0x3ec] ss:$60 sps:$4 sm:$0xff]  }
 0x199   : > { %3641 = vmatprep.subr.bf16.mxu0 %v5674_v20  ;;  %3747 = vmatprep.subr.bf16.mxu1 %v5677_v22  ;;  %v5762_v20 = vld [vmem:[%s6873_s5 + $0x3e0] ss:$60 sps:$4 sm:$0xff]   ;;  %v5765_v22 = vld [vmem:[%s6873_s5 + $0x3e8] ss:$60 sps:$4 sm:$0xff]  }
 0x19b   : > { %3627 = vmatmul.mubr.bf16.gmra.mrb[12].mxu0 %v6968_v31  ;;  %3733 = vmatmul.mubr.bf16.gmra.mrb[12].mxu1 %v6968_v31  ;;  %v5687_v31 = vld [vmem:[%s6873_s5 + $0x978] ss:$60 sps:$4 sm:$0xff]  }
 0x19c   : > { %3642 = vmatpush1.bf16.msra.mxu0 %v5672_v23  ;;  %3748 = vmatpush1.bf16.msra.mxu1 %v5675_v24  ;;  %v5770_v23 = vld [vmem:[%s6873_s5 + $0x45c] ss:$60 sps:$4 sm:$0xff]   ;;  %v5773_v24 = vld [vmem:[%s6873_s5 + $0x464] ss:$60 sps:$4 sm:$0xff]  }
 0x19d   : > { %3643 = vmatprep.subr.bf16.mxu0 %v5680_v21  ;;  %3749 = vmatprep.subr.bf16.mxu1 %v5683_v25  ;;  %v5768_v21 = vld [vmem:[%s6873_s5 + $0x458] ss:$60 sps:$4 sm:$0xff]   ;;  %v5771_v25 = vld [vmem:[%s6873_s5 + $0x460] ss:$60 sps:$4 sm:$0xff]  }
 0x19e   : > { %5143 = vmatprep.mubr.msk.bf16.mxu0 %vm3365_vm0, %v6977_v36  ;;  %5145 = vmatprep.mubr.msk.bf16.mxu1 %vm3365_vm0, %v6977_v36  ;;  %v5698_v36 = vld [vmem:[%s6873_s5 + $0xa64] ss:$60 sps:$4 sm:$0xff]  }
 0x1a0   : > { %3644 = vmatpush1.bf16.msra.mxu0 %v5678_v16  ;;  %3750 = vmatpush1.bf16.msra.mxu1 %v5681_v27  ;;  %v5776_v16 = vld [vmem:[%s6873_s5 + $0x4d4] ss:$60 sps:$4 sm:$0xff]   ;;  %v5779_v27 = vld [vmem:[%s6873_s5 + $0x4dc] ss:$60 sps:$4 sm:$0xff]  }
 0x1a1   : > { %3645 = vmatprep.subr.bf16.mxu0 %v5686_v26  ;;  %3751 = vmatprep.subr.bf16.mxu1 %v5689_v28  ;;  %v5774_v26 = vld [vmem:[%s6873_s5 + $0x4d0] ss:$60 sps:$4 sm:$0xff]   ;;  %v5777_v28 = vld [vmem:[%s6873_s5 + $0x4d8] ss:$60 sps:$4 sm:$0xff]  }
 0x1a4   : > { %3646 = vmatpush1.bf16.msra.mxu0 %v5684_v29  ;;  %3752 = vmatpush1.bf16.msra.mxu1 %v5687_v31  ;;  %v5782_v29 = vld [vmem:[%s6873_s5 + $0x54c] ss:$60 sps:$4 sm:$0xff]   ;;  %v5785_v31 = vld [vmem:[%s6873_s5 + $0x554] ss:$60 sps:$4 sm:$0xff]  }
 0x1a5   : > { %3647 = vmatprep.subr.bf16.mxu0 %v5692_v30  ;;  %3753 = vmatprep.subr.bf16.mxu1 %v5695_v32  ;;  %v5780_v30 = vld [vmem:[%s6873_s5 + $0x548] ss:$60 sps:$4 sm:$0xff]   ;;  %v5783_v32 = vld [vmem:[%s6873_s5 + $0x550] ss:$60 sps:$4 sm:$0xff]  }
 0x1a8   : > { %3648 = vmatpush1.bf16.msra.mxu0 %v5690_v33  ;;  %3754 = vmatpush1.bf16.msra.mxu1 %v5693_v34  ;;  %v5788_v33 = vld [vmem:[%s6873_s5 + $0x5c4] ss:$60 sps:$4 sm:$0xff]   ;;  %v5791_v34 = vld [vmem:[%s6873_s5 + $0x5cc] ss:$60 sps:$4 sm:$0xff]  }
 0x1a9   : > { %3649 = vmatprep.subr.bf16.mxu0 %v5698_v36  ;;  %3755 = vmatprep.subr.bf16.mxu1 %v5701_v35  ;;  %v5786_v36 = vld [vmem:[%s6873_s5 + $0x5c0] ss:$60 sps:$4 sm:$0xff]   ;;  %v5789_v35 = vld [vmem:[%s6873_s5 + $0x5c8] ss:$60 sps:$4 sm:$0xff]  }
 0x1ac   : > { %3650 = vmatpush1.bf16.msra.mxu0 %v5696_v37  ;;  %3756 = vmatpush1.bf16.msra.mxu1 %v5699_v38  ;;  %v5794_v37 = vld [vmem:[%s6873_s5 + $0x63c] ss:$60 sps:$4 sm:$0xff]   ;;  %v5797_v38 = vld [vmem:[%s6873_s5 + $0x644] ss:$60 sps:$4 sm:$0xff]  }
 0x1ad   : > { %3651 = vmatprep.subr.bf16.mxu0 %v5704_v39  ;;  %3757 = vmatprep.subr.bf16.mxu1 %v5707_v40  ;;  %v5792_v39 = vld [vmem:[%s6873_s5 + $0x638] ss:$60 sps:$4 sm:$0xff]   ;;  %v5795_v40 = vld [vmem:[%s6873_s5 + $0x640] ss:$60 sps:$4 sm:$0xff]  }
 0x1b0   : > { %3652 = vmatpush1.bf16.msra.mxu0 %v5702_v41  ;;  %3758 = vmatpush1.bf16.msra.mxu1 %v5705_v42  ;;  %v5800_v41 = vld [vmem:[%s6873_s5 + $0x6b4] ss:$60 sps:$4 sm:$0xff]   ;;  %v5803_v42 = vld [vmem:[%s6873_s5 + $0x6bc] ss:$60 sps:$4 sm:$0xff]  }
 0x1b1   : > { %3653 = vmatprep.subr.bf16.mxu0 %v5710_v43  ;;  %3759 = vmatprep.subr.bf16.mxu1 %v5713_v44  ;;  %v5798_v43 = vld [vmem:[%s6873_s5 + $0x6b0] ss:$60 sps:$4 sm:$0xff]   ;;  %v5801_v44 = vld [vmem:[%s6873_s5 + $0x6b8] ss:$60 sps:$4 sm:$0xff]  }
 0x1b4   : > { %3654 = vmatpush1.bf16.msra.mxu0 %v5708_v45  ;;  %3760 = vmatpush1.bf16.msra.mxu1 %v5711_v46  ;;  %v5806_v45 = vld [vmem:[%s6873_s5 + $0x72c] ss:$60 sps:$4 sm:$0xff]   ;;  %v5809_v46 = vld [vmem:[%s6873_s5 + $0x734] ss:$60 sps:$4 sm:$0xff]  }
 0x1b5   : > { %3796 = vmatprep.subr.bf16.mxu0 %v5716_v47  ;;  %3902 = vmatprep.subr.bf16.mxu1 %v5719_v48  ;;  %v5804_v47 = vld [vmem:[%s6873_s5 + $0x728] ss:$60 sps:$4 sm:$0xff]   ;;  %v5807_v48 = vld [vmem:[%s6873_s5 + $0x730] ss:$60 sps:$4 sm:$0xff]  }
 0x1b7   : > { %3670 = vmatmul.mubr.bf16.vlgmr.msra.gmra.mrb[8].mxu0 %v7012_v61  ;;  %3776 = vmatmul.mubr.bf16.vlgmr.msra.gmra.mrb[8].mxu1 %v7012_v61  ;;  %v5729_v61 = vld [vmem:[%s6873_s5 + $0x118] ss:$60 sps:$4 sm:$0xff]  }
 0x1b8   : > { %3797 = vmatpush1.bf16.msra.mxu0 %v5714_v49  ;;  %3903 = vmatpush1.bf16.msra.mxu1 %v5717_v50  ;;  %v5812_v49 = vld [vmem:[%s6873_s5 + $0x7a4] ss:$60 sps:$4 sm:$0xff]   ;;  %v5815_v50 = vld [vmem:[%s6873_s5 + $0x7ac] ss:$60 sps:$4 sm:$0xff]  }
 0x1b9   : > { %3798 = vmatprep.subr.bf16.mxu0 %v5722_v51  ;;  %3904 = vmatprep.subr.bf16.mxu1 %v5725_v52  ;;  %v5810_v51 = vld [vmem:[%s6873_s5 + $0x7a0] ss:$60 sps:$4 sm:$0xff]   ;;  %v5813_v52 = vld [vmem:[%s6873_s5 + $0x7a8] ss:$60 sps:$4 sm:$0xff]  }
 0x1ba   : > { %5144 = vmatprep.mubr.msk.bf16.mxu0 %vm3365_vm0, %v7021_v2  ;;  %5146 = vmatprep.mubr.msk.bf16.mxu1 %vm3365_vm0, %v7021_v2  ;;  %v5735_v2 = vld [vmem:[%s6873_s5 + $0x190] ss:$60 sps:$4 sm:$0xff]  }
 0x1bc   : > { %3799 = vmatpush1.bf16.msra.mxu0 %v5720_v53  ;;  %3905 = vmatpush1.bf16.msra.mxu1 %v5723_v54  ;;  %v5818_v53 = vld [vmem:[%s6873_s5 + $0x81c] ss:$60 sps:$4 sm:$0xff]   ;;  %v5821_v54 = vld [vmem:[%s6873_s5 + $0x824] ss:$60 sps:$4 sm:$0xff]  }
 0x1bd   : > { %3800 = vmatprep.subr.bf16.mxu0 %v5728_v55  ;;  %3906 = vmatprep.subr.bf16.mxu1 %v5731_v56  ;;  %v7242_v55 = vld [vmem:[%s7616_s0] ss:$16 sps:$4 sm:$0xff]  }
 0x1be   : > { %v5816_v56 = vld [vmem:[%s6873_s5 + $0x818] ss:$60 sps:$4 sm:$0xff]  }
 0x1bf   : > { %3680 = vmatmul.mubr.bf16.gmra.mrb[12].mxu0 %v7034_v7  ;;  %3786 = vmatmul.mubr.bf16.gmra.mrb[12].mxu1 %v7034_v7  ;;  %v5741_v7 = vld [vmem:[%s6873_s5 + $0x208] ss:$60 sps:$4 sm:$0xff]  }
 0x1c0   : > { %3801 = vmatpush1.bf16.msra.mxu0 %v5726_v57  ;;  %3907 = vmatpush1.bf16.msra.mxu1 %v5729_v61  ;;  %v5819_v57 = vld [vmem:[%s6873_s5 + $0x820] ss:$60 sps:$4 sm:$0xff]   ;;  %v5824_v61 = vld [vmem:[%s6873_s5 + $0x894] ss:$60 sps:$4 sm:$0xff]  }
 0x1c1   : > { %3802 = vmatprep.subr.bf16.mxu0 %v5734_v58  ;;  %3908 = vmatprep.subr.bf16.mxu1 %v5737_v59  ;;  %v5827_v58 = vld [vmem:[%s6873_s5 + $0x89c] ss:$60 sps:$4 sm:$0xff]  }
 0x1c2   : > { %3828 = vmatprep.mubr.bf16.mxu0 %v7184_v1  ;;  %3934 = vmatprep.mubr.bf16.mxu1 %v7184_v1  ;;  %v7253_v59 = vld [vmem:[%s7616_s0 + $0x24] ss:$16 sps:$4 sm:$0xff]  }
 0x1c4   : > { %3803 = vmatpush1.bf16.msra.mxu0 %v5732_v60  ;;  %3909 = vmatpush1.bf16.msra.mxu1 %v5735_v2  ;;  %v5822_v60 = vld [vmem:[%s6873_s5 + $0x890] ss:$60 sps:$4 sm:$0xff]   ;;  %v5825_v2 = vld [vmem:[%s6873_s5 + $0x898] ss:$60 sps:$4 sm:$0xff]  }
 0x1c5   : > { %3804 = vmatprep.subr.bf16.mxu0 %v5740_v62  ;;  %3910 = vmatprep.subr.bf16.mxu1 %v5743_v63  ;;  %v5830_v62 = vld [vmem:[%s6873_s5 + $0x90c] ss:$60 sps:$4 sm:$0xff]   ;;  %v5833_v63 = vld [vmem:[%s6873_s5 + $0x914] ss:$60 sps:$4 sm:$0xff]  }
 0x1c8   : > { %3805 = vmatpush1.bf16.msra.mxu0 %v5738_v0  ;;  %3911 = vmatpush1.bf16.msra.mxu1 %v5741_v7  ;;  %v7264_v0 = vld [vmem:[%s7616_s0 + $0x20] ss:$16 sps:$4 sm:$0xff]  }
 0x1c9   : > { %3806 = vmatprep.subr.bf16.mxu0 %v5746_v3  ;;  %3912 = vmatprep.subr.bf16.mxu1 %v5749_v4  ;;  %v5828_v7 = vld [vmem:[%s6873_s5 + $0x908] ss:$60 sps:$4 sm:$0xff]   ;;  %v5831_v3 = vld [vmem:[%s6873_s5 + $0x910] ss:$60 sps:$4 sm:$0xff]  }
 0x1ca   : > { %v5836_v4 = vld [vmem:[%s6873_s5 + $0x984] ss:$60 sps:$4 sm:$0xff]  }
 0x1cc   : > { %3807 = vmatpush1.bf16.msra.mxu0 %v5744_v5  ;;  %3913 = vmatpush1.bf16.msra.mxu1 %v5747_v6  ;;  %v5839_v5 = vld [vmem:[%s6873_s5 + $0x98c] ss:$60 sps:$4 sm:$0xff]  }
 0x1cd   : > { %3808 = vmatprep.subr.bf16.mxu0 %v5752_v8  ;;  %3914 = vmatprep.subr.bf16.mxu1 %v5755_v9  ;;  %v7275_v6 = vld [vmem:[%s7616_s0 + $0xc] ss:$16 sps:$4 sm:$0xff]  }
 0x1ce   : > { %v5834_v8 = vld [vmem:[%s6873_s5 + $0x980] ss:$60 sps:$4 sm:$0xff]   ;;  %v5837_v9 = vld [vmem:[%s6873_s5 + $0x988] ss:$60 sps:$4 sm:$0xff]  }
 0x1d0   : > { %3809 = vmatpush1.bf16.msra.mxu0 %v5750_v10  ;;  %3915 = vmatpush1.bf16.msra.mxu1 %v5753_v12  ;;  %v5842_v10 = vld [vmem:[%s6873_s5 + $0x9fc] ss:$60 sps:$4 sm:$0xff]   ;;  %v5845_v12 = vld [vmem:[%s6873_s5 + $0xa04] ss:$60 sps:$4 sm:$0xff]  }
 0x1d1   : > { %3810 = vmatprep.subr.bf16.mxu0 %v5758_v13  ;;  %3916 = vmatprep.subr.bf16.mxu1 %v5761_v14  ;;  %v5840_v13 = vld [vmem:[%s6873_s5 + $0x9f8] ss:$60 sps:$4 sm:$0xff]   ;;  %v5843_v14 = vld [vmem:[%s6873_s5 + $0xa00] ss:$60 sps:$4 sm:$0xff]  }
 0x1d4   : > { %3811 = vmatpush1.bf16.msra.mxu0 %v5756_v15  ;;  %3917 = vmatpush1.bf16.msra.mxu1 %v5759_v17  ;;  %v5848_v15 = vld [vmem:[%s6873_s5 + $0xa74] ss:$60 sps:$4 sm:$0xff]   ;;  %v5851_v17 = vld [vmem:[%s6873_s5 + $0xa7c] ss:$60 sps:$4 sm:$0xff]  }
 0x1d5   : > { %3812 = vmatprep.subr.bf16.mxu0 %v5764_v18  ;;  %3918 = vmatprep.subr.bf16.mxu1 %v5767_v19  ;;  %v5846_v18 = vld [vmem:[%s6873_s5 + $0xa70] ss:$60 sps:$4 sm:$0xff]   ;;  %v5849_v19 = vld [vmem:[%s6873_s5 + $0xa78] ss:$60 sps:$4 sm:$0xff]  }
 0x1d8   : > { %3813 = vmatpush1.bf16.msra.mxu0 %v5762_v20  ;;  %3919 = vmatpush1.bf16.msra.mxu1 %v5765_v22  ;;  %v5854_v20 = vld [vmem:[%s6873_s5 + $0xaec] ss:$60 sps:$4 sm:$0xff]   ;;  %v5857_v22 = vld [vmem:[%s6873_s5 + $0xaf4] ss:$60 sps:$4 sm:$0xff]  }
 0x1d9   : > { %3814 = vmatprep.subr.bf16.mxu0 %v5770_v23  ;;  %3920 = vmatprep.subr.bf16.mxu1 %v5773_v24  ;;  %v5852_v23 = vld [vmem:[%s6873_s5 + $0xae8] ss:$60 sps:$4 sm:$0xff]   ;;  %v5855_v24 = vld [vmem:[%s6873_s5 + $0xaf0] ss:$60 sps:$4 sm:$0xff]  }
 0x1dc   : > { %3815 = vmatpush1.bf16.msra.mxu0 %v5768_v21  ;;  %3921 = vmatpush1.bf16.msra.mxu1 %v5771_v25  ;;  %v5860_v21 = vld [vmem:[%s6873_s5 + $0xb64] ss:$60 sps:$4 sm:$0xff]   ;;  %v5863_v25 = vld [vmem:[%s6873_s5 + $0xb6c] ss:$60 sps:$4 sm:$0xff]  }
 0x1dd   : > { %3816 = vmatprep.subr.bf16.mxu0 %v5776_v16  ;;  %3922 = vmatprep.subr.bf16.mxu1 %v5779_v27  ;;  %v5858_v16 = vld [vmem:[%s6873_s5 + $0xb60] ss:$60 sps:$4 sm:$0xff]   ;;  %v5861_v27 = vld [vmem:[%s6873_s5 + $0xb68] ss:$60 sps:$4 sm:$0xff]  }
 0x1e0   : > { %3817 = vmatpush1.bf16.msra.mxu0 %v5774_v26  ;;  %3923 = vmatpush1.bf16.msra.mxu1 %v5777_v28  ;;  %v5866_v26 = vld [vmem:[%s6873_s5 + $0x34] ss:$60 sps:$4 sm:$0xff]  }
 0x1e1   : > { %3818 = vmatprep.subr.bf16.mxu0 %v5782_v29  ;;  %3924 = vmatprep.subr.bf16.mxu1 %v5785_v31  ;;  %v5867_v28 = vld [vmem:[%s6873_s5 + $0x3f8] ss:$60 sps:$4 sm:$0xff]   ;;  %v5864_v29 = vld [vmem:[%s6873_s5 + $0x30] ss:$60 sps:$4 sm:$0xff]  }
 0x1e2   : > { %v5868_v31 = vld [vmem:[%s6873_s5 + $0x38] ss:$60 sps:$4 sm:$0xff]  }
 0x1e4   : > { %3819 = vmatpush1.bf16.msra.mxu0 %v5780_v30  ;;  %3925 = vmatpush1.bf16.msra.mxu1 %v5783_v32  ;;  %v5871_v30 = vld [vmem:[%s6873_s5 + $0xac] ss:$60 sps:$4 sm:$0xff]  }
 0x1e5   : > { %3820 = vmatprep.subr.bf16.mxu0 %v5788_v33  ;;  %3926 = vmatprep.subr.bf16.mxu1 %v5791_v34  ;;  %v5872_v32 = vld [vmem:[%s6873_s5 + $0x470] ss:$60 sps:$4 sm:$0xff]   ;;  %v5869_v34 = vld [vmem:[%s6873_s5 + $0xa8] ss:$60 sps:$4 sm:$0xff]  }
 0x1e6   : > { %v7308_v33 = vld [vmem:[%s7616_s0 + $0x8] ss:$16 sps:$4 sm:$0xff]  }
 0x1e8   : > { %3821 = vmatpush1.bf16.msra.mxu0 %v5786_v36  ;;  %3927 = vmatpush1.bf16.msra.mxu1 %v5789_v35  ;;  %v5873_v36 = vld [vmem:[%s6873_s5 + $0xb0] ss:$60 sps:$4 sm:$0xff]   ;;  %v5876_v35 = vld [vmem:[%s6873_s5 + $0x124] ss:$60 sps:$4 sm:$0xff]  }
 0x1e9   : > { %3822 = vmatprep.subr.bf16.mxu0 %v5794_v37  ;;  %3928 = vmatprep.subr.bf16.mxu1 %v5797_v38  ;;  %v5877_v37 = vld [vmem:[%s6873_s5 + $0x4e8] ss:$60 sps:$4 sm:$0xff]  }
 0x1ea   : > { %v7319_v38 = vld [vmem:[%s7616_s0 + $0x2c] ss:$16 sps:$4 sm:$0xff]  }
 0x1ec   : > { %3823 = vmatpush1.bf16.msra.mxu0 %v5792_v39  ;;  %3929 = vmatpush1.bf16.msra.mxu1 %v5795_v40  ;;  %v7325_v39 = vpop.permute.xlu0 %1409  ;;  %v5874_v40 = vld [vmem:[%s6873_s5 + $0x120] ss:$60 sps:$4 sm:$0xff]  }
 0x1ed   : > { %3824 = vmatprep.subr.bf16.mxu0 %v5800_v41  ;;  %3930 = vmatprep.subr.bf16.mxu1 %v5803_v42  ;;  %v5878_v41 = vld [vmem:[%s6873_s5 + $0x128] ss:$60 sps:$4 sm:$0xff]   ;;  %v5881_v42 = vld [vmem:[%s6873_s5 + $0x19c] ss:$60 sps:$4 sm:$0xff]  }
 0x1f0   : > { %3825 = vmatpush1.bf16.msra.mxu0 %v5798_v43  ;;  %3931 = vmatpush1.bf16.msra.mxu1 %v5801_v44  ;;  %v5882_v43 = vld [vmem:[%s6873_s5 + $0x560] ss:$60 sps:$4 sm:$0xff]  }
 0x1f1   : > { %3826 = vmatprep.subr.bf16.mxu0 %v5806_v45  ;;  %3932 = vmatprep.subr.bf16.mxu1 %v5809_v46  ;;  %v7334_v44 = vld [vmem:[%s7616_s0 + $0x28] ss:$16 sps:$4 sm:$0xff]  }
 0x1f2   : > { %v5879_v45 = vld [vmem:[%s6873_s5 + $0x198] ss:$60 sps:$4 sm:$0xff]   ;;  %v5883_v46 = vld [vmem:[%s6873_s5 + $0x1a0] ss:$60 sps:$4 sm:$0xff]  }
 0x1f4   : > { %3827 = vmatpush1.bf16.msra.mxu0 %v5804_v47  ;;  %3933 = vmatpush1.bf16.msra.mxu1 %v5807_v48  ;;  %v7340_v47 = vpop.permute.xlu0 %1414  ;;  %v5886_v48 = vld [vmem:[%s6873_s5 + $0x214] ss:$60 sps:$4 sm:$0xff]  }
 0x1f5   : > { %3849 = vmatprep.subr.bf16.mxu0 %v5812_v49  ;;  %3955 = vmatprep.subr.bf16.mxu1 %v5815_v50  ;;  %v5887_v49 = vld [vmem:[%s6873_s5 + $0x5d8] ss:$60 sps:$4 sm:$0xff]   ;;  %v7344_v50 = vpop.permute.xlu1 %1419 }
 0x1f7   : > { %3829 = vmatmul.mubr.bf16.vlgmr.msra.gmra.mrb[16].mxu0 %v7242_v55  ;;  %3935 = vmatmul.mubr.bf16.vlgmr.msra.gmra.mrb[16].mxu1 %v7242_v55 }
 0x1f8   : > { %3850 = vmatpush1.bf16.msra.mxu0 %v5810_v51  ;;  %3956 = vmatpush1.bf16.msra.mxu1 %v5813_v52 }
 0x1f9   : > { %3851 = vmatprep.subr.bf16.mxu0 %v5818_v53  ;;  %3957 = vmatprep.subr.bf16.mxu1 %v5821_v54 }
 0x1fa   : > { %3838 = vmatprep.mubr.bf16.mxu0 %v7253_v59  ;;  %3944 = vmatprep.mubr.bf16.mxu1 %v7253_v59 }
 0x1fc   : > { %3852 = vmatpush1.bf16.msra.mxu0 %v5816_v56  ;;  %3958 = vmatpush1.bf16.msra.mxu1 %v5819_v57 }
 0x1fd   : > { %3853 = vmatprep.subr.bf16.mxu0 %v5824_v61  ;;  %3959 = vmatprep.subr.bf16.mxu1 %v5827_v58  ;;  %v5884_v61 = vld [vmem:[%s6873_s5 + $0x210] ss:$60 sps:$4 sm:$0xff]  }
 0x1ff   : > { %3839 = vmatmul.mubr.bf16.gmra.mrb[20].mxu0 %v7264_v0  ;;  %3945 = vmatmul.mubr.bf16.gmra.mrb[20].mxu1 %v7264_v0 }
 0x200   : > { %3854 = vmatpush1.bf16.msra.mxu0 %v5822_v60  ;;  %3960 = vmatpush1.bf16.msra.mxu1 %v5825_v2 }
 0x201   : > { %3855 = vmatprep.subr.bf16.mxu0 %v5830_v62  ;;  %3961 = vmatprep.subr.bf16.mxu1 %v5833_v63  ;;  %v5891_v63 = vld [vmem:[%s6873_s5 + $0x28c] ss:$60 sps:$4 sm:$0xff]  }
 0x202   : > { %5147 = vmatprep.mubr.msk.bf16.mxu0 %vm3365_vm0, %v7275_v6  ;;  %5149 = vmatprep.mubr.msk.bf16.mxu1 %vm3365_vm0, %v7275_v6 }
 0x204   : > { %3856 = vmatpush1.bf16.msra.mxu0 %v5828_v7  ;;  %3962 = vmatpush1.bf16.msra.mxu1 %v5831_v3 }
 0x205   : > { %3857 = vmatprep.subr.bf16.mxu0 %v5836_v4  ;;  %3963 = vmatprep.subr.bf16.mxu1 %v5839_v5 }
 0x208   : > { %3858 = vmatpush1.bf16.msra.mxu0 %v5834_v8  ;;  %3964 = vmatpush1.bf16.msra.mxu1 %v5837_v9 }
 0x209   : > { %3859 = vmatprep.subr.bf16.mxu0 %v5842_v10  ;;  %3965 = vmatprep.subr.bf16.mxu1 %v5845_v12  ;;  %v5892_v10 = vld [vmem:[%s6873_s5 + $0x650] ss:$60 sps:$4 sm:$0xff]  }
 0x20c   : > { %3860 = vmatpush1.bf16.msra.mxu0 %v5840_v13  ;;  %3966 = vmatpush1.bf16.msra.mxu1 %v5843_v14 }
 0x20d   : > { %3861 = vmatprep.subr.bf16.mxu0 %v5848_v15  ;;  %3967 = vmatprep.subr.bf16.mxu1 %v5851_v17 }
 0x210   : > { %3862 = vmatpush1.bf16.msra.mxu0 %v5846_v18  ;;  %3968 = vmatpush1.bf16.msra.mxu1 %v5849_v19 }
 0x211   : > { %3863 = vmatprep.subr.bf16.mxu0 %v5854_v20  ;;  %3969 = vmatprep.subr.bf16.mxu1 %v5857_v22 }
 0x214   : > { %3864 = vmatpush1.bf16.msra.mxu0 %v5852_v23  ;;  %3970 = vmatpush1.bf16.msra.mxu1 %v5855_v24  ;;  %v5889_v24 = vld [vmem:[%s6873_s5 + $0x288] ss:$60 sps:$4 sm:$0xff]  }
 0x215   : > { %3865 = vmatprep.subr.bf16.mxu0 %v5860_v21  ;;  %3971 = vmatprep.subr.bf16.mxu1 %v5863_v25  ;;  %v5893_v21 = vld [vmem:[%s6873_s5 + $0x290] ss:$60 sps:$4 sm:$0xff]   ;;  %v7366_v25 = vpop.permute.xlu1 %1424 }
 0x218   : > { %3866 = vmatpush1.bf16.msra.mxu0 %v5858_v16  ;;  %3972 = vmatpush1.bf16.msra.mxu1 %v5861_v27  ;;  %v5896_v16 = vld [vmem:[%s6873_s5 + $0x304] ss:$60 sps:$4 sm:$0xff]  }
 0x219   : > { %4008 = vmatprep.subr.bf16.mxu0 %v5866_v26  ;;  %5232 = vmatprep.subr.bf16.mxu1 %v5867_v28  ;;  %v5897_v27 = vld [vmem:[%s6873_s5 + $0x6c8] ss:$60 sps:$4 sm:$0xff]  }
 0x21b   : > { %3882 = vmatmul.mubr.bf16.vlgmr.msra.gmra.mrb[16].mxu0 %v7308_v33  ;;  %3988 = vmatmul.mubr.bf16.vlgmr.msra.gmra.mrb[16].mxu1 %v7308_v33 }
 0x21c   : > { %4009 = vmatpush1.bf16.msra.mxu0 %v5864_v29  ;;  %5233 = vmatpush3.bf16.msra.mxu1 %v5868_v31 }
 0x21d   : > { %4010 = vmatprep.subr.bf16.mxu0 %v5871_v30  ;;  %5234 = vmatprep.subr.bf16.mxu1 %v5872_v32 }
 0x21e   : > { %5148 = vmatprep.mubr.msk.bf16.mxu0 %vm3365_vm0, %v7319_v38  ;;  %5150 = vmatprep.mubr.msk.bf16.mxu1 %vm3365_vm0, %v7319_v38 }
 0x220   : > { %4011 = vmatpush1.bf16.msra.mxu0 %v5869_v34  ;;  %5235 = vmatpush3.bf16.msra.mxu1 %v5873_v36  ;;  %v5894_v34 = vld [vmem:[%s6873_s5 + $0x300] ss:$60 sps:$4 sm:$0xff]  }
 0x221   : > { %4012 = vmatprep.subr.bf16.mxu0 %v5876_v35  ;;  %5236 = vmatprep.subr.bf16.mxu1 %v5877_v37 }
 0x223   : > { %3892 = vmatmul.mubr.bf16.gmra.mrb[20].mxu0 %v7334_v44  ;;  %3998 = vmatmul.mubr.bf16.gmra.mrb[20].mxu1 %v7334_v44 }
 0x224   : > { %4013 = vmatpush1.bf16.msra.mxu0 %v5874_v40  ;;  %5237 = vmatpush3.bf16.msra.mxu1 %v5878_v41  ;;  %v5898_v41 = vld [vmem:[%s6873_s5 + $0x308] ss:$60 sps:$4 sm:$0xff]  }
 0x225   : > { %4014 = vmatprep.subr.bf16.mxu0 %v5881_v42  ;;  %5238 = vmatprep.subr.bf16.mxu1 %v5882_v43  ;;  %v5901_v42 = vld [vmem:[%s6873_s5 + $0x37c] ss:$60 sps:$4 sm:$0xff]  }
 0x226   : > { %v3459_v51 = vpop.f32.mrb[0].mxu0  ;;  %v3565_v52 = vpop.f32.mrb[0].mxu1  ;;  %4146 = vmatprep.mubr.bf16.mxu1 %v7184_v1  ;;  %4040 = vmatprep.mubr.bf16.mxu0 %v7184_v1  ;;  %v5888_v1 = vld [vmem:[%s6873_s5 + $0x218] ss:$60 sps:$4 sm:$0xff]  }
 0x227   : > { %v5260_v53 = vadd.f32 %v3459_v51, %v7325_v39  ;;  %v5268_v54 = vadd.f32 %v3565_v52, %v7325_v39  ;;  %v3461_v56 = vpop.f32.mrb[1].mxu0  ;;  %v3567_v57 = vpop.f32.mrb[1].mxu1  ;;  %v5902_v51 = vld [vmem:[%s6873_s5 + $0x740] ss:$60 sps:$4 sm:$0xff]  }
 0x228   : > { %v5261_v58 = vadd.f32 %v3461_v56, %v7325_v39  ;;  %v5269_v60 = vadd.f32 %v3567_v57, %v7325_v39  ;;  %v3463_v2 = vpop.f32.mrb[2].mxu0  ;;  %v3569_v62 = vpop.f32.mrb[2].mxu1  ;;  %4015 = vmatpush1.bf16.msra.mxu0 %v5879_v45  ;;  %5239 = vmatpush3.bf16.msra.mxu1 %v5883_v46 }
 0x229   : > { %v4212_v7 = vmax.f32 %v5260_v53, 0.0  ;;  %v4214_v3 = vmax.f32 %v5268_v54, 0.0  ;;  %v5262_v4 = vadd.f32 %v3463_v2, %v7340_v47  ;;  %v5270_v5 = vadd.f32 %v3569_v62, %v7340_v47  ;;  %v3465_v8 = vpop.f32.mrb[3].mxu0  ;;  %v3571_v9 = vpop.f32.mrb[3].mxu1  ;;  %4016 = vmatprep.subr.bf16.mxu0 %v5886_v48  ;;  %5240 = vmatprep.subr.bf16.mxu1 %v5887_v49 }
 0x22a   : > { %v4213_v12 = vmax.f32 %v5261_v58, 0.0  ;;  %v4215_v13 = vmax.f32 %v5269_v60, 0.0  ;;  %v5263_v14 = vadd.f32 %v3465_v8, %v7340_v47  ;;  %v5271_v15 = vadd.f32 %v3571_v9, %v7340_v47 }
 0x22b   : > { %v4227_v17 = vmax.f32 %v5262_v4, 0.0  ;;  %v4229_v18 = vmax.f32 %v5270_v5, 0.0  ;;  %v5906_v5 = vld [vmem:[%s6873_s5 + $0x3f4] ss:$60 sps:$4 sm:$0xff]  }
 0x22c   : > { %v5199_v19 = vpack.c.bf16 %v4213_v12, %v4212_v7  ;;  %v5200_v20 = vpack.c.bf16 %v4215_v13, %v4214_v3  ;;  %v4228_v22 = vmax.f32 %v5263_v14, 0.0  ;;  %v4230_v23 = vmax.f32 %v5271_v15, 0.0  ;;  %4017 = vmatpush1.bf16.msra.mxu0 %v5884_v61  ;;  %5241 = vmatpush3.bf16.msra.mxu1 %v5888_v1  ;;  %v5903_v7 = vld [vmem:[%s6873_s5 + $0x380] ss:$60 sps:$4 sm:$0xff]   ;;  %v5907_v12 = vld [vmem:[%s6873_s5 + $0x7b8] ss:$60 sps:$4 sm:$0xff]  }
 0x22d   : > { %4018 = vmatprep.subr.bf16.mxu0 %v5891_v63  ;;  %5242 = vmatprep.subr.bf16.mxu1 %v5892_v10  ;;  %v5899_v63 = vld [vmem:[%s6873_s5 + $0x378] ss:$60 sps:$4 sm:$0xff]   ;;  %v5904_v10 = vld [vmem:[%s6873_s5 + $0x3f0] ss:$60 sps:$4 sm:$0xff]   ;;  %v5908_v14 = vld [vmem:[%s6873_s5 + $0x468] ss:$60 sps:$4 sm:$0xff]  }
 0x22e   : > { %4456 = vst [vmem:[%s7371_s12] sm:$0xff] %v5199_v19  ;;  %4457 = vst [vmem:[%s7371_s12 + $0x8] sm:$0xff] %v5200_v20  ;;  %v5207_v26 = vpack.c.bf16 %v4228_v22, %v4227_v17  ;;  %v5208_v28 = vpack.c.bf16 %v4230_v23, %v4229_v18  ;;  %v3469_v29 = vpop.f32.mrb[4].mxu0  ;;  %v3575_v31 = vpop.f32.mrb[4].mxu1  ;;  %v5910_v13 = vld [vmem:[%s6873_s5 + $0x46c] ss:$60 sps:$4 sm:$0xff]  }
 0x22f   : > { %v5264_v30 = vadd.f32 %v3469_v29, %v7344_v50  ;;  %v3471_v32 = vpop.f32.mrb[5].mxu0  ;;  %v5272_v36 = vadd.f32 %v3575_v31, %v7344_v50  ;;  %v3577_v35 = vpop.f32.mrb[5].mxu1  ;;  %v5911_v15 = vld [vmem:[%s6873_s5 + $0x830] ss:$60 sps:$4 sm:$0xff]   ;;  %v5914_v17 = vld [vmem:[%s6873_s5 + $0x4e4] ss:$60 sps:$4 sm:$0xff]  }
 0x230   : > { %4464 = vst [vmem:[%s7371_s12 + $0x3c] sm:$0xff] %v5207_v26  ;;  %4465 = vst [vmem:[%s7371_s12 + $0x44] sm:$0xff] %v5208_v28  ;;  %v5265_v37 = vadd.f32 %v3471_v32, %v7344_v50  ;;  %v3473_v40 = vpop.f32.mrb[6].mxu0  ;;  %4019 = vmatpush1.bf16.msra.mxu0 %v5889_v24  ;;  %5243 = vmatpush3.bf16.msra.mxu1 %v5893_v21  ;;  %v5273_v43 = vadd.f32 %v3577_v35, %v7344_v50  ;;  %v3579_v45 = vpop.f32.mrb[6].mxu1  ;;  %v5912_v18 = vld [vmem:[%s6873_s5 + $0x4e0] ss:$60 sps:$4 sm:$0xff]  }
 0x231   : > { %v4242_v46 = vmax.f32 %v5264_v30, 0.0  ;;  %v5266_v48 = vadd.f32 %v3473_v40, %v7366_v25  ;;  %v3475_v49 = vpop.f32.mrb[7].mxu0  ;;  %4020 = vmatprep.subr.bf16.mxu0 %v5896_v16  ;;  %5244 = vmatprep.subr.bf16.mxu1 %v5897_v27  ;;  %v4244_v52 = vmax.f32 %v5272_v36, 0.0  ;;  %v5274_v53 = vadd.f32 %v3579_v45, %v7366_v25  ;;  %v3581_v54 = vpop.f32.mrb[7].mxu1  ;;  %v5915_v19 = vld [vmem:[%s6873_s5 + $0x8a8] ss:$60 sps:$4 sm:$0xff]  }
 0x232   : > { %v4243_v56 = vmax.f32 %v5265_v37, 0.0  ;;  %v5267_v57 = vadd.f32 %v3475_v49, %v7366_v25  ;;  %v4245_v61 = vmax.f32 %v5273_v43, 0.0  ;;  %v5275_v58 = vadd.f32 %v3581_v54, %v7366_v25  ;;  %v5918_v20 = vld [vmem:[%s6873_s5 + $0x55c] ss:$60 sps:$4 sm:$0xff]   ;;  %v5922_v24 = vld [vmem:[%s6873_s5 + $0x5d4] ss:$60 sps:$4 sm:$0xff]  }
 0x233   : > { %v4257_v60 = vmax.f32 %v5266_v48, 0.0  ;;  %v4259_v2 = vmax.f32 %v5274_v53, 0.0  ;;  %v5916_v22 = vld [vmem:[%s6873_s5 + $0x558] ss:$60 sps:$4 sm:$0xff]   ;;  %v5919_v23 = vld [vmem:[%s6873_s5 + $0x920] ss:$60 sps:$4 sm:$0xff]  }
 0x234   : > { %v5215_v62 = vpack.c.bf16 %v4243_v56, %v4242_v46  ;;  %v4258_v1 = vmax.f32 %v5267_v57, 0.0  ;;  %4021 = vmatpush1.bf16.msra.mxu0 %v5894_v34  ;;  %5245 = vmatpush3.bf16.msra.mxu1 %v5898_v41  ;;  %v5216_v3 = vpack.c.bf16 %v4245_v61, %v4244_v52  ;;  %v4260_v4 = vmax.f32 %v5275_v58, 0.0  ;;  %v5920_v21 = vld [vmem:[%s6873_s5 + $0x5d0] ss:$60 sps:$4 sm:$0xff]   ;;  %v5923_v16 = vld [vmem:[%s6873_s5 + $0x998] ss:$60 sps:$4 sm:$0xff]  }
 0x235   : > { %4022 = vmatprep.subr.bf16.mxu0 %v5901_v42  ;;  %5246 = vmatprep.subr.bf16.mxu1 %v5902_v51  ;;  %v5926_v27 = vld [vmem:[%s6873_s5 + $0x64c] ss:$60 sps:$4 sm:$0xff]   ;;  %v5930_v29 = vld [vmem:[%s6873_s5 + $0x6c4] ss:$60 sps:$4 sm:$0xff]   ;;  %v5934_v32 = vld [vmem:[%s6873_s5 + $0x73c] ss:$60 sps:$4 sm:$0xff]  }
 0x236   : > { %4472 = vst [vmem:[%s7371_s12 + $0x78] sm:$0xff] %v5215_v62  ;;  %v5223_v8 = vpack.c.bf16 %v4258_v1, %v4257_v60  ;;  %4473 = vst [vmem:[%s7371_s12 + $0x80] sm:$0xff] %v5216_v3  ;;  %v5224_v9 = vpack.c.bf16 %v4260_v4, %v4259_v2  ;;  %v5924_v26 = vld [vmem:[%s6873_s5 + $0x648] ss:$60 sps:$4 sm:$0xff]   ;;  %v5927_v28 = vld [vmem:[%s6873_s5 + $0xa10] ss:$60 sps:$4 sm:$0xff]  }
 0x237   : > { %v5928_v31 = vld [vmem:[%s6873_s5 + $0x6c0] ss:$60 sps:$4 sm:$0xff]   ;;  %v5931_v30 = vld [vmem:[%s6873_s5 + $0xa88] ss:$60 sps:$4 sm:$0xff]   ;;  %v5932_v34 = vld [vmem:[%s6873_s5 + $0x738] ss:$60 sps:$4 sm:$0xff]  }
 0x238   : > { %4480 = vst [vmem:[%s7371_s12 + $0xb4] sm:$0xff] %v5223_v8  ;;  %4023 = vmatpush1.bf16.msra.mxu0 %v5899_v63  ;;  %5247 = vmatpush3.bf16.msra.mxu1 %v5903_v7  ;;  %4481 = vst [vmem:[%s7371_s12 + $0xbc] sm:$0xff] %v5224_v9  ;;  %v5935_v36 = vld [vmem:[%s6873_s5 + $0xb00] ss:$60 sps:$4 sm:$0xff]   ;;  %v5938_v35 = vld [vmem:[%s6873_s5 + $0x7b4] ss:$60 sps:$4 sm:$0xff]  }
 0x239   : > { %4024 = vmatprep.subr.bf16.mxu0 %v5906_v5  ;;  %4163 = vmatprep.subr.bf16.mxu1 %v5996_v11  ;;  %v5936_v37 = vld [vmem:[%s6873_s5 + $0x7b0] ss:$60 sps:$4 sm:$0xff]   ;;  %v5939_v40 = vld [vmem:[%s6873_s5 + $0xb78] ss:$60 sps:$4 sm:$0xff]   ;;  %v5940_v42 = vld [vmem:[%s6873_s5 + $0x828] ss:$60 sps:$4 sm:$0xff]  }
 0x23a   : > { %v5942_v41 = vld [vmem:[%s6873_s5 + $0x82c] ss:$60 sps:$4 sm:$0xff]   ;;  %v5945_v43 = vld [vmem:[%s6873_s5 + $0x8a4] ss:$60 sps:$4 sm:$0xff]   ;;  %v5960_v52 = vld [vmem:[%s6873_s5 + $0xafc] ss:$60 sps:$4 sm:$0xff]  }
 0x23b   : > { %4147 = vmatmul.mubr.bf16.vlgmr.msra.gmra.mrb[24].mxu1 %v7242_v55  ;;  %v5943_v45 = vld [vmem:[%s6873_s5 + $0x8a0] ss:$60 sps:$4 sm:$0xff]   ;;  %v5949_v46 = vld [vmem:[%s6873_s5 + $0x990] ss:$60 sps:$4 sm:$0xff]  }
 0x23c   : > { %4025 = vmatpush1.bf16.msra.mxu0 %v5904_v10  ;;  %4164 = vmatpush1.bf16.msra.mxu1 %v5907_v12  ;;  %v5954_v48 = vld [vmem:[%s6873_s5 + $0xa0c] ss:$60 sps:$4 sm:$0xff]   ;;  %v5957_v49 = vld [vmem:[%s6873_s5 + $0xa84] ss:$60 sps:$4 sm:$0xff]   ;;  %v5963_v53 = vld [vmem:[%s6873_s5 + $0xb74] ss:$60 sps:$4 sm:$0xff]  }
 0x23d   : > { %4026 = vmatprep.subr.bf16.mxu0 %v5910_v13  ;;  %4165 = vmatprep.subr.bf16.mxu1 %v5996_v11  ;;  %v5955_v51 = vld [vmem:[%s6873_s5 + $0xa80] ss:$60 sps:$4 sm:$0xff]   ;;  %v5961_v54 = vld [vmem:[%s6873_s5 + $0xb70] ss:$60 sps:$4 sm:$0xff]  }
 0x23e   : > { %4154 = vmatprep.mubr.bf16.mxu1 %v7253_v59 }
 0x240   : > { %4027 = vmatpush1.bf16.msra.mxu0 %v5908_v14  ;;  %4166 = vmatpush1.bf16.msra.mxu1 %v5911_v15 }
 0x241   : > { %4028 = vmatprep.subr.bf16.mxu0 %v5914_v17  ;;  %4167 = vmatprep.subr.bf16.mxu1 %v5996_v11 }
 0x243   : > { %4155 = vmatmul.mubr.bf16.gmra.mrb[28].mxu1 %v7264_v0 }
 0x244   : > { %4029 = vmatpush1.bf16.msra.mxu0 %v5912_v18  ;;  %4168 = vmatpush1.bf16.msra.mxu1 %v5915_v19 }
 0x245   : > { %4030 = vmatprep.subr.bf16.mxu0 %v5918_v20  ;;  %4169 = vmatprep.subr.bf16.mxu1 %v5996_v11 }
 0x246   : > { %5153 = vmatprep.mubr.msk.bf16.mxu1 %vm3365_vm0, %v7275_v6 }
 0x248   : > { %4031 = vmatpush1.bf16.msra.mxu0 %v5916_v22  ;;  %4170 = vmatpush1.bf16.msra.mxu1 %v5919_v23 }
 0x249   : > { %4032 = vmatprep.subr.bf16.mxu0 %v5922_v24  ;;  %4171 = vmatprep.subr.bf16.mxu1 %v5996_v11 }
 0x24c   : > { %4033 = vmatpush1.bf16.msra.mxu0 %v5920_v21  ;;  %4172 = vmatpush1.bf16.msra.mxu1 %v5923_v16 }
 0x24d   : > { %4034 = vmatprep.subr.bf16.mxu0 %v5926_v27  ;;  %4173 = vmatprep.subr.bf16.mxu1 %v5996_v11 }
 0x250   : > { %4035 = vmatpush1.bf16.msra.mxu0 %v5924_v26  ;;  %4174 = vmatpush1.bf16.msra.mxu1 %v5927_v28 }
 0x251   : > { %4036 = vmatprep.subr.bf16.mxu0 %v5930_v29  ;;  %4175 = vmatprep.subr.bf16.mxu1 %v5996_v11 }
 0x254   : > { %4037 = vmatpush1.bf16.msra.mxu0 %v5928_v31  ;;  %4176 = vmatpush1.bf16.msra.mxu1 %v5931_v30 }
 0x255   : > { %4038 = vmatprep.subr.bf16.mxu0 %v5934_v32  ;;  %4177 = vmatprep.subr.bf16.mxu1 %v5996_v11 }
 0x258   : > { %4039 = vmatpush1.bf16.msra.mxu0 %v5932_v34  ;;  %4178 = vmatpush1.bf16.msra.mxu1 %v5935_v36 }
 0x259   : > { %4061 = vmatprep.subr.bf16.mxu0 %v5938_v35  ;;  %4179 = vmatprep.subr.bf16.mxu1 %v5996_v11  ;;  %v5948_v11 = vld [vmem:[%s6873_s5 + $0x91c] ss:$60 sps:$4 sm:$0xff]  }
 0x25b   : > { %4041 = vmatmul.mubr.bf16.vlgmr.msra.gmra.mrb[24].mxu0 %v7242_v55  ;;  %v5946_v55 = vld [vmem:[%s6873_s5 + $0x918] ss:$60 sps:$4 sm:$0xff]  }
 0x25c   : > { %4062 = vmatpush1.bf16.msra.mxu0 %v5936_v37  ;;  %4180 = vmatpush1.bf16.msra.mxu1 %v5939_v40 }
 0x25d   : > { %4063 = vmatprep.subr.bf16.mxu0 %v5942_v41  ;;  %4050 = vmatprep.mubr.bf16.mxu0 %v7253_v59  ;;  %v5951_v59 = vld [vmem:[%s6873_s5 + $0x994] ss:$60 sps:$4 sm:$0xff]  }
 0x25f   : > { %4196 = vmatmul.mubr.bf16.vlgmr.msra.gmra.mrb[32].mxu1 %v7308_v33 }
 0x260   : > { %4064 = vmatpush1.bf16.msra.mxu0 %v5940_v42  ;;  %5154 = vmatprep.mubr.msk.bf16.mxu1 %vm3365_vm0, %v7319_v38 }
 0x261   : > { %4065 = vmatprep.subr.bf16.mxu0 %v5945_v43 }
 0x263   : > { %4051 = vmatmul.mubr.bf16.gmra.mrb[28].mxu0 %v7264_v0  ;;  %v5952_v0 = vld [vmem:[%s6873_s5 + $0xa08] ss:$60 sps:$4 sm:$0xff]  }
 0x264   : > { %4066 = vmatpush1.bf16.msra.mxu0 %v5943_v45  ;;  %5151 = vmatprep.mubr.msk.bf16.mxu0 %vm3365_vm0, %v7275_v6  ;;  %v5958_v6 = vld [vmem:[%s6873_s5 + $0xaf8] ss:$60 sps:$4 sm:$0xff]   ;;  %s7546_s5 = scalar_lea.vmem (%p6047_p5), %s7619_s3, %s5231_s28 }
 0x265   : > { %4067 = vmatprep.subr.bf16.mxu0 %v5948_v11 }
 0x267   : > { %4204 = vmatmul.mubr.bf16.gmra.mrb[36].mxu1 %v7334_v44 }
 0x268   : > { %4068 = vmatpush1.bf16.msra.mxu0 %v5946_v55 }
 0x269   : > { %4069 = vmatprep.subr.bf16.mxu0 %v5951_v59 }
 0x26c   : > { %4070 = vmatpush1.bf16.msra.mxu0 %v5949_v46 }
 0x26d   : > { %4071 = vmatprep.subr.bf16.mxu0 %v5954_v48 }
 0x270   : > { %4072 = vmatpush1.bf16.msra.mxu0 %v5952_v0 }
 0x271   : > { %4073 = vmatprep.subr.bf16.mxu0 %v5957_v49 }
 0x274   : > { %4074 = vmatpush1.bf16.msra.mxu0 %v5955_v51 }
 0x275   : > { %4075 = vmatprep.subr.bf16.mxu0 %v5960_v52 }
 0x278   : > { %4076 = vmatpush1.bf16.msra.mxu0 %v5958_v6 }
 0x279   : > { %4077 = vmatprep.subr.bf16.mxu0 %v5963_v53 }
 0x27c   : > { %4078 = vmatpush1.bf16.msra.mxu0 %v5961_v54 }
 0x27f   : > { %4094 = vmatmul.mubr.bf16.vlgmr.msra.gmra.mrb[24].mxu0 %v7308_v33 }
 0x280   : > { %5152 = vmatprep.mubr.msk.bf16.mxu0 %vm3365_vm0, %v7319_v38 }
 0x287   : > { %4104 = vmatmul.mubr.bf16.gmra.mrb[28].mxu0 %v7334_v44 }
 0x28a   : > { %v3671_v56 = vpop.f32.mrb[8].mxu0  ;;  %v3777_v57 = vpop.f32.mrb[8].mxu1 }
 0x28b   : > { %v5276_v61 = vadd.f32 %v3671_v56, %v7325_v39  ;;  %v5284_v58 = vadd.f32 %v3777_v57, %v7325_v39  ;;  %v3673_v60 = vpop.f32.mrb[9].mxu0  ;;  %v3779_v2 = vpop.f32.mrb[9].mxu1 }
 0x28c   : > { %v5277_v62 = vadd.f32 %v3673_v60, %v7325_v39  ;;  %v5285_v1 = vadd.f32 %v3779_v2, %v7325_v39  ;;  %v3675_v63 = vpop.f32.mrb[10].mxu0  ;;  %v3781_v7 = vpop.f32.mrb[10].mxu1 }
 0x28d   : > { %v4216_v33 = vmax.f32 %v5276_v61, 0.0  ;;  %v4218_v3 = vmax.f32 %v5284_v58, 0.0  ;;  %v5278_v38 = vadd.f32 %v3675_v63, %v7340_v47  ;;  %v5286_v44 = vadd.f32 %v3781_v7, %v7340_v47  ;;  %v3677_v4 = vpop.f32.mrb[11].mxu0  ;;  %v3783_v5 = vpop.f32.mrb[11].mxu1 }
 0x28e   : > { %v4217_v8 = vmax.f32 %v5277_v62, 0.0  ;;  %v4219_v9 = vmax.f32 %v5285_v1, 0.0  ;;  %v5279_v10 = vadd.f32 %v3677_v4, %v7340_v47  ;;  %v5287_v12 = vadd.f32 %v3783_v5, %v7340_v47 }
 0x28f   : > { %v4231_v13 = vmax.f32 %v5278_v38, 0.0  ;;  %v4233_v14 = vmax.f32 %v5286_v44, 0.0 }
 0x290   : > { %v5201_v15 = vpack.c.bf16 %v4217_v8, %v4216_v33  ;;  %v5202_v17 = vpack.c.bf16 %v4219_v9, %v4218_v3  ;;  %v4232_v18 = vmax.f32 %v5279_v10, 0.0  ;;  %v4234_v19 = vmax.f32 %v5287_v12, 0.0 }
 0x292   : > { %4458 = vst [vmem:[%s7371_s12 + $0x10] sm:$0xff] %v5201_v15  ;;  %4459 = vst [vmem:[%s7371_s12 + $0x18] sm:$0xff] %v5202_v17  ;;  %v5209_v20 = vpack.c.bf16 %v4232_v18, %v4231_v13  ;;  %v5210_v22 = vpack.c.bf16 %v4234_v19, %v4233_v14  ;;  %v3681_v23 = vpop.f32.mrb[12].mxu0  ;;  %v3787_v24 = vpop.f32.mrb[12].mxu1 }
 0x293   : > { %v5280_v21 = vadd.f32 %v3681_v23, %v7344_v50  ;;  %v3683_v16 = vpop.f32.mrb[13].mxu0  ;;  %v5288_v27 = vadd.f32 %v3787_v24, %v7344_v50  ;;  %v3789_v26 = vpop.f32.mrb[13].mxu1 }
 0x294   : > { %4466 = vst [vmem:[%s7371_s12 + $0x4c] sm:$0xff] %v5209_v20  ;;  %4467 = vst [vmem:[%s7371_s12 + $0x54] sm:$0xff] %v5210_v22  ;;  %v5281_v28 = vadd.f32 %v3683_v16, %v7344_v50  ;;  %v3685_v29 = vpop.f32.mrb[14].mxu0  ;;  %v5289_v31 = vadd.f32 %v3789_v26, %v7344_v50  ;;  %v3791_v30 = vpop.f32.mrb[14].mxu1 }
 0x295   : > { %v4246_v32 = vmax.f32 %v5280_v21, 0.0  ;;  %v5282_v34 = vadd.f32 %v3685_v29, %v7366_v25  ;;  %v3687_v36 = vpop.f32.mrb[15].mxu0  ;;  %v4248_v35 = vmax.f32 %v5288_v27, 0.0  ;;  %v5290_v37 = vadd.f32 %v3791_v30, %v7366_v25  ;;  %v3793_v40 = vpop.f32.mrb[15].mxu1 }
 0x296   : > { %v4247_v41 = vmax.f32 %v5281_v28, 0.0  ;;  %v5283_v42 = vadd.f32 %v3687_v36, %v7366_v25  ;;  %v4249_v43 = vmax.f32 %v5289_v31, 0.0  ;;  %v5291_v45 = vadd.f32 %v3793_v40, %v7366_v25 }
 0x297   : > { %v4261_v11 = vmax.f32 %v5282_v34, 0.0  ;;  %v4263_v55 = vmax.f32 %v5290_v37, 0.0 }
 0x298   : > { %v5217_v59 = vpack.c.bf16 %v4247_v41, %v4246_v32  ;;  %v4262_v46 = vmax.f32 %v5283_v42, 0.0  ;;  %v5218_v48 = vpack.c.bf16 %v4249_v43, %v4248_v35  ;;  %v4264_v0 = vmax.f32 %v5291_v45, 0.0 }
 0x29a   : > { %4474 = vst [vmem:[%s7371_s12 + $0x88] sm:$0xff] %v5217_v59  ;;  %v5225_v49 = vpack.c.bf16 %v4262_v46, %v4261_v11  ;;  %4475 = vst [vmem:[%s7371_s12 + $0x90] sm:$0xff] %v5218_v48  ;;  %v5226_v51 = vpack.c.bf16 %v4264_v0, %v4263_v55 }
 0x29c   : > { %4482 = vst [vmem:[%s7371_s12 + $0xc4] sm:$0xff] %v5225_v49  ;;  %4483 = vst [vmem:[%s7371_s12 + $0xcc] sm:$0xff] %v5226_v51 }
 0x2ee   : > { %v3883_v52 = vpop.f32.mrb[16].mxu0  ;;  %v3989_v6 = vpop.f32.mrb[16].mxu1 }
 0x2ef   : > { %v5292_v53 = vadd.f32 %v3883_v52, %v7325_v39  ;;  %v5300_v54 = vadd.f32 %v3989_v6, %v7325_v39  ;;  %v3885_v56 = vpop.f32.mrb[17].mxu0  ;;  %v3991_v57 = vpop.f32.mrb[17].mxu1 }
 0x2f0   : > { %v5293_v61 = vadd.f32 %v3885_v56, %v7325_v39  ;;  %v5301_v58 = vadd.f32 %v3991_v57, %v7325_v39  ;;  %v3887_v60 = vpop.f32.mrb[18].mxu0  ;;  %v3993_v2 = vpop.f32.mrb[18].mxu1 }
 0x2f1   : > { %v4220_v62 = vmax.f32 %v5292_v53, 0.0  ;;  %v4222_v1 = vmax.f32 %v5300_v54, 0.0  ;;  %v5294_v63 = vadd.f32 %v3887_v60, %v7340_v47  ;;  %v5302_v7 = vadd.f32 %v3993_v2, %v7340_v47  ;;  %v3889_v33 = vpop.f32.mrb[19].mxu0  ;;  %v3995_v3 = vpop.f32.mrb[19].mxu1 }
 0x2f2   : > { %v4221_v38 = vmax.f32 %v5293_v61, 0.0  ;;  %v4223_v44 = vmax.f32 %v5301_v58, 0.0  ;;  %v5295_v4 = vadd.f32 %v3889_v33, %v7340_v47  ;;  %v5303_v5 = vadd.f32 %v3995_v3, %v7340_v47 }
 0x2f3   : > { %v4235_v8 = vmax.f32 %v5294_v63, 0.0  ;;  %v4237_v9 = vmax.f32 %v5302_v7, 0.0 }
 0x2f4   : > { %v5203_v10 = vpack.c.bf16 %v4221_v38, %v4220_v62  ;;  %v5204_v12 = vpack.c.bf16 %v4223_v44, %v4222_v1  ;;  %v4236_v13 = vmax.f32 %v5295_v4, 0.0  ;;  %v4238_v14 = vmax.f32 %v5303_v5, 0.0 }
 0x2f6   : > { %4460 = vst [vmem:[%s7371_s12 + $0x20] sm:$0xff] %v5203_v10  ;;  %4461 = vst [vmem:[%s7371_s12 + $0x28] sm:$0xff] %v5204_v12  ;;  %v5211_v15 = vpack.c.bf16 %v4236_v13, %v4235_v8  ;;  %v5212_v17 = vpack.c.bf16 %v4238_v14, %v4237_v9  ;;  %v3893_v18 = vpop.f32.mrb[20].mxu0  ;;  %v3999_v19 = vpop.f32.mrb[20].mxu1 }
 0x2f7   : > { %v5296_v20 = vadd.f32 %v3893_v18, %v7344_v50  ;;  %v3895_v22 = vpop.f32.mrb[21].mxu0  ;;  %v5304_v23 = vadd.f32 %v3999_v19, %v7344_v50  ;;  %v4001_v24 = vpop.f32.mrb[21].mxu1 }
 0x2f8   : > { %4468 = vst [vmem:[%s7371_s12 + $0x5c] sm:$0xff] %v5211_v15  ;;  %4469 = vst [vmem:[%s7371_s12 + $0x64] sm:$0xff] %v5212_v17  ;;  %v5297_v21 = vadd.f32 %v3895_v22, %v7344_v50  ;;  %v3897_v16 = vpop.f32.mrb[22].mxu0  ;;  %v5305_v27 = vadd.f32 %v4001_v24, %v7344_v50  ;;  %v4003_v26 = vpop.f32.mrb[22].mxu1 }
 0x2f9   : > { %v4250_v28 = vmax.f32 %v5296_v20, 0.0  ;;  %v5298_v29 = vadd.f32 %v3897_v16, %v7366_v25  ;;  %v3899_v31 = vpop.f32.mrb[23].mxu0  ;;  %v4252_v30 = vmax.f32 %v5304_v23, 0.0  ;;  %v5306_v32 = vadd.f32 %v4003_v26, %v7366_v25  ;;  %v4005_v34 = vpop.f32.mrb[23].mxu1 }
 0x2fa   : > { %v4251_v36 = vmax.f32 %v5297_v21, 0.0  ;;  %v5299_v35 = vadd.f32 %v3899_v31, %v7366_v25  ;;  %v4253_v37 = vmax.f32 %v5305_v27, 0.0  ;;  %v5307_v40 = vadd.f32 %v4005_v34, %v7366_v25 }
 0x2fb   : > { %v4265_v41 = vmax.f32 %v5298_v29, 0.0  ;;  %v4267_v42 = vmax.f32 %v5306_v32, 0.0 }
 0x2fc   : > { %v5219_v43 = vpack.c.bf16 %v4251_v36, %v4250_v28  ;;  %v4266_v45 = vmax.f32 %v5299_v35, 0.0  ;;  %v5220_v11 = vpack.c.bf16 %v4253_v37, %v4252_v30  ;;  %v4268_v55 = vmax.f32 %v5307_v40, 0.0 }
 0x2fe   : > { %4476 = vst [vmem:[%s7371_s12 + $0x98] sm:$0xff] %v5219_v43  ;;  %v5227_v59 = vpack.c.bf16 %v4266_v45, %v4265_v41  ;;  %4477 = vst [vmem:[%s7371_s12 + $0xa0] sm:$0xff] %v5220_v11  ;;  %v5228_v46 = vpack.c.bf16 %v4268_v55, %v4267_v42 }
 0x300   : > { %4484 = vst [vmem:[%s7371_s12 + $0xd4] sm:$0xff] %v5227_v59  ;;  %4485 = vst [vmem:[%s7371_s12 + $0xdc] sm:$0xff] %v5228_v46 }
 0x30e   : > { %v5248_v48 = vpop.f32.mrb[24].mxu1 }
 0x30f   : > { %v5249_v0 = vpop.f32.mrb[25].mxu1 }
 0x310   : > { %v5250_v49 = vadd.f32 %v5249_v0, %v5248_v48  ;;  %v5251_v51 = vpop.f32.mrb[26].mxu1 }
 0x311   : > { %v5252_v52 = vpop.f32.mrb[27].mxu1 }
 0x312   : > { %v5253_v6 = vadd.f32 %v5252_v52, %v5251_v51  ;;  %v4149_v60 = vadd.f32 %v5250_v49, %v7325_v39  ;;  %v4516_v49 = vld [vmem:[%s7371_s12 + $0x10] sm:$0xff] (%p6047_p5)  ;;  %v4518_v51 = vld [vmem:[%s7371_s12 + $0x18] sm:$0xff] (%p6047_p5)  ;;  %v4520_v52 = vld [vmem:[%s7371_s12 + $0x20] sm:$0xff] (%p6047_p5) }
 0x313   : > { %4517 = vst [vmem:[%s7546_s5 + $0x10] sm:$0xff] (%p6047_p5), %v4516_v49  ;;  %4519 = vst [vmem:[%s7546_s5 + $0x18] sm:$0xff] (%p6047_p5), %v4518_v51 }
 0x314   : > { %v4152_v2 = vadd.f32 %v5253_v6, %v7340_v47  ;;  %v4522_v6 = vld [vmem:[%s7371_s12 + $0x28] sm:$0xff] (%p6047_p5)  ;;  %4521 = vst [vmem:[%s7546_s5 + $0x20] sm:$0xff] (%p6047_p5), %v4520_v52 }
 0x315   : > { %4523 = vst [vmem:[%s7546_s5 + $0x28] sm:$0xff] (%p6047_p5), %v4522_v6 }
 0x316   : > { %v5254_v53 = vpop.f32.mrb[28].mxu1 }
 0x317   : > { %v5255_v54 = vpop.f32.mrb[29].mxu1 }
 0x318   : > { %v5256_v56 = vadd.f32 %v5255_v54, %v5254_v53  ;;  %v5257_v57 = vpop.f32.mrb[30].mxu1  ;;  %v4526_v54 = vld [vmem:[%s7371_s12 + $0x3c] sm:$0xff] (%p6047_p5) }
 0x319   : > { %v5258_v61 = vpop.f32.mrb[31].mxu1  ;;  %4527 = vst [vmem:[%s7546_s5 + $0x78] sm:$0xff] (%p6047_p5), %v4526_v54 }
 0x31a   : > { %v5259_v58 = vadd.f32 %v5258_v61, %v5257_v57  ;;  %v4157_v5 = vadd.f32 %v5256_v56, %v7344_v50  ;;  %v4528_v56 = vld [vmem:[%s7371_s12 + $0x44] sm:$0xff] (%p6047_p5)  ;;  %v4530_v57 = vld [vmem:[%s7371_s12 + $0x4c] sm:$0xff] (%p6047_p5)  ;;  %v4532_v61 = vld [vmem:[%s7371_s12 + $0x54] sm:$0xff] (%p6047_p5) }
 0x31b   : > { %4529 = vst [vmem:[%s7546_s5 + $0x80] sm:$0xff] (%p6047_p5), %v4528_v56  ;;  %4531 = vst [vmem:[%s7546_s5 + $0x88] sm:$0xff] (%p6047_p5), %v4530_v57 }
 0x31c   : > { %v4160_v9 = vadd.f32 %v5259_v58, %v7366_v25  ;;  %v4534_v58 = vld [vmem:[%s7371_s12 + $0x5c] sm:$0xff] (%p6047_p5)  ;;  %4533 = vst [vmem:[%s7546_s5 + $0x90] sm:$0xff] (%p6047_p5), %v4532_v61 }
 0x31d   : > { %4535 = vst [vmem:[%s7546_s5 + $0x98] sm:$0xff] (%p6047_p5), %v4534_v58 }
 0x332   : > { %v4197_v62 = vpop.f32.mrb[32].mxu1 }
 0x333   : > { %v4198_v1 = vadd.f32 %v4197_v62, %v4149_v60  ;;  %v4199_v63 = vpop.f32.mrb[33].mxu1  ;;  %v4536_v60 = vld [vmem:[%s7371_s12 + $0x64] sm:$0xff] (%p6047_p5)  ;;  %v4540_v62 = vld [vmem:[%s7371_s12 + $0x78] sm:$0xff] (%p6047_p5) }
 0x334   : > { %v4200_v7 = vpop.f32.mrb[34].mxu1  ;;  %4537 = vst [vmem:[%s7546_s5 + $0xa0] sm:$0xff] (%p6047_p5), %v4536_v60  ;;  %4541 = vst [vmem:[%s7546_s5 + $0xf0] sm:$0xff] (%p6047_p5), %v4540_v62  ;;  %v4544_v63 = vld [vmem:[%s7371_s12 + $0x88] sm:$0xff] (%p6047_p5) }
 0x335   : > { %v4226_v33 = vmax.f32 %v4198_v1, 0.0  ;;  %v4201_v3 = vadd.f32 %v4200_v7, %v4152_v2  ;;  %v4202_v38 = vpop.f32.mrb[35].mxu1  ;;  %v4542_v1 = vld [vmem:[%s7371_s12 + $0x80] sm:$0xff] (%p6047_p5)  ;;  %v4546_v7 = vld [vmem:[%s7371_s12 + $0x90] sm:$0xff] (%p6047_p5)  ;;  %4545 = vst [vmem:[%s7546_s5 + $0x100] sm:$0xff] (%p6047_p5), %v4544_v63 }
 0x336   : > { %4543 = vst [vmem:[%s7546_s5 + $0xf8] sm:$0xff] (%p6047_p5), %v4542_v1  ;;  %4547 = vst [vmem:[%s7546_s5 + $0x108] sm:$0xff] (%p6047_p5), %v4546_v7 }
 0x337   : > { %v5206_v44 = vpack.c.bf16 %v4226_v33, %v4226_v33  ;;  %v4241_v4 = vmax.f32 %v4201_v3, 0.0  ;;  %v4548_v33 = vld [vmem:[%s7371_s12 + $0x98] sm:$0xff] (%p6047_p5)  ;;  %v4550_v3 = vld [vmem:[%s7371_s12 + $0xa0] sm:$0xff] (%p6047_p5) }
 0x338   : > { %4549 = vst [vmem:[%s7546_s5 + $0x110] sm:$0xff] (%p6047_p5), %v4548_v33  ;;  %4551 = vst [vmem:[%s7546_s5 + $0x118] sm:$0xff] (%p6047_p5), %v4550_v3 }
 0x339   : > { %4463 = vst [vmem:[%s7371_s12 + $0x38] sm:$0xf] %v5206_v44  ;;  %v5214_v8 = vpack.c.bf16 %v4241_v4, %v4241_v4  ;;  %v4554_v44 = vld [vmem:[%s7371_s12 + $0xb4] sm:$0xff] (%p6047_p5)  ;;  %v4556_v4 = vld [vmem:[%s7371_s12 + $0xbc] sm:$0xff] (%p6047_p5) }
 0x33a   : > { %v4205_v10 = vpop.f32.mrb[36].mxu1  ;;  %4555 = vst [vmem:[%s7546_s5 + $0x168] sm:$0xff] (%p6047_p5), %v4554_v44  ;;  %4557 = vst [vmem:[%s7546_s5 + $0x170] sm:$0xff] (%p6047_p5), %v4556_v4 }
 0x33b   : > { %4471 = vst [vmem:[%s7371_s12 + $0x74] sm:$0xf] %v5214_v8  ;;  %v4206_v12 = vadd.f32 %v4205_v10, %v4157_v5  ;;  %v4207_v13 = vpop.f32.mrb[37].mxu1  ;;  %v4558_v5 = vld [vmem:[%s7371_s12 + $0xc4] sm:$0xff] (%p6047_p5)  ;;  %v4560_v8 = vld [vmem:[%s7371_s12 + $0xcc] sm:$0xff] (%p6047_p5)  ;;  %v4564_v10 = vld [vmem:[%s7371_s12 + $0xdc] sm:$0xff] (%p6047_p5) }
 0x33c   : > { %v4208_v14 = vpop.f32.mrb[38].mxu1  ;;  %4559 = vst [vmem:[%s7546_s5 + $0x178] sm:$0xff] (%p6047_p5), %v4558_v5  ;;  %4561 = vst [vmem:[%s7546_s5 + $0x180] sm:$0xff] (%p6047_p5), %v4560_v8 }
 0x33d   : > { %v4256_v15 = vmax.f32 %v4206_v12, 0.0  ;;  %v4209_v17 = vadd.f32 %v4208_v14, %v4160_v9  ;;  %v4210_v18 = vpop.f32.mrb[39].mxu1  ;;  %v4562_v9 = vld [vmem:[%s7371_s12 + $0xd4] sm:$0xff] (%p6047_p5)  ;;  %4565 = vst [vmem:[%s7546_s5 + $0x190] sm:$0xff] (%p6047_p5), %v4564_v10 }
 0x33e   : > { %4563 = vst [vmem:[%s7546_s5 + $0x188] sm:$0xff] (%p6047_p5), %v4562_v9 }
 0x33f   : > { %v5222_v19 = vpack.c.bf16 %v4256_v15, %v4256_v15  ;;  %v4271_v20 = vmax.f32 %v4209_v17, 0.0 }
 0x340   : > { %v5188_v13 = vld [vmem:[%s7371_s12 + $0x38] sm:$0xf] (%p6047_p5) }
 0x341   : > { %4479 = vst [vmem:[%s7371_s12 + $0xb0] sm:$0xf] %v5222_v19  ;;  %v5230_v22 = vpack.c.bf16 %v4271_v20, %v4271_v20  ;;  %5189 = vst [vmem:[%s7546_s5 + $0x38] sm:$0xf] (%p6047_p5), %v5188_v13 }
 0x342   : > { %v5190_v14 = vld [vmem:[%s7371_s12 + $0x74] sm:$0xf] (%p6047_p5) }
 0x343   : > { %4487 = vst [vmem:[%s7371_s12 + $0xec] sm:$0xf] %v5230_v22  ;;  %5191 = vst [vmem:[%s7546_s5 + $0xb0] sm:$0xf] (%p6047_p5), %v5190_v14 }
 0x348   : > { %v5192_v15 = vld [vmem:[%s7371_s12 + $0xb0] sm:$0xf] (%p6047_p5) }
 0x349   : > { %5193 = vst [vmem:[%s7546_s5 + $0x128] sm:$0xf] (%p6047_p5), %v5192_v15 }
 0x34a   : > { %v5194_v17 = vld [vmem:[%s7371_s12 + $0xec] sm:$0xf] (%p6047_p5) }
 0x34b   : > { %5195 = vst [vmem:[%s7546_s5 + $0x1a0] sm:$0xf] (%p6047_p5), %v5194_v17 }
 0x352   : > { %v4095_v23 = vpop.f32.mrb[24].mxu0 }
 0x353   : > { %v5308_v24 = vadd.f32 %v4095_v23, %v7325_v39  ;;  %v4097_v21 = vpop.f32.mrb[25].mxu0 }
 0x354   : > { %v5309_v16 = vadd.f32 %v4097_v21, %v7325_v39  ;;  %v4099_v27 = vpop.f32.mrb[26].mxu0 }
 0x355   : > { %v4224_v26 = vmax.f32 %v5308_v24, 0.0  ;;  %v5310_v28 = vadd.f32 %v4099_v27, %v7340_v47  ;;  %v4101_v29 = vpop.f32.mrb[27].mxu0 }
 0x356   : > { %v4225_v31 = vmax.f32 %v5309_v16, 0.0  ;;  %v5311_v30 = vadd.f32 %v4101_v29, %v7340_v47 }
 0x357   : > { %v4239_v32 = vmax.f32 %v5310_v28, 0.0 }
 0x358   : > { %v5205_v34 = vpack.c.bf16 %v4225_v31, %v4224_v26  ;;  %v4240_v36 = vmax.f32 %v5311_v30, 0.0 }
 0x35a   : > { %4462 = vst [vmem:[%s7371_s12 + $0x30] sm:$0xff] %v5205_v34  ;;  %v5213_v35 = vpack.c.bf16 %v4240_v36, %v4239_v32  ;;  %v4105_v37 = vpop.f32.mrb[28].mxu0 }
 0x35b   : > { %v5312_v40 = vadd.f32 %v4105_v37, %v7344_v50  ;;  %v4107_v41 = vpop.f32.mrb[29].mxu0 }
 0x35c   : > { %4470 = vst [vmem:[%s7371_s12 + $0x6c] sm:$0xff] %v5213_v35  ;;  %v5313_v39 = vadd.f32 %v4107_v41, %v7344_v50  ;;  %v4109_v42 = vpop.f32.mrb[30].mxu0  ;;  %v4512_v50 = vld [vmem:[%s7371_s12] sm:$0xff] (%p6047_p5) }
 0x35d   : > { %v4254_v43 = vmax.f32 %v5312_v40, 0.0  ;;  %v5314_v45 = vadd.f32 %v4109_v42, %v7366_v25  ;;  %v4111_v11 = vpop.f32.mrb[31].mxu0  ;;  %4513 = vst [vmem:[%s7546_s5] sm:$0xff] (%p6047_p5), %v4512_v50 }
 0x35e   : > { %v4255_v47 = vmax.f32 %v5313_v39, 0.0  ;;  %v5315_v55 = vadd.f32 %v4111_v11, %v7366_v25  ;;  %4494 = sbr.rel (!%p6047_p5) target bundleno = 877 (0x36d), region = 62  ;;  %v4514_v25 = vld [vmem:[%s7371_s12 + $0x8] sm:$0xff] (%p6047_p5) }
 0x35f   : > { %v4269_v59 = vmax.f32 %v5314_v45, 0.0  ;;  %4515 = vst [vmem:[%s7546_s5 + $0x8] sm:$0xff] (%p6047_p5), %v4514_v25 }
 0x360   : > { %v5221_v46 = vpack.c.bf16 %v4255_v47, %v4254_v43  ;;  %v4270_v48 = vmax.f32 %v5315_v55, 0.0 }
 0x361   : > { %v4524_v53 = vld [vmem:[%s7371_s12 + $0x30] sm:$0xff] (%p6047_p5) }
 0x362   : > { %4478 = vst [vmem:[%s7371_s12 + $0xa8] sm:$0xff] %v5221_v46  ;;  %v5229_v0 = vpack.c.bf16 %v4270_v48, %v4269_v59  ;;  %4525 = vst [vmem:[%s7546_s5 + $0x30] sm:$0xff] (%p6047_p5), %v4524_v53 }
 0x363   : > { %v4538_v2 = vld [vmem:[%s7371_s12 + $0x6c] sm:$0xff] (%p6047_p5) }
 0x364   : > { %4486 = vst [vmem:[%s7371_s12 + $0xe4] sm:$0xff] %v5229_v0  ;;  %4539 = vst [vmem:[%s7546_s5 + $0xa8] sm:$0xff] (%p6047_p5), %v4538_v2 }
 0x369   : > { %v4552_v38 = vld [vmem:[%s7371_s12 + $0xa8] sm:$0xff] }
 0x36a   : > { %4553 = vst [vmem:[%s7546_s5 + $0x120] sm:$0xff] %v4552_v38 }
 0x36b   : > { %v4566_v12 = vld [vmem:[%s7371_s12 + $0xe4] sm:$0xff] }
 0x36c   : > { %4567 = vst [vmem:[%s7546_s5 + $0x198] sm:$0xff] %v4566_v12 }
 0x36d PF: > { %p10_p10 = scmp.ge.s32.totalorder %s6034_s16, 4   ;;  %s7621_s12 = smov %s5990_s13 }
 0x36e   : > { %s7622_s13 = smov %s6045_s19  ;;  %s7623_s14 = smov %s6034_s16 }
 0x36f   :  { %12 = sbr.rel (!%p10_p10) target bundleno = 2 (0x2), region = 131 }

// kernel: behavioral_cloning_forward.8
= control target key start
LH: loop header
LB: loop body
LE: loop exit
PB: predicated region body
PF: predicated region fallthrough
CT: control target
= control target key end

     0   :  { %v2352_v1 = vmov 0   ;;  %vm931_vm0 = vcmask 261120   ;;  %vm1747_vm1 = vcmask 928768   ;;  %s3113_s1 = inlined_call_operand.vmem [shape: bf16[288,882], index: 1, kind: input, shape index: {}]   ;;  %s3114_s0 = inlined_call_operand.vmem [shape: bf16[64,288], index: 0, kind: input, shape index: {}]   ;;  %s3115_s2 = inlined_call_operand.vmem [shape: f32[64,1], index: 2, kind: input, shape index: {}]   ;;  %s3116_s3 = inlined_call_operand.vmem [shape: bf16[64,882], index: 3, kind: output, shape index: {}]  }
   0x1   :  { %v2156_v0 = vld [vmem:[%s3113_s1 + $0x4] ss:$28 sps:$4 sm:$0xff]   ;;  %1049 = vmatprep.mubr.bf16.mxu1 %v2352_v1  ;;  %2154 = vset.pattern.permute.xlu0 %v2352_v1  ;;  %v2162_v5 = vld [vmem:[%s3113_s1 + $0x3c] ss:$28 sps:$4 sm:$0xff]   ;;  %v2168_v9 = vld [vmem:[%s3113_s1 + $0x74] ss:$28 sps:$4 sm:$0xff]  }
   0x2   :  { %v2158_v2 = vld [vmem:[%s3113_s1 + $0x384] ss:$28 sps:$4 sm:$0xff]   ;;  %2155 = vset.pattern.permute.xlu1 %v2352_v1  ;;  %944 = vmatprep.subr.bf16.mxu0 %v2156_v0  ;;  %v2164_v6 = vld [vmem:[%s3113_s1 + $0x3bc] ss:$28 sps:$4 sm:$0xff]   ;;  %v2172_v11 = vld [vmem:[%s3113_s1 + $0xc] ss:$28 sps:$4 sm:$0xff]  }
   0x3   :  { %v2160_v3 = vld [vmem:[%s3113_s1] ss:$28 sps:$4 sm:$0xff]   ;;  %1017 = vmatprep.subr.bf16.mxu1 %v2158_v2  ;;  %v2166_v7 = vld [vmem:[%s3113_s1 + $0x38] ss:$28 sps:$4 sm:$0xff]   ;;  %v2170_v10 = vld [vmem:[%s3113_s1 + $0x8] ss:$28 sps:$4 sm:$0xff]  }
   0x4   :  { %v2161_v4 = vld [vmem:[%s3113_s1 + $0x380] ss:$28 sps:$4 sm:$0xff]   ;;  %945 = vmatpush1.bf16.msra.mxu0 %v2160_v3  ;;  %v2167_v8 = vld [vmem:[%s3113_s1 + $0x3b8] ss:$28 sps:$4 sm:$0xff]   ;;  %v2173_v12 = vld [vmem:[%s3113_s1 + $0x70] ss:$28 sps:$4 sm:$0xff]  }
   0x5   :  { %1018 = vmatpush1.bf16.msra.mxu1 %v2161_v4  ;;  %946 = vmatprep.subr.bf16.mxu0 %v2162_v5  ;;  %v2415_v13 = vld [vmem:[%s3114_s0 + $0x8] ss:$12 sps:$4 sm:$0xff]   ;;  %v2177_v15 = vld [vmem:[%s3113_s1 + $0x40] ss:$28 sps:$4 sm:$0xff]   ;;  %v2189_v24 = vld [vmem:[%s3113_s1 + $0xb0] ss:$28 sps:$4 sm:$0xff]  }
   0x6   :  { %1019 = vmatprep.subr.bf16.mxu1 %v2164_v6  ;;  %v2175_v14 = vld [vmem:[%s3113_s1 + $0xac] ss:$28 sps:$4 sm:$0xff]   ;;  %v2179_v16 = vld [vmem:[%s3113_s1 + $0x44] ss:$28 sps:$4 sm:$0xff]   ;;  %v2185_v19 = vld [vmem:[%s3113_s1 + $0x7c] ss:$28 sps:$4 sm:$0xff]  }
   0x7   :  { %v2180_v17 = vld [vmem:[%s3113_s1 + $0xa8] ss:$28 sps:$4 sm:$0xff]   ;;  %v2183_v20 = vld [vmem:[%s3113_s1 + $0x78] ss:$28 sps:$4 sm:$0xff]   ;;  %v2186_v21 = vld [vmem:[%s3113_s1 + $0xe0] ss:$28 sps:$4 sm:$0xff]  }
   0x8   :  { %947 = vmatpush1.bf16.msra.mxu0 %v2166_v7  ;;  %v2181_v18 = vld [vmem:[%s3113_s1 + $0xe4] ss:$28 sps:$4 sm:$0xff]   ;;  %v2187_v22 = vld [vmem:[%s3113_s1 + $0x11c] ss:$28 sps:$4 sm:$0xff]   ;;  %v2191_v23 = vld [vmem:[%s3113_s1 + $0xb4] ss:$28 sps:$4 sm:$0xff]  }
   0x9   :  { %1020 = vmatpush1.bf16.msra.mxu1 %v2167_v8  ;;  %948 = vmatprep.subr.bf16.mxu0 %v2168_v9  ;;  %v2192_v25 = vld [vmem:[%s3113_s1 + $0x118] ss:$28 sps:$4 sm:$0xff]   ;;  %v2197_v27 = vld [vmem:[%s3113_s1 + $0xec] ss:$28 sps:$4 sm:$0xff]   ;;  %v2203_v31 = vld [vmem:[%s3113_s1 + $0x124] ss:$28 sps:$4 sm:$0xff]  }
   0xa   :  { %1090 = vmatprep.subr.bf16.mxu1 %v2172_v11  ;;  %v2193_v26 = vld [vmem:[%s3113_s1 + $0x154] ss:$28 sps:$4 sm:$0xff]   ;;  %v2195_v28 = vld [vmem:[%s3113_s1 + $0xe8] ss:$28 sps:$4 sm:$0xff]   ;;  %v2201_v32 = vld [vmem:[%s3113_s1 + $0x120] ss:$28 sps:$4 sm:$0xff]  }
   0xb   :  { %v2198_v29 = vld [vmem:[%s3113_s1 + $0x150] ss:$28 sps:$4 sm:$0xff]   ;;  %v2204_v33 = vld [vmem:[%s3113_s1 + $0x188] ss:$28 sps:$4 sm:$0xff]   ;;  %v2209_v35 = vld [vmem:[%s3113_s1 + $0x15c] ss:$28 sps:$4 sm:$0xff]  }
   0xc   :  { %1919 = vmatmul.mubr.msk.bf16.vlgmr.msra.gmra.mrb[0].mxu1 %vm931_vm0, %v2415_v13  ;;  %949 = vmatpush1.bf16.msra.mxu0 %v2173_v12  ;;  %v2199_v30 = vld [vmem:[%s3113_s1 + $0x18c] ss:$28 sps:$4 sm:$0xff]   ;;  %v2205_v34 = vld [vmem:[%s3113_s1 + $0x1c4] ss:$28 sps:$4 sm:$0xff]   ;;  %v2207_v36 = vld [vmem:[%s3113_s1 + $0x158] ss:$28 sps:$4 sm:$0xff]  }
   0xd   :  { %1091 = vmatpush1.bf16.msra.mxu1 %v2170_v10  ;;  %950 = vmatprep.subr.bf16.mxu0 %v2175_v14  ;;  %v2210_v37 = vld [vmem:[%s3113_s1 + $0x1c0] ss:$28 sps:$4 sm:$0xff]   ;;  %v2215_v39 = vld [vmem:[%s3113_s1 + $0x194] ss:$28 sps:$4 sm:$0xff]   ;;  %v2221_v44 = vld [vmem:[%s3113_s1 + $0x1cc] ss:$28 sps:$4 sm:$0xff]  }
   0xe   :  { %1092 = vmatprep.subr.bf16.mxu1 %v2179_v16  ;;  %1059 = vmatprep.mubr.bf16.mxu1 %v2352_v1  ;;  %v2211_v38 = vld [vmem:[%s3113_s1 + $0x1fc] ss:$28 sps:$4 sm:$0xff]   ;;  %v2501_v40 = vld [vmem:[%s3114_s0 + $0x20] ss:$12 sps:$4 sm:$0xff]   ;;  %v2217_v43 = vld [vmem:[%s3113_s1 + $0x234] ss:$28 sps:$4 sm:$0xff]  }
   0xf   :  { %v2213_v41 = vld [vmem:[%s3113_s1 + $0x190] ss:$28 sps:$4 sm:$0xff]   ;;  %v2216_v42 = vld [vmem:[%s3113_s1 + $0x1f8] ss:$28 sps:$4 sm:$0xff]   ;;  %v2219_v45 = vld [vmem:[%s3113_s1 + $0x1c8] ss:$28 sps:$4 sm:$0xff]  }
  0x10   :  { %951 = vmatpush1.bf16.msra.mxu0 %v2180_v17  ;;  %v2222_v46 = vld [vmem:[%s3113_s1 + $0x230] ss:$28 sps:$4 sm:$0xff]   ;;  %v2227_v48 = vld [vmem:[%s3113_s1 + $0x204] ss:$28 sps:$4 sm:$0xff]   ;;  %v2234_v53 = vld [vmem:[%s3113_s1 + $0x23c] ss:$28 sps:$4 sm:$0xff]  }
  0x11   :  { %1093 = vmatpush1.bf16.msra.mxu1 %v2177_v15  ;;  %952 = vmatprep.subr.bf16.mxu0 %v2181_v18  ;;  %v2223_v47 = vld [vmem:[%s3113_s1 + $0x26c] ss:$28 sps:$4 sm:$0xff]   ;;  %v2533_v49 = vld [vmem:[%s3114_s0 + $0x38] ss:$12 sps:$4 sm:$0xff]   ;;  %v2225_v50 = vld [vmem:[%s3113_s1 + $0x200] ss:$28 sps:$4 sm:$0xff]  }
  0x12   :  { %1094 = vmatprep.subr.bf16.mxu1 %v2185_v19  ;;  %v2228_v51 = vld [vmem:[%s3113_s1 + $0x268] ss:$28 sps:$4 sm:$0xff]   ;;  %v2232_v54 = vld [vmem:[%s3113_s1 + $0x238] ss:$28 sps:$4 sm:$0xff]   ;;  %v2235_v56 = vld [vmem:[%s3113_s1 + $0x2a0] ss:$28 sps:$4 sm:$0xff]  }
  0x13   :  { %v2229_v52 = vld [vmem:[%s3113_s1 + $0x2a4] ss:$28 sps:$4 sm:$0xff]   ;;  %v2236_v57 = vld [vmem:[%s3113_s1 + $0x2dc] ss:$28 sps:$4 sm:$0xff]   ;;  %v2240_v58 = vld [vmem:[%s3113_s1 + $0x274] ss:$28 sps:$4 sm:$0xff]  }
  0x14   :  { %953 = vmatpush1.bf16.msra.mxu0 %v2186_v21  ;;  %1920 = vmatmul.mubr.msk.bf16.gmra.mrb[4].mxu1 %vm931_vm0, %v2501_v40  ;;  %v2555_v55 = vld [vmem:[%s3114_s0 + $0x4] ss:$12 sps:$4 sm:$0xff]   ;;  %v2241_v61 = vld [vmem:[%s3113_s1 + $0x2d8] ss:$28 sps:$4 sm:$0xff]   ;;  %v2247_v63 = vld [vmem:[%s3113_s1 + $0x2ac] ss:$28 sps:$4 sm:$0xff]  }
  0x15   :  { %1095 = vmatpush1.bf16.msra.mxu1 %v2183_v20  ;;  %954 = vmatprep.subr.bf16.mxu0 %v2187_v22  ;;  %v2571_v59 = vld [vmem:[%s3114_s0 + $0x50] ss:$12 sps:$4 sm:$0xff]   ;;  %v2245_v0 = vld [vmem:[%s3113_s1 + $0x2a8] ss:$28 sps:$4 sm:$0xff]   ;;  %v2615_v9 = vld [vmem:[%s3114_s0] ss:$12 sps:$4 sm:$0xff]  }
  0x16   :  { %1096 = vmatprep.subr.bf16.mxu1 %v2191_v23  ;;  %1069 = vmatprep.mubr.bf16.mxu1 %v2352_v1  ;;  %v2238_v60 = vld [vmem:[%s3113_s1 + $0x270] ss:$28 sps:$4 sm:$0xff]   ;;  %v2253_v4 = vld [vmem:[%s3113_s1 + $0x2e4] ss:$28 sps:$4 sm:$0xff]   ;;  %v2261_v7 = vld [vmem:[%s3113_s1 + $0x31c] ss:$28 sps:$4 sm:$0xff]  }
  0x17   :  { %976 = vmatprep.mubr.bf16.mxu0 %v2555_v55  ;;  %v2242_v62 = vld [vmem:[%s3113_s1 + $0x314] ss:$28 sps:$4 sm:$0xff]   ;;  %v2249_v3 = vld [vmem:[%s3113_s1 + $0x34c] ss:$28 sps:$4 sm:$0xff]   ;;  %v2251_v5 = vld [vmem:[%s3113_s1 + $0x2e0] ss:$28 sps:$4 sm:$0xff]  }
  0x18   :  { %955 = vmatpush1.bf16.msra.mxu0 %v2192_v25  ;;  %v2248_v2 = vld [vmem:[%s3113_s1 + $0x310] ss:$28 sps:$4 sm:$0xff]   ;;  %v2254_v6 = vld [vmem:[%s3113_s1 + $0x348] ss:$28 sps:$4 sm:$0xff]   ;;  %v2259_v10 = vld [vmem:[%s3113_s1 + $0x318] ss:$28 sps:$4 sm:$0xff]  }
  0x19   :  { %1097 = vmatpush1.bf16.msra.mxu1 %v2189_v24  ;;  %956 = vmatprep.subr.bf16.mxu0 %v2193_v26  ;;  %v2264_v8 = vld [vmem:[%s3113_s1 + $0x14] ss:$28 sps:$4 sm:$0xff]   ;;  %v2270_v14 = vld [vmem:[%s3113_s1 + $0x4c] ss:$28 sps:$4 sm:$0xff]   ;;  %v2276_v18 = vld [vmem:[%s3113_s1 + $0x84] ss:$28 sps:$4 sm:$0xff]  }
  0x1a   :  { %1098 = vmatprep.subr.bf16.mxu1 %v2197_v27  ;;  %v2262_v11 = vld [vmem:[%s3113_s1 + $0x10] ss:$28 sps:$4 sm:$0xff]   ;;  %v2632_v15 = vld [vmem:[%s3114_s0 + $0x1c] ss:$12 sps:$4 sm:$0xff]   ;;  %v2651_v20 = vld [vmem:[%s3114_s0 + $0x18] ss:$12 sps:$4 sm:$0xff]  }
  0x1b   :  { %v2267_v12 = vld [vmem:[%s3113_s1 + $0x354] ss:$28 sps:$4 sm:$0xff]   ;;  %v2268_v17 = vld [vmem:[%s3113_s1 + $0x48] ss:$28 sps:$4 sm:$0xff]   ;;  %v2274_v21 = vld [vmem:[%s3113_s1 + $0x80] ss:$28 sps:$4 sm:$0xff]  }
  0x1c   :  { %957 = vmatpush1.bf16.msra.mxu0 %v2198_v29  ;;  %1921 = vmatmul.mubr.msk.bf16.gmra.mrb[8].mxu1 %vm931_vm0, %v2533_v49  ;;  %v2265_v16 = vld [vmem:[%s3113_s1 + $0x350] ss:$28 sps:$4 sm:$0xff]   ;;  %v2659_v22 = vld [vmem:[%s3114_s0 + $0x34] ss:$12 sps:$4 sm:$0xff]   ;;  %v2279_v23 = vld [vmem:[%s3113_s1 + $0xbc] ss:$28 sps:$4 sm:$0xff]  }
  0x1d   :  { %1099 = vmatpush1.bf16.msra.mxu1 %v2195_v28  ;;  %958 = vmatprep.subr.bf16.mxu0 %v2199_v30  ;;  %v2285_v19 = vld [vmem:[%s3113_s1 + $0x38c] ss:$28 sps:$4 sm:$0xff]   ;;  %v2303_v25 = vld [vmem:[%s3113_s1 + $0x3c4] ss:$28 sps:$4 sm:$0xff]   ;;  %v2277_v26 = vld [vmem:[%s3113_s1 + $0xb8] ss:$28 sps:$4 sm:$0xff]  }
  0x1e   :  { %1100 = vmatprep.subr.bf16.mxu1 %v2203_v31  ;;  %1079 = vmatprep.mubr.bf16.mxu1 %v2352_v1  ;;  %v2283_v24 = vld [vmem:[%s3113_s1 + $0x388] ss:$28 sps:$4 sm:$0xff]   ;;  %v2288_v27 = vld [vmem:[%s3113_s1 + $0xf4] ss:$28 sps:$4 sm:$0xff]   ;;  %v2301_v29 = vld [vmem:[%s3113_s1 + $0x3c0] ss:$28 sps:$4 sm:$0xff]  }
  0x1f   :  { %v2683_v28 = vld [vmem:[%s3114_s0 + $0x30] ss:$12 sps:$4 sm:$0xff]   ;;  %v2694_v31 = vld [vmem:[%s3114_s0 + $0x4c] ss:$12 sps:$4 sm:$0xff]  }
  0x20   :  { %959 = vmatpush1.bf16.msra.mxu0 %v2204_v33  ;;  %v2286_v30 = vld [vmem:[%s3113_s1 + $0xf0] ss:$28 sps:$4 sm:$0xff]   ;;  %v2313_v33 = vld [vmem:[%s3113_s1 + $0x1d8] ss:$28 sps:$4 sm:$0xff]  }
  0x21   :  { %1101 = vmatpush1.bf16.msra.mxu1 %v2201_v32  ;;  %960 = vmatprep.subr.bf16.mxu0 %v2205_v34  ;;  %v2291_v32 = vld [vmem:[%s3113_s1 + $0x12c] ss:$28 sps:$4 sm:$0xff]  }
  0x22   :  { %1102 = vmatprep.subr.bf16.mxu1 %v2209_v35  ;;  %v2289_v34 = vld [vmem:[%s3113_s1 + $0x128] ss:$28 sps:$4 sm:$0xff]  }
  0x23   :  { %v2297_v35 = vld [vmem:[%s3113_s1 + $0x164] ss:$28 sps:$4 sm:$0xff]  }
  0x24   :  { %961 = vmatpush1.bf16.msra.mxu0 %v2210_v37  ;;  %1922 = vmatmul.mubr.msk.bf16.gmra.mrb[12].mxu1 %vm931_vm0, %v2571_v59  ;;  %v2295_v37 = vld [vmem:[%s3113_s1 + $0x160] ss:$28 sps:$4 sm:$0xff]  }
  0x25   :  { %1103 = vmatpush1.bf16.msra.mxu1 %v2207_v36  ;;  %962 = vmatprep.subr.bf16.mxu0 %v2211_v38  ;;  %v2715_v36 = vld [vmem:[%s3114_s0 + $0x48] ss:$12 sps:$4 sm:$0xff]   ;;  %v2300_v38 = vld [vmem:[%s3113_s1 + $0x19c] ss:$28 sps:$4 sm:$0xff]  }
  0x26   :  { %1104 = vmatprep.subr.bf16.mxu1 %v2215_v39  ;;  %1122 = vmatprep.mubr.bf16.mxu1 %v2555_v55  ;;  %v2298_v39 = vld [vmem:[%s3113_s1 + $0x198] ss:$28 sps:$4 sm:$0xff]  }
  0x28   :  { %963 = vmatpush1.bf16.msra.mxu0 %v2216_v42  ;;  %v2304_v42 = vld [vmem:[%s3113_s1 + $0x1d0] ss:$28 sps:$4 sm:$0xff]  }
  0x29   :  { %1105 = vmatpush1.bf16.msra.mxu1 %v2213_v41  ;;  %964 = vmatprep.subr.bf16.mxu0 %v2217_v43  ;;  %v2306_v41 = vld [vmem:[%s3113_s1 + $0x1d4] ss:$28 sps:$4 sm:$0xff]   ;;  %v2309_v43 = vld [vmem:[%s3113_s1 + $0x20c] ss:$28 sps:$4 sm:$0xff]  }
  0x2a   :  { %1106 = vmatprep.subr.bf16.mxu1 %v2221_v44  ;;  %v175_v44 = vld [vmem:[%s3115_s2] sm:$0xff] }
  0x2b   :  { %185 = vperm.xlu0 %2154, %v175_v44  }
  0x2c   :  { %965 = vmatpush1.bf16.msra.mxu0 %v2222_v46  ;;  %v2307_v46 = vld [vmem:[%s3113_s1 + $0x208] ss:$28 sps:$4 sm:$0xff]  }
  0x2d   :  { %1107 = vmatpush1.bf16.msra.mxu1 %v2219_v45  ;;  %966 = vmatprep.subr.bf16.mxu0 %v2223_v47  ;;  %v177_v45 = vld [vmem:[%s3115_s2 + $0x10] sm:$0xff]  ;;  %v176_v47 = vld [vmem:[%s3115_s2 + $0x8] sm:$0xff] }
  0x2e   :  { %1108 = vmatprep.subr.bf16.mxu1 %v2227_v48  ;;  %v2312_v48 = vld [vmem:[%s3113_s1 + $0x244] ss:$28 sps:$4 sm:$0xff]   ;;  %195 = vperm.xlu1 %2155, %v177_v45  }
  0x2f   :  { %190 = vperm.xlu0 %2154, %v176_v47  }
  0x30   :  { %967 = vmatpush1.bf16.msra.mxu0 %v2228_v51  ;;  %v2310_v51 = vld [vmem:[%s3113_s1 + $0x240] ss:$28 sps:$4 sm:$0xff]  }
  0x31   :  { %1109 = vmatpush1.bf16.msra.mxu1 %v2225_v50  ;;  %968 = vmatprep.subr.bf16.mxu0 %v2229_v52  ;;  %v178_v50 = vld [vmem:[%s3115_s2 + $0x18] sm:$0xff] }
  0x32   :  { %1110 = vmatprep.subr.bf16.mxu1 %v2234_v53  ;;  %v2314_v52 = vld [vmem:[%s3113_s1 + $0x18] ss:$28 sps:$4 sm:$0xff]   ;;  %v179_v53 = vld [vmem:[%s3115_s2 + $0x20] sm:$0xff]  ;;  %200 = vperm.xlu1 %2155, %v178_v50  }
  0x33   :  { %205 = vperm.xlu0 %2154, %v179_v53  }
  0x34   :  { %969 = vmatpush1.bf16.msra.mxu0 %v2235_v56  ;;  %v2318_v56 = vld [vmem:[%s3113_s1 + $0x210] ss:$28 sps:$4 sm:$0xff]  }
  0x35   :  { %1111 = vmatpush1.bf16.msra.mxu1 %v2232_v54  ;;  %970 = vmatprep.subr.bf16.mxu0 %v2236_v57  ;;  %v2317_v54 = vld [vmem:[%s3113_s1 + $0x27c] ss:$28 sps:$4 sm:$0xff]   ;;  %v180_v57 = vld [vmem:[%s3115_s2 + $0x28] sm:$0xff] }
  0x36   :  { %1112 = vmatprep.subr.bf16.mxu1 %v2240_v58  ;;  %v2315_v58 = vld [vmem:[%s3113_s1 + $0x278] ss:$28 sps:$4 sm:$0xff]   ;;  %210 = vperm.xlu1 %2155, %v180_v57  }
  0x38   :  { %971 = vmatpush1.bf16.msra.mxu0 %v2241_v61  ;;  %v181_v61 = vld [vmem:[%s3115_s2 + $0x30] sm:$0xff] }
  0x39   :  { %1113 = vmatpush1.bf16.msra.mxu1 %v2238_v60  ;;  %972 = vmatprep.subr.bf16.mxu0 %v2242_v62  ;;  %v2319_v60 = vld [vmem:[%s3113_s1 + $0x50] ss:$28 sps:$4 sm:$0xff]  }
  0x3a   :  { %1114 = vmatprep.subr.bf16.mxu1 %v2247_v63  ;;  %v2322_v62 = vld [vmem:[%s3113_s1 + $0x2b4] ss:$28 sps:$4 sm:$0xff]   ;;  %v2323_v63 = vld [vmem:[%s3113_s1 + $0x248] ss:$28 sps:$4 sm:$0xff]   ;;  %215 = vperm.xlu0 %2154, %v181_v61  }
  0x3c   :  { %973 = vmatpush1.bf16.msra.mxu0 %v2248_v2  ;;  %v2320_v2 = vld [vmem:[%s3113_s1 + $0x2b0] ss:$28 sps:$4 sm:$0xff]  }
  0x3d   :  { %1115 = vmatpush1.bf16.msra.mxu1 %v2245_v0  ;;  %974 = vmatprep.subr.bf16.mxu0 %v2249_v3  ;;  %v182_v0 = vld [vmem:[%s3115_s2 + $0x38] sm:$0xff]  ;;  %v2324_v3 = vld [vmem:[%s3113_s1 + $0x88] ss:$28 sps:$4 sm:$0xff]  }
  0x3e   :  { %1116 = vmatprep.subr.bf16.mxu1 %v2253_v4  ;;  %v2327_v4 = vld [vmem:[%s3113_s1 + $0x2ec] ss:$28 sps:$4 sm:$0xff]   ;;  %220 = vperm.xlu1 %2155, %v182_v0  }
  0x40   :  { %975 = vmatpush1.bf16.msra.mxu0 %v2254_v6  ;;  %v2325_v6 = vld [vmem:[%s3113_s1 + $0x2e8] ss:$28 sps:$4 sm:$0xff]  }
  0x41   :  { %1117 = vmatpush1.bf16.msra.mxu1 %v2251_v5  ;;  %1236 = vmatprep.subr.bf16.mxu0 %v2264_v8  ;;  %v2328_v5 = vld [vmem:[%s3113_s1 + $0x280] ss:$28 sps:$4 sm:$0xff]  }
  0x42   :  { %1118 = vmatprep.subr.bf16.mxu1 %v2261_v7  ;;  %v2329_v7 = vld [vmem:[%s3113_s1 + $0xc0] ss:$28 sps:$4 sm:$0xff]  }
  0x43   :  { %977 = vmatmul.mubr.bf16.vlgmr.msra.gmra.mrb[0].mxu0 %v2615_v9  ;;  %v2332_v8 = vld [vmem:[%s3113_s1 + $0x324] ss:$28 sps:$4 sm:$0xff]  }
  0x44   :  { %1237 = vmatpush1.bf16.msra.mxu0 %v2262_v11  ;;  %986 = vmatprep.mubr.bf16.mxu0 %v2632_v15  ;;  %v2330_v11 = vld [vmem:[%s3113_s1 + $0x320] ss:$28 sps:$4 sm:$0xff]  }
  0x45   :  { %1119 = vmatpush1.bf16.msra.mxu1 %v2259_v10  ;;  %1238 = vmatprep.subr.bf16.mxu0 %v2270_v14  ;;  %v2333_v10 = vld [vmem:[%s3113_s1 + $0x2b8] ss:$28 sps:$4 sm:$0xff]  }
  0x46   :  { %1120 = vmatprep.subr.bf16.mxu1 %v2267_v12  ;;  %v2334_v12 = vld [vmem:[%s3113_s1 + $0xf8] ss:$28 sps:$4 sm:$0xff]  }
  0x47   :  { %v2337_v14 = vld [vmem:[%s3113_s1 + $0x35c] ss:$28 sps:$4 sm:$0xff]  }
  0x48   :  { %1239 = vmatpush1.bf16.msra.mxu0 %v2268_v17  ;;  %v2335_v17 = vld [vmem:[%s3113_s1 + $0x358] ss:$28 sps:$4 sm:$0xff]  }
  0x49   :  { %1121 = vmatpush1.bf16.msra.mxu1 %v2265_v16  ;;  %1240 = vmatprep.subr.bf16.mxu0 %v2276_v18  ;;  %v2338_v16 = vld [vmem:[%s3113_s1 + $0x2f0] ss:$28 sps:$4 sm:$0xff]  }
  0x4a   :  { %1163 = vmatprep.subr.bf16.mxu1 %v2285_v19  ;;  %v2339_v18 = vld [vmem:[%s3113_s1 + $0x130] ss:$28 sps:$4 sm:$0xff]  }
  0x4b   :  { %987 = vmatmul.mubr.bf16.gmra.mrb[4].mxu0 %v2651_v20  ;;  %v2342_v19 = vld [vmem:[%s3113_s1 + $0x394] ss:$28 sps:$4 sm:$0xff]  }
  0x4c   :  { %1123 = vmatmul.mubr.bf16.vlgmr.msra.gmra.mrb[16].mxu1 %v2615_v9  ;;  %1241 = vmatpush1.bf16.msra.mxu0 %v2274_v21  ;;  %v2343_v21 = vld [vmem:[%s3113_s1 + $0x328] ss:$28 sps:$4 sm:$0xff]  }
  0x4d   :  { %996 = vmatprep.mubr.bf16.mxu0 %v2659_v22  ;;  %1242 = vmatprep.subr.bf16.mxu0 %v2279_v23  ;;  %v2340_v23 = vld [vmem:[%s3113_s1 + $0x390] ss:$28 sps:$4 sm:$0xff]  }
  0x4e   :  { %1132 = vmatprep.mubr.bf16.mxu1 %v2632_v15  ;;  %1164 = vmatpush1.bf16.msra.mxu1 %v2283_v24  ;;  %v2344_v24 = vld [vmem:[%s3113_s1 + $0x168] ss:$28 sps:$4 sm:$0xff]  }
  0x4f   :  { %1165 = vmatprep.subr.bf16.mxu1 %v2303_v25  ;;  %v2345_v25 = vld [vmem:[%s3113_s1 + $0x360] ss:$28 sps:$4 sm:$0xff]  }
  0x50   :  { %1243 = vmatpush1.bf16.msra.mxu0 %v2277_v26  ;;  %v2349_v26 = vld [vmem:[%s3113_s1 + $0x3cc] ss:$28 sps:$4 sm:$0xff]  }
  0x51   :  { %1244 = vmatprep.subr.bf16.mxu0 %v2288_v27  ;;  %v2346_v27 = vld [vmem:[%s3113_s1 + $0x1a0] ss:$28 sps:$4 sm:$0xff]  }
  0x52   :  { %1166 = vmatpush1.bf16.msra.mxu1 %v2301_v29  ;;  %v2347_v29 = vld [vmem:[%s3113_s1 + $0x3c8] ss:$28 sps:$4 sm:$0xff]  }
  0x53   :  { %997 = vmatmul.mubr.bf16.gmra.mrb[8].mxu0 %v2683_v28  ;;  %1999 = vmatprep.subr.bf16.mxu1 %v2313_v33 }
  0x54   :  { %1133 = vmatmul.mubr.bf16.gmra.mrb[20].mxu1 %v2651_v20  ;;  %1245 = vmatpush1.bf16.msra.mxu0 %v2286_v30  ;;  %v2350_v30 = vld [vmem:[%s3113_s1 + $0x398] ss:$28 sps:$4 sm:$0xff]  }
  0x55   :  { %1006 = vmatprep.mubr.bf16.mxu0 %v2694_v31  ;;  %1246 = vmatprep.subr.bf16.mxu0 %v2291_v32  ;;  %v2351_v32 = vld [vmem:[%s3113_s1 + $0x3d0] ss:$28 sps:$4 sm:$0xff]  }
  0x56   :  { %1142 = vmatprep.mubr.bf16.mxu1 %v2659_v22 }
  0x58   :  { %1247 = vmatpush1.bf16.msra.mxu0 %v2289_v34 }
  0x59   :  { %1248 = vmatprep.subr.bf16.mxu0 %v2297_v35 }
  0x5b   :  { %1007 = vmatmul.mubr.bf16.gmra.mrb[12].mxu0 %v2715_v36 }
  0x5c   :  { %1143 = vmatmul.mubr.bf16.gmra.mrb[24].mxu1 %v2683_v28  ;;  %1249 = vmatpush1.bf16.msra.mxu0 %v2295_v37 }
  0x5d   :  { %1152 = vmatprep.mubr.bf16.mxu1 %v2694_v31  ;;  %1250 = vmatprep.subr.bf16.mxu0 %v2300_v38 }
  0x5e   :  { %1268 = vmatprep.mubr.bf16.mxu0 %v2555_v55 }
  0x60   :  { %1251 = vmatpush1.bf16.msra.mxu0 %v2298_v39 }
  0x61   :  { %1252 = vmatprep.subr.bf16.mxu0 %v2306_v41 }
  0x64   :  { %1153 = vmatmul.mubr.bf16.gmra.mrb[28].mxu1 %v2715_v36  ;;  %1253 = vmatpush1.bf16.msra.mxu0 %v2304_v42 }
  0x65   :  { %1195 = vmatprep.mubr.bf16.mxu1 %v2352_v1  ;;  %1254 = vmatprep.subr.bf16.mxu0 %v2309_v43 }
  0x68   :  { %1255 = vmatpush1.bf16.msra.mxu0 %v2307_v46 }
  0x69   :  { %1256 = vmatprep.subr.bf16.mxu0 %v2312_v48 }
  0x6c   :  { %1923 = vmatmul.mubr.msk.bf16.vlgmr.msra.gmra.mrb[16].mxu1 %vm931_vm0, %v2415_v13  ;;  %1257 = vmatpush1.bf16.msra.mxu0 %v2310_v51 }
  0x6d   :  { %2000 = vmatpush3.bf16.msra.mxu1 %v2314_v52  ;;  %1258 = vmatprep.subr.bf16.mxu0 %v2317_v54 }
  0x6e   :  { %2001 = vmatprep.subr.bf16.mxu1 %v2318_v56  ;;  %1205 = vmatprep.mubr.bf16.mxu1 %v2352_v1 }
  0x70   :  { %1259 = vmatpush1.bf16.msra.mxu0 %v2315_v58 }
  0x71   :  { %2002 = vmatpush3.bf16.msra.mxu1 %v2319_v60  ;;  %1260 = vmatprep.subr.bf16.mxu0 %v2322_v62 }
  0x72   :  { %2003 = vmatprep.subr.bf16.mxu1 %v2323_v63 }
  0x74   :  { %1924 = vmatmul.mubr.msk.bf16.gmra.mrb[20].mxu1 %vm931_vm0, %v2501_v40  ;;  %1261 = vmatpush1.bf16.msra.mxu0 %v2320_v2 }
  0x75   :  { %2004 = vmatpush3.bf16.msra.mxu1 %v2324_v3  ;;  %1262 = vmatprep.subr.bf16.mxu0 %v2327_v4 }
  0x76   :  { %2005 = vmatprep.subr.bf16.mxu1 %v2328_v5  ;;  %1215 = vmatprep.mubr.bf16.mxu1 %v2352_v1 }
  0x78   :  { %1263 = vmatpush1.bf16.msra.mxu0 %v2325_v6 }
  0x79   :  { %2006 = vmatpush3.bf16.msra.mxu1 %v2329_v7  ;;  %1264 = vmatprep.subr.bf16.mxu0 %v2332_v8 }
  0x7a   :  { %2007 = vmatprep.subr.bf16.mxu1 %v2333_v10 }
  0x7c   :  { %1925 = vmatmul.mubr.msk.bf16.gmra.mrb[24].mxu1 %vm931_vm0, %v2533_v49  ;;  %1265 = vmatpush1.bf16.msra.mxu0 %v2330_v11 }
  0x7d   :  { %2008 = vmatpush3.bf16.msra.mxu1 %v2334_v12  ;;  %1266 = vmatprep.subr.bf16.mxu0 %v2337_v14 }
  0x7e   :  { %2009 = vmatprep.subr.bf16.mxu1 %v2338_v16  ;;  %1225 = vmatprep.mubr.bf16.mxu1 %v2352_v1 }
  0x80   :  { %1267 = vmatpush1.bf16.msra.mxu0 %v2335_v17 }
  0x81   :  { %2010 = vmatpush3.bf16.msra.mxu1 %v2339_v18  ;;  %1309 = vmatprep.subr.bf16.mxu0 %v2342_v19 }
  0x82   :  { %2011 = vmatprep.subr.bf16.mxu1 %v2343_v21 }
  0x83   :  { %1269 = vmatmul.mubr.bf16.vlgmr.msra.gmra.mrb[16].mxu0 %v2615_v9 }
  0x84   :  { %1926 = vmatmul.mubr.msk.bf16.gmra.mrb[28].mxu1 %vm931_vm0, %v2571_v59  ;;  %1310 = vmatpush1.bf16.msra.mxu0 %v2340_v23 }
  0x85   :  { %2012 = vmatpush3.bf16.msra.mxu1 %v2344_v24  ;;  %1278 = vmatprep.mubr.bf16.mxu0 %v2632_v15 }
  0x86   :  { %2013 = vmatprep.subr.bf16.mxu1 %v2345_v25  ;;  %1414 = vmatprep.mubr.bf16.mxu1 %v2555_v55 }
  0x87   :  { %1311 = vmatprep.subr.bf16.mxu0 %v2349_v26 }
  0x88   :  { %1312 = vmatpush1.bf16.msra.mxu0 %v2347_v29 }
  0x89   :  { %2014 = vmatpush3.bf16.msra.mxu1 %v2346_v27 }
  0x8a   :  { %2045 = vmatprep.subr.bf16.mxu1 %v2350_v30 }
  0x8b   :  { %1279 = vmatmul.mubr.bf16.gmra.mrb[20].mxu0 %v2651_v20 }
  0x8c   :  { %1415 = vmatmul.mubr.bf16.vlgmr.msra.gmra.mrb[32].mxu1 %v2615_v9  ;;  %1288 = vmatprep.mubr.bf16.mxu0 %v2659_v22 }
  0x8d   :  { %1422 = vmatprep.mubr.bf16.mxu1 %v2632_v15  ;;  %2046 = vmatpush3.bf16.msra.mxu1 %v2350_v30 }
  0x8e   :  { %2047 = vmatprep.subr.bf16.mxu1 %v2351_v32 }
  0x91   :  { %2048 = vmatpush3.bf16.msra.mxu1 %v2351_v32 }
  0x93   :  { %1289 = vmatmul.mubr.bf16.gmra.mrb[24].mxu0 %v2683_v28 }
  0x94   :  { %1423 = vmatmul.mubr.bf16.gmra.mrb[36].mxu1 %v2651_v20  ;;  %1298 = vmatprep.mubr.bf16.mxu0 %v2694_v31 }
  0x95   :  { %1430 = vmatprep.mubr.bf16.mxu1 %v2659_v22 }
  0x9b   :  { %1299 = vmatmul.mubr.bf16.gmra.mrb[28].mxu0 %v2715_v36 }
  0x9c   :  { %1431 = vmatmul.mubr.bf16.gmra.mrb[40].mxu1 %v2683_v28  ;;  %1341 = vmatprep.mubr.bf16.mxu0 %v2352_v1 }
  0x9d   :  { %1438 = vmatprep.mubr.bf16.mxu1 %v2694_v31 }
  0xa3   :  { %1927 = vmatmul.mubr.msk.bf16.vlgmr.msra.gmra.mrb[16].mxu0 %vm931_vm0, %v2415_v13 }
  0xa4   :  { %1439 = vmatmul.mubr.bf16.gmra.mrb[44].mxu1 %v2715_v36  ;;  %1351 = vmatprep.mubr.bf16.mxu0 %v2352_v1 }
  0xa5   :  { %2049 = vmatprep.mubr.msk.bf16.mxu1 %vm931_vm0, %v2415_v13 }
  0xaa   :  { %v2925_v37 = vpop.permute.xlu0 %185 }
  0xab   :  { %1928 = vmatmul.mubr.msk.bf16.gmra.mrb[20].mxu0 %vm931_vm0, %v2501_v40 }
  0xac   :  { %2050 = vmatmul.mubr.msk.bf16.vlgmr.msra.gmra.mrb[48].mxu1 %vm931_vm0, %v2501_v40  ;;  %1361 = vmatprep.mubr.bf16.mxu0 %v2352_v1 }
  0xad   :  { %2053 = vmatprep.mubr.msk.bf16.mxu1 %vm931_vm0, %v2533_v49  ;;  %v2931_v45 = vpop.permute.xlu1 %195 }
  0xae   :  { %v2927_v39 = vpop.permute.xlu0 %190 }
  0xb1   :  { %v2935_v62 = vpop.permute.xlu1 %200 }
  0xb2   :  { %v2947_v17 = vpop.permute.xlu0 %205 }
  0xb3   :  { %1929 = vmatmul.mubr.msk.bf16.gmra.mrb[24].mxu0 %vm931_vm0, %v2533_v49 }
  0xb4   :  { %2054 = vmatmul.mubr.msk.bf16.gmra.mrb[52].mxu1 %vm931_vm0, %v2571_v59  ;;  %1371 = vmatprep.mubr.bf16.mxu0 %v2352_v1 }
  0xb5   :  { %v2949_v24 = vpop.permute.xlu1 %210 }
  0xbb   :  { %1930 = vmatmul.mubr.msk.bf16.gmra.mrb[28].mxu0 %vm931_vm0, %v2571_v59 }
  0xdf   :  { %v1051_v13 = vpop.f32.mrb[0].mxu1 }
  0xe0   :  { %v1053_v55 = vpop.f32.mrb[1].mxu1 }
  0xe1   :  { %v1055_v9 = vpop.f32.mrb[2].mxu1 }
  0xe2   :  { %v1057_v40 = vpop.f32.mrb[3].mxu1 }
  0xe7   :  { %v1061_v15 = vpop.f32.mrb[4].mxu1 }
  0xe8   :  { %v1063_v20 = vpop.f32.mrb[5].mxu1 }
  0xe9   :  { %v1065_v22 = vpop.f32.mrb[6].mxu1 }
  0xea   :  { %v1067_v28 = vpop.f32.mrb[7].mxu1 }
  0xef   :  { %v1071_v31 = vpop.f32.mrb[8].mxu1 }
  0xf0   :  { %v1073_v33 = vpop.f32.mrb[9].mxu1 }
  0xf1   :  { %v2913_v34 = vpop.f32.mrb[10].mxu1 }
  0xf2   :  { %v2915_v49 = vpop.f32.mrb[11].mxu1 }
  0xf7   :  { %v2917_v35 = vpop.f32.mrb[12].mxu1 }
  0xf8   :  { %v2919_v1 = vpop.f32.mrb[13].mxu1 }
  0xf9   :  { %v2921_v36 = vpop.f32.mrb[14].mxu1 }
  0xfa   :  { %v2923_v59 = vpop.f32.mrb[15].mxu1 }
 0x116   :  { %v978_v38 = vpop.f32.mrb[0].mxu0 }
 0x117   :  { %v979_v41 = vadd.f32 %v978_v38, %v2925_v37  ;;  %v980_v42 = vpop.f32.mrb[1].mxu0  ;;  %v2963_v38 = vpop.permute.xlu0 %215 }
 0x118   :  { %v981_v43 = vadd.f32 %v980_v42, %v2925_v37  ;;  %v982_v44 = vpop.f32.mrb[2].mxu0 }
 0x119   :  { %v1052_v46 = vadd.f32 %v1051_v13, %v979_v41  ;;  %v983_v47 = vadd.f32 %v982_v44, %v2927_v39  ;;  %v984_v48 = vpop.f32.mrb[3].mxu0  ;;  %v2965_v44 = vpop.permute.xlu1 %220 }
 0x11a   :  { %v1054_v50 = vadd.f32 %v1053_v55, %v981_v43  ;;  %v985_v51 = vadd.f32 %v984_v48, %v2927_v39 }
 0x11b   :  { %v1512_v52 = vmax.f32 %v1052_v46, 0.0  ;;  %v1056_v53 = vadd.f32 %v1055_v9, %v983_v47 }
 0x11c   :  { %v1513_v54 = vmax.f32 %v1054_v50, 0.0  ;;  %v1058_v56 = vadd.f32 %v1057_v40, %v985_v51 }
 0x11d   :  { %v1519_v57 = vmax.f32 %v1056_v53, 0.0 }
 0x11e   :  { %v1967_v58 = vpack.c.bf16 %v1513_v54, %v1512_v52  ;;  %v1520_v60 = vmax.f32 %v1058_v56, 0.0  ;;  %v988_v61 = vpop.f32.mrb[4].mxu0 }
 0x11f   :  { %v989_v63 = vadd.f32 %v988_v61, %v2931_v45  ;;  %v990_v0 = vpop.f32.mrb[5].mxu0 }
 0x120   :  { %1744 = vst [vmem:[%s3116_s3] sm:$0xff] %v1967_v58  ;;  %v1971_v2 = vpack.c.bf16 %v1520_v60, %v1519_v57  ;;  %v991_v3 = vadd.f32 %v990_v0, %v2931_v45  ;;  %v992_v4 = vpop.f32.mrb[6].mxu0 }
 0x121   :  { %v1062_v5 = vadd.f32 %v1061_v15, %v989_v63  ;;  %v993_v6 = vadd.f32 %v992_v4, %v2935_v62  ;;  %v994_v7 = vpop.f32.mrb[7].mxu0 }
 0x122   :  { %1749 = vst [vmem:[%s3116_s3 + $0x1c] sm:$0xff] %v1971_v2  ;;  %v1064_v8 = vadd.f32 %v1063_v20, %v991_v3  ;;  %v995_v10 = vadd.f32 %v994_v7, %v2935_v62 }
 0x123   :  { %v1526_v11 = vmax.f32 %v1062_v5, 0.0  ;;  %v1066_v12 = vadd.f32 %v1065_v22, %v993_v6 }
 0x124   :  { %v1527_v14 = vmax.f32 %v1064_v8, 0.0  ;;  %v1068_v16 = vadd.f32 %v1067_v28, %v995_v10 }
 0x125   :  { %v1533_v18 = vmax.f32 %v1066_v12, 0.0 }
 0x126   :  { %v1975_v19 = vpack.c.bf16 %v1527_v14, %v1526_v11  ;;  %v1534_v21 = vmax.f32 %v1068_v16, 0.0  ;;  %v998_v23 = vpop.f32.mrb[8].mxu0 }
 0x127   :  { %v999_v25 = vadd.f32 %v998_v23, %v2947_v17  ;;  %v1000_v26 = vpop.f32.mrb[9].mxu0 }
 0x128   :  { %1753 = vst [vmem:[%s3116_s3 + $0x38] sm:$0xff] %v1975_v19  ;;  %v1979_v27 = vpack.c.bf16 %v1534_v21, %v1533_v18  ;;  %v1001_v29 = vadd.f32 %v1000_v26, %v2947_v17  ;;  %v1002_v30 = vpop.f32.mrb[10].mxu0 }
 0x129   :  { %v1072_v32 = vadd.f32 %v1071_v31, %v999_v25  ;;  %v1003_v13 = vadd.f32 %v1002_v30, %v2949_v24  ;;  %v1004_v55 = vpop.f32.mrb[11].mxu0 }
 0x12a   :  { %1757 = vst [vmem:[%s3116_s3 + $0x54] sm:$0xff] %v1979_v27  ;;  %v1074_v9 = vadd.f32 %v1073_v33, %v1001_v29  ;;  %v1005_v40 = vadd.f32 %v1004_v55, %v2949_v24 }
 0x12b   :  { %v1540_v15 = vmax.f32 %v1072_v32, 0.0  ;;  %v1076_v20 = vadd.f32 %v2913_v34, %v1003_v13 }
 0x12c   :  { %v1541_v22 = vmax.f32 %v1074_v9, 0.0  ;;  %v1078_v28 = vadd.f32 %v2915_v49, %v1005_v40 }
 0x12d   :  { %v1547_v41 = vmax.f32 %v1076_v20, 0.0 }
 0x12e   :  { %v1983_v31 = vpack.c.bf16 %v1541_v22, %v1540_v15  ;;  %v1548_v42 = vmax.f32 %v1078_v28, 0.0  ;;  %v1008_v43 = vpop.f32.mrb[12].mxu0 }
 0x12f   :  { %v1009_v46 = vadd.f32 %v1008_v43, %v2963_v38  ;;  %v1010_v47 = vpop.f32.mrb[13].mxu0 }
 0x130   :  { %1761 = vst [vmem:[%s3116_s3 + $0x70] sm:$0xff] %v1983_v31  ;;  %v1987_v33 = vpack.c.bf16 %v1548_v42, %v1547_v41  ;;  %v1011_v34 = vadd.f32 %v1010_v47, %v2963_v38  ;;  %v1012_v48 = vpop.f32.mrb[14].mxu0 }
 0x131   :  { %v1082_v49 = vadd.f32 %v2917_v35, %v1009_v46  ;;  %v1013_v50 = vadd.f32 %v1012_v48, %v2965_v44  ;;  %v1014_v51 = vpop.f32.mrb[15].mxu0 }
 0x132   :  { %1765 = vst [vmem:[%s3116_s3 + $0x8c] sm:$0xff] %v1987_v33  ;;  %v1084_v52 = vadd.f32 %v2919_v1, %v1011_v34  ;;  %v1015_v53 = vadd.f32 %v1014_v51, %v2965_v44 }
 0x133   :  { %v1554_v54 = vmax.f32 %v1082_v49, 0.0  ;;  %v1086_v56 = vadd.f32 %v2921_v36, %v1013_v50 }
 0x134   :  { %v1555_v57 = vmax.f32 %v1084_v52, 0.0  ;;  %v1088_v58 = vadd.f32 %v2923_v59, %v1015_v53 }
 0x135   :  { %v1561_v60 = vmax.f32 %v1086_v56, 0.0 }
 0x136   :  { %v1991_v61 = vpack.c.bf16 %v1555_v57, %v1554_v54  ;;  %v1562_v35 = vmax.f32 %v1088_v58, 0.0 }
 0x138   :  { %1769 = vst [vmem:[%s3116_s3 + $0xa8] sm:$0xff] %v1991_v61  ;;  %v1995_v63 = vpack.c.bf16 %v1562_v35, %v1561_v60 }
 0x13a   :  { %1773 = vst [vmem:[%s3116_s3 + $0xc4] sm:$0xff] %v1995_v63 }
 0x13f   :  { %v1197_v1 = vpop.f32.mrb[16].mxu1 }
 0x140   :  { %v2089_v0 = vadd.f32 %v1197_v1, %v2925_v37  ;;  %v1199_v2 = vpop.f32.mrb[17].mxu1 }
 0x141   :  { %v2090_v36 = vadd.f32 %v1199_v2, %v2925_v37  ;;  %v1201_v3 = vpop.f32.mrb[18].mxu1 }
 0x142   :  { %v1514_v59 = vmax.f32 %v2089_v0, 0.0  ;;  %v2091_v4 = vadd.f32 %v1201_v3, %v2927_v39  ;;  %v1203_v5 = vpop.f32.mrb[19].mxu1 }
 0x143   :  { %v1515_v6 = vmax.f32 %v2090_v36, 0.0  ;;  %v2092_v7 = vadd.f32 %v1203_v5, %v2927_v39 }
 0x144   :  { %v1521_v8 = vmax.f32 %v2091_v4, 0.0 }
 0x145   :  { %v1968_v10 = vpack.c.bf16 %v1515_v6, %v1514_v59  ;;  %v1522_v11 = vmax.f32 %v2092_v7, 0.0 }
 0x147   :  { %1745 = vst [vmem:[%s3116_s3 + $0x8] sm:$0xff] %v1968_v10  ;;  %v1972_v12 = vpack.c.bf16 %v1522_v11, %v1521_v8  ;;  %v1207_v14 = vpop.f32.mrb[20].mxu1 }
 0x148   :  { %v2093_v16 = vadd.f32 %v1207_v14, %v2931_v45  ;;  %v1209_v18 = vpop.f32.mrb[21].mxu1 }
 0x149   :  { %1750 = vst [vmem:[%s3116_s3 + $0x24] sm:$0xff] %v1972_v12  ;;  %v2094_v19 = vadd.f32 %v1209_v18, %v2931_v45  ;;  %v1211_v21 = vpop.f32.mrb[22].mxu1 }
 0x14a   :  { %v1528_v23 = vmax.f32 %v2093_v16, 0.0  ;;  %v2095_v25 = vadd.f32 %v1211_v21, %v2935_v62  ;;  %v1213_v26 = vpop.f32.mrb[23].mxu1 }
 0x14b   :  { %v1529_v27 = vmax.f32 %v2094_v19, 0.0  ;;  %v2096_v29 = vadd.f32 %v1213_v26, %v2935_v62 }
 0x14c   :  { %v1535_v30 = vmax.f32 %v2095_v25, 0.0 }
 0x14d   :  { %v1976_v32 = vpack.c.bf16 %v1529_v27, %v1528_v23  ;;  %v1536_v13 = vmax.f32 %v2096_v29, 0.0 }
 0x14f   :  { %1754 = vst [vmem:[%s3116_s3 + $0x40] sm:$0xff] %v1976_v32  ;;  %v1980_v55 = vpack.c.bf16 %v1536_v13, %v1535_v30  ;;  %v1217_v9 = vpop.f32.mrb[24].mxu1 }
 0x150   :  { %v2097_v40 = vadd.f32 %v1217_v9, %v2947_v17  ;;  %v1219_v15 = vpop.f32.mrb[25].mxu1 }
 0x151   :  { %1758 = vst [vmem:[%s3116_s3 + $0x5c] sm:$0xff] %v1980_v55  ;;  %v2098_v20 = vadd.f32 %v1219_v15, %v2947_v17  ;;  %v1221_v22 = vpop.f32.mrb[26].mxu1 }
 0x152   :  { %v1542_v28 = vmax.f32 %v2097_v40, 0.0  ;;  %v2099_v41 = vadd.f32 %v1221_v22, %v2949_v24  ;;  %v1223_v31 = vpop.f32.mrb[27].mxu1 }
 0x153   :  { %v1543_v42 = vmax.f32 %v2098_v20, 0.0  ;;  %v2100_v43 = vadd.f32 %v1223_v31, %v2949_v24 }
 0x154   :  { %v1549_v46 = vmax.f32 %v2099_v41, 0.0 }
 0x155   :  { %v1984_v47 = vpack.c.bf16 %v1543_v42, %v1542_v28  ;;  %v1550_v33 = vmax.f32 %v2100_v43, 0.0 }
 0x157   :  { %1762 = vst [vmem:[%s3116_s3 + $0x78] sm:$0xff] %v1984_v47  ;;  %v1988_v34 = vpack.c.bf16 %v1550_v33, %v1549_v46  ;;  %v1227_v48 = vpop.f32.mrb[28].mxu1 }
 0x158   :  { %v2101_v49 = vadd.f32 %v1227_v48, %v2963_v38  ;;  %v1229_v50 = vpop.f32.mrb[29].mxu1 }
 0x159   :  { %1766 = vst [vmem:[%s3116_s3 + $0x94] sm:$0xff] %v1988_v34  ;;  %v2102_v51 = vadd.f32 %v1229_v50, %v2963_v38  ;;  %v1231_v52 = vpop.f32.mrb[30].mxu1 }
 0x15a   :  { %v1556_v53 = vmax.f32 %v2101_v49, 0.0  ;;  %v2103_v54 = vadd.f32 %v1231_v52, %v2965_v44  ;;  %v1233_v56 = vpop.f32.mrb[31].mxu1 }
 0x15b   :  { %v1557_v57 = vmax.f32 %v2102_v51, 0.0  ;;  %v2104_v58 = vadd.f32 %v1233_v56, %v2965_v44 }
 0x15c   :  { %v1563_v60 = vmax.f32 %v2103_v54, 0.0 }
 0x15d   :  { %v1992_v61 = vpack.c.bf16 %v1557_v57, %v1556_v53  ;;  %v1564_v35 = vmax.f32 %v2104_v58, 0.0 }
 0x15f   :  { %1770 = vst [vmem:[%s3116_s3 + $0xb0] sm:$0xff] %v1992_v61  ;;  %v1996_v63 = vpack.c.bf16 %v1564_v35, %v1563_v60  ;;  %v2015_v1 = vpop.f32.mrb[32].mxu1 }
 0x160   :  { %v2016_v0 = vpop.f32.mrb[33].mxu1 }
 0x161   :  { %1774 = vst [vmem:[%s3116_s3 + $0xcc] sm:$0xff] %v1996_v63  ;;  %v2017_v2 = vadd.f32 %v2016_v0, %v2015_v1  ;;  %v2018_v36 = vpop.f32.mrb[34].mxu1 }
 0x162   :  { %v2019_v3 = vpop.f32.mrb[35].mxu1 }
 0x163   :  { %v2020_v59 = vadd.f32 %v2019_v3, %v2018_v36  ;;  %v1417_v34 = vadd.f32 %v2017_v2, %v2925_v37 }
 0x165   :  { %v1420_v58 = vadd.f32 %v2020_v59, %v2927_v39 }
 0x167   :  { %v2021_v4 = vpop.f32.mrb[36].mxu1 }
 0x168   :  { %v2022_v5 = vpop.f32.mrb[37].mxu1 }
 0x169   :  { %v2023_v6 = vadd.f32 %v2022_v5, %v2021_v4  ;;  %v2024_v7 = vpop.f32.mrb[38].mxu1 }
 0x16a   :  { %v2025_v8 = vpop.f32.mrb[39].mxu1 }
 0x16b   :  { %v2026_v10 = vadd.f32 %v2025_v8, %v2024_v7  ;;  %v1425_v43 = vadd.f32 %v2023_v6, %v2931_v45 }
 0x16d   :  { %v1428_v52 = vadd.f32 %v2026_v10, %v2935_v62 }
 0x16f   :  { %v2027_v11 = vpop.f32.mrb[40].mxu1 }
 0x170   :  { %v2028_v12 = vpop.f32.mrb[41].mxu1 }
 0x171   :  { %v3027_v14 = vadd.f32 %v2028_v12, %v2027_v11  ;;  %v2030_v16 = vpop.f32.mrb[42].mxu1 }
 0x172   :  { %v2031_v18 = vpop.f32.mrb[43].mxu1 }
 0x173   :  { %v3029_v19 = vadd.f32 %v2031_v18, %v2030_v16  ;;  %v1433_v18 = vadd.f32 %v3027_v14, %v2947_v17 }
 0x176   :  { %v1343_v21 = vpop.f32.mrb[16].mxu0 }
 0x177   :  { %v2033_v23 = vpop.f32.mrb[44].mxu1  ;;  %v2105_v25 = vadd.f32 %v1343_v21, %v2925_v37  ;;  %v1345_v26 = vpop.f32.mrb[17].mxu0 }
 0x178   :  { %v2034_v27 = vpop.f32.mrb[45].mxu1  ;;  %v2106_v29 = vadd.f32 %v1345_v26, %v2925_v37  ;;  %v1347_v30 = vpop.f32.mrb[18].mxu0 }
 0x179   :  { %v2035_v32 = vadd.f32 %v2034_v27, %v2033_v23  ;;  %v2036_v13 = vpop.f32.mrb[46].mxu1  ;;  %v1516_v55 = vmax.f32 %v2105_v25, 0.0  ;;  %v2107_v9 = vadd.f32 %v1347_v30, %v2927_v39  ;;  %v1349_v40 = vpop.f32.mrb[19].mxu0 }
 0x17a   :  { %v2037_v15 = vpop.f32.mrb[47].mxu1  ;;  %v1517_v20 = vmax.f32 %v2106_v29, 0.0  ;;  %v2108_v22 = vadd.f32 %v1349_v40, %v2927_v39 }
 0x17b   :  { %v2038_v28 = vadd.f32 %v2037_v15, %v2036_v13  ;;  %v1523_v41 = vmax.f32 %v2107_v9, 0.0  ;;  %v1441_v59 = vadd.f32 %v2035_v32, %v2963_v38  ;;  %v1436_v13 = vadd.f32 %v3029_v19, %v2949_v24 }
 0x17c   :  { %v1969_v31 = vpack.c.bf16 %v1517_v20, %v1516_v55  ;;  %v1524_v42 = vmax.f32 %v2108_v22, 0.0 }
 0x17d   :  { %v1444_v27 = vadd.f32 %v2038_v28, %v2965_v44 }
 0x17e   :  { %1746 = vst [vmem:[%s3116_s3 + $0x10] sm:$0xff] %v1969_v31  ;;  %v1973_v46 = vpack.c.bf16 %v1524_v42, %v1523_v41  ;;  %v1353_v47 = vpop.f32.mrb[20].mxu0 }
 0x17f   :  { %v2051_v33 = vpop.f32.mrb[48].mxu1  ;;  %v2109_v48 = vadd.f32 %v1353_v47, %v2931_v45  ;;  %v1355_v50 = vpop.f32.mrb[21].mxu0 }
 0x180   :  { %v1490_v49 = vadd.f32 %v2051_v33, %v1425_v43  ;;  %v1481_v51 = vpop.f32.mrb[49].mxu1  ;;  %1751 = vst [vmem:[%s3116_s3 + $0x2c] sm:$0xff] %v1973_v46  ;;  %v2110_v53 = vadd.f32 %v1355_v50, %v2931_v45  ;;  %v1357_v56 = vpop.f32.mrb[22].mxu0 }
 0x181   :  { %v1482_v54 = vadd.f32 %v1481_v51, %v1417_v34  ;;  %v2052_v57 = vpop.f32.mrb[50].mxu1  ;;  %v1530_v37 = vmax.f32 %v2109_v48, 0.0  ;;  %v2111_v61 = vadd.f32 %v1357_v56, %v2935_v62  ;;  %v1359_v63 = vpop.f32.mrb[23].mxu0 }
 0x182   :  { %v1532_v60 = vmax.f32 %v1490_v49, 0.0  ;;  %v1493_v35 = vadd.f32 %v2052_v57, %v1428_v52  ;;  %v1484_v1 = vpop.f32.mrb[51].mxu1  ;;  %v1531_v0 = vmax.f32 %v2110_v53, 0.0  ;;  %v2112_v36 = vadd.f32 %v1359_v63, %v2935_v62 }
 0x183   :  { %v1518_v2 = vmax.f32 %v1482_v54, 0.0  ;;  %v1485_v3 = vadd.f32 %v1484_v1, %v1420_v58  ;;  %v1537_v5 = vmax.f32 %v2111_v61, 0.0 }
 0x184   :  { %v1978_v4 = vpack.c.bf16 %v1532_v60, %v1532_v60  ;;  %v1539_v45 = vmax.f32 %v1493_v35, 0.0  ;;  %v1977_v6 = vpack.c.bf16 %v1531_v0, %v1530_v37  ;;  %v1538_v8 = vmax.f32 %v2112_v36, 0.0 }
 0x185   :  { %v1970_v7 = vpack.c.bf16 %v1518_v2, %v1518_v2  ;;  %v1525_v10 = vmax.f32 %v1485_v3, 0.0 }
 0x186   :  { %1756 = vst.msk [vmem:[%s3116_s3 + $0x50] sm:$0xf] %vm1747_vm1, %v1978_v4  ;;  %v1982_v39 = vpack.c.bf16 %v1539_v45, %v1539_v45  ;;  %1755 = vst [vmem:[%s3116_s3 + $0x48] sm:$0xff] %v1977_v6  ;;  %v1981_v62 = vpack.c.bf16 %v1538_v8, %v1537_v5  ;;  %v1363_v12 = vpop.f32.mrb[24].mxu0 }
 0x187   :  { %1748 = vst.msk [vmem:[%s3116_s3 + $0x18] sm:$0xf] %vm1747_vm1, %v1970_v7  ;;  %v1974_v11 = vpack.c.bf16 %v1525_v10, %v1525_v10  ;;  %v2055_v16 = vpop.f32.mrb[52].mxu1  ;;  %v2113_v21 = vadd.f32 %v1363_v12, %v2947_v17  ;;  %v1365_v25 = vpop.f32.mrb[25].mxu0 }
 0x188   :  { %1760 = vst.msk [vmem:[%s3116_s3 + $0x6c] sm:$0xf] %vm1747_vm1, %v1982_v39  ;;  %v1506_v23 = vadd.f32 %v2055_v16, %v1441_v59  ;;  %v1497_v26 = vpop.f32.mrb[53].mxu1  ;;  %1759 = vst [vmem:[%s3116_s3 + $0x64] sm:$0xff] %v1981_v62  ;;  %v2114_v14 = vadd.f32 %v1365_v25, %v2947_v17  ;;  %v1367_v30 = vpop.f32.mrb[26].mxu0 }
 0x189   :  { %1752 = vst.msk [vmem:[%s3116_s3 + $0x34] sm:$0xf] %vm1747_vm1, %v1974_v11  ;;  %v1498_v29 = vadd.f32 %v1497_v26, %v1433_v18  ;;  %v2056_v32 = vpop.f32.mrb[54].mxu1  ;;  %v1544_v55 = vmax.f32 %v2113_v21, 0.0  ;;  %v2115_v40 = vadd.f32 %v1367_v30, %v2949_v24  ;;  %v1369_v20 = vpop.f32.mrb[27].mxu0 }
 0x18a   :  { %v1560_v9 = vmax.f32 %v1506_v23, 0.0  ;;  %v1509_v15 = vadd.f32 %v2056_v32, %v1444_v27  ;;  %v1500_v22 = vpop.f32.mrb[55].mxu1  ;;  %v1545_v28 = vmax.f32 %v2114_v14, 0.0  ;;  %v2116_v31 = vadd.f32 %v1369_v20, %v2949_v24 }
 0x18b   :  { %v1546_v41 = vmax.f32 %v1498_v29, 0.0  ;;  %v1501_v42 = vadd.f32 %v1500_v22, %v1436_v13  ;;  %v1551_v17 = vmax.f32 %v2115_v40, 0.0 }
 0x18c   :  { %v1994_v43 = vpack.c.bf16 %v1560_v9, %v1560_v9  ;;  %v1567_v46 = vmax.f32 %v1509_v15, 0.0  ;;  %v1985_v47 = vpack.c.bf16 %v1545_v28, %v1544_v55  ;;  %v1552_v34 = vmax.f32 %v2116_v31, 0.0 }
 0x18d   :  { %v1986_v33 = vpack.c.bf16 %v1546_v41, %v1546_v41  ;;  %v1553_v48 = vmax.f32 %v1501_v42, 0.0 }
 0x18e   :  { %1772 = vst.msk [vmem:[%s3116_s3 + $0xc0] sm:$0xf] %vm1747_vm1, %v1994_v43  ;;  %v1998_v19 = vpack.c.bf16 %v1567_v46, %v1567_v46  ;;  %1763 = vst [vmem:[%s3116_s3 + $0x80] sm:$0xff] %v1985_v47  ;;  %v1989_v24 = vpack.c.bf16 %v1552_v34, %v1551_v17  ;;  %v1373_v50 = vpop.f32.mrb[28].mxu0 }
 0x18f   :  { %1764 = vst.msk [vmem:[%s3116_s3 + $0x88] sm:$0xf] %vm1747_vm1, %v1986_v33  ;;  %v1990_v49 = vpack.c.bf16 %v1553_v48, %v1553_v48  ;;  %v2117_v51 = vadd.f32 %v1373_v50, %v2963_v38  ;;  %v1375_v52 = vpop.f32.mrb[29].mxu0 }
 0x190   :  { %1776 = vst.msk [vmem:[%s3116_s3 + $0xdc] sm:$0xf] %vm1747_vm1, %v1998_v19  ;;  %1767 = vst [vmem:[%s3116_s3 + $0x9c] sm:$0xff] %v1989_v24  ;;  %v2118_v53 = vadd.f32 %v1375_v52, %v2963_v38  ;;  %v1377_v54 = vpop.f32.mrb[30].mxu0 }
 0x191   :  { %1768 = vst.msk [vmem:[%s3116_s3 + $0xa4] sm:$0xf] %vm1747_vm1, %v1990_v49  ;;  %v1558_v56 = vmax.f32 %v2117_v51, 0.0  ;;  %v2119_v57 = vadd.f32 %v1377_v54, %v2965_v44  ;;  %v1379_v58 = vpop.f32.mrb[31].mxu0 }
 0x192   :  { %v1559_v37 = vmax.f32 %v2118_v53, 0.0  ;;  %v2120_v60 = vadd.f32 %v1379_v58, %v2965_v44 }
 0x193   :  { %v1565_v61 = vmax.f32 %v2119_v57, 0.0 }
 0x194   :  { %v1993_v35 = vpack.c.bf16 %v1559_v37, %v1558_v56  ;;  %v1566_v63 = vmax.f32 %v2120_v60, 0.0 }
 0x196   :  { %1771 = vst [vmem:[%s3116_s3 + $0xb8] sm:$0xff] %v1993_v35  ;;  %v1997_v1 = vpack.c.bf16 %v1566_v63, %v1565_v61 }
 0x198   :  { %1775 = vst [vmem:[%s3116_s3 + $0xd4] sm:$0xff] %v1997_v1 }

// kernel: behavioral_cloning_forward.9
= control target key start
LH: loop header
LB: loop body
LE: loop exit
PB: predicated region body
PF: predicated region fallthrough
CT: control target
= control target key end

     0   :  { %v1237_v1 = vmov 0   ;;  %vm619_vm0 = vcmask 523264   ;;  %vm915_vm1 = vcmask 1043456   ;;  %vm916_vm2 = vcmask 588804   ;;  %s1625_s1 = inlined_call_operand.vmem [shape: bf16[576,200], index: 1, kind: input, shape index: {}]   ;;  %s1626_s0 = inlined_call_operand.vmem [shape: bf16[64,576], index: 0, kind: input, shape index: {}]   ;;  %s1627_s2 = inlined_call_operand.vmem [shape: f32[64,1], index: 2, kind: input, shape index: {}]   ;;  %s1628_s3 = inlined_call_operand.vmem [shape: bf16[64,200], index: 3, kind: output, shape index: {}]  }
   0x1   :  { %v1101_v0 = vld [vmem:[%s1625_s1 + $0x4] ss:$8 sps:$4 sm:$0xff]   ;;  %1099 = vset.pattern.permute.xlu0 %v1237_v1  ;;  %1100 = vset.pattern.permute.xlu1 %v1237_v1  ;;  %v1105_v3 = vld [vmem:[%s1625_s1] ss:$8 sps:$4 sm:$0xff]   ;;  %v1107_v5 = vld [vmem:[%s1625_s1 + $0x14] ss:$8 sps:$4 sm:$0xff]  }
   0x2   :  { %v1103_v2 = vld [vmem:[%s1625_s1 + $0x104] ss:$8 sps:$4 sm:$0xff]   ;;  %632 = vmatprep.subr.bf16.mxu1 %v1101_v0  ;;  %v1106_v4 = vld [vmem:[%s1625_s1 + $0x100] ss:$8 sps:$4 sm:$0xff]   ;;  %v1109_v6 = vld [vmem:[%s1625_s1 + $0x114] ss:$8 sps:$4 sm:$0xff]  }
   0x3   :  { %705 = vmatprep.subr.bf16.mxu0 %v1103_v2  ;;  %633 = vmatpush1.bf16.msra.mxu1 %v1105_v3  ;;  %v1111_v7 = vld [vmem:[%s1625_s1 + $0x10] ss:$8 sps:$4 sm:$0xff]   ;;  %v1113_v9 = vld [vmem:[%s1625_s1 + $0x24] ss:$8 sps:$4 sm:$0xff]   ;;  %v1117_v11 = vld [vmem:[%s1625_s1 + $0x20] ss:$8 sps:$4 sm:$0xff]  }
   0x4   :  { %706 = vmatpush1.bf16.msra.mxu0 %v1106_v4  ;;  %634 = vmatprep.subr.bf16.mxu1 %v1107_v5  ;;  %v1112_v8 = vld [vmem:[%s1625_s1 + $0x110] ss:$8 sps:$4 sm:$0xff]   ;;  %v1115_v10 = vld [vmem:[%s1625_s1 + $0x124] ss:$8 sps:$4 sm:$0xff]   ;;  %v1118_v12 = vld [vmem:[%s1625_s1 + $0x120] ss:$8 sps:$4 sm:$0xff]  }
   0x5   :  { %707 = vmatprep.subr.bf16.mxu0 %v1109_v6  ;;  %v1119_v13 = vld [vmem:[%s1625_s1 + $0x34] ss:$8 sps:$4 sm:$0xff]   ;;  %v1123_v15 = vld [vmem:[%s1625_s1 + $0x30] ss:$8 sps:$4 sm:$0xff]   ;;  %v1125_v17 = vld [vmem:[%s1625_s1 + $0x44] ss:$8 sps:$4 sm:$0xff]  }
   0x6   :  { %v1121_v14 = vld [vmem:[%s1625_s1 + $0x134] ss:$8 sps:$4 sm:$0xff]   ;;  %v1124_v16 = vld [vmem:[%s1625_s1 + $0x130] ss:$8 sps:$4 sm:$0xff]   ;;  %v1127_v18 = vld [vmem:[%s1625_s1 + $0x144] ss:$8 sps:$4 sm:$0xff]  }
   0x7   :  { %635 = vmatpush1.bf16.msra.mxu1 %v1111_v7  ;;  %v1129_v19 = vld [vmem:[%s1625_s1 + $0x40] ss:$8 sps:$4 sm:$0xff]   ;;  %v1131_v21 = vld [vmem:[%s1625_s1 + $0x54] ss:$8 sps:$4 sm:$0xff]   ;;  %v1135_v23 = vld [vmem:[%s1625_s1 + $0x50] ss:$8 sps:$4 sm:$0xff]  }
   0x8   :  { %708 = vmatpush1.bf16.msra.mxu0 %v1112_v8  ;;  %636 = vmatprep.subr.bf16.mxu1 %v1113_v9  ;;  %v1130_v20 = vld [vmem:[%s1625_s1 + $0x140] ss:$8 sps:$4 sm:$0xff]   ;;  %v1133_v22 = vld [vmem:[%s1625_s1 + $0x154] ss:$8 sps:$4 sm:$0xff]   ;;  %v1136_v24 = vld [vmem:[%s1625_s1 + $0x150] ss:$8 sps:$4 sm:$0xff]  }
   0x9   :  { %709 = vmatprep.subr.bf16.mxu0 %v1115_v10  ;;  %v1137_v25 = vld [vmem:[%s1625_s1 + $0x64] ss:$8 sps:$4 sm:$0xff]   ;;  %v1141_v27 = vld [vmem:[%s1625_s1 + $0x60] ss:$8 sps:$4 sm:$0xff]   ;;  %v1143_v29 = vld [vmem:[%s1625_s1 + $0x74] ss:$8 sps:$4 sm:$0xff]  }
   0xa   :  { %v1139_v26 = vld [vmem:[%s1625_s1 + $0x164] ss:$8 sps:$4 sm:$0xff]   ;;  %v1142_v28 = vld [vmem:[%s1625_s1 + $0x160] ss:$8 sps:$4 sm:$0xff]   ;;  %v1145_v30 = vld [vmem:[%s1625_s1 + $0x174] ss:$8 sps:$4 sm:$0xff]  }
   0xb   :  { %637 = vmatpush1.bf16.msra.mxu1 %v1117_v11  ;;  %v1147_v31 = vld [vmem:[%s1625_s1 + $0x70] ss:$8 sps:$4 sm:$0xff]   ;;  %v1149_v33 = vld [vmem:[%s1625_s1 + $0x84] ss:$8 sps:$4 sm:$0xff]   ;;  %v1153_v35 = vld [vmem:[%s1625_s1 + $0x80] ss:$8 sps:$4 sm:$0xff]  }
   0xc   :  { %710 = vmatpush1.bf16.msra.mxu0 %v1118_v12  ;;  %638 = vmatprep.subr.bf16.mxu1 %v1119_v13  ;;  %v1148_v32 = vld [vmem:[%s1625_s1 + $0x170] ss:$8 sps:$4 sm:$0xff]   ;;  %v1151_v34 = vld [vmem:[%s1625_s1 + $0x184] ss:$8 sps:$4 sm:$0xff]   ;;  %v1154_v36 = vld [vmem:[%s1625_s1 + $0x180] ss:$8 sps:$4 sm:$0xff]  }
   0xd   :  { %711 = vmatprep.subr.bf16.mxu0 %v1121_v14  ;;  %v1155_v37 = vld [vmem:[%s1625_s1 + $0x94] ss:$8 sps:$4 sm:$0xff]   ;;  %v1159_v39 = vld [vmem:[%s1625_s1 + $0x90] ss:$8 sps:$4 sm:$0xff]   ;;  %v1161_v41 = vld [vmem:[%s1625_s1 + $0xa4] ss:$8 sps:$4 sm:$0xff]  }
   0xe   :  { %v1157_v38 = vld [vmem:[%s1625_s1 + $0x194] ss:$8 sps:$4 sm:$0xff]   ;;  %v1160_v40 = vld [vmem:[%s1625_s1 + $0x190] ss:$8 sps:$4 sm:$0xff]   ;;  %v1163_v42 = vld [vmem:[%s1625_s1 + $0x1a4] ss:$8 sps:$4 sm:$0xff]  }
   0xf   :  { %639 = vmatpush1.bf16.msra.mxu1 %v1123_v15  ;;  %v1165_v43 = vld [vmem:[%s1625_s1 + $0xa0] ss:$8 sps:$4 sm:$0xff]   ;;  %v1167_v45 = vld [vmem:[%s1625_s1 + $0xb4] ss:$8 sps:$4 sm:$0xff]   ;;  %v1171_v47 = vld [vmem:[%s1625_s1 + $0xb0] ss:$8 sps:$4 sm:$0xff]  }
  0x10   :  { %712 = vmatpush1.bf16.msra.mxu0 %v1124_v16  ;;  %640 = vmatprep.subr.bf16.mxu1 %v1125_v17  ;;  %v1166_v44 = vld [vmem:[%s1625_s1 + $0x1a0] ss:$8 sps:$4 sm:$0xff]   ;;  %v1169_v46 = vld [vmem:[%s1625_s1 + $0x1b4] ss:$8 sps:$4 sm:$0xff]   ;;  %v1172_v48 = vld [vmem:[%s1625_s1 + $0x1b0] ss:$8 sps:$4 sm:$0xff]  }
  0x11   :  { %713 = vmatprep.subr.bf16.mxu0 %v1127_v18  ;;  %v1173_v49 = vld [vmem:[%s1625_s1 + $0xc4] ss:$8 sps:$4 sm:$0xff]   ;;  %v1177_v53 = vld [vmem:[%s1625_s1 + $0xc0] ss:$8 sps:$4 sm:$0xff]   ;;  %v1179_v55 = vld [vmem:[%s1625_s1 + $0xd4] ss:$8 sps:$4 sm:$0xff]  }
  0x12   :  { %v1199_v50 = vld [vmem:[%s1626_s0 + $0x4] ss:$20 sps:$4 sm:$0xff]   ;;  %v1202_v52 = vld [vmem:[%s1626_s0 + $0xc] ss:$20 sps:$4 sm:$0xff]   ;;  %v1181_v56 = vld [vmem:[%s1625_s1 + $0x1d4] ss:$8 sps:$4 sm:$0xff]  }
  0x13   :  { %641 = vmatpush1.bf16.msra.mxu1 %v1129_v19  ;;  %v1175_v51 = vld [vmem:[%s1625_s1 + $0x1c4] ss:$8 sps:$4 sm:$0xff]   ;;  %664 = vmatprep.mubr.bf16.mxu1 %v1199_v50  ;;  %v1178_v54 = vld [vmem:[%s1625_s1 + $0x1c0] ss:$8 sps:$4 sm:$0xff]   ;;  %v1183_v57 = vld [vmem:[%s1625_s1 + $0xd0] ss:$8 sps:$4 sm:$0xff]  }
  0x14   :  { %714 = vmatpush1.bf16.msra.mxu0 %v1130_v20  ;;  %642 = vmatprep.subr.bf16.mxu1 %v1131_v21  ;;  %v1184_v58 = vld [vmem:[%s1625_s1 + $0x1d0] ss:$8 sps:$4 sm:$0xff]   ;;  %v1185_v59 = vld [vmem:[%s1625_s1 + $0xe4] ss:$8 sps:$4 sm:$0xff]   ;;  %v1189_v61 = vld [vmem:[%s1625_s1 + $0xe0] ss:$8 sps:$4 sm:$0xff]  }
  0x15   :  { %715 = vmatprep.subr.bf16.mxu0 %v1133_v22  ;;  %737 = vmatprep.mubr.bf16.mxu0 %v1202_v52  ;;  %v1187_v60 = vld [vmem:[%s1625_s1 + $0x1e4] ss:$8 sps:$4 sm:$0xff]   ;;  %v1190_v62 = vld [vmem:[%s1625_s1 + $0x1e0] ss:$8 sps:$4 sm:$0xff]   ;;  %v1191_v63 = vld [vmem:[%s1625_s1 + $0xf4] ss:$8 sps:$4 sm:$0xff]  }
  0x16   :  { %v1193_v0 = vld [vmem:[%s1625_s1 + $0x1f4] ss:$8 sps:$4 sm:$0xff]   ;;  %v1195_v2 = vld [vmem:[%s1625_s1 + $0xf0] ss:$8 sps:$4 sm:$0xff]   ;;  %v1205_v4 = vld [vmem:[%s1625_s1 + $0x204] ss:$8 sps:$4 sm:$0xff]  }
  0x17   :  { %643 = vmatpush1.bf16.msra.mxu1 %v1135_v23  ;;  %v1196_v3 = vld [vmem:[%s1625_s1 + $0x1f0] ss:$8 sps:$4 sm:$0xff]   ;;  %v115_v5 = vld [vmem:[%s1627_s2 + $0x20] sm:$0xff]  ;;  %v1200_v7 = vld [vmem:[%s1626_s0 + $0x8] ss:$20 sps:$4 sm:$0xff]  }
  0x18   :  { %716 = vmatpush1.bf16.msra.mxu0 %v1136_v24  ;;  %644 = vmatprep.subr.bf16.mxu1 %v1137_v25  ;;  %v1197_v6 = vld [vmem:[%s1626_s0] ss:$20 sps:$4 sm:$0xff]   ;;  %v1212_v13 = vld [vmem:[%s1625_s1 + $0x210] ss:$8 sps:$4 sm:$0xff]   ;;  %v116_v14 = vld [vmem:[%s1627_s2 + $0x28] sm:$0xff] }
  0x19   :  { %717 = vmatprep.subr.bf16.mxu0 %v1139_v26  ;;  %141 = vperm.xlu0 %1099, %v115_v5   ;;  %v117_v8 = vld [vmem:[%s1627_s2 + $0x30] sm:$0xff]  ;;  %v1203_v9 = vld [vmem:[%s1625_s1 + $0x200] ss:$8 sps:$4 sm:$0xff]   ;;  %v118_v15 = vld [vmem:[%s1627_s2 + $0x38] sm:$0xff] }
  0x1a   :  { %v1206_v10 = vld [vmem:[%s1626_s0 + $0x2c] ss:$20 sps:$4 sm:$0xff]   ;;  %v1208_v11 = vld [vmem:[%s1626_s0 + $0x34] ss:$20 sps:$4 sm:$0xff]   ;;  %151 = vperm.xlu1 %1100, %v117_v8   ;;  %v1211_v18 = vld [vmem:[%s1626_s0 + $0x30] ss:$20 sps:$4 sm:$0xff]  }
  0x1b   :  { %645 = vmatpush1.bf16.msra.mxu1 %v1141_v27  ;;  %v1214_v12 = vld [vmem:[%s1625_s1 + $0x214] ss:$8 sps:$4 sm:$0xff]   ;;  %v1223_v16 = vld [vmem:[%s1625_s1 + $0x224] ss:$8 sps:$4 sm:$0xff]   ;;  %v1221_v21 = vld [vmem:[%s1625_s1 + $0x220] ss:$8 sps:$4 sm:$0xff]  }
  0x1c   :  { %718 = vmatpush1.bf16.msra.mxu0 %v1142_v28  ;;  %646 = vmatprep.subr.bf16.mxu1 %v1143_v29  ;;  %v1210_v17 = vld [vmem:[%s1626_s0 + $0x28] ss:$20 sps:$4 sm:$0xff]   ;;  %v111_v23 = vld [vmem:[%s1627_s2] sm:$0xff]  ;;  %v1230_v25 = vld [vmem:[%s1625_s1 + $0x230] ss:$8 sps:$4 sm:$0xff]  }
  0x1d   :  { %719 = vmatprep.subr.bf16.mxu0 %v1145_v30  ;;  %146 = vperm.xlu0 %1099, %v116_v14   ;;  %v1215_v19 = vld [vmem:[%s1626_s0 + $0x54] ss:$20 sps:$4 sm:$0xff]   ;;  %v1217_v20 = vld [vmem:[%s1626_s0 + $0x5c] ss:$20 sps:$4 sm:$0xff]   ;;  %v1220_v27 = vld [vmem:[%s1626_s0 + $0x58] ss:$20 sps:$4 sm:$0xff]  }
  0x1e   :  { %156 = vperm.xlu1 %1100, %v118_v15   ;;  %v1232_v22 = vld [vmem:[%s1625_s1 + $0x234] ss:$8 sps:$4 sm:$0xff]   ;;  %v112_v24 = vld [vmem:[%s1627_s2 + $0x8] sm:$0xff]  ;;  %v1219_v26 = vld [vmem:[%s1626_s0 + $0x50] ss:$20 sps:$4 sm:$0xff]  }
  0x1f   :  { %647 = vmatpush1.bf16.msra.mxu1 %v1147_v31  ;;  %v1224_v28 = vld [vmem:[%s1626_s0 + $0x7c] ss:$20 sps:$4 sm:$0xff]   ;;  %v1226_v29 = vld [vmem:[%s1626_s0 + $0x84] ss:$20 sps:$4 sm:$0xff]   ;;  %vm1576_vm3 = vmor %vm916_vm2, %vm915_vm1 }
  0x20   :  { %720 = vmatpush1.bf16.msra.mxu0 %v1148_v32  ;;  %648 = vmatprep.subr.bf16.mxu1 %v1149_v33  ;;  %v113_v30 = vld [vmem:[%s1627_s2 + $0x10] sm:$0xff]  ;;  %v114_v31 = vld [vmem:[%s1627_s2 + $0x18] sm:$0xff] }
  0x21   :  { %721 = vmatprep.subr.bf16.mxu0 %v1151_v34  ;;  %121 = vperm.xlu0 %1099, %v111_v23   ;;  %v1228_v32 = vld [vmem:[%s1626_s0 + $0x78] ss:$20 sps:$4 sm:$0xff]   ;;  %v1229_v33 = vld [vmem:[%s1626_s0 + $0x80] ss:$20 sps:$4 sm:$0xff]   ;;  %v1233_v34 = vld [vmem:[%s1626_s0 + $0x10] ss:$20 sps:$4 sm:$0xff]  }
  0x22   :  { %126 = vperm.xlu1 %1100, %v112_v24  }
  0x23   :  { %649 = vmatpush1.bf16.msra.mxu1 %v1153_v35  ;;  %v1234_v35 = vld [vmem:[%s1626_s0 + $0x60] ss:$20 sps:$4 sm:$0xff]  }
  0x24   :  { %722 = vmatpush1.bf16.msra.mxu0 %v1154_v36  ;;  %650 = vmatprep.subr.bf16.mxu1 %v1155_v37  ;;  %v1235_v36 = vld [vmem:[%s1626_s0 + $0x38] ss:$20 sps:$4 sm:$0xff]   ;;  %v1236_v37 = vld [vmem:[%s1626_s0 + $0x88] ss:$20 sps:$4 sm:$0xff]  }
  0x25   :  { %723 = vmatprep.subr.bf16.mxu0 %v1157_v38  ;;  %131 = vperm.xlu0 %1099, %v113_v30  }
  0x26   :  { %136 = vperm.xlu1 %1100, %v114_v31  }
  0x27   :  { %651 = vmatpush1.bf16.msra.mxu1 %v1159_v39 }
  0x28   :  { %724 = vmatpush1.bf16.msra.mxu0 %v1160_v40  ;;  %652 = vmatprep.subr.bf16.mxu1 %v1161_v41 }
  0x29   :  { %725 = vmatprep.subr.bf16.mxu0 %v1163_v42 }
  0x2b   :  { %653 = vmatpush1.bf16.msra.mxu1 %v1165_v43 }
  0x2c   :  { %726 = vmatpush1.bf16.msra.mxu0 %v1166_v44  ;;  %654 = vmatprep.subr.bf16.mxu1 %v1167_v45 }
  0x2d   :  { %727 = vmatprep.subr.bf16.mxu0 %v1169_v46 }
  0x2f   :  { %655 = vmatpush1.bf16.msra.mxu1 %v1171_v47 }
  0x30   :  { %728 = vmatpush1.bf16.msra.mxu0 %v1172_v48  ;;  %656 = vmatprep.subr.bf16.mxu1 %v1173_v49 }
  0x31   :  { %729 = vmatprep.subr.bf16.mxu0 %v1175_v51 }
  0x33   :  { %657 = vmatpush1.bf16.msra.mxu1 %v1177_v53 }
  0x34   :  { %730 = vmatpush1.bf16.msra.mxu0 %v1178_v54  ;;  %658 = vmatprep.subr.bf16.mxu1 %v1179_v55 }
  0x35   :  { %731 = vmatprep.subr.bf16.mxu0 %v1181_v56 }
  0x37   :  { %659 = vmatpush1.bf16.msra.mxu1 %v1183_v57 }
  0x38   :  { %732 = vmatpush1.bf16.msra.mxu0 %v1184_v58  ;;  %660 = vmatprep.subr.bf16.mxu1 %v1185_v59 }
  0x39   :  { %733 = vmatprep.subr.bf16.mxu0 %v1187_v60 }
  0x3b   :  { %661 = vmatpush1.bf16.msra.mxu1 %v1189_v61 }
  0x3c   :  { %734 = vmatpush1.bf16.msra.mxu0 %v1190_v62  ;;  %662 = vmatprep.subr.bf16.mxu1 %v1191_v63 }
  0x3d   :  { %735 = vmatprep.subr.bf16.mxu0 %v1193_v0 }
  0x3f   :  { %663 = vmatpush1.bf16.msra.mxu1 %v1195_v2 }
  0x40   :  { %736 = vmatpush1.bf16.msra.mxu0 %v1196_v3  ;;  %1042 = vmatprep.subr.bf16.mxu1 %v1205_v4 }
  0x41   :  { %778 = vmatprep.subr.bf16.mxu0 %v1205_v4 }
  0x42   :  { %665 = vmatmul.mubr.bf16.vlgmr.msra.gmra.mrb[0].mxu1 %v1197_v6 }
  0x43   :  { %738 = vmatmul.mubr.bf16.vlgmr.msra.gmra.mrb[0].mxu0 %v1200_v7  ;;  %1046 = vmatpush1.bf16.msra.mxu1 %v1203_v9 }
  0x44   :  { %779 = vmatpush1.bf16.msra.mxu0 %v1203_v9  ;;  %674 = vmatprep.mubr.bf16.mxu1 %v1206_v10 }
  0x45   :  { %747 = vmatprep.mubr.bf16.mxu0 %v1208_v11  ;;  %780 = vmatprep.subr.bf16.mxu0 %v1214_v12 }
  0x46   :  { %1043 = vmatprep.subr.bf16.mxu1 %v1214_v12 }
  0x47   :  { %1047 = vmatpush1.bf16.msra.mxu1 %v1212_v13 }
  0x48   :  { %781 = vmatpush1.bf16.msra.mxu0 %v1212_v13  ;;  %1044 = vmatprep.subr.bf16.mxu1 %v1223_v16 }
  0x49   :  { %782 = vmatprep.subr.bf16.mxu0 %v1223_v16 }
  0x4a   :  { %675 = vmatmul.mubr.bf16.gmra.mrb[4].mxu1 %v1210_v17 }
  0x4b   :  { %748 = vmatmul.mubr.bf16.gmra.mrb[4].mxu0 %v1211_v18  ;;  %684 = vmatprep.mubr.bf16.mxu1 %v1215_v19 }
  0x4c   :  { %757 = vmatprep.mubr.bf16.mxu0 %v1217_v20  ;;  %783 = vmatpush1.bf16.msra.mxu0 %v1221_v21 }
  0x4d   :  { %1048 = vmatpush1.bf16.msra.mxu1 %v1221_v21  ;;  %784 = vmatprep.subr.bf16.mxu0 %v1232_v22 }
  0x4e   :  { %1045 = vmatprep.subr.bf16.mxu1 %v1232_v22 }
  0x50   :  { %785 = vmatpush1.bf16.msra.mxu0 %v1230_v25 }
  0x51   :  { %1049 = vmatpush1.bf16.msra.mxu1 %v1230_v25 }
  0x52   :  { %685 = vmatmul.mubr.bf16.gmra.mrb[8].mxu1 %v1219_v26 }
  0x53   :  { %758 = vmatmul.mubr.bf16.gmra.mrb[8].mxu0 %v1220_v27  ;;  %694 = vmatprep.mubr.bf16.mxu1 %v1224_v28 }
  0x54   :  { %767 = vmatprep.mubr.bf16.mxu0 %v1226_v29 }
  0x5a   :  { %695 = vmatmul.mubr.bf16.gmra.mrb[12].mxu1 %v1228_v32 }
  0x5b   :  { %768 = vmatmul.mubr.bf16.gmra.mrb[12].mxu0 %v1229_v33  ;;  %830 = vmatprep.mubr.bf16.mxu1 %v1237_v1 }
  0x5c   :  { %810 = vmatprep.mubr.bf16.mxu0 %v1237_v1 }
  0x62   :  { %1024 = vmatmul.mubr.msk.bf16.vlgmr.msra.gmra.mrb[16].mxu1 %vm619_vm0, %v1234_v35 }
  0x63   :  { %1022 = vmatmul.mubr.msk.bf16.vlgmr.msra.gmra.mrb[0].mxu0 %vm619_vm0, %v1233_v34  ;;  %840 = vmatprep.mubr.bf16.mxu1 %v1237_v1 }
  0x64   :  { %820 = vmatprep.mubr.bf16.mxu0 %v1237_v1 }
  0x6a   :  { %1025 = vmatmul.mubr.msk.bf16.gmra.mrb[20].mxu1 %vm619_vm0, %v1236_v37 }
  0x6b   :  { %1023 = vmatmul.mubr.msk.bf16.gmra.mrb[4].mxu0 %vm619_vm0, %v1235_v36 }
  0x98   :  { %v142_v43 = vpop.permute.xlu0 %141 }
  0x99   :  { %v152_v46 = vpop.permute.xlu1 %151 }
  0x9c   :  { %v147_v47 = vpop.permute.xlu0 %146 }
  0x9d   :  { %v157_v0 = vpop.permute.xlu1 %156 }
  0xa0   :  { %v122_v14 = vpop.permute.xlu0 %121 }
  0xa1   :  { %v127_v18 = vpop.permute.xlu1 %126 }
 0x115   :  { %v666_v38 = vpop.f32.mrb[0].mxu1 }
 0x116   :  { %v668_v39 = vpop.f32.mrb[1].mxu1  ;;  %v667_v20 = vadd.f32 %v666_v38, %v122_v14 }
 0x117   :  { %v670_v40 = vpop.f32.mrb[2].mxu1  ;;  %v669_v21 = vadd.f32 %v668_v39, %v122_v14 }
 0x118   :  { %v672_v41 = vpop.f32.mrb[3].mxu1  ;;  %v671_v24 = vadd.f32 %v670_v40, %v127_v18 }
 0x119   :  { %v673_v29 = vadd.f32 %v672_v41, %v127_v18 }
 0x11d   :  { %v1564_v42 = vpop.f32.mrb[4].mxu1 }
 0x11e   :  { %v1566_v44 = vpop.f32.mrb[5].mxu1 }
 0x11f   :  { %v1568_v1 = vpop.f32.mrb[6].mxu1 }
 0x120   :  { %v1570_v45 = vpop.f32.mrb[7].mxu1 }
 0x125   :  { %v686_v48 = vpop.f32.mrb[8].mxu1 }
 0x126   :  { %v759_v49 = vpop.f32.mrb[8].mxu0  ;;  %v687_v50 = vadd.f32 %v686_v48, %v142_v43  ;;  %v688_v51 = vpop.f32.mrb[9].mxu1 }
 0x127   :  { %v761_v52 = vpop.f32.mrb[9].mxu0  ;;  %v689_v53 = vadd.f32 %v688_v51, %v142_v43  ;;  %v690_v54 = vpop.f32.mrb[10].mxu1 }
 0x128   :  { %v763_v55 = vpop.f32.mrb[10].mxu0  ;;  %v760_v56 = vadd.f32 %v759_v49, %v687_v50  ;;  %v691_v57 = vadd.f32 %v690_v54, %v147_v47  ;;  %v692_v58 = vpop.f32.mrb[11].mxu1 }
 0x129   :  { %v765_v59 = vpop.f32.mrb[11].mxu0  ;;  %v762_v60 = vadd.f32 %v761_v52, %v689_v53  ;;  %v693_v61 = vadd.f32 %v692_v58, %v147_v47  ;;  %v132_v43 = vpop.permute.xlu0 %131 }
 0x12a   :  { %v764_v62 = vadd.f32 %v763_v55, %v691_v57  ;;  %v137_v51 = vpop.permute.xlu1 %136  ;;  %v679_v57 = vadd.f32 %v1566_v44, %v132_v43 }
 0x12b   :  { %v766_v63 = vadd.f32 %v765_v59, %v693_v61 }
 0x12d   :  { %v696_v2 = vpop.f32.mrb[12].mxu1 }
 0x12e   :  { %v769_v3 = vpop.f32.mrb[12].mxu0  ;;  %v697_v4 = vadd.f32 %v696_v2, %v152_v46  ;;  %v698_v5 = vpop.f32.mrb[13].mxu1  ;;  %v683_v2 = vadd.f32 %v1570_v45, %v137_v51 }
 0x12f   :  { %v771_v6 = vpop.f32.mrb[13].mxu0  ;;  %v699_v7 = vadd.f32 %v698_v5, %v152_v46  ;;  %v700_v8 = vpop.f32.mrb[14].mxu1 }
 0x130   :  { %v773_v9 = vpop.f32.mrb[14].mxu0  ;;  %v770_v10 = vadd.f32 %v769_v3, %v697_v4  ;;  %v701_v11 = vadd.f32 %v700_v8, %v157_v0  ;;  %v702_v12 = vpop.f32.mrb[15].mxu1 }
 0x131   :  { %v775_v13 = vpop.f32.mrb[15].mxu0  ;;  %v772_v15 = vadd.f32 %v771_v6, %v699_v7  ;;  %v703_v16 = vadd.f32 %v702_v12, %v157_v0 }
 0x132   :  { %v774_v17 = vadd.f32 %v773_v9, %v701_v11 }
 0x133   :  { %v1572_v19 = vadd.f32 %v775_v13, %v703_v16 }
 0x135   :  { %v832_v23 = vpop.f32.mrb[16].mxu1 }
 0x136   :  { %v812_v22 = vpop.f32.mrb[0].mxu0  ;;  %v833_v26 = vadd.f32 %v832_v23, %v760_v56  ;;  %v834_v28 = vpop.f32.mrb[17].mxu1  ;;  %v677_v56 = vadd.f32 %v1564_v42, %v132_v43  ;;  %v681_v42 = vadd.f32 %v1568_v1, %v137_v51 }
 0x137   :  { %v1051_v25 = vadd.f32 %v812_v22, %v667_v20  ;;  %v814_v27 = vpop.f32.mrb[1].mxu0  ;;  %v835_v31 = vadd.f32 %v834_v28, %v762_v60  ;;  %v836_v33 = vpop.f32.mrb[18].mxu1 }
 0x138   :  { %v1053_v30 = vadd.f32 %v814_v27, %v669_v21  ;;  %v816_v32 = vpop.f32.mrb[2].mxu0  ;;  %v859_v35 = vmax.f32 %v833_v26, 0.0  ;;  %v837_v37 = vadd.f32 %v836_v33, %v764_v62  ;;  %v838_v39 = vpop.f32.mrb[19].mxu1 }
 0x139   :  { %v851_v34 = vmax.f32 %v1051_v25, 0.0  ;;  %v1055_v36 = vadd.f32 %v816_v32, %v671_v24  ;;  %v818_v38 = vpop.f32.mrb[3].mxu0  ;;  %v860_v40 = vmax.f32 %v835_v31, 0.0  ;;  %v839_v48 = vadd.f32 %v838_v39, %v766_v63 }
 0x13a   :  { %v852_v46 = vmax.f32 %v1053_v30, 0.0  ;;  %v1057_v47 = vadd.f32 %v818_v38, %v673_v29  ;;  %v861_v50 = vmax.f32 %v837_v37, 0.0 }
 0x13b   :  { %v853_v49 = vmax.f32 %v1055_v36, 0.0  ;;  %v1038_v53 = vpack.c.bf16 %v860_v40, %v859_v35  ;;  %v862_v55 = vmax.f32 %v839_v48, 0.0 }
 0x13c   :  { %v1034_v52 = vpack.c.bf16 %v852_v46, %v851_v34  ;;  %v854_v54 = vmax.f32 %v1057_v47, 0.0 }
 0x13d   :  { %922 = vst.msk [vmem:[%s1628_s3 + $0x20] sm:$0xff] %vm1576_vm3, %v1038_v53  ;;  %v1039_v59 = vpack.c.bf16 %v862_v55, %v861_v50  ;;  %v842_v61 = vpop.f32.mrb[20].mxu1 }
 0x13e   :  { %918 = vst.msk [vmem:[%s1628_s3] sm:$0xff] %vm1576_vm3, %v1034_v52  ;;  %v1035_v58 = vpack.c.bf16 %v854_v54, %v853_v49  ;;  %v822_v60 = vpop.f32.mrb[4].mxu0  ;;  %v843_v44 = vadd.f32 %v842_v61, %v770_v10  ;;  %v844_v0 = vpop.f32.mrb[21].mxu1 }
 0x13f   :  { %v1059_v62 = vadd.f32 %v822_v60, %v677_v56  ;;  %v824_v63 = vpop.f32.mrb[5].mxu0  ;;  %923 = vst.msk [vmem:[%s1628_s3 + $0x28] sm:$0xff] %vm1576_vm3, %v1039_v59  ;;  %v845_v1 = vadd.f32 %v844_v0, %v772_v15  ;;  %v846_v5 = vpop.f32.mrb[22].mxu1 }
 0x140   :  { %919 = vst.msk [vmem:[%s1628_s3 + $0x8] sm:$0xff] %vm1576_vm3, %v1035_v58  ;;  %v1061_v3 = vadd.f32 %v824_v63, %v679_v57  ;;  %v826_v4 = vpop.f32.mrb[6].mxu0  ;;  %v863_v7 = vmax.f32 %v843_v44, 0.0  ;;  %v847_v45 = vadd.f32 %v846_v5, %v774_v17  ;;  %v848_v10 = vpop.f32.mrb[23].mxu1 }
 0x141   :  { %v855_v6 = vmax.f32 %v1059_v62, 0.0  ;;  %v1063_v8 = vadd.f32 %v826_v4, %v681_v42  ;;  %v828_v9 = vpop.f32.mrb[7].mxu0  ;;  %v864_v12 = vmax.f32 %v845_v1, 0.0  ;;  %v849_v14 = vadd.f32 %v848_v10, %v1572_v19 }
 0x142   :  { %v856_v11 = vmax.f32 %v1061_v3, 0.0  ;;  %v1065_v13 = vadd.f32 %v828_v9, %v683_v2  ;;  %v865_v18 = vmax.f32 %v847_v45, 0.0 }
 0x143   :  { %v857_v16 = vmax.f32 %v1063_v8, 0.0  ;;  %v1040_v21 = vpack.c.bf16 %v864_v12, %v863_v7  ;;  %v866_v23 = vmax.f32 %v849_v14, 0.0 }
 0x144   :  { %v1036_v20 = vpack.c.bf16 %v856_v11, %v855_v6  ;;  %v858_v22 = vmax.f32 %v1065_v13, 0.0 }
 0x145   :  { %924 = vst.msk [vmem:[%s1628_s3 + $0x30] sm:$0xff] %vm1576_vm3, %v1040_v21  ;;  %v1041_v17 = vpack.c.bf16 %v866_v23, %v865_v18 }
 0x146   :  { %920 = vst.msk [vmem:[%s1628_s3 + $0x10] sm:$0xff] %vm1576_vm3, %v1036_v20  ;;  %v1037_v15 = vpack.c.bf16 %v858_v22, %v857_v16 }
 0x147   :  { %925 = vst.msk [vmem:[%s1628_s3 + $0x38] sm:$0xff] %vm1576_vm3, %v1041_v17 }
 0x148   :  { %921 = vst.msk [vmem:[%s1628_s3 + $0x18] sm:$0xff] %vm1576_vm3, %v1037_v15 }

// kernel: behavioral_cloning_forward.10
= control target key start
LH: loop header
LB: loop body
LE: loop exit
PB: predicated region body
PF: predicated region fallthrough
CT: control target
= control target key end

     0   :  { %v1447_v1 = vmov 0   ;;  %vm647_vm0 = vcmask 523264   ;;  %vm1043_vm1 = vcmask 257024   ;;  %s1852_s1 = inlined_call_operand.vmem [shape: bf16[576,32], index: 1, kind: input, shape index: {}]   ;;  %s1853_s0 = inlined_call_operand.vmem [shape: bf16[128,576], index: 0, kind: input, shape index: {}]   ;;  %s1854_s2 = inlined_call_operand.vmem [shape: f32[128,1], index: 2, kind: input, shape index: {}]   ;;  %s1855_s3 = inlined_call_operand.vmem [shape: bf16[128,32], index: 3, kind: output, shape index: {}]  }
   0x1   :  { %v1355_v0 = vld [vmem:[%s1852_s1 + $0x40] sm:$0xff]   ;;  %1353 = vset.pattern.permute.xlu0 %v1447_v1  ;;  %1354 = vset.pattern.permute.xlu1 %v1447_v1  ;;  %v1359_v5 = vld [vmem:[%s1852_s1 + $0x48] sm:$0xff]   ;;  %v1363_v9 = vld [vmem:[%s1852_s1 + $0x50] sm:$0xff]  }
   0x2   :  { %v1356_v2 = vld [vmem:[%s1852_s1 + $0xc0] sm:$0xff]   ;;  %1180 = vmatprep.subr.bf16.mxu0 %v1355_v0  ;;  %v1360_v6 = vld [vmem:[%s1852_s1 + $0xc8] sm:$0xff]   ;;  %v1364_v10 = vld [vmem:[%s1852_s1 + $0xd0] sm:$0xff]  }
   0x3   :  { %v1357_v3 = vld [vmem:[%s1852_s1] sm:$0xff]   ;;  %1244 = vmatprep.subr.bf16.mxu1 %v1356_v2  ;;  %v1361_v7 = vld [vmem:[%s1852_s1 + $0x8] sm:$0xff]   ;;  %v1365_v11 = vld [vmem:[%s1852_s1 + $0x10] sm:$0xff]  }
   0x4   :  { %v1358_v4 = vld [vmem:[%s1852_s1 + $0x80] sm:$0xff]   ;;  %1181 = vmatpush3.bf16.msra.mxu0 %v1357_v3  ;;  %v1362_v8 = vld [vmem:[%s1852_s1 + $0x88] sm:$0xff]   ;;  %v1366_v12 = vld [vmem:[%s1852_s1 + $0x90] sm:$0xff]  }
   0x5   :  { %1245 = vmatpush3.bf16.msra.mxu1 %v1358_v4  ;;  %1182 = vmatprep.subr.bf16.mxu0 %v1359_v5  ;;  %v1367_v13 = vld [vmem:[%s1852_s1 + $0x58] sm:$0xff]   ;;  %v1371_v17 = vld [vmem:[%s1852_s1 + $0x60] sm:$0xff]   ;;  %v1375_v21 = vld [vmem:[%s1852_s1 + $0x68] sm:$0xff]  }
   0x6   :  { %1246 = vmatprep.subr.bf16.mxu1 %v1360_v6  ;;  %v1368_v14 = vld [vmem:[%s1852_s1 + $0xd8] sm:$0xff]   ;;  %v1372_v18 = vld [vmem:[%s1852_s1 + $0xe0] sm:$0xff]   ;;  %v1376_v22 = vld [vmem:[%s1852_s1 + $0xe8] sm:$0xff]  }
   0x7   :  { %v1369_v15 = vld [vmem:[%s1852_s1 + $0x18] sm:$0xff]   ;;  %v1373_v19 = vld [vmem:[%s1852_s1 + $0x20] sm:$0xff]   ;;  %v1377_v23 = vld [vmem:[%s1852_s1 + $0x28] sm:$0xff]  }
   0x8   :  { %1183 = vmatpush3.bf16.msra.mxu0 %v1361_v7  ;;  %v1370_v16 = vld [vmem:[%s1852_s1 + $0x98] sm:$0xff]   ;;  %v1374_v20 = vld [vmem:[%s1852_s1 + $0xa0] sm:$0xff]   ;;  %v1378_v24 = vld [vmem:[%s1852_s1 + $0xa8] sm:$0xff]  }
   0x9   :  { %1247 = vmatpush3.bf16.msra.mxu1 %v1362_v8  ;;  %1184 = vmatprep.subr.bf16.mxu0 %v1363_v9  ;;  %v1379_v25 = vld [vmem:[%s1852_s1 + $0x70] sm:$0xff]   ;;  %v1383_v29 = vld [vmem:[%s1852_s1 + $0x78] sm:$0xff]   ;;  %v1392_v36 = vld [vmem:[%s1853_s0 + $0xc] ss:$20 sps:$4 sm:$0xff]  }
   0xa   :  { %1248 = vmatprep.subr.bf16.mxu1 %v1364_v10  ;;  %v1380_v26 = vld [vmem:[%s1852_s1 + $0xf0] sm:$0xff]   ;;  %v1384_v30 = vld [vmem:[%s1852_s1 + $0xf8] sm:$0xff]   ;;  %v1393_v37 = vld [vmem:[%s1852_s1 + $0x100] sm:$0xff]   ;;  %801 = vmatprep.mubr.bf16.mxu1 %v1392_v36 }
   0xb   :  { %v1381_v27 = vld [vmem:[%s1852_s1 + $0x30] sm:$0xff]   ;;  %v1385_v31 = vld [vmem:[%s1852_s1 + $0x38] sm:$0xff]   ;;  %v1394_v38 = vld [vmem:[%s1853_s0 + $0x2c] ss:$20 sps:$4 sm:$0xff]  }
   0xc   :  { %1185 = vmatpush3.bf16.msra.mxu0 %v1365_v11  ;;  %v1382_v28 = vld [vmem:[%s1852_s1 + $0xb0] sm:$0xff]   ;;  %v1386_v32 = vld [vmem:[%s1852_s1 + $0xb8] sm:$0xff]   ;;  %v1406_v43 = vld [vmem:[%s1852_s1 + $0x108] sm:$0xff]  }
   0xd   :  { %1249 = vmatpush3.bf16.msra.mxu1 %v1366_v12  ;;  %1186 = vmatprep.subr.bf16.mxu0 %v1367_v13  ;;  %v1387_v33 = vld [vmem:[%s1853_s0] ss:$20 sps:$4 sm:$0xff]   ;;  %v1389_v34 = vld [vmem:[%s1853_s0 + $0x4] ss:$20 sps:$4 sm:$0xff]   ;;  %v1390_v35 = vld [vmem:[%s1853_s0 + $0x8] ss:$20 sps:$4 sm:$0xff]  }
   0xe   :  { %1250 = vmatprep.subr.bf16.mxu1 %v1368_v14  ;;  %704 = vmatprep.mubr.bf16.mxu0 %v1389_v34  ;;  %v1396_v39 = vld [vmem:[%s1853_s0 + $0x34] ss:$20 sps:$4 sm:$0xff]   ;;  %v1399_v41 = vld [vmem:[%s1853_s0 + $0x30] ss:$20 sps:$4 sm:$0xff]   ;;  %v1405_v46 = vld [vmem:[%s1853_s0 + $0x58] ss:$20 sps:$4 sm:$0xff]  }
   0xf   :  { %v1398_v40 = vld [vmem:[%s1853_s0 + $0x28] ss:$20 sps:$4 sm:$0xff]   ;;  %v1404_v45 = vld [vmem:[%s1853_s0 + $0x50] ss:$20 sps:$4 sm:$0xff]   ;;  %v1411_v51 = vld [vmem:[%s1853_s0 + $0x78] ss:$20 sps:$4 sm:$0xff]  }
  0x10   :  { %1187 = vmatpush3.bf16.msra.mxu0 %v1369_v15  ;;  %v1400_v42 = vld [vmem:[%s1853_s0 + $0x54] ss:$20 sps:$4 sm:$0xff]   ;;  %v1402_v44 = vld [vmem:[%s1853_s0 + $0x5c] ss:$20 sps:$4 sm:$0xff]   ;;  %v1409_v49 = vld [vmem:[%s1853_s0 + $0x84] ss:$20 sps:$4 sm:$0xff]  }
  0x11   :  { %1251 = vmatpush3.bf16.msra.mxu1 %v1370_v16  ;;  %1188 = vmatprep.subr.bf16.mxu0 %v1371_v17  ;;  %v1419_v47 = vld [vmem:[%s1852_s1 + $0x110] sm:$0xff]   ;;  %v1432_v50 = vld [vmem:[%s1852_s1 + $0x118] sm:$0xff]   ;;  %v1415_v54 = vld [vmem:[%s1853_s0 + $0xac] ss:$20 sps:$4 sm:$0xff]  }
  0x12   :  { %1252 = vmatprep.subr.bf16.mxu1 %v1372_v18  ;;  %v1407_v48 = vld [vmem:[%s1853_s0 + $0x7c] ss:$20 sps:$4 sm:$0xff]   ;;  %v1412_v52 = vld [vmem:[%s1853_s0 + $0x80] ss:$20 sps:$4 sm:$0xff]   ;;  %v1413_v53 = vld [vmem:[%s1853_s0 + $0xa4] ss:$20 sps:$4 sm:$0xff]  }
  0x13   :  { %v1417_v55 = vld [vmem:[%s1853_s0 + $0xa0] ss:$20 sps:$4 sm:$0xff]   ;;  %v1418_v56 = vld [vmem:[%s1853_s0 + $0xa8] ss:$20 sps:$4 sm:$0xff]   ;;  %v1425_v2 = vld [vmem:[%s1853_s0 + $0xd0] ss:$20 sps:$4 sm:$0xff]  }
  0x14   :  { %1189 = vmatpush3.bf16.msra.mxu0 %v1373_v19  ;;  %v1420_v57 = vld [vmem:[%s1853_s0 + $0xcc] ss:$20 sps:$4 sm:$0xff]   ;;  %v1422_v59 = vld [vmem:[%s1853_s0 + $0xd4] ss:$20 sps:$4 sm:$0xff]   ;;  %v138_v62 = vld [vmem:[%s1854_s2 + $0x18] sm:$0xff] }
  0x15   :  { %1253 = vmatpush3.bf16.msra.mxu1 %v1374_v20  ;;  %1190 = vmatprep.subr.bf16.mxu0 %v1375_v21  ;;  %v135_v58 = vld [vmem:[%s1854_s2] sm:$0xff]  ;;  %v137_v60 = vld [vmem:[%s1854_s2 + $0x10] sm:$0xff]  ;;  %v136_v61 = vld [vmem:[%s1854_s2 + $0x8] sm:$0xff] }
  0x16   :  { %1254 = vmatprep.subr.bf16.mxu1 %v1376_v22  ;;  %153 = vperm.xlu0 %1353, %v135_v58   ;;  %v139_v63 = vld [vmem:[%s1854_s2 + $0x20] sm:$0xff]  ;;  %v1424_v0 = vld [vmem:[%s1853_s0 + $0xc8] ss:$20 sps:$4 sm:$0xff]   ;;  %v141_v5 = vld [vmem:[%s1854_s2 + $0x30] sm:$0xff] }
  0x17   :  { %163 = vperm.xlu1 %1354, %v137_v60   ;;  %v140_v1 = vld [vmem:[%s1854_s2 + $0x28] sm:$0xff]  ;;  %v1428_v4 = vld [vmem:[%s1853_s0 + $0xfc] ss:$20 sps:$4 sm:$0xff]   ;;  %v143_v7 = vld [vmem:[%s1854_s2 + $0x40] sm:$0xff] }
  0x18   :  { %1191 = vmatpush3.bf16.msra.mxu0 %v1377_v23  ;;  %v1426_v3 = vld [vmem:[%s1853_s0 + $0xf4] ss:$20 sps:$4 sm:$0xff]   ;;  %v142_v6 = vld [vmem:[%s1854_s2 + $0x38] sm:$0xff]  ;;  %v1430_v8 = vld [vmem:[%s1853_s0 + $0xf0] ss:$20 sps:$4 sm:$0xff]  }
  0x19   :  { %1255 = vmatpush3.bf16.msra.mxu1 %v1378_v24  ;;  %1192 = vmatprep.subr.bf16.mxu0 %v1379_v25  ;;  %v144_v9 = vld [vmem:[%s1854_s2 + $0x48] sm:$0xff]  ;;  %v1433_v11 = vld [vmem:[%s1853_s0 + $0x11c] ss:$20 sps:$4 sm:$0xff]   ;;  %v1435_v12 = vld [vmem:[%s1853_s0 + $0x124] ss:$20 sps:$4 sm:$0xff]  }
  0x1a   :  { %1256 = vmatprep.subr.bf16.mxu1 %v1380_v26  ;;  %158 = vperm.xlu0 %1353, %v136_v61   ;;  %v1431_v10 = vld [vmem:[%s1853_s0 + $0xf8] ss:$20 sps:$4 sm:$0xff]   ;;  %v145_v13 = vld [vmem:[%s1854_s2 + $0x50] sm:$0xff]  ;;  %v147_v15 = vld [vmem:[%s1854_s2 + $0x60] sm:$0xff] }
  0x1b   :  { %168 = vperm.xlu1 %1354, %v138_v62   ;;  %v146_v14 = vld [vmem:[%s1854_s2 + $0x58] sm:$0xff]  ;;  %v148_v17 = vld [vmem:[%s1854_s2 + $0x68] sm:$0xff]  ;;  %v1438_v18 = vld [vmem:[%s1853_s0 + $0x120] ss:$20 sps:$4 sm:$0xff]  }
  0x1c   :  { %1193 = vmatpush3.bf16.msra.mxu0 %v1381_v27  ;;  %v1437_v16 = vld [vmem:[%s1853_s0 + $0x118] ss:$20 sps:$4 sm:$0xff]   ;;  %v1439_v19 = vld [vmem:[%s1853_s0 + $0x10] ss:$20 sps:$4 sm:$0xff]   ;;  %v1443_v25 = vld [vmem:[%s1853_s0 + $0x60] ss:$20 sps:$4 sm:$0xff]  }
  0x1d   :  { %1257 = vmatpush3.bf16.msra.mxu1 %v1382_v28  ;;  %1194 = vmatprep.subr.bf16.mxu0 %v1383_v29  ;;  %v1440_v20 = vld [vmem:[%s1853_s0 + $0xb0] ss:$20 sps:$4 sm:$0xff]   ;;  %v150_v22 = vld [vmem:[%s1854_s2 + $0x78] sm:$0xff]  ;;  %v1444_v26 = vld [vmem:[%s1853_s0 + $0x100] ss:$20 sps:$4 sm:$0xff]  }
  0x1e   :  { %1258 = vmatprep.subr.bf16.mxu1 %v1384_v30  ;;  %173 = vperm.xlu0 %1353, %v139_v63   ;;  %v149_v21 = vld [vmem:[%s1854_s2 + $0x70] sm:$0xff]  ;;  %v1441_v23 = vld [vmem:[%s1853_s0 + $0x38] ss:$20 sps:$4 sm:$0xff]   ;;  %v1445_v27 = vld [vmem:[%s1853_s0 + $0x88] ss:$20 sps:$4 sm:$0xff]  }
  0x1f   :  { %178 = vperm.xlu1 %1354, %v140_v1   ;;  %v1442_v24 = vld [vmem:[%s1853_s0 + $0xd8] ss:$20 sps:$4 sm:$0xff]   ;;  %v1446_v28 = vld [vmem:[%s1853_s0 + $0x128] ss:$20 sps:$4 sm:$0xff]  }
  0x20   :  { %1195 = vmatpush3.bf16.msra.mxu0 %v1385_v31 }
  0x21   :  { %1259 = vmatpush3.bf16.msra.mxu1 %v1386_v32  ;;  %1320 = vmatprep.subr.bf16.mxu0 %v1393_v37 }
  0x22   :  { %1344 = vmatprep.subr.bf16.mxu1 %v1393_v37  ;;  %183 = vperm.xlu0 %1353, %v141_v5  }
  0x23   :  { %705 = vmatmul.mubr.bf16.vlgmr.msra.gmra.mrb[0].mxu0 %v1387_v33  ;;  %188 = vperm.xlu1 %1354, %v142_v6  }
  0x24   :  { %802 = vmatmul.mubr.bf16.vlgmr.msra.gmra.mrb[0].mxu1 %v1390_v35  ;;  %1321 = vmatpush3.bf16.msra.mxu0 %v1393_v37 }
  0x25   :  { %1348 = vmatpush3.bf16.msra.mxu1 %v1393_v37  ;;  %712 = vmatprep.mubr.bf16.mxu0 %v1394_v38 }
  0x26   :  { %809 = vmatprep.mubr.bf16.mxu1 %v1396_v39  ;;  %1322 = vmatprep.subr.bf16.mxu0 %v1406_v43 }
  0x27   :  { %1345 = vmatprep.subr.bf16.mxu1 %v1406_v43  ;;  %193 = vperm.xlu0 %1353, %v143_v7  }
  0x28   :  { %1323 = vmatpush3.bf16.msra.mxu0 %v1406_v43  ;;  %198 = vperm.xlu1 %1354, %v144_v9  }
  0x29   :  { %1349 = vmatpush3.bf16.msra.mxu1 %v1406_v43  ;;  %1324 = vmatprep.subr.bf16.mxu0 %v1419_v47 }
  0x2a   :  { %1346 = vmatprep.subr.bf16.mxu1 %v1419_v47 }
  0x2b   :  { %713 = vmatmul.mubr.bf16.gmra.mrb[4].mxu0 %v1398_v40  ;;  %203 = vperm.xlu0 %1353, %v145_v13  }
  0x2c   :  { %810 = vmatmul.mubr.bf16.gmra.mrb[4].mxu1 %v1399_v41  ;;  %720 = vmatprep.mubr.bf16.mxu0 %v1400_v42 }
  0x2d   :  { %817 = vmatprep.mubr.bf16.mxu1 %v1402_v44  ;;  %1325 = vmatpush3.bf16.msra.mxu0 %v1419_v47 }
  0x2e   :  { %1350 = vmatpush3.bf16.msra.mxu1 %v1419_v47  ;;  %1326 = vmatprep.subr.bf16.mxu0 %v1432_v50 }
  0x2f   :  { %1347 = vmatprep.subr.bf16.mxu1 %v1432_v50  ;;  %208 = vperm.xlu1 %1354, %v146_v14  }
  0x30   :  { %213 = vperm.xlu0 %1353, %v147_v15  }
  0x31   :  { %1327 = vmatpush3.bf16.msra.mxu0 %v1432_v50 }
  0x32   :  { %1351 = vmatpush3.bf16.msra.mxu1 %v1432_v50 }
  0x33   :  { %721 = vmatmul.mubr.bf16.gmra.mrb[8].mxu0 %v1404_v45  ;;  %218 = vperm.xlu1 %1354, %v148_v17  }
  0x34   :  { %818 = vmatmul.mubr.bf16.gmra.mrb[8].mxu1 %v1405_v46  ;;  %728 = vmatprep.mubr.bf16.mxu0 %v1407_v48 }
  0x35   :  { %825 = vmatprep.mubr.bf16.mxu1 %v1409_v49  ;;  %223 = vperm.xlu0 %1353, %v149_v21  }
  0x37   :  { %228 = vperm.xlu1 %1354, %v150_v22  }
  0x3b   :  { %729 = vmatmul.mubr.bf16.gmra.mrb[12].mxu0 %v1411_v51 }
  0x3c   :  { %826 = vmatmul.mubr.bf16.gmra.mrb[12].mxu1 %v1412_v52  ;;  %736 = vmatprep.mubr.bf16.mxu0 %v1413_v53 }
  0x3d   :  { %833 = vmatprep.mubr.bf16.mxu1 %v1415_v54 }
  0x43   :  { %737 = vmatmul.mubr.bf16.gmra.mrb[16].mxu0 %v1417_v55 }
  0x44   :  { %834 = vmatmul.mubr.bf16.gmra.mrb[16].mxu1 %v1418_v56  ;;  %744 = vmatprep.mubr.bf16.mxu0 %v1420_v57 }
  0x45   :  { %841 = vmatprep.mubr.bf16.mxu1 %v1422_v59 }
  0x4b   :  { %745 = vmatmul.mubr.bf16.gmra.mrb[20].mxu0 %v1424_v0 }
  0x4c   :  { %842 = vmatmul.mubr.bf16.gmra.mrb[20].mxu1 %v1425_v2  ;;  %752 = vmatprep.mubr.bf16.mxu0 %v1426_v3 }
  0x4d   :  { %849 = vmatprep.mubr.bf16.mxu1 %v1428_v4 }
  0x53   :  { %753 = vmatmul.mubr.bf16.gmra.mrb[24].mxu0 %v1430_v8 }
  0x54   :  { %850 = vmatmul.mubr.bf16.gmra.mrb[24].mxu1 %v1431_v10  ;;  %760 = vmatprep.mubr.bf16.mxu0 %v1433_v11 }
  0x55   :  { %857 = vmatprep.mubr.bf16.mxu1 %v1435_v12 }
  0x5b   :  { %761 = vmatmul.mubr.bf16.gmra.mrb[28].mxu0 %v1437_v16 }
  0x5c   :  { %858 = vmatmul.mubr.bf16.gmra.mrb[28].mxu1 %v1438_v18  ;;  %1328 = vmatprep.mubr.msk.bf16.mxu0 %vm647_vm0, %v1439_v19 }
  0x5d   :  { %1336 = vmatprep.mubr.msk.bf16.mxu1 %vm647_vm0, %v1440_v20 }
  0x63   :  { %1329 = vmatmul.mubr.msk.bf16.vlgmr.msra.gmra.mrb[32].mxu0 %vm647_vm0, %v1441_v23 }
  0x64   :  { %1337 = vmatmul.mubr.msk.bf16.vlgmr.msra.gmra.mrb[32].mxu1 %vm647_vm0, %v1442_v24  ;;  %1332 = vmatprep.mubr.msk.bf16.mxu0 %vm647_vm0, %v1443_v25 }
  0x65   :  { %1340 = vmatprep.mubr.msk.bf16.mxu1 %vm647_vm0, %v1444_v26 }
  0x6b   :  { %1333 = vmatmul.mubr.msk.bf16.gmra.mrb[36].mxu0 %vm647_vm0, %v1445_v27 }
  0x6c   :  { %1341 = vmatmul.mubr.msk.bf16.gmra.mrb[36].mxu1 %vm647_vm0, %v1446_v28 }
  0x95   :  { %v154_v29 = vpop.permute.xlu0 %153 }
  0x96   :  { %v164_v30 = vpop.permute.xlu1 %163 }
  0x99   :  { %v159_v32 = vpop.permute.xlu0 %158 }
  0x9a   :  { %v169_v48 = vpop.permute.xlu1 %168 }
  0x9d   :  { %v174_v0 = vpop.permute.xlu0 %173 }
  0x9e   :  { %v179_v2 = vpop.permute.xlu1 %178 }
  0xa1   :  { %v184_v19 = vpop.permute.xlu0 %183 }
  0xf6   :  { %v1196_v31 = vpop.f32.mrb[0].mxu0 }
  0xf7   :  { %v1260_v33 = vpop.f32.mrb[0].mxu1  ;;  %v1197_v34 = vpop.f32.mrb[1].mxu0 }
  0xf8   :  { %v1198_v35 = vadd.f32 %v1197_v34, %v1196_v31  ;;  %v1261_v36 = vpop.f32.mrb[1].mxu1  ;;  %v1199_v37 = vpop.f32.mrb[2].mxu0 }
  0xf9   :  { %v1262_v38 = vadd.f32 %v1261_v36, %v1260_v33  ;;  %v1263_v39 = vpop.f32.mrb[2].mxu1  ;;  %v1200_v40 = vpop.f32.mrb[3].mxu0 }
  0xfa   :  { %v707_v41 = vadd.f32 %v1198_v35, %v154_v29  ;;  %v1201_v42 = vadd.f32 %v1200_v40, %v1199_v37  ;;  %v1264_v43 = vpop.f32.mrb[3].mxu1  ;;  %v189_v33 = vpop.permute.xlu1 %188 }
  0xfb   :  { %v1265_v44 = vadd.f32 %v1264_v43, %v1263_v39  ;;  %v194_v36 = vpop.permute.xlu0 %193 }
  0xfc   :  { %v710_v45 = vadd.f32 %v1201_v42, %v159_v32  ;;  %v1752_v46 = vadd.f32 %v1262_v38, %v707_v41 }
  0xfe   :  { %v1202_v47 = vpop.f32.mrb[4].mxu0  ;;  %v1754_v49 = vadd.f32 %v1265_v44, %v710_v45 }
  0xff   :  { %v1266_v50 = vpop.f32.mrb[4].mxu1  ;;  %v1203_v51 = vpop.f32.mrb[5].mxu0 }
 0x100   :  { %v1204_v52 = vadd.f32 %v1203_v51, %v1202_v47  ;;  %v1267_v53 = vpop.f32.mrb[5].mxu1  ;;  %v1205_v54 = vpop.f32.mrb[6].mxu0 }
 0x101   :  { %v1268_v55 = vadd.f32 %v1267_v53, %v1266_v50  ;;  %v1269_v56 = vpop.f32.mrb[6].mxu1  ;;  %v1206_v57 = vpop.f32.mrb[7].mxu0 }
 0x102   :  { %v715_v58 = vadd.f32 %v1204_v52, %v164_v30  ;;  %v1207_v59 = vadd.f32 %v1206_v57, %v1205_v54  ;;  %v1270_v60 = vpop.f32.mrb[7].mxu1  ;;  %v199_v52 = vpop.permute.xlu1 %198 }
 0x103   :  { %v1271_v61 = vadd.f32 %v1270_v60, %v1269_v56  ;;  %v204_v56 = vpop.permute.xlu0 %203 }
 0x104   :  { %v718_v62 = vadd.f32 %v1207_v59, %v169_v48  ;;  %v1756_v63 = vadd.f32 %v1268_v55, %v715_v58 }
 0x106   :  { %v1208_v1 = vpop.f32.mrb[8].mxu0  ;;  %v1758_v3 = vadd.f32 %v1271_v61, %v718_v62 }
 0x107   :  { %v1272_v4 = vpop.f32.mrb[8].mxu1  ;;  %v1209_v5 = vpop.f32.mrb[9].mxu0 }
 0x108   :  { %v1210_v6 = vadd.f32 %v1209_v5, %v1208_v1  ;;  %v1273_v7 = vpop.f32.mrb[9].mxu1  ;;  %v1211_v8 = vpop.f32.mrb[10].mxu0 }
 0x109   :  { %v1274_v9 = vadd.f32 %v1273_v7, %v1272_v4  ;;  %v1275_v10 = vpop.f32.mrb[10].mxu1  ;;  %v1212_v11 = vpop.f32.mrb[11].mxu0 }
 0x10a   :  { %v723_v12 = vadd.f32 %v1210_v6, %v174_v0  ;;  %v1213_v13 = vadd.f32 %v1212_v11, %v1211_v8  ;;  %v1276_v14 = vpop.f32.mrb[11].mxu1  ;;  %v209_v8 = vpop.permute.xlu1 %208 }
 0x10b   :  { %v1277_v15 = vadd.f32 %v1276_v14, %v1275_v10 }
 0x10c   :  { %v726_v16 = vadd.f32 %v1213_v13, %v179_v2  ;;  %v1760_v17 = vadd.f32 %v1274_v9, %v723_v12  ;;  %v214_v12 = vpop.permute.xlu0 %213 }
 0x10e   :  { %v1214_v18 = vpop.f32.mrb[12].mxu0  ;;  %v1762_v20 = vadd.f32 %v1277_v15, %v726_v16 }
 0x10f   :  { %v1278_v21 = vpop.f32.mrb[12].mxu1  ;;  %v1215_v22 = vpop.f32.mrb[13].mxu0 }
 0x110   :  { %v1216_v23 = vadd.f32 %v1215_v22, %v1214_v18  ;;  %v1279_v24 = vpop.f32.mrb[13].mxu1  ;;  %v1217_v25 = vpop.f32.mrb[14].mxu0 }
 0x111   :  { %v1280_v26 = vadd.f32 %v1279_v24, %v1278_v21  ;;  %v1281_v27 = vpop.f32.mrb[14].mxu1  ;;  %v1218_v28 = vpop.f32.mrb[15].mxu0 }
 0x112   :  { %v731_v29 = vadd.f32 %v1216_v23, %v184_v19  ;;  %v1219_v30 = vadd.f32 %v1218_v28, %v1217_v25  ;;  %v1282_v31 = vpop.f32.mrb[15].mxu1  ;;  %v219_v28 = vpop.permute.xlu1 %218 }
 0x113   :  { %v1283_v32 = vadd.f32 %v1282_v31, %v1281_v27 }
 0x114   :  { %v734_v34 = vadd.f32 %v1219_v30, %v189_v33  ;;  %v1764_v35 = vadd.f32 %v1280_v26, %v731_v29 }
 0x116   :  { %v1220_v37 = vpop.f32.mrb[16].mxu0  ;;  %v1766_v38 = vadd.f32 %v1283_v32, %v734_v34  ;;  %v224_v32 = vpop.permute.xlu0 %223 }
 0x117   :  { %v1284_v39 = vpop.f32.mrb[16].mxu1  ;;  %v1221_v40 = vpop.f32.mrb[17].mxu0 }
 0x118   :  { %v1222_v41 = vadd.f32 %v1221_v40, %v1220_v37  ;;  %v1285_v42 = vpop.f32.mrb[17].mxu1  ;;  %v1223_v43 = vpop.f32.mrb[18].mxu0 }
 0x119   :  { %v1286_v44 = vadd.f32 %v1285_v42, %v1284_v39  ;;  %v1287_v45 = vpop.f32.mrb[18].mxu1  ;;  %v1224_v47 = vpop.f32.mrb[19].mxu0 }
 0x11a   :  { %v739_v48 = vadd.f32 %v1222_v41, %v194_v36  ;;  %v1225_v50 = vadd.f32 %v1224_v47, %v1223_v43  ;;  %v1288_v51 = vpop.f32.mrb[19].mxu1 }
 0x11b   :  { %v1289_v53 = vadd.f32 %v1288_v51, %v1287_v45 }
 0x11c   :  { %v742_v54 = vadd.f32 %v1225_v50, %v199_v52  ;;  %v1768_v55 = vadd.f32 %v1286_v44, %v739_v48  ;;  %v229_v50 = vpop.permute.xlu1 %228 }
 0x11e   :  { %v1226_v57 = vpop.f32.mrb[20].mxu0  ;;  %v1770_v58 = vadd.f32 %v1289_v53, %v742_v54 }
 0x11f   :  { %v1290_v59 = vpop.f32.mrb[20].mxu1  ;;  %v1227_v60 = vpop.f32.mrb[21].mxu0 }
 0x120   :  { %v1228_v61 = vadd.f32 %v1227_v60, %v1226_v57  ;;  %v1291_v62 = vpop.f32.mrb[21].mxu1  ;;  %v1229_v0 = vpop.f32.mrb[22].mxu0 }
 0x121   :  { %v1292_v1 = vadd.f32 %v1291_v62, %v1290_v59  ;;  %v1293_v2 = vpop.f32.mrb[22].mxu1  ;;  %v1230_v4 = vpop.f32.mrb[23].mxu0 }
 0x122   :  { %v747_v5 = vadd.f32 %v1228_v61, %v204_v56  ;;  %v1231_v6 = vadd.f32 %v1230_v4, %v1229_v0  ;;  %v1294_v7 = vpop.f32.mrb[23].mxu1 }
 0x123   :  { %v1295_v9 = vadd.f32 %v1294_v7, %v1293_v2 }
 0x124   :  { %v750_v10 = vadd.f32 %v1231_v6, %v209_v8  ;;  %v844_v11 = vadd.f32 %v1292_v1, %v747_v5 }
 0x126   :  { %v1232_v13 = vpop.f32.mrb[24].mxu0  ;;  %v847_v14 = vadd.f32 %v1295_v9, %v750_v10 }
 0x127   :  { %v1296_v15 = vpop.f32.mrb[24].mxu1  ;;  %v1233_v16 = vpop.f32.mrb[25].mxu0 }
 0x128   :  { %v1234_v18 = vadd.f32 %v1233_v16, %v1232_v13  ;;  %v1297_v19 = vpop.f32.mrb[25].mxu1  ;;  %v1235_v21 = vpop.f32.mrb[26].mxu0 }
 0x129   :  { %v1298_v22 = vadd.f32 %v1297_v19, %v1296_v15  ;;  %v1299_v23 = vpop.f32.mrb[26].mxu1  ;;  %v1236_v24 = vpop.f32.mrb[27].mxu0 }
 0x12a   :  { %v755_v25 = vadd.f32 %v1234_v18, %v214_v12  ;;  %v1237_v26 = vadd.f32 %v1236_v24, %v1235_v21  ;;  %v1300_v27 = vpop.f32.mrb[27].mxu1 }
 0x12b   :  { %v1301_v29 = vadd.f32 %v1300_v27, %v1299_v23 }
 0x12c   :  { %v758_v30 = vadd.f32 %v1237_v26, %v219_v28  ;;  %v1772_v31 = vadd.f32 %v1298_v22, %v755_v25 }
 0x12e   :  { %v1238_v33 = vpop.f32.mrb[28].mxu0  ;;  %v1774_v34 = vadd.f32 %v1301_v29, %v758_v30 }
 0x12f   :  { %v1302_v36 = vpop.f32.mrb[28].mxu1  ;;  %v1239_v37 = vpop.f32.mrb[29].mxu0 }
 0x130   :  { %v1240_v39 = vadd.f32 %v1239_v37, %v1238_v33  ;;  %v1303_v40 = vpop.f32.mrb[29].mxu1  ;;  %v1241_v41 = vpop.f32.mrb[30].mxu0 }
 0x131   :  { %v1304_v42 = vadd.f32 %v1303_v40, %v1302_v36  ;;  %v1305_v43 = vpop.f32.mrb[30].mxu1  ;;  %v1242_v44 = vpop.f32.mrb[31].mxu0 }
 0x132   :  { %v763_v45 = vadd.f32 %v1240_v39, %v224_v32  ;;  %v1243_v47 = vadd.f32 %v1242_v44, %v1241_v41  ;;  %v1306_v48 = vpop.f32.mrb[31].mxu1 }
 0x133   :  { %v1307_v51 = vadd.f32 %v1306_v48, %v1305_v43 }
 0x134   :  { %v766_v52 = vadd.f32 %v1243_v47, %v229_v50  ;;  %v860_v53 = vadd.f32 %v1304_v42, %v763_v45 }
 0x136   :  { %v1330_v54 = vpop.f32.mrb[32].mxu0  ;;  %v863_v56 = vadd.f32 %v1307_v51, %v766_v52 }
 0x137   :  { %v909_v57 = vadd.f32 %v1330_v54, %v1756_v63  ;;  %v1338_v59 = vpop.f32.mrb[32].mxu1  ;;  %v900_v60 = vpop.f32.mrb[33].mxu0 }
 0x138   :  { %v941_v61 = vadd.f32 %v1338_v59, %v844_v11  ;;  %v901_v62 = vadd.f32 %v900_v60, %v1752_v46  ;;  %v932_v0 = vpop.f32.mrb[33].mxu1  ;;  %v1331_v1 = vpop.f32.mrb[34].mxu0 }
 0x139   :  { %v965_v2 = vmax.f32 %v909_v57, 0.0  ;;  %v933_v4 = vadd.f32 %v932_v0, %v1768_v55  ;;  %v912_v5 = vadd.f32 %v1331_v1, %v1758_v3  ;;  %v1339_v6 = vpop.f32.mrb[34].mxu1  ;;  %v903_v7 = vpop.f32.mrb[35].mxu0 }
 0x13a   :  { %v973_v8 = vmax.f32 %v941_v61, 0.0  ;;  %v963_v9 = vmax.f32 %v901_v62, 0.0  ;;  %v944_v10 = vadd.f32 %v1339_v6, %v847_v14  ;;  %v904_v63 = vadd.f32 %v903_v7, %v1754_v49  ;;  %v935_v12 = vpop.f32.mrb[35].mxu1 }
 0x13b   :  { %v1166_v13 = vpack.c.bf16 %v965_v2, %v965_v2  ;;  %v971_v11 = vmax.f32 %v933_v4, 0.0  ;;  %v966_v15 = vmax.f32 %v912_v5, 0.0  ;;  %v936_v46 = vadd.f32 %v935_v12, %v1770_v58 }
 0x13c   :  { %v1174_v16 = vpack.c.bf16 %v973_v8, %v973_v8  ;;  %v1164_v18 = vpack.c.bf16 %v963_v9, %v963_v9  ;;  %v974_v19 = vmax.f32 %v944_v10, 0.0  ;;  %v964_v21 = vmax.f32 %v904_v63, 0.0 }
 0x13d   :  { %1046 = vst.msk [vmem:[%s1855_s3 + $0x8] sm:$0xf] %vm1043_vm1, %v1166_v13  ;;  %v1172_v3 = vpack.c.bf16 %v971_v11, %v971_v11  ;;  %v1167_v55 = vpack.c.bf16 %v966_v15, %v966_v15  ;;  %v972_v14 = vmax.f32 %v936_v46, 0.0 }
 0x13e   :  { %1054 = vst.msk [vmem:[%s1855_s3 + $0x28] sm:$0xf] %vm1043_vm1, %v1174_v16  ;;  %1044 = vst.msk [vmem:[%s1855_s3] sm:$0xf] %vm1043_vm1, %v1164_v18  ;;  %v1175_v49 = vpack.c.bf16 %v974_v19, %v974_v19  ;;  %v1165_v58 = vpack.c.bf16 %v964_v21, %v964_v21  ;;  %v1334_v22 = vpop.f32.mrb[36].mxu0 }
 0x13f   :  { %1052 = vst.msk [vmem:[%s1855_s3 + $0x20] sm:$0xf] %vm1043_vm1, %v1172_v3  ;;  %1047 = vst.msk [vmem:[%s1855_s3 + $0xc] sm:$0xf] %vm1043_vm1, %v1167_v55  ;;  %v1173_v23 = vpack.c.bf16 %v972_v14, %v972_v14  ;;  %v925_v24 = vadd.f32 %v1334_v22, %v1764_v35  ;;  %v1342_v25 = vpop.f32.mrb[36].mxu1  ;;  %v916_v26 = vpop.f32.mrb[37].mxu0 }
 0x140   :  { %1055 = vst.msk [vmem:[%s1855_s3 + $0x2c] sm:$0xf] %vm1043_vm1, %v1175_v49  ;;  %1045 = vst.msk [vmem:[%s1855_s3 + $0x4] sm:$0xf] %vm1043_vm1, %v1165_v58  ;;  %v957_v27 = vadd.f32 %v1342_v25, %v860_v53  ;;  %v917_v28 = vadd.f32 %v916_v26, %v1760_v17  ;;  %v948_v29 = vpop.f32.mrb[37].mxu1  ;;  %v1335_v30 = vpop.f32.mrb[38].mxu0 }
 0x141   :  { %1053 = vst.msk [vmem:[%s1855_s3 + $0x24] sm:$0xf] %vm1043_vm1, %v1173_v23  ;;  %v969_v35 = vmax.f32 %v925_v24, 0.0  ;;  %v949_v32 = vadd.f32 %v948_v29, %v1772_v31  ;;  %v928_v33 = vadd.f32 %v1335_v30, %v1766_v38  ;;  %v1343_v36 = vpop.f32.mrb[38].mxu1  ;;  %v919_v37 = vpop.f32.mrb[39].mxu0 }
 0x142   :  { %v977_v39 = vmax.f32 %v957_v27, 0.0  ;;  %v967_v40 = vmax.f32 %v917_v28, 0.0  ;;  %v960_v41 = vadd.f32 %v1343_v36, %v863_v56  ;;  %v920_v42 = vadd.f32 %v919_v37, %v1762_v20  ;;  %v951_v17 = vpop.f32.mrb[39].mxu1 }
 0x143   :  { %v1170_v43 = vpack.c.bf16 %v969_v35, %v969_v35  ;;  %v975_v44 = vmax.f32 %v949_v32, 0.0  ;;  %v970_v45 = vmax.f32 %v928_v33, 0.0  ;;  %v952_v47 = vadd.f32 %v951_v17, %v1774_v34 }
 0x144   :  { %v1178_v48 = vpack.c.bf16 %v977_v39, %v977_v39  ;;  %v1168_v50 = vpack.c.bf16 %v967_v40, %v967_v40  ;;  %v978_v51 = vmax.f32 %v960_v41, 0.0  ;;  %v968_v52 = vmax.f32 %v920_v42, 0.0 }
 0x145   :  { %1050 = vst.msk [vmem:[%s1855_s3 + $0x18] sm:$0xf] %vm1043_vm1, %v1170_v43  ;;  %v1176_v38 = vpack.c.bf16 %v975_v44, %v975_v44  ;;  %v1171_v31 = vpack.c.bf16 %v970_v45, %v970_v45  ;;  %v976_v53 = vmax.f32 %v952_v47, 0.0 }
 0x146   :  { %1058 = vst.msk [vmem:[%s1855_s3 + $0x38] sm:$0xf] %vm1043_vm1, %v1178_v48  ;;  %1048 = vst.msk [vmem:[%s1855_s3 + $0x10] sm:$0xf] %vm1043_vm1, %v1168_v50  ;;  %v1179_v20 = vpack.c.bf16 %v978_v51, %v978_v51  ;;  %v1169_v34 = vpack.c.bf16 %v968_v52, %v968_v52 }
 0x147   :  { %1056 = vst.msk [vmem:[%s1855_s3 + $0x30] sm:$0xf] %vm1043_vm1, %v1176_v38  ;;  %1051 = vst.msk [vmem:[%s1855_s3 + $0x1c] sm:$0xf] %vm1043_vm1, %v1171_v31  ;;  %v1177_v54 = vpack.c.bf16 %v976_v53, %v976_v53 }
 0x148   :  { %1059 = vst.msk [vmem:[%s1855_s3 + $0x3c] sm:$0xf] %vm1043_vm1, %v1179_v20  ;;  %1049 = vst.msk [vmem:[%s1855_s3 + $0x14] sm:$0xf] %vm1043_vm1, %v1169_v34 }
 0x149   :  { %1057 = vst.msk [vmem:[%s1855_s3 + $0x34] sm:$0xf] %vm1043_vm1, %v1177_v54 }

// kernel: behavioral_cloning_forward.11
= control target key start
LH: loop header
LB: loop body
LE: loop exit
PB: predicated region body
PF: predicated region fallthrough
CT: control target
= control target key end

     0   :  { %v3016_v1 = vmov 0   ;;  %vm2252_vm1 = vcmask 10240   ;;  %s3857_s0 = inlined_call_operand.vmem [shape: bf16[1152,2], index: 0, kind: input, shape index: {}]   ;;  %s3858_s1 = inlined_call_operand.vmem [shape: bf16[128,1152], index: 1, kind: input, shape index: {}]   ;;  %s3859_s2 = inlined_call_operand.vmem [shape: f32[128,1], index: 2, kind: input, shape index: {}]   ;;  %s3860_s4 = inlined_call_operand.vmem [shape: f32[256,1], index: 4, kind: input, shape index: {}]   ;;  %s3861_s6 = inlined_call_operand.vmem [shape: f32[3,1], index: 6, kind: input, shape index: {}]   ;;  %s3862_s3 = inlined_call_operand.vmem [shape: bf16[256,128], index: 3, kind: input, shape index: {}]   ;;  %s3863_s5 = inlined_call_operand.vmem [shape: bf16[3,256], index: 5, kind: input, shape index: {}]   ;;  %s3864_s7 = inlined_call_operand.vmem [shape: f32[3,2], index: 7, kind: output, shape index: {}]  }
   0x1   :  { %v2820_v0 = vld [vmem:[%s3857_s0 + $0x40] sm:$0xff]   ;;  %2818 = vset.pattern.permute.xlu0 %v3016_v1  ;;  %2819 = vset.pattern.permute.xlu1 %v3016_v1  ;;  %v2824_v5 = vld [vmem:[%s3857_s0 + $0x48] sm:$0xff]   ;;  %v2828_v9 = vld [vmem:[%s3857_s0 + $0x50] sm:$0xff]  }
   0x2   :  { %v2821_v2 = vld [vmem:[%s3857_s0] sm:$0xff]   ;;  %2419 = vmatprep.subr.bf16.mxu0 %v2820_v0  ;;  %v2825_v6 = vld [vmem:[%s3857_s0 + $0x8] sm:$0xff]   ;;  %v2829_v10 = vld [vmem:[%s3857_s0 + $0x10] sm:$0xff]  }
   0x3   :  { %v2822_v3 = vld [vmem:[%s3857_s0 + $0xc0] sm:$0xff]   ;;  %2420 = vmatpush3.bf16.msra.mxu0 %v2821_v2  ;;  %v2826_v7 = vld [vmem:[%s3857_s0 + $0xc8] sm:$0xff]   ;;  %v2830_v11 = vld [vmem:[%s3857_s0 + $0xd0] sm:$0xff]  }
   0x4   :  { %v2823_v4 = vld [vmem:[%s3857_s0 + $0x80] sm:$0xff]   ;;  %2483 = vmatprep.subr.bf16.mxu1 %v2822_v3  ;;  %2421 = vmatprep.subr.bf16.mxu0 %v2824_v5  ;;  %v2827_v8 = vld [vmem:[%s3857_s0 + $0x88] sm:$0xff]   ;;  %v2831_v12 = vld [vmem:[%s3857_s0 + $0x90] sm:$0xff]  }
   0x5   :  { %2484 = vmatpush3.bf16.msra.mxu1 %v2823_v4  ;;  %v2832_v13 = vld [vmem:[%s3857_s0 + $0x58] sm:$0xff]   ;;  %v2836_v17 = vld [vmem:[%s3857_s0 + $0x60] sm:$0xff]   ;;  %v2840_v21 = vld [vmem:[%s3857_s0 + $0x68] sm:$0xff]  }
   0x6   :  { %2485 = vmatprep.subr.bf16.mxu1 %v2826_v7  ;;  %v2833_v14 = vld [vmem:[%s3857_s0 + $0x18] sm:$0xff]   ;;  %v2837_v18 = vld [vmem:[%s3857_s0 + $0x20] sm:$0xff]   ;;  %v2841_v22 = vld [vmem:[%s3857_s0 + $0x28] sm:$0xff]  }
   0x7   :  { %2422 = vmatpush3.bf16.msra.mxu0 %v2825_v6  ;;  %v2834_v15 = vld [vmem:[%s3857_s0 + $0xd8] sm:$0xff]   ;;  %v2838_v19 = vld [vmem:[%s3857_s0 + $0xe0] sm:$0xff]   ;;  %v2842_v23 = vld [vmem:[%s3857_s0 + $0xe8] sm:$0xff]  }
   0x8   :  { %2423 = vmatprep.subr.bf16.mxu0 %v2828_v9  ;;  %v2835_v16 = vld [vmem:[%s3857_s0 + $0x98] sm:$0xff]   ;;  %v2839_v20 = vld [vmem:[%s3857_s0 + $0xa0] sm:$0xff]   ;;  %v2843_v24 = vld [vmem:[%s3857_s0 + $0xa8] sm:$0xff]  }
   0x9   :  { %2486 = vmatpush3.bf16.msra.mxu1 %v2827_v8  ;;  %v2844_v25 = vld [vmem:[%s3857_s0 + $0x70] sm:$0xff]   ;;  %v2848_v29 = vld [vmem:[%s3857_s0 + $0x78] sm:$0xff]   ;;  %v2851_v32 = vld [vmem:[%s3858_s1] ss:$36 sps:$4 sm:$0xff]  }
   0xa   :  { %2487 = vmatprep.subr.bf16.mxu1 %v2830_v11  ;;  %v2845_v26 = vld [vmem:[%s3857_s0 + $0x30] sm:$0xff]   ;;  %v2849_v30 = vld [vmem:[%s3857_s0 + $0x38] sm:$0xff]   ;;  %v2853_v33 = vld [vmem:[%s3858_s1 + $0x4] ss:$36 sps:$4 sm:$0xff]  }
   0xb   :  { %2424 = vmatpush3.bf16.msra.mxu0 %v2829_v10  ;;  %v2846_v27 = vld [vmem:[%s3857_s0 + $0xf0] sm:$0xff]   ;;  %v2850_v31 = vld [vmem:[%s3857_s0 + $0xf8] sm:$0xff]   ;;  %1179 = vmatprep.mubr.bf16.mxu0 %v2853_v33  ;;  %v2855_v35 = vld [vmem:[%s3858_s1 + $0x8] ss:$36 sps:$4 sm:$0xff]  }
   0xc   :  { %2425 = vmatprep.subr.bf16.mxu0 %v2832_v13  ;;  %v2847_v28 = vld [vmem:[%s3857_s0 + $0xb0] sm:$0xff]   ;;  %v2854_v34 = vld [vmem:[%s3857_s0 + $0xb8] sm:$0xff]   ;;  %v2860_v39 = vld [vmem:[%s3858_s1 + $0x48] ss:$36 sps:$4 sm:$0xff]  }
   0xd   :  { %2488 = vmatpush3.bf16.msra.mxu1 %v2831_v12  ;;  %v2857_v36 = vld [vmem:[%s3858_s1 + $0xc] ss:$36 sps:$4 sm:$0xff]   ;;  %v2861_v38 = vld [vmem:[%s3858_s1 + $0x54] ss:$36 sps:$4 sm:$0xff]   ;;  %v2867_v42 = vld [vmem:[%s3858_s1 + $0x9c] ss:$36 sps:$4 sm:$0xff]  }
   0xe   :  { %2489 = vmatprep.subr.bf16.mxu1 %v2834_v15  ;;  %v2858_v37 = vld [vmem:[%s3858_s1 + $0x4c] ss:$36 sps:$4 sm:$0xff]   ;;  %1276 = vmatprep.mubr.bf16.mxu1 %v2857_v36  ;;  %v2864_v40 = vld [vmem:[%s3858_s1 + $0x94] ss:$36 sps:$4 sm:$0xff]   ;;  %v2879_v43 = vld [vmem:[%s3857_s0 + $0x140] sm:$0xff]  }
   0xf   :  { %2426 = vmatpush3.bf16.msra.mxu0 %v2833_v14  ;;  %v2863_v41 = vld [vmem:[%s3858_s1 + $0x50] ss:$36 sps:$4 sm:$0xff]   ;;  %v2882_v45 = vld [vmem:[%s3857_s0 + $0x100] sm:$0xff]   ;;  %v2869_v47 = vld [vmem:[%s3858_s1 + $0x98] ss:$36 sps:$4 sm:$0xff]  }
  0x10   :  { %2427 = vmatprep.subr.bf16.mxu0 %v2836_v17  ;;  %v2866_v44 = vld [vmem:[%s3858_s1 + $0x90] ss:$36 sps:$4 sm:$0xff]   ;;  %v2870_v46 = vld [vmem:[%s3858_s1 + $0xdc] ss:$36 sps:$4 sm:$0xff]   ;;  %v2873_v49 = vld [vmem:[%s3858_s1 + $0xe4] ss:$36 sps:$4 sm:$0xff]  }
  0x11   :  { %2490 = vmatpush3.bf16.msra.mxu1 %v2835_v16  ;;  %v2884_v48 = vld [vmem:[%s3857_s0 + $0x1c0] sm:$0xff]   ;;  %v2886_v51 = vld [vmem:[%s3857_s0 + $0x148] sm:$0xff]   ;;  %v2872_v54 = vld [vmem:[%s3858_s1 + $0xd8] ss:$36 sps:$4 sm:$0xff]  }
  0x12   :  { %2491 = vmatprep.subr.bf16.mxu1 %v2838_v19  ;;  %v2885_v50 = vld [vmem:[%s3857_s0 + $0x180] sm:$0xff]   ;;  %v2887_v52 = vld [vmem:[%s3857_s0 + $0x108] sm:$0xff]   ;;  %v2893_v56 = vld [vmem:[%s3857_s0 + $0x150] sm:$0xff]  }
  0x13   :  { %2428 = vmatpush3.bf16.msra.mxu0 %v2837_v18  ;;  %v2888_v53 = vld [vmem:[%s3857_s0 + $0x1c8] sm:$0xff]   ;;  %v2875_v57 = vld [vmem:[%s3858_s1 + $0xe0] ss:$36 sps:$4 sm:$0xff]   ;;  %v2896_v60 = vld [vmem:[%s3857_s0 + $0x110] sm:$0xff]  }
  0x14   :  { %2429 = vmatprep.subr.bf16.mxu0 %v2840_v21  ;;  %v2891_v55 = vld [vmem:[%s3857_s0 + $0x188] sm:$0xff]   ;;  %v2898_v61 = vld [vmem:[%s3857_s0 + $0x1d0] sm:$0xff]   ;;  %v2900_v63 = vld [vmem:[%s3857_s0 + $0x158] sm:$0xff]  }
  0x15   :  { %2492 = vmatpush3.bf16.msra.mxu1 %v2839_v20  ;;  %v2876_v58 = vld [vmem:[%s3858_s1 + $0x124] ss:$36 sps:$4 sm:$0xff]   ;;  %v2880_v59 = vld [vmem:[%s3858_s1 + $0x12c] ss:$36 sps:$4 sm:$0xff]   ;;  %v2901_v1 = vld [vmem:[%s3857_s0 + $0x118] sm:$0xff]  }
  0x16   :  { %2493 = vmatprep.subr.bf16.mxu1 %v2842_v23  ;;  %v2899_v62 = vld [vmem:[%s3857_s0 + $0x190] sm:$0xff]   ;;  %v2878_v0 = vld [vmem:[%s3858_s1 + $0x120] ss:$36 sps:$4 sm:$0xff]   ;;  %v2902_v2 = vld [vmem:[%s3857_s0 + $0x1d8] sm:$0xff]  }
  0x17   :  { %2430 = vmatpush3.bf16.msra.mxu0 %v2841_v22  ;;  %v2889_v3 = vld [vmem:[%s3858_s1 + $0x16c] ss:$36 sps:$4 sm:$0xff]   ;;  %v2905_v4 = vld [vmem:[%s3857_s0 + $0x198] sm:$0xff]   ;;  %v2907_v6 = vld [vmem:[%s3857_s0 + $0x160] sm:$0xff]  }
  0x18   :  { %2431 = vmatprep.subr.bf16.mxu0 %v2844_v25  ;;  %v2883_v5 = vld [vmem:[%s3858_s1 + $0x128] ss:$36 sps:$4 sm:$0xff]   ;;  %v2894_v7 = vld [vmem:[%s3858_s1 + $0x174] ss:$36 sps:$4 sm:$0xff]   ;;  %v2910_v8 = vld [vmem:[%s3857_s0 + $0x120] sm:$0xff]  }
  0x19   :  { %2494 = vmatpush3.bf16.msra.mxu1 %v2843_v24  ;;  %v2892_v9 = vld [vmem:[%s3858_s1 + $0x168] ss:$36 sps:$4 sm:$0xff]   ;;  %v2912_v10 = vld [vmem:[%s3857_s0 + $0x1e0] sm:$0xff]   ;;  %v2903_v11 = vld [vmem:[%s3858_s1 + $0x1b4] ss:$36 sps:$4 sm:$0xff]  }
  0x1a   :  { %2495 = vmatprep.subr.bf16.mxu1 %v2846_v27  ;;  %v2913_v12 = vld [vmem:[%s3857_s0 + $0x1a0] sm:$0xff]   ;;  %v2914_v13 = vld [vmem:[%s3857_s0 + $0x168] sm:$0xff]   ;;  %v2897_v16 = vld [vmem:[%s3858_s1 + $0x170] ss:$36 sps:$4 sm:$0xff]  }
  0x1b   :  { %2432 = vmatpush3.bf16.msra.mxu0 %v2845_v26  ;;  %v2915_v14 = vld [vmem:[%s3857_s0 + $0x128] sm:$0xff]   ;;  %v2908_v17 = vld [vmem:[%s3858_s1 + $0x1bc] ss:$36 sps:$4 sm:$0xff]   ;;  %v2921_v19 = vld [vmem:[%s3857_s0 + $0x170] sm:$0xff]  }
  0x1c   :  { %2433 = vmatprep.subr.bf16.mxu0 %v2848_v29  ;;  %v2916_v15 = vld [vmem:[%s3857_s0 + $0x1e8] sm:$0xff]   ;;  %v2906_v20 = vld [vmem:[%s3858_s1 + $0x1b0] ss:$36 sps:$4 sm:$0xff]   ;;  %v2917_v22 = vld [vmem:[%s3858_s1 + $0x1fc] ss:$36 sps:$4 sm:$0xff]  }
  0x1d   :  { %2496 = vmatpush3.bf16.msra.mxu1 %v2847_v28  ;;  %v2919_v18 = vld [vmem:[%s3857_s0 + $0x1a8] sm:$0xff]   ;;  %v2924_v21 = vld [vmem:[%s3857_s0 + $0x130] sm:$0xff]   ;;  %v2911_v23 = vld [vmem:[%s3858_s1 + $0x1b8] ss:$36 sps:$4 sm:$0xff]  }
  0x1e   :  { %2497 = vmatprep.subr.bf16.mxu1 %v2850_v31  ;;  %v2926_v24 = vld [vmem:[%s3857_s0 + $0x1f0] sm:$0xff]   ;;  %v2922_v25 = vld [vmem:[%s3858_s1 + $0x204] ss:$36 sps:$4 sm:$0xff]   ;;  %v2928_v27 = vld [vmem:[%s3857_s0 + $0x178] sm:$0xff]  }
  0x1f   :  { %2434 = vmatpush3.bf16.msra.mxu0 %v2849_v30  ;;  %v2927_v26 = vld [vmem:[%s3857_s0 + $0x1b0] sm:$0xff]   ;;  %v2929_v28 = vld [vmem:[%s3857_s0 + $0x138] sm:$0xff]   ;;  %v2925_v33 = vld [vmem:[%s3858_s1 + $0x200] ss:$36 sps:$4 sm:$0xff]  }
  0x20   :  { %2547 = vmatprep.subr.bf16.mxu0 %v2879_v43  ;;  %v2930_v29 = vld [vmem:[%s3857_s0 + $0x1f8] sm:$0xff]   ;;  %v2931_v36 = vld [vmem:[%s3858_s1 + $0x10] ss:$36 sps:$4 sm:$0xff]  }
  0x21   :  { %2498 = vmatpush3.bf16.msra.mxu1 %v2854_v34  ;;  %v2934_v30 = vld [vmem:[%s3857_s0 + $0x1b8] sm:$0xff]  }
  0x22   :  { %1180 = vmatmul.mubr.bf16.vlgmr.msra.gmra.mrb[0].mxu0 %v2851_v32  ;;  %2611 = vmatprep.subr.bf16.mxu1 %v2884_v48  ;;  %v2920_v31 = vld [vmem:[%s3858_s1 + $0x1f8] ss:$36 sps:$4 sm:$0xff]   ;;  %v2967_v48 = vld [vmem:[%s3857_s0 + $0x210] sm:$0xff]  }
  0x23   :  { %1187 = vmatprep.mubr.bf16.mxu0 %v2858_v37  ;;  %2548 = vmatpush3.bf16.msra.mxu0 %v2882_v45  ;;  %v2933_v32 = vld [vmem:[%s3858_s1 + $0x14] ss:$36 sps:$4 sm:$0xff]   ;;  %v2937_v34 = vld [vmem:[%s3858_s1 + $0x1c] ss:$36 sps:$4 sm:$0xff]   ;;  %v252_v37 = vld [vmem:[%s3859_s2 + $0x8] sm:$0xff] }
  0x24   :  { %1277 = vmatmul.mubr.bf16.vlgmr.msra.gmra.mrb[0].mxu1 %v2855_v35  ;;  %2549 = vmatprep.subr.bf16.mxu0 %v2886_v51  ;;  %v251_v35 = vld [vmem:[%s3859_s2] sm:$0xff]  ;;  %v254_v43 = vld [vmem:[%s3859_s2 + $0x18] sm:$0xff]  ;;  %v2947_v51 = vld [vmem:[%s3858_s1 + $0xac] ss:$36 sps:$4 sm:$0xff]  }
  0x25   :  { %1284 = vmatprep.mubr.bf16.mxu1 %v2861_v38  ;;  %2612 = vmatpush3.bf16.msra.mxu1 %v2885_v50  ;;  %v2938_v38 = vld [vmem:[%s3858_s1 + $0x5c] ss:$36 sps:$4 sm:$0xff]  }
  0x26   :  { %2613 = vmatprep.subr.bf16.mxu1 %v2888_v53  ;;  %269 = vperm.xlu0 %2818, %v251_v35   ;;  %v255_v45 = vld [vmem:[%s3859_s2 + $0x20] sm:$0xff]  ;;  %v257_v53 = vld [vmem:[%s3859_s2 + $0x30] sm:$0xff]  ;;  %v2982_v35 = vld [vmem:[%s3858_s1 + $0x208] ss:$36 sps:$4 sm:$0xff]  }
  0x27   :  { %2550 = vmatpush3.bf16.msra.mxu0 %v2887_v52  ;;  %v2943_v50 = vld [vmem:[%s3858_s1 + $0x60] ss:$36 sps:$4 sm:$0xff]   ;;  %v2971_v52 = vld [vmem:[%s3857_s0 + $0x218] sm:$0xff]  }
  0x28   :  { %2551 = vmatprep.subr.bf16.mxu0 %v2893_v56  ;;  %v2975_v56 = vld [vmem:[%s3857_s0 + $0x220] sm:$0xff]  }
  0x29   :  { %2614 = vmatpush3.bf16.msra.mxu1 %v2891_v55  ;;  %v2946_v55 = vld [vmem:[%s3858_s1 + $0xa0] ss:$36 sps:$4 sm:$0xff]  }
  0x2a   :  { %1188 = vmatmul.mubr.bf16.gmra.mrb[4].mxu0 %v2860_v39  ;;  %2615 = vmatprep.subr.bf16.mxu1 %v2898_v61  ;;  %v253_v39 = vld [vmem:[%s3859_s2 + $0x10] sm:$0xff]  ;;  %v2979_v61 = vld [vmem:[%s3857_s0 + $0x228] sm:$0xff]  }
  0x2b   :  { %1195 = vmatprep.mubr.bf16.mxu0 %v2864_v40  ;;  %2552 = vmatpush3.bf16.msra.mxu0 %v2896_v60  ;;  %v2935_v40 = vld [vmem:[%s3858_s1 + $0x18] ss:$36 sps:$4 sm:$0xff]  }
  0x2c   :  { %1285 = vmatmul.mubr.bf16.gmra.mrb[4].mxu1 %v2863_v41  ;;  %2553 = vmatprep.subr.bf16.mxu0 %v2900_v63  ;;  %v2941_v41 = vld [vmem:[%s3858_s1 + $0x64] ss:$36 sps:$4 sm:$0xff]   ;;  %v2953_v60 = vld [vmem:[%s3858_s1 + $0xf4] ss:$36 sps:$4 sm:$0xff]  }
  0x2d   :  { %1292 = vmatprep.mubr.bf16.mxu1 %v2867_v42  ;;  %2616 = vmatpush3.bf16.msra.mxu1 %v2899_v62  ;;  %v2959_v42 = vld [vmem:[%s3857_s0 + $0x200] sm:$0xff]   ;;  %v260_v62 = vld [vmem:[%s3859_s2 + $0x48] sm:$0xff] }
  0x2e   :  { %2617 = vmatprep.subr.bf16.mxu1 %v2902_v2  ;;  %279 = vperm.xlu1 %2819, %v253_v39   ;;  %v2952_v63 = vld [vmem:[%s3858_s1 + $0xe8] ss:$36 sps:$4 sm:$0xff]   ;;  %v2956_v2 = vld [vmem:[%s3858_s1 + $0x134] ss:$36 sps:$4 sm:$0xff]  }
  0x2f   :  { %2554 = vmatpush3.bf16.msra.mxu0 %v2901_v1  ;;  %274 = vperm.xlu0 %2818, %v252_v37   ;;  %v2983_v1 = vld [vmem:[%s3857_s0 + $0x230] sm:$0xff]   ;;  %v1711_v39 = vld [vmem:[%s3860_s4 + $0xb8] sm:$0xff] }
  0x30   :  { %2555 = vmatprep.subr.bf16.mxu0 %v2907_v6  ;;  %v2960_v6 = vld [vmem:[%s3858_s1 + $0x13c] ss:$36 sps:$4 sm:$0xff]   ;;  %v1710_v37 = vld [vmem:[%s3860_s4 + $0xb0] sm:$0xff] }
  0x31   :  { %2618 = vmatpush3.bf16.msra.mxu1 %v2905_v4  ;;  %v263_v4 = vld [vmem:[%s3859_s2 + $0x60] sm:$0xff] }
  0x32   :  { %1196 = vmatmul.mubr.bf16.gmra.mrb[8].mxu0 %v2866_v44  ;;  %2619 = vmatprep.subr.bf16.mxu1 %v2912_v10  ;;  %v2963_v44 = vld [vmem:[%s3857_s0 + $0x208] sm:$0xff]   ;;  %v266_v10 = vld [vmem:[%s3859_s2 + $0x78] sm:$0xff] }
  0x33   :  { %1203 = vmatprep.mubr.bf16.mxu0 %v2870_v46  ;;  %2556 = vmatpush3.bf16.msra.mxu0 %v2910_v8  ;;  %v2940_v46 = vld [vmem:[%s3858_s1 + $0x58] ss:$36 sps:$4 sm:$0xff]   ;;  %v264_v8 = vld [vmem:[%s3859_s2 + $0x68] sm:$0xff] }
  0x34   :  { %1293 = vmatmul.mubr.bf16.gmra.mrb[8].mxu1 %v2869_v47  ;;  %2557 = vmatprep.subr.bf16.mxu0 %v2914_v13  ;;  %v2944_v47 = vld [vmem:[%s3858_s1 + $0xa4] ss:$36 sps:$4 sm:$0xff]  }
  0x35   :  { %1300 = vmatprep.mubr.bf16.mxu1 %v2873_v49  ;;  %2620 = vmatpush3.bf16.msra.mxu1 %v2913_v12  ;;  %v256_v49 = vld [vmem:[%s3859_s2 + $0x28] sm:$0xff]  ;;  %v2964_v12 = vld [vmem:[%s3858_s1 + $0x17c] ss:$36 sps:$4 sm:$0xff]  }
  0x36   :  { %2621 = vmatprep.subr.bf16.mxu1 %v2916_v15  ;;  %284 = vperm.xlu1 %2819, %v254_v43   ;;  %v1704_v13 = vld [vmem:[%s3860_s4 + $0x80] sm:$0xff]  ;;  %v1705_v15 = vld [vmem:[%s3860_s4 + $0x88] sm:$0xff]  ;;  %v2990_v43 = vld [vmem:[%s3858_s1 + $0xb0] ss:$36 sps:$4 sm:$0xff]  }
  0x37   :  { %2558 = vmatpush3.bf16.msra.mxu0 %v2915_v14  ;;  %289 = vperm.xlu0 %2818, %v255_v45   ;;  %v2962_v14 = vld [vmem:[%s3858_s1 + $0x138] ss:$36 sps:$4 sm:$0xff]   ;;  %v1713_v45 = vld [vmem:[%s3860_s4 + $0xc8] sm:$0xff] }
  0x38   :  { %2559 = vmatprep.subr.bf16.mxu0 %v2921_v19  ;;  %v2966_v19 = vld [vmem:[%s3858_s1 + $0x178] ss:$36 sps:$4 sm:$0xff]  }
  0x39   :  { %2622 = vmatpush3.bf16.msra.mxu1 %v2919_v18  ;;  %v1689_v18 = vld [vmem:[%s3860_s4 + $0x8] sm:$0xff] }
  0x3a   :  { %1204 = vmatmul.mubr.bf16.gmra.mrb[12].mxu0 %v2872_v54  ;;  %2623 = vmatprep.subr.bf16.mxu1 %v2926_v24  ;;  %v258_v54 = vld [vmem:[%s3859_s2 + $0x38] sm:$0xff]  ;;  %v2976_v24 = vld [vmem:[%s3858_s1 + $0x1cc] ss:$36 sps:$4 sm:$0xff]  }
  0x3b   :  { %1211 = vmatprep.mubr.bf16.mxu0 %v2876_v58  ;;  %2560 = vmatpush3.bf16.msra.mxu0 %v2924_v21  ;;  %v259_v58 = vld [vmem:[%s3859_s2 + $0x40] sm:$0xff]  ;;  %v1706_v21 = vld [vmem:[%s3860_s4 + $0x90] sm:$0xff] }
  0x3c   :  { %1301 = vmatmul.mubr.bf16.gmra.mrb[12].mxu1 %v2875_v57  ;;  %2561 = vmatprep.subr.bf16.mxu0 %v2928_v27  ;;  %v2950_v57 = vld [vmem:[%s3858_s1 + $0xec] ss:$36 sps:$4 sm:$0xff]   ;;  %v2974_v27 = vld [vmem:[%s3858_s1 + $0x1c0] ss:$36 sps:$4 sm:$0xff]  }
  0x3d   :  { %1308 = vmatprep.mubr.bf16.mxu1 %v2880_v59  ;;  %2624 = vmatpush3.bf16.msra.mxu1 %v2927_v26  ;;  %v2949_v59 = vld [vmem:[%s3858_s1 + $0xa8] ss:$36 sps:$4 sm:$0xff]   ;;  %v1691_v26 = vld [vmem:[%s3860_s4 + $0x18] sm:$0xff] }
  0x3e   :  { %2625 = vmatprep.subr.bf16.mxu1 %v2930_v29  ;;  %294 = vperm.xlu1 %2819, %v256_v49   ;;  %v1708_v29 = vld [vmem:[%s3860_s4 + $0xa0] sm:$0xff] }
  0x3f   :  { %2562 = vmatpush3.bf16.msra.mxu0 %v2929_v28  ;;  %299 = vperm.xlu0 %2818, %v257_v53   ;;  %v2980_v28 = vld [vmem:[%s3858_s1 + $0x20c] ss:$36 sps:$4 sm:$0xff]   ;;  %v2992_v49 = vld [vmem:[%s3858_s1 + $0x140] ss:$36 sps:$4 sm:$0xff]   ;;  %v1699_v53 = vld [vmem:[%s3860_s4 + $0x58] sm:$0xff] }
  0x40   :  { %2737 = vmatprep.subr.bf16.mxu0 %v2959_v42 }
  0x41   :  { %2626 = vmatpush3.bf16.msra.mxu1 %v2934_v30  ;;  %v2978_v30 = vld [vmem:[%s3858_s1 + $0x1c8] ss:$36 sps:$4 sm:$0xff]  }
  0x42   :  { %1212 = vmatmul.mubr.bf16.gmra.mrb[16].mxu0 %v2878_v0  ;;  %304 = vperm.xlu1 %2819, %v258_v54   ;;  %v261_v0 = vld [vmem:[%s3859_s2 + $0x50] sm:$0xff]  ;;  %v2993_v54 = vld [vmem:[%s3858_s1 + $0x188] ss:$36 sps:$4 sm:$0xff]  }
  0x43   :  { %1219 = vmatprep.mubr.bf16.mxu0 %v2889_v3  ;;  %309 = vperm.xlu0 %2818, %v259_v58   ;;  %v262_v3 = vld [vmem:[%s3859_s2 + $0x58] sm:$0xff]  ;;  %v1700_v58 = vld [vmem:[%s3860_s4 + $0x60] sm:$0xff] }
  0x44   :  { %1309 = vmatmul.mubr.bf16.gmra.mrb[16].mxu1 %v2883_v5  ;;  %v2955_v5 = vld [vmem:[%s3858_s1 + $0xf0] ss:$36 sps:$4 sm:$0xff]  }
  0x45   :  { %1316 = vmatprep.mubr.bf16.mxu1 %v2894_v7  ;;  %v2987_v7 = vld [vmem:[%s3857_s0 + $0x238] sm:$0xff]  }
  0x46   :  { %314 = vperm.xlu1 %2819, %v260_v62   ;;  %v1719_v62 = vld [vmem:[%s3860_s4 + $0xf8] sm:$0xff] }
  0x47   :  { %319 = vperm.xlu0 %2818, %v261_v0   ;;  %v1703_v0 = vld [vmem:[%s3860_s4 + $0x78] sm:$0xff] }
  0x4a   :  { %1220 = vmatmul.mubr.bf16.gmra.mrb[20].mxu0 %v2892_v9  ;;  %324 = vperm.xlu1 %2819, %v262_v3   ;;  %v265_v9 = vld [vmem:[%s3859_s2 + $0x70] sm:$0xff] }
  0x4b   :  { %1227 = vmatprep.mubr.bf16.mxu0 %v2903_v11  ;;  %329 = vperm.xlu0 %2818, %v263_v4   ;;  %v2958_v11 = vld [vmem:[%s3858_s1 + $0x130] ss:$36 sps:$4 sm:$0xff]  }
  0x4c   :  { %1317 = vmatmul.mubr.bf16.gmra.mrb[20].mxu1 %v2897_v16  ;;  %v2968_v16 = vld [vmem:[%s3858_s1 + $0x184] ss:$36 sps:$4 sm:$0xff]  }
  0x4d   :  { %1324 = vmatprep.mubr.bf16.mxu1 %v2908_v17  ;;  %v1688_v17 = vld [vmem:[%s3860_s4] sm:$0xff] }
  0x4e   :  { %334 = vperm.xlu1 %2819, %v264_v8  }
  0x4f   :  { %339 = vperm.xlu0 %2818, %v265_v9  }
  0x52   :  { %1228 = vmatmul.mubr.bf16.gmra.mrb[24].mxu0 %v2906_v20  ;;  %344 = vperm.xlu1 %2819, %v266_v10   ;;  %v2972_v20 = vld [vmem:[%s3858_s1 + $0x1c4] ss:$36 sps:$4 sm:$0xff]  }
  0x53   :  { %1235 = vmatprep.mubr.bf16.mxu0 %v2917_v22  ;;  %1802 = vperm.xlu0 %2818, %v1704_v13   ;;  %v2970_v22 = vld [vmem:[%s3858_s1 + $0x180] ss:$36 sps:$4 sm:$0xff]  }
  0x54   :  { %1325 = vmatmul.mubr.bf16.gmra.mrb[24].mxu1 %v2911_v23  ;;  %v1707_v23 = vld [vmem:[%s3860_s4 + $0x98] sm:$0xff] }
  0x55   :  { %1332 = vmatprep.mubr.bf16.mxu1 %v2922_v25  ;;  %v1690_v25 = vld [vmem:[%s3860_s4 + $0x10] sm:$0xff] }
  0x56   :  { %1807 = vperm.xlu1 %2819, %v1705_v15  }
  0x57   :  { %1722 = vperm.xlu0 %2818, %v1688_v17  }
  0x5a   :  { %1236 = vmatmul.mubr.bf16.gmra.mrb[28].mxu0 %v2920_v31  ;;  %1727 = vperm.xlu1 %2819, %v1689_v18   ;;  %v1709_v31 = vld [vmem:[%s3860_s4 + $0xa8] sm:$0xff] }
  0x5b   :  { %1373 = vmatprep.mubr.bf16.mxu0 %v2933_v32  ;;  %1812 = vperm.xlu0 %2818, %v1706_v21   ;;  %v2984_v32 = vld [vmem:[%s3858_s1 + $0x214] ss:$36 sps:$4 sm:$0xff]  }
  0x5c   :  { %1333 = vmatmul.mubr.bf16.gmra.mrb[28].mxu1 %v2925_v33  ;;  %v1692_v33 = vld [vmem:[%s3860_s4 + $0x20] sm:$0xff] }
  0x5d   :  { %1470 = vmatprep.mubr.bf16.mxu1 %v2937_v34  ;;  %v1693_v34 = vld [vmem:[%s3860_s4 + $0x28] sm:$0xff] }
  0x5e   :  { %1817 = vperm.xlu1 %2819, %v1707_v23  }
  0x5f   :  { %1732 = vperm.xlu0 %2818, %v1690_v25  }
  0x62   :  { %1374 = vmatmul.mubr.bf16.vlgmr.msra.gmra.mrb[32].mxu0 %v2931_v36  ;;  %1737 = vperm.xlu1 %2819, %v1691_v26   ;;  %v2988_v36 = vld [vmem:[%s3858_s1 + $0x20] ss:$36 sps:$4 sm:$0xff]  }
  0x63   :  { %1381 = vmatprep.mubr.bf16.mxu0 %v2938_v38  ;;  %2738 = vmatpush3.bf16.msra.mxu0 %v2959_v42  ;;  %v2986_v38 = vld [vmem:[%s3858_s1 + $0x210] ss:$36 sps:$4 sm:$0xff]   ;;  %v2989_v42 = vld [vmem:[%s3858_s1 + $0x68] ss:$36 sps:$4 sm:$0xff]  }
  0x64   :  { %1471 = vmatmul.mubr.bf16.vlgmr.msra.gmra.mrb[32].mxu1 %v2935_v40  ;;  %2739 = vmatprep.subr.bf16.mxu0 %v2963_v44  ;;  %v1694_v40 = vld [vmem:[%s3860_s4 + $0x30] sm:$0xff] }
  0x65   :  { %1478 = vmatprep.mubr.bf16.mxu1 %v2941_v41  ;;  %1822 = vperm.xlu0 %2818, %v1708_v29   ;;  %v1695_v41 = vld [vmem:[%s3860_s4 + $0x38] sm:$0xff] }
  0x66   :  { %1827 = vperm.xlu1 %2819, %v1709_v31  }
  0x67   :  { %2740 = vmatpush3.bf16.msra.mxu0 %v2963_v44  ;;  %v1712_v44 = vld [vmem:[%s3860_s4 + $0xc0] sm:$0xff] }
  0x68   :  { %2741 = vmatprep.subr.bf16.mxu0 %v2967_v48 }
  0x69   :  { %1742 = vperm.xlu0 %2818, %v1692_v33  }
  0x6a   :  { %1382 = vmatmul.mubr.bf16.gmra.mrb[36].mxu0 %v2940_v46  ;;  %1747 = vperm.xlu1 %2819, %v1693_v34   ;;  %v1696_v46 = vld [vmem:[%s3860_s4 + $0x40] sm:$0xff] }
  0x6b   :  { %1389 = vmatprep.mubr.bf16.mxu0 %v2944_v47  ;;  %2742 = vmatpush3.bf16.msra.mxu0 %v2967_v48  ;;  %v1697_v47 = vld [vmem:[%s3860_s4 + $0x48] sm:$0xff]  ;;  %v2991_v48 = vld [vmem:[%s3858_s1 + $0xf8] ss:$36 sps:$4 sm:$0xff]  }
  0x6c   :  { %1479 = vmatmul.mubr.bf16.gmra.mrb[36].mxu1 %v2943_v50  ;;  %2743 = vmatprep.subr.bf16.mxu0 %v2971_v52  ;;  %v1714_v50 = vld [vmem:[%s3860_s4 + $0xd0] sm:$0xff] }
  0x6d   :  { %1486 = vmatprep.mubr.bf16.mxu1 %v2947_v51  ;;  %1832 = vperm.xlu0 %2818, %v1710_v37   ;;  %v1715_v51 = vld [vmem:[%s3860_s4 + $0xd8] sm:$0xff] }
  0x6e   :  { %1837 = vperm.xlu1 %2819, %v1711_v39  }
  0x6f   :  { %2744 = vmatpush3.bf16.msra.mxu0 %v2971_v52  ;;  %v1698_v52 = vld [vmem:[%s3860_s4 + $0x50] sm:$0xff] }
  0x70   :  { %2745 = vmatprep.subr.bf16.mxu0 %v2975_v56 }
  0x71   :  { %1752 = vperm.xlu0 %2818, %v1694_v40  }
  0x72   :  { %1390 = vmatmul.mubr.bf16.gmra.mrb[40].mxu0 %v2946_v55  ;;  %1757 = vperm.xlu1 %2819, %v1695_v41   ;;  %v2994_v55 = vld [vmem:[%s3858_s1 + $0x1d0] ss:$36 sps:$4 sm:$0xff]  }
  0x73   :  { %1397 = vmatprep.mubr.bf16.mxu0 %v2950_v57  ;;  %2746 = vmatpush3.bf16.msra.mxu0 %v2975_v56  ;;  %v1716_v56 = vld [vmem:[%s3860_s4 + $0xe0] sm:$0xff]  ;;  %v1717_v57 = vld [vmem:[%s3860_s4 + $0xe8] sm:$0xff] }
  0x74   :  { %1487 = vmatmul.mubr.bf16.gmra.mrb[40].mxu1 %v2949_v59  ;;  %2747 = vmatprep.subr.bf16.mxu0 %v2979_v61  ;;  %v1701_v59 = vld [vmem:[%s3860_s4 + $0x68] sm:$0xff] }
  0x75   :  { %1494 = vmatprep.mubr.bf16.mxu1 %v2953_v60  ;;  %1842 = vperm.xlu0 %2818, %v1712_v44   ;;  %v2995_v60 = vld [vmem:[%s3858_s1 + $0x218] ss:$36 sps:$4 sm:$0xff]  }
  0x76   :  { %1847 = vperm.xlu1 %2819, %v1713_v45  }
  0x77   :  { %2748 = vmatpush3.bf16.msra.mxu0 %v2979_v61  ;;  %v1718_v61 = vld [vmem:[%s3860_s4 + $0xf0] sm:$0xff] }
  0x78   :  { %2749 = vmatprep.subr.bf16.mxu0 %v2983_v1 }
  0x79   :  { %1762 = vperm.xlu0 %2818, %v1696_v46  }
  0x7a   :  { %1398 = vmatmul.mubr.bf16.gmra.mrb[44].mxu0 %v2952_v63  ;;  %1767 = vperm.xlu1 %2819, %v1697_v47   ;;  %v1702_v63 = vld [vmem:[%s3860_s4 + $0x70] sm:$0xff] }
  0x7b   :  { %1405 = vmatprep.mubr.bf16.mxu0 %v2956_v2  ;;  %2750 = vmatpush3.bf16.msra.mxu0 %v2983_v1  ;;  %v2186_v1 = vld [vmem:[%s3861_s6] sm:$0x7] }
  0x7c   :  { %1495 = vmatmul.mubr.bf16.gmra.mrb[44].mxu1 %v2955_v5  ;;  %2751 = vmatprep.subr.bf16.mxu0 %v2987_v7 }
  0x7d   :  { %1502 = vmatprep.mubr.bf16.mxu1 %v2960_v6  ;;  %1852 = vperm.xlu0 %2818, %v1714_v50  }
  0x7e   :  { %1857 = vperm.xlu1 %2819, %v1715_v51  }
  0x7f   :  { %2752 = vmatpush3.bf16.msra.mxu0 %v2987_v7 }
  0x81   :  { %1772 = vperm.xlu0 %2818, %v1698_v52  }
  0x82   :  { %1406 = vmatmul.mubr.bf16.gmra.mrb[48].mxu0 %v2958_v11  ;;  %1777 = vperm.xlu1 %2819, %v1699_v53  }
  0x83   :  { %1413 = vmatprep.mubr.bf16.mxu0 %v2964_v12 }
  0x84   :  { %1503 = vmatmul.mubr.bf16.gmra.mrb[48].mxu1 %v2962_v14 }
  0x85   :  { %1510 = vmatprep.mubr.bf16.mxu1 %v2968_v16  ;;  %1862 = vperm.xlu0 %2818, %v1716_v56  }
  0x86   :  { %1867 = vperm.xlu1 %2819, %v1717_v57  }
  0x89   :  { %1782 = vperm.xlu0 %2818, %v1700_v58  }
  0x8a   :  { %1414 = vmatmul.mubr.bf16.gmra.mrb[52].mxu0 %v2966_v19  ;;  %1787 = vperm.xlu1 %2819, %v1701_v59  }
  0x8b   :  { %1421 = vmatprep.mubr.bf16.mxu0 %v2972_v20 }
  0x8c   :  { %1511 = vmatmul.mubr.bf16.gmra.mrb[52].mxu1 %v2970_v22 }
  0x8d   :  { %1518 = vmatprep.mubr.bf16.mxu1 %v2976_v24  ;;  %1872 = vperm.xlu0 %2818, %v1718_v61  }
  0x8e   :  { %1877 = vperm.xlu1 %2819, %v1719_v62  }
  0x91   :  { %1792 = vperm.xlu0 %2818, %v1702_v63  }
  0x92   :  { %1422 = vmatmul.mubr.bf16.gmra.mrb[56].mxu0 %v2974_v27  ;;  %1797 = vperm.xlu1 %2819, %v1703_v0  }
  0x93   :  { %1429 = vmatprep.mubr.bf16.mxu0 %v2980_v28 }
  0x94   :  { %1519 = vmatmul.mubr.bf16.gmra.mrb[56].mxu1 %v2978_v30 }
  0x95   :  { %1526 = vmatprep.mubr.bf16.mxu1 %v2984_v32  ;;  %2189 = vperm.xlu0 %2818, %v2186_v1  }
  0x9a   :  { %1430 = vmatmul.mubr.bf16.gmra.mrb[60].mxu0 %v2982_v35 }
  0x9b   :  { %2753 = vmatprep.mubr.bf16.mxu0 %v2988_v36 }
  0x9c   :  { %1527 = vmatmul.mubr.bf16.gmra.mrb[60].mxu1 %v2986_v38 }
  0xa2   :  { %2754 = vmatmul.mubr.bf16.vlgmr.msra.gmra.mrb[64].mxu0 %v2989_v42 }
  0xa3   :  { %2757 = vmatprep.mubr.bf16.mxu0 %v2990_v43 }
  0xa5   :  { %v270_v2 = vpop.permute.xlu0 %269 }
  0xaa   :  { %2758 = vmatmul.mubr.bf16.gmra.mrb[68].mxu0 %v2991_v48 }
  0xab   :  { %2761 = vmatprep.mubr.bf16.mxu0 %v2992_v49 }
  0xad   :  { %v280_v13 = vpop.permute.xlu1 %279 }
  0xae   :  { %v275_v7 = vpop.permute.xlu0 %274 }
  0xb2   :  { %2762 = vmatmul.mubr.bf16.gmra.mrb[72].mxu0 %v2993_v54 }
  0xb3   :  { %2765 = vmatprep.mubr.bf16.mxu0 %v2994_v55 }
  0xb5   :  { %v285_v25 = vpop.permute.xlu1 %284 }
  0xb6   :  { %v290_v40 = vpop.permute.xlu0 %289 }
  0xba   :  { %2766 = vmatmul.mubr.bf16.gmra.mrb[76].mxu0 %v2995_v60 }
  0xbd   :  { %v295_v43 = vpop.permute.xlu1 %294 }
  0xbe   :  { %v300_v58 = vpop.permute.xlu0 %299 }
  0xc1   :  { %v305_v61 = vpop.permute.xlu1 %304 }
  0xf5   :  { %v2435_v3 = vpop.f32.mrb[0].mxu0 }
  0xf6   :  { %v2436_v4 = vpop.f32.mrb[1].mxu0 }
  0xf7   :  { %v2437_v5 = vadd.f32 %v2436_v4, %v2435_v3  ;;  %v2438_v6 = vpop.f32.mrb[2].mxu0  ;;  %v2499_v8 = vpop.f32.mrb[0].mxu1 }
  0xf8   :  { %v2439_v9 = vpop.f32.mrb[3].mxu0  ;;  %v2500_v12 = vpop.f32.mrb[1].mxu1 }
  0xf9   :  { %v1182_v10 = vadd.f32 %v2437_v5, %v270_v2  ;;  %v2440_v11 = vadd.f32 %v2439_v9, %v2438_v6  ;;  %v2501_v14 = vadd.f32 %v2500_v12, %v2499_v8  ;;  %v2502_v15 = vpop.f32.mrb[2].mxu1  ;;  %v310_v12 = vpop.permute.xlu0 %309 }
  0xfa   :  { %v2503_v17 = vpop.f32.mrb[3].mxu1 }
  0xfb   :  { %v1185_v16 = vadd.f32 %v2440_v11, %v275_v7  ;;  %v3636_v18 = vadd.f32 %v2501_v14, %v1182_v10  ;;  %v2504_v19 = vadd.f32 %v2503_v17, %v2502_v15  ;;  %v315_v15 = vpop.permute.xlu1 %314 }
  0xfd   :  { %v2441_v20 = vpop.f32.mrb[4].mxu0  ;;  %v3638_v21 = vadd.f32 %v2504_v19, %v1185_v16 }
  0xfe   :  { %v2442_v22 = vpop.f32.mrb[5].mxu0 }
  0xff   :  { %v2443_v23 = vadd.f32 %v2442_v22, %v2441_v20  ;;  %v2444_v24 = vpop.f32.mrb[6].mxu0  ;;  %v2505_v26 = vpop.f32.mrb[4].mxu1 }
 0x100   :  { %v2445_v27 = vpop.f32.mrb[7].mxu0  ;;  %v2506_v30 = vpop.f32.mrb[5].mxu1 }
 0x101   :  { %v1190_v28 = vadd.f32 %v2443_v23, %v280_v13  ;;  %v2446_v29 = vadd.f32 %v2445_v27, %v2444_v24  ;;  %v2507_v31 = vadd.f32 %v2506_v30, %v2505_v26  ;;  %v2508_v32 = vpop.f32.mrb[6].mxu1  ;;  %v2996_v30 = vld [vmem:[%s3862_s3] sm:$0xff]  }
 0x102   :  { %v2509_v34 = vpop.f32.mrb[7].mxu1  ;;  %2785 = vmatprep.mubr.bf16.mxu1 %v2996_v30 }
 0x103   :  { %v1193_v33 = vadd.f32 %v2446_v29, %v285_v25  ;;  %v3640_v35 = vadd.f32 %v2507_v31, %v1190_v28  ;;  %v2510_v36 = vadd.f32 %v2509_v34, %v2508_v32 }
 0x105   :  { %v2447_v37 = vpop.f32.mrb[8].mxu0  ;;  %v3642_v38 = vadd.f32 %v2510_v36, %v1193_v33  ;;  %v320_v33 = vpop.permute.xlu0 %319 }
 0x106   :  { %v2448_v39 = vpop.f32.mrb[9].mxu0 }
 0x107   :  { %v2449_v41 = vadd.f32 %v2448_v39, %v2447_v37  ;;  %v2450_v42 = vpop.f32.mrb[10].mxu0  ;;  %v2511_v44 = vpop.f32.mrb[8].mxu1 }
 0x108   :  { %v2451_v45 = vpop.f32.mrb[11].mxu0  ;;  %v2512_v48 = vpop.f32.mrb[9].mxu1 }
 0x109   :  { %v1198_v46 = vadd.f32 %v2449_v41, %v290_v40  ;;  %v2452_v47 = vadd.f32 %v2451_v45, %v2450_v42  ;;  %v2513_v49 = vadd.f32 %v2512_v48, %v2511_v44  ;;  %v2514_v50 = vpop.f32.mrb[10].mxu1  ;;  %v325_v37 = vpop.permute.xlu1 %324 }
 0x10a   :  { %v2515_v52 = vpop.f32.mrb[11].mxu1 }
 0x10b   :  { %v1201_v51 = vadd.f32 %v2452_v47, %v295_v43  ;;  %v3644_v53 = vadd.f32 %v2513_v49, %v1198_v46  ;;  %v2516_v54 = vadd.f32 %v2515_v52, %v2514_v50  ;;  %v330_v52 = vpop.permute.xlu0 %329 }
 0x10d   :  { %v2453_v55 = vpop.f32.mrb[12].mxu0  ;;  %v3646_v56 = vadd.f32 %v2516_v54, %v1201_v51 }
 0x10e   :  { %v2454_v57 = vpop.f32.mrb[13].mxu0 }
 0x10f   :  { %v2455_v59 = vadd.f32 %v2454_v57, %v2453_v55  ;;  %v2456_v60 = vpop.f32.mrb[14].mxu0  ;;  %v2517_v62 = vpop.f32.mrb[12].mxu1 }
 0x110   :  { %v2457_v63 = vpop.f32.mrb[15].mxu0  ;;  %v2518_v2 = vpop.f32.mrb[13].mxu1 }
 0x111   :  { %v1206_v0 = vadd.f32 %v2455_v59, %v300_v58  ;;  %v2458_v1 = vadd.f32 %v2457_v63, %v2456_v60  ;;  %v2519_v3 = vadd.f32 %v2518_v2, %v2517_v62  ;;  %v2520_v4 = vpop.f32.mrb[14].mxu1  ;;  %v335_v58 = vpop.permute.xlu1 %334 }
 0x112   :  { %v2521_v6 = vpop.f32.mrb[15].mxu1 }
 0x113   :  { %v1209_v5 = vadd.f32 %v2458_v1, %v305_v61  ;;  %v3648_v7 = vadd.f32 %v2519_v3, %v1206_v0  ;;  %v2522_v8 = vadd.f32 %v2521_v6, %v2520_v4 }
 0x115   :  { %v2459_v9 = vpop.f32.mrb[16].mxu0  ;;  %v3650_v10 = vadd.f32 %v2522_v8, %v1209_v5 }
 0x116   :  { %v2460_v11 = vpop.f32.mrb[17].mxu0 }
 0x117   :  { %v2461_v13 = vadd.f32 %v2460_v11, %v2459_v9  ;;  %v2462_v14 = vpop.f32.mrb[18].mxu0  ;;  %v2523_v16 = vpop.f32.mrb[16].mxu1 }
 0x118   :  { %v2463_v17 = vpop.f32.mrb[19].mxu0  ;;  %v2524_v22 = vpop.f32.mrb[17].mxu1 }
 0x119   :  { %v1214_v19 = vadd.f32 %v2461_v13, %v310_v12  ;;  %v2464_v20 = vadd.f32 %v2463_v17, %v2462_v14  ;;  %v2525_v23 = vadd.f32 %v2524_v22, %v2523_v16  ;;  %v2526_v24 = vpop.f32.mrb[18].mxu1  ;;  %v340_v11 = vpop.permute.xlu0 %339 }
 0x11a   :  { %v2527_v26 = vpop.f32.mrb[19].mxu1 }
 0x11b   :  { %v1217_v25 = vadd.f32 %v2464_v20, %v315_v15  ;;  %v3652_v27 = vadd.f32 %v2525_v23, %v1214_v19  ;;  %v2528_v28 = vadd.f32 %v2527_v26, %v2526_v24  ;;  %v345_v23 = vpop.permute.xlu1 %344 }
 0x11d   :  { %v2465_v29 = vpop.f32.mrb[20].mxu0  ;;  %v3657_v31 = vadd.f32 %v2528_v28, %v1217_v25 }
 0x11e   :  { %v2466_v32 = vpop.f32.mrb[21].mxu0 }
 0x11f   :  { %v2467_v34 = vadd.f32 %v2466_v32, %v2465_v29  ;;  %v2468_v36 = vpop.f32.mrb[22].mxu0  ;;  %v2529_v39 = vpop.f32.mrb[20].mxu1 }
 0x120   :  { %v2469_v40 = vpop.f32.mrb[23].mxu0  ;;  %v2530_v43 = vpop.f32.mrb[21].mxu1 }
 0x121   :  { %v1222_v41 = vadd.f32 %v2467_v34, %v320_v33  ;;  %v2470_v42 = vadd.f32 %v2469_v40, %v2468_v36  ;;  %v2531_v44 = vadd.f32 %v2530_v43, %v2529_v39  ;;  %v2532_v45 = vpop.f32.mrb[22].mxu1 }
 0x122   :  { %v2533_v47 = vpop.f32.mrb[23].mxu1 }
 0x123   :  { %v1225_v46 = vadd.f32 %v2470_v42, %v325_v37  ;;  %v3659_v48 = vadd.f32 %v2531_v44, %v1222_v41  ;;  %v2534_v49 = vadd.f32 %v2533_v47, %v2532_v45 }
 0x125   :  { %v2471_v50 = vpop.f32.mrb[24].mxu0  ;;  %v3661_v51 = vadd.f32 %v2534_v49, %v1225_v46 }
 0x126   :  { %v2472_v54 = vpop.f32.mrb[25].mxu0 }
 0x127   :  { %v2473_v55 = vadd.f32 %v2472_v54, %v2471_v50  ;;  %v2474_v57 = vpop.f32.mrb[26].mxu0  ;;  %v2535_v59 = vpop.f32.mrb[24].mxu1 }
 0x128   :  { %v2475_v60 = vpop.f32.mrb[27].mxu0  ;;  %v2536_v63 = vpop.f32.mrb[25].mxu1 }
 0x129   :  { %v1230_v61 = vadd.f32 %v2473_v55, %v330_v52  ;;  %v2476_v62 = vadd.f32 %v2475_v60, %v2474_v57  ;;  %v2537_v0 = vadd.f32 %v2536_v63, %v2535_v59  ;;  %v2538_v1 = vpop.f32.mrb[26].mxu1 }
 0x12a   :  { %v2539_v3 = vpop.f32.mrb[27].mxu1 }
 0x12b   :  { %v1233_v2 = vadd.f32 %v2476_v62, %v335_v58  ;;  %v3663_v4 = vadd.f32 %v2537_v0, %v1230_v61  ;;  %v2540_v5 = vadd.f32 %v2539_v3, %v2538_v1 }
 0x12d   :  { %v2477_v6 = vpop.f32.mrb[28].mxu0  ;;  %v3665_v8 = vadd.f32 %v2540_v5, %v1233_v2 }
 0x12e   :  { %v2478_v9 = vpop.f32.mrb[29].mxu0 }
 0x12f   :  { %v2479_v12 = vadd.f32 %v2478_v9, %v2477_v6  ;;  %v2480_v13 = vpop.f32.mrb[30].mxu0  ;;  %v2541_v14 = vpop.f32.mrb[28].mxu1 }
 0x130   :  { %v2481_v15 = vpop.f32.mrb[31].mxu0  ;;  %v2542_v19 = vpop.f32.mrb[29].mxu1 }
 0x131   :  { %v1238_v16 = vadd.f32 %v2479_v12, %v340_v11  ;;  %v2482_v17 = vadd.f32 %v2481_v15, %v2480_v13  ;;  %v2543_v20 = vadd.f32 %v2542_v19, %v2541_v14  ;;  %v2544_v22 = vpop.f32.mrb[30].mxu1 }
 0x132   :  { %v2545_v25 = vpop.f32.mrb[31].mxu1 }
 0x133   :  { %v1241_v24 = vadd.f32 %v2482_v17, %v345_v23  ;;  %v3667_v26 = vadd.f32 %v2543_v20, %v1238_v16  ;;  %v2546_v28 = vadd.f32 %v2545_v25, %v2544_v22 }
 0x135   :  { %v2563_v29 = vpop.f32.mrb[32].mxu0  ;;  %v3669_v30 = vadd.f32 %v2546_v28, %v1241_v24 }
 0x136   :  { %v2564_v32 = vpop.f32.mrb[33].mxu0 }
 0x137   :  { %v2565_v33 = vadd.f32 %v2564_v32, %v2563_v29  ;;  %v2566_v34 = vpop.f32.mrb[34].mxu0  ;;  %v2627_v36 = vpop.f32.mrb[32].mxu1 }
 0x138   :  { %v2567_v37 = vpop.f32.mrb[35].mxu0  ;;  %v2628_v41 = vpop.f32.mrb[33].mxu1 }
 0x139   :  { %v1376_v39 = vadd.f32 %v2565_v33, %v3636_v18  ;;  %v2568_v40 = vadd.f32 %v2567_v37, %v2566_v34  ;;  %v2629_v42 = vadd.f32 %v2628_v41, %v2627_v36  ;;  %v2630_v43 = vpop.f32.mrb[34].mxu1 }
 0x13a   :  { %v2631_v45 = vpop.f32.mrb[35].mxu1 }
 0x13b   :  { %v1379_v44 = vadd.f32 %v2568_v40, %v3638_v21  ;;  %v2632_v46 = vadd.f32 %v2631_v45, %v2630_v43  ;;  %v3673_v47 = vadd.f32 %v2629_v42, %v1376_v39 }
 0x13d   :  { %v2569_v49 = vpop.f32.mrb[36].mxu0  ;;  %v3675_v52 = vadd.f32 %v2632_v46, %v1379_v44 }
 0x13e   :  { %v2570_v50 = vpop.f32.mrb[37].mxu0 }
 0x13f   :  { %v2571_v54 = vadd.f32 %v2570_v50, %v2569_v49  ;;  %v2572_v55 = vpop.f32.mrb[38].mxu0  ;;  %v2633_v57 = vpop.f32.mrb[36].mxu1 }
 0x140   :  { %v2573_v58 = vpop.f32.mrb[39].mxu0  ;;  %v2634_v60 = vpop.f32.mrb[37].mxu1 }
 0x141   :  { %v1384_v18 = vadd.f32 %v2571_v54, %v3640_v35  ;;  %v2574_v59 = vadd.f32 %v2573_v58, %v2572_v55  ;;  %v2635_v61 = vadd.f32 %v2634_v60, %v2633_v57  ;;  %v2636_v62 = vpop.f32.mrb[38].mxu1 }
 0x142   :  { %v2637_v63 = vpop.f32.mrb[39].mxu1 }
 0x143   :  { %v1387_v21 = vadd.f32 %v2574_v59, %v3642_v38  ;;  %v2638_v0 = vadd.f32 %v2637_v63, %v2636_v62  ;;  %v3679_v1 = vadd.f32 %v2635_v61, %v1384_v18 }
 0x145   :  { %v2575_v2 = vpop.f32.mrb[40].mxu0  ;;  %v3681_v5 = vadd.f32 %v2638_v0, %v1387_v21 }
 0x146   :  { %v2576_v3 = vpop.f32.mrb[41].mxu0 }
 0x147   :  { %v2577_v6 = vadd.f32 %v2576_v3, %v2575_v2  ;;  %v2578_v9 = vpop.f32.mrb[42].mxu0  ;;  %v2639_v11 = vpop.f32.mrb[40].mxu1 }
 0x148   :  { %v2579_v12 = vpop.f32.mrb[43].mxu0  ;;  %v2640_v14 = vpop.f32.mrb[41].mxu1 }
 0x149   :  { %v1392_v35 = vadd.f32 %v2577_v6, %v3644_v53  ;;  %v2580_v13 = vadd.f32 %v2579_v12, %v2578_v9  ;;  %v2641_v15 = vadd.f32 %v2640_v14, %v2639_v11  ;;  %v2642_v16 = vpop.f32.mrb[42].mxu1 }
 0x14a   :  { %v2643_v17 = vpop.f32.mrb[43].mxu1 }
 0x14b   :  { %v1395_v38 = vadd.f32 %v2580_v13, %v3646_v56  ;;  %v2644_v19 = vadd.f32 %v2643_v17, %v2642_v16  ;;  %v3685_v20 = vadd.f32 %v2641_v15, %v1392_v35 }
 0x14d   :  { %v2581_v22 = vpop.f32.mrb[44].mxu0  ;;  %v3687_v24 = vadd.f32 %v2644_v19, %v1395_v38 }
 0x14e   :  { %v2582_v23 = vpop.f32.mrb[45].mxu0 }
 0x14f   :  { %v2583_v25 = vadd.f32 %v2582_v23, %v2581_v22  ;;  %v2584_v28 = vpop.f32.mrb[46].mxu0  ;;  %v2645_v29 = vpop.f32.mrb[44].mxu1 }
 0x150   :  { %v2585_v32 = vpop.f32.mrb[47].mxu0  ;;  %v2646_v34 = vpop.f32.mrb[45].mxu1 }
 0x151   :  { %v1400_v53 = vadd.f32 %v2583_v25, %v3648_v7  ;;  %v2586_v33 = vadd.f32 %v2585_v32, %v2584_v28  ;;  %v2647_v36 = vadd.f32 %v2646_v34, %v2645_v29  ;;  %v2648_v37 = vpop.f32.mrb[46].mxu1 }
 0x152   :  { %v2649_v39 = vpop.f32.mrb[47].mxu1 }
 0x153   :  { %v1403_v56 = vadd.f32 %v2586_v33, %v3650_v10  ;;  %v2650_v40 = vadd.f32 %v2649_v39, %v2648_v37  ;;  %v3691_v41 = vadd.f32 %v2647_v36, %v1400_v53 }
 0x155   :  { %v2587_v42 = vpop.f32.mrb[48].mxu0  ;;  %v3693_v44 = vadd.f32 %v2650_v40, %v1403_v56 }
 0x156   :  { %v2588_v43 = vpop.f32.mrb[49].mxu0 }
 0x157   :  { %v2589_v45 = vadd.f32 %v2588_v43, %v2587_v42  ;;  %v2590_v46 = vpop.f32.mrb[50].mxu0  ;;  %v2651_v49 = vpop.f32.mrb[48].mxu1 }
 0x158   :  { %v2591_v50 = vpop.f32.mrb[51].mxu0  ;;  %v2652_v55 = vpop.f32.mrb[49].mxu1 }
 0x159   :  { %v1408_v7 = vadd.f32 %v2589_v45, %v3652_v27  ;;  %v2592_v54 = vadd.f32 %v2591_v50, %v2590_v46  ;;  %v2653_v57 = vadd.f32 %v2652_v55, %v2651_v49  ;;  %v2654_v58 = vpop.f32.mrb[50].mxu1 }
 0x15a   :  { %v2655_v18 = vpop.f32.mrb[51].mxu1 }
 0x15b   :  { %v1411_v10 = vadd.f32 %v2592_v54, %v3657_v31  ;;  %v2656_v59 = vadd.f32 %v2655_v18, %v2654_v58  ;;  %v3697_v60 = vadd.f32 %v2653_v57, %v1408_v7 }
 0x15d   :  { %v2593_v61 = vpop.f32.mrb[52].mxu0  ;;  %v3699_v21 = vadd.f32 %v2656_v59, %v1411_v10 }
 0x15e   :  { %v2594_v62 = vpop.f32.mrb[53].mxu0 }
 0x15f   :  { %v2595_v63 = vadd.f32 %v2594_v62, %v2593_v61  ;;  %v2596_v0 = vpop.f32.mrb[54].mxu0  ;;  %v2657_v2 = vpop.f32.mrb[52].mxu1 }
 0x160   :  { %v2597_v3 = vpop.f32.mrb[55].mxu0  ;;  %v2658_v9 = vpop.f32.mrb[53].mxu1 }
 0x161   :  { %v1416_v27 = vadd.f32 %v2595_v63, %v3659_v48  ;;  %v2598_v6 = vadd.f32 %v2597_v3, %v2596_v0  ;;  %v2659_v11 = vadd.f32 %v2658_v9, %v2657_v2  ;;  %v2660_v12 = vpop.f32.mrb[54].mxu1 }
 0x162   :  { %v2661_v35 = vpop.f32.mrb[55].mxu1 }
 0x163   :  { %v1419_v31 = vadd.f32 %v2598_v6, %v3661_v51  ;;  %v2662_v13 = vadd.f32 %v2661_v35, %v2660_v12  ;;  %v3703_v14 = vadd.f32 %v2659_v11, %v1416_v27 }
 0x165   :  { %v2599_v15 = vpop.f32.mrb[56].mxu0  ;;  %v3705_v38 = vadd.f32 %v2662_v13, %v1419_v31 }
 0x166   :  { %v2600_v16 = vpop.f32.mrb[57].mxu0 }
 0x167   :  { %v2601_v17 = vadd.f32 %v2600_v16, %v2599_v15  ;;  %v2602_v19 = vpop.f32.mrb[58].mxu0  ;;  %v2663_v22 = vpop.f32.mrb[56].mxu1 }
 0x168   :  { %v2603_v23 = vpop.f32.mrb[59].mxu0  ;;  %v2664_v28 = vpop.f32.mrb[57].mxu1 }
 0x169   :  { %v1424_v48 = vadd.f32 %v2601_v17, %v3663_v4  ;;  %v2604_v25 = vadd.f32 %v2603_v23, %v2602_v19  ;;  %v2665_v29 = vadd.f32 %v2664_v28, %v2663_v22  ;;  %v2666_v32 = vpop.f32.mrb[58].mxu1 }
 0x16a   :  { %v2667_v53 = vpop.f32.mrb[59].mxu1 }
 0x16b   :  { %v1427_v51 = vadd.f32 %v2604_v25, %v3665_v8  ;;  %v2668_v33 = vadd.f32 %v2667_v53, %v2666_v32  ;;  %v3709_v34 = vadd.f32 %v2665_v29, %v1424_v48 }
 0x16d   :  { %v2605_v36 = vpop.f32.mrb[60].mxu0  ;;  %v3711_v56 = vadd.f32 %v2668_v33, %v1427_v51 }
 0x16e   :  { %v2606_v37 = vpop.f32.mrb[61].mxu0 }
 0x16f   :  { %v2607_v39 = vadd.f32 %v2606_v37, %v2605_v36  ;;  %v2608_v40 = vpop.f32.mrb[62].mxu0  ;;  %v2669_v42 = vpop.f32.mrb[60].mxu1 }
 0x170   :  { %v2609_v43 = vpop.f32.mrb[63].mxu0  ;;  %v2670_v46 = vpop.f32.mrb[61].mxu1 }
 0x171   :  { %v1432_v4 = vadd.f32 %v2607_v39, %v3667_v26  ;;  %v2610_v45 = vadd.f32 %v2609_v43, %v2608_v40  ;;  %v2671_v49 = vadd.f32 %v2670_v46, %v2669_v42  ;;  %v2672_v50 = vpop.f32.mrb[62].mxu1 }
 0x172   :  { %v2673_v7 = vpop.f32.mrb[63].mxu1 }
 0x173   :  { %v1435_v8 = vadd.f32 %v2610_v45, %v3669_v30  ;;  %v2674_v54 = vadd.f32 %v2673_v7, %v2672_v50  ;;  %v1529_v55 = vadd.f32 %v2671_v49, %v1432_v4  ;;  %v2999_v50 = vld [vmem:[%s3862_s3 + $0x18] sm:$0xff]   ;;  %v3001_v7 = vld [vmem:[%s3862_s3 + $0x28] sm:$0xff]  }
 0x175   :  { %v2755_v57 = vpop.f32.mrb[64].mxu0  ;;  %v1532_v18 = vadd.f32 %v2674_v54, %v1435_v8  ;;  %v3000_v8 = vld [vmem:[%s3862_s3 + $0x20] sm:$0xff]   ;;  %v3002_v54 = vld [vmem:[%s3862_s3 + $0x30] sm:$0xff]  }
 0x176   :  { %v1578_v58 = vadd.f32 %v2755_v57, %v3679_v1  ;;  %v1569_v10 = vpop.f32.mrb[65].mxu0  ;;  %v3004_v57 = vld [vmem:[%s3862_s3 + $0x40] sm:$0xff]  }
 0x177   :  { %v1570_v59 = vadd.f32 %v1569_v10, %v3673_v47  ;;  %v2756_v61 = vpop.f32.mrb[66].mxu0  ;;  %v3006_v10 = vld [vmem:[%s3862_s3 + $0x50] sm:$0xff]  }
 0x178   :  { %v1581_v62 = vadd.f32 %v2756_v61, %v3681_v5  ;;  %v1572_v26 = vpop.f32.mrb[67].mxu0  ;;  %v1634_v0 = vmax.f32 %v1578_v58, 0.0  ;;  %v3005_v58 = vld [vmem:[%s3862_s3 + $0x48] sm:$0xff]  }
 0x179   :  { %v1573_v63 = vadd.f32 %v1572_v26, %v3675_v52  ;;  %v1632_v3 = vmax.f32 %v1570_v59, 0.0  ;;  %v3008_v59 = vld [vmem:[%s3862_s3 + $0x60] sm:$0xff]   ;;  %v3009_v61 = vld [vmem:[%s3862_s3 + $0x68] sm:$0xff]   ;;  %v3011_v26 = vld [vmem:[%s3862_s3 + $0x78] sm:$0xff]  }
 0x17a   :  { %v1635_v2 = vmax.f32 %v1581_v62, 0.0  ;;  %v3010_v62 = vld [vmem:[%s3862_s3 + $0x70] sm:$0xff]  }
 0x17b   :  { %v1633_v30 = vmax.f32 %v1573_v63, 0.0  ;;  %v3774_v63 = vpop.permute.xlu0 %1802 }
 0x17c   :  { %v1649_v27 = vpack.c.bf16 %v1635_v2, %v1634_v0  ;;  %v3776_v0 = vpop.permute.xlu1 %1807 }
 0x17d   :  { %v1648_v6 = vpack.c.bf16 %v1633_v30, %v1632_v3  ;;  %v2759_v9 = vpop.f32.mrb[68].mxu0  ;;  %v3781_v30 = vld.sshfl [vmem:[%s3863_s5] sm:$0x33 pattern:$0x76325410] }
 0x17e   :  { %v1594_v11 = vadd.f32 %v2759_v9, %v3691_v41  ;;  %v1585_v1 = vpop.f32.mrb[69].mxu0 }
 0x17f   :  { %v1586_v12 = vadd.f32 %v1585_v1, %v3685_v20  ;;  %v2760_v31 = vpop.f32.mrb[70].mxu0  ;;  %2769 = vmatprep.subr.bf16.mxu1 %v1648_v6  ;;  %v1723_v2 = vpop.permute.xlu0 %1722 }
 0x180   :  { %v1597_v47 = vadd.f32 %v2760_v31, %v3693_v44  ;;  %v1588_v5 = vpop.f32.mrb[71].mxu0  ;;  %2770 = vmatpush3.bf16.msra.mxu1 %v1648_v6  ;;  %v1638_v35 = vmax.f32 %v1594_v11, 0.0  ;;  %v1728_v3 = vpop.permute.xlu1 %1727 }
 0x181   :  { %v1589_v52 = vadd.f32 %v1588_v5, %v3687_v24  ;;  %2771 = vmatprep.subr.bf16.mxu1 %v1649_v27  ;;  %v1636_v15 = vmax.f32 %v1586_v12, 0.0 }
 0x182   :  { %v1639_v13 = vmax.f32 %v1597_v47, 0.0 }
 0x183   :  { %v1637_v16 = vmax.f32 %v1589_v52, 0.0  ;;  %v3785_v6 = vpop.permute.xlu0 %1812 }
 0x184   :  { %v1651_v17 = vpack.c.bf16 %v1639_v13, %v1638_v35  ;;  %2772 = vmatpush3.bf16.msra.mxu1 %v1649_v27  ;;  %v2200_v27 = vcombine.high %v3781_v30, %v3781_v30  ;;  %v3787_v9 = vpop.permute.xlu1 %1817 }
 0x185   :  { %v1650_v19 = vpack.c.bf16 %v1637_v16, %v1636_v15  ;;  %v2763_v41 = vpop.f32.mrb[72].mxu0 }
 0x186   :  { %v1610_v22 = vadd.f32 %v2763_v41, %v3703_v14  ;;  %v1601_v20 = vpop.f32.mrb[73].mxu0  ;;  %2235 = vmatprep.mubr.bf16.mxu0 %v2200_v27 }
 0x187   :  { %v1602_v23 = vadd.f32 %v1601_v20, %v3697_v60  ;;  %v2764_v48 = vpop.f32.mrb[74].mxu0  ;;  %2773 = vmatprep.subr.bf16.mxu1 %v1650_v19  ;;  %v1733_v11 = vpop.permute.xlu0 %1732 }
 0x188   :  { %v1613_v44 = vadd.f32 %v2764_v48, %v3705_v38  ;;  %v1604_v25 = vpop.f32.mrb[75].mxu0  ;;  %2774 = vmatpush3.bf16.msra.mxu1 %v1650_v19  ;;  %v1642_v28 = vmax.f32 %v1610_v22, 0.0  ;;  %v1738_v1 = vpop.permute.xlu1 %1737 }
 0x189   :  { %v1605_v24 = vadd.f32 %v1604_v25, %v3699_v21  ;;  %2775 = vmatprep.subr.bf16.mxu1 %v1651_v17  ;;  %v1640_v32 = vmax.f32 %v1602_v23, 0.0 }
 0x18a   :  { %v1643_v29 = vmax.f32 %v1613_v44, 0.0 }
 0x18b   :  { %v1641_v51 = vmax.f32 %v1605_v24, 0.0  ;;  %v3789_v12 = vpop.permute.xlu0 %1822 }
 0x18c   :  { %v1653_v53 = vpack.c.bf16 %v1643_v29, %v1642_v28  ;;  %2776 = vmatpush3.bf16.msra.mxu1 %v1651_v17  ;;  %v3791_v31 = vpop.permute.xlu1 %1827 }
 0x18d   :  { %v1652_v33 = vpack.c.bf16 %v1641_v51, %v1640_v32  ;;  %v2767_v14 = vpop.f32.mrb[76].mxu0 }
 0x18e   :  { %v1626_v36 = vadd.f32 %v2767_v14, %v1529_v55  ;;  %v1617_v37 = vpop.f32.mrb[77].mxu0  ;;  %v3003_v55 = vld [vmem:[%s3862_s3 + $0x38] sm:$0xff]  }
 0x18f   :  { %v1618_v60 = vadd.f32 %v1617_v37, %v3709_v34  ;;  %v2768_v39 = vpop.f32.mrb[78].mxu0  ;;  %2777 = vmatprep.subr.bf16.mxu1 %v1652_v33  ;;  %v2997_v34 = vld [vmem:[%s3862_s3 + $0x8] sm:$0xff]   ;;  %v1743_v47 = vpop.permute.xlu0 %1742 }
 0x190   :  { %v1629_v38 = vadd.f32 %v2768_v39, %v1532_v18  ;;  %v1620_v40 = vpop.f32.mrb[79].mxu0  ;;  %2778 = vmatpush3.bf16.msra.mxu1 %v1652_v33  ;;  %v1646_v42 = vmax.f32 %v1626_v36, 0.0  ;;  %v3007_v18 = vld [vmem:[%s3862_s3 + $0x58] sm:$0xff]   ;;  %v1748_v5 = vpop.permute.xlu1 %1747 }
 0x191   :  { %v1621_v21 = vadd.f32 %v1620_v40, %v3711_v56  ;;  %2779 = vmatprep.subr.bf16.mxu1 %v1653_v53  ;;  %v1644_v4 = vmax.f32 %v1618_v60, 0.0  ;;  %v2998_v56 = vld [vmem:[%s3862_s3 + $0x10] sm:$0xff]  }
 0x192   :  { %v1647_v43 = vmax.f32 %v1629_v38, 0.0 }
 0x193   :  { %v1645_v45 = vmax.f32 %v1621_v21, 0.0  ;;  %v3793_v52 = vpop.permute.xlu0 %1832 }
 0x194   :  { %v1655_v46 = vpack.c.bf16 %v1647_v43, %v1646_v42  ;;  %2780 = vmatpush3.bf16.msra.mxu1 %v1653_v53  ;;  %v3795_v35 = vpop.permute.xlu1 %1837 }
 0x195   :  { %v1654_v49 = vpack.c.bf16 %v1645_v45, %v1644_v4 }
 0x197   :  { %2781 = vmatprep.subr.bf16.mxu1 %v1654_v49  ;;  %v1753_v13 = vpop.permute.xlu0 %1752 }
 0x198   :  { %2782 = vmatpush3.bf16.msra.mxu1 %v1654_v49  ;;  %v1758_v15 = vpop.permute.xlu1 %1757 }
 0x199   :  { %2783 = vmatprep.subr.bf16.mxu1 %v1655_v46 }
 0x19b   :  { %v3797_v16 = vpop.permute.xlu0 %1842 }
 0x19c   :  { %2784 = vmatpush3.bf16.msra.mxu1 %v1655_v46  ;;  %v3799_v17 = vpop.permute.xlu1 %1847 }
 0x19f   :  { %2786 = vmatmul.mubr.bf16.vlgmr.msra.gmra.mrb[64].mxu1 %v2997_v34  ;;  %v1763_v19 = vpop.permute.xlu0 %1762 }
 0x1a0   :  { %2789 = vmatprep.mubr.bf16.mxu1 %v2998_v56  ;;  %v1768_v41 = vpop.permute.xlu1 %1767 }
 0x1a3   :  { %v3801_v22 = vpop.permute.xlu0 %1852 }
 0x1a4   :  { %v3803_v20 = vpop.permute.xlu1 %1857 }
 0x1a7   :  { %2790 = vmatmul.mubr.bf16.gmra.mrb[68].mxu1 %v2999_v50  ;;  %v1773_v23 = vpop.permute.xlu0 %1772 }
 0x1a8   :  { %2793 = vmatprep.mubr.bf16.mxu1 %v3000_v8  ;;  %v1778_v24 = vpop.permute.xlu1 %1777 }
 0x1ab   :  { %v3805_v36 = vpop.permute.xlu0 %1862 }
 0x1ac   :  { %v3809_v38 = vpop.permute.xlu1 %1867 }
 0x1af   :  { %2794 = vmatmul.mubr.bf16.gmra.mrb[72].mxu1 %v3001_v7  ;;  %v1783_v34 = vpop.permute.xlu0 %1782 }
 0x1b0   :  { %2797 = vmatprep.mubr.bf16.mxu1 %v3002_v54  ;;  %v1788_v7 = vpop.permute.xlu1 %1787 }
 0x1b4   :  { %v3819_v27 = vpop.permute.xlu1 %1877 }
 0x1b7   :  { %2798 = vmatmul.mubr.bf16.gmra.mrb[76].mxu1 %v3003_v55 }
 0x1b8   :  { %2801 = vmatprep.mubr.bf16.mxu1 %v3004_v57 }
 0x1bf   :  { %2802 = vmatmul.mubr.bf16.gmra.mrb[80].mxu1 %v3005_v58 }
 0x1c0   :  { %2805 = vmatprep.mubr.bf16.mxu1 %v3006_v10 }
 0x1c7   :  { %2806 = vmatmul.mubr.bf16.gmra.mrb[84].mxu1 %v3007_v18 }
 0x1c8   :  { %2809 = vmatprep.mubr.bf16.mxu1 %v3008_v59 }
 0x1cf   :  { %2810 = vmatmul.mubr.bf16.gmra.mrb[88].mxu1 %v3009_v61  ;;  %v3817_v61 = vpop.permute.xlu0 %1872 }
 0x1d0   :  { %2813 = vmatprep.mubr.bf16.mxu1 %v3010_v62 }
 0x1d7   :  { %2814 = vmatmul.mubr.bf16.gmra.mrb[92].mxu1 %v3011_v26 }
 0x272   :  { %v2787_v48 = vpop.f32.mrb[64].mxu1 }
 0x273   :  { %v2019_v44 = vadd.f32 %v2787_v48, %v1733_v11  ;;  %v2010_v25 = vpop.f32.mrb[65].mxu1  ;;  %v1793_v48 = vpop.permute.xlu0 %1792 }
 0x274   :  { %v2011_v28 = vadd.f32 %v2010_v25, %v1723_v2  ;;  %v2788_v29 = vpop.f32.mrb[66].mxu1 }
 0x275   :  { %v2022_v32 = vadd.f32 %v2788_v29, %v1738_v1  ;;  %v2013_v51 = vpop.f32.mrb[67].mxu1  ;;  %v2139_v33 = vmax.f32 %v2019_v44, 0.0  ;;  %v1798_v29 = vpop.permute.xlu1 %1797 }
 0x276   :  { %v2014_v53 = vadd.f32 %v2013_v51, %v1728_v3  ;;  %v2137_v37 = vmax.f32 %v2011_v28, 0.0 }
 0x277   :  { %v2140_v14 = vmax.f32 %v2022_v32, 0.0 }
 0x278   :  { %v2138_v60 = vmax.f32 %v2014_v53, 0.0 }
 0x279   :  { %v3807_v39 = vpack.c.bf16 %v2140_v14, %v2139_v33 }
 0x27a   :  { %v3811_v40 = vpack.c.bf16 %v2138_v60, %v2137_v37  ;;  %v2791_v21 = vpop.f32.mrb[68].mxu1 }
 0x27b   :  { %v2035_v42 = vadd.f32 %v2791_v21, %v1753_v13  ;;  %v2026_v43 = vpop.f32.mrb[69].mxu1 }
 0x27c   :  { %v2027_v4 = vadd.f32 %v2026_v43, %v1743_v47  ;;  %v2792_v45 = vpop.f32.mrb[70].mxu1 }
 0x27d   :  { %v2038_v46 = vadd.f32 %v2792_v45, %v1758_v15  ;;  %v2029_v49 = vpop.f32.mrb[71].mxu1  ;;  %v2143_v50 = vmax.f32 %v2035_v42, 0.0 }
 0x27e   :  { %v2030_v56 = vadd.f32 %v2029_v49, %v1748_v5  ;;  %v2141_v54 = vmax.f32 %v2027_v4, 0.0 }
 0x27f   :  { %v2144_v8 = vmax.f32 %v2038_v46, 0.0 }
 0x280   :  { %v2142_v55 = vmax.f32 %v2030_v56, 0.0 }
 0x281   :  { %v3813_v57 = vpack.c.bf16 %v2144_v8, %v2143_v50 }
 0x282   :  { %v3815_v58 = vpack.c.bf16 %v2142_v55, %v2141_v54  ;;  %v2795_v10 = vpop.f32.mrb[72].mxu1 }
 0x283   :  { %v2051_v18 = vadd.f32 %v2795_v10, %v1773_v23  ;;  %v2042_v59 = vpop.f32.mrb[73].mxu1 }
 0x284   :  { %v2043_v62 = vadd.f32 %v2042_v59, %v1763_v19  ;;  %v2796_v26 = vpop.f32.mrb[74].mxu1 }
 0x285   :  { %v2054_v2 = vadd.f32 %v2796_v26, %v1778_v24  ;;  %v2045_v3 = vpop.f32.mrb[75].mxu1  ;;  %v2147_v1 = vmax.f32 %v2051_v18, 0.0 }
 0x286   :  { %v2046_v11 = vadd.f32 %v2045_v3, %v1768_v41  ;;  %v2145_v5 = vmax.f32 %v2043_v62, 0.0 }
 0x287   :  { %v2148_v47 = vmax.f32 %v2054_v2, 0.0 }
 0x288   :  { %v2146_v13 = vmax.f32 %v2046_v11, 0.0 }
 0x289   :  { %v3821_v15 = vpack.c.bf16 %v2148_v47, %v2147_v1 }
 0x28a   :  { %v3823_v44 = vpack.c.bf16 %v2146_v13, %v2145_v5  ;;  %v2799_v23 = vpop.f32.mrb[76].mxu1 }
 0x28b   :  { %v2067_v25 = vadd.f32 %v2799_v23, %v1793_v48  ;;  %v2058_v28 = vpop.f32.mrb[77].mxu1 }
 0x28c   :  { %v2059_v19 = vadd.f32 %v2058_v28, %v1783_v34  ;;  %v2800_v32 = vpop.f32.mrb[78].mxu1 }
 0x28d   :  { %v2070_v24 = vadd.f32 %v2800_v32, %v1798_v29  ;;  %v2061_v51 = vpop.f32.mrb[79].mxu1  ;;  %v2151_v33 = vmax.f32 %v2067_v25, 0.0 }
 0x28e   :  { %v2062_v53 = vadd.f32 %v2061_v51, %v1788_v7  ;;  %v2149_v14 = vmax.f32 %v2059_v19, 0.0 }
 0x28f   :  { %v2152_v41 = vmax.f32 %v2070_v24, 0.0 }
 0x290   :  { %v2150_v37 = vmax.f32 %v2062_v53, 0.0 }
 0x291   :  { %v3825_v60 = vpack.c.bf16 %v2152_v41, %v2151_v33 }
 0x292   :  { %v3827_v21 = vpack.c.bf16 %v2150_v37, %v2149_v14  ;;  %v2803_v42 = vpop.f32.mrb[80].mxu1 }
 0x293   :  { %v2083_v43 = vadd.f32 %v2803_v42, %v3785_v6  ;;  %v2074_v4 = vpop.f32.mrb[81].mxu1  ;;  %v2190_v42 = vpop.permute.xlu0 %2189 }
 0x294   :  { %v2075_v45 = vadd.f32 %v2074_v4, %v3774_v63  ;;  %v2804_v46 = vpop.f32.mrb[82].mxu1 }
 0x295   :  { %v2086_v49 = vadd.f32 %v2804_v46, %v3787_v9  ;;  %v2077_v34 = vpop.f32.mrb[83].mxu1  ;;  %v2155_v50 = vmax.f32 %v2083_v43, 0.0  ;;  %v2243_v46 = vlaneseq }
 0x296   :  { %v2078_v56 = vadd.f32 %v2077_v34, %v3776_v0  ;;  %v2153_v7 = vmax.f32 %v2075_v45, 0.0 }
 0x297   :  { %v2156_v8 = vmax.f32 %v2086_v49, 0.0 }
 0x298   :  { %v2154_v54 = vmax.f32 %v2078_v56, 0.0 }
 0x299   :  { %v2178_v55 = vpack.c.bf16 %v2156_v8, %v2155_v50 }
 0x29a   :  { %v2177_v10 = vpack.c.bf16 %v2154_v54, %v2153_v7  ;;  %v2807_v18 = vpop.f32.mrb[84].mxu1 }
 0x29b   :  { %v2099_v59 = vadd.f32 %v2807_v18, %v3793_v52  ;;  %v2090_v62 = vpop.f32.mrb[85].mxu1 }
 0x29c   :  { %v2091_v6 = vadd.f32 %v2090_v62, %v3789_v12  ;;  %v2808_v26 = vpop.f32.mrb[86].mxu1  ;;  %2715 = vmatprep.subr.bf16.mxu0 %v2177_v10 }
 0x29d   :  { %v2102_v63 = vadd.f32 %v2808_v26, %v3795_v35  ;;  %v2093_v9 = vpop.f32.mrb[87].mxu1  ;;  %2716 = vmatpush3.bf16.msra.mxu0 %v3811_v40  ;;  %v2159_v2 = vmax.f32 %v2099_v59, 0.0 }
 0x29e   :  { %v2094_v0 = vadd.f32 %v2093_v9, %v3791_v31  ;;  %2717 = vmatprep.subr.bf16.mxu0 %v2178_v55  ;;  %v2157_v11 = vmax.f32 %v2091_v6, 0.0 }
 0x29f   :  { %v2160_v3 = vmax.f32 %v2102_v63, 0.0 }
 0x2a0   :  { %v2158_v1 = vmax.f32 %v2094_v0, 0.0 }
 0x2a1   :  { %v2180_v47 = vpack.c.bf16 %v2160_v3, %v2159_v2  ;;  %2718 = vmatpush3.bf16.msra.mxu0 %v3807_v39 }
 0x2a2   :  { %v2179_v52 = vpack.c.bf16 %v2158_v1, %v2157_v11  ;;  %v2811_v5 = vpop.f32.mrb[88].mxu1 }
 0x2a3   :  { %v2115_v12 = vadd.f32 %v2811_v5, %v3801_v22  ;;  %v2106_v13 = vpop.f32.mrb[89].mxu1 }
 0x2a4   :  { %v2107_v35 = vadd.f32 %v2106_v13, %v3797_v16  ;;  %v2812_v48 = vpop.f32.mrb[90].mxu1  ;;  %2719 = vmatprep.subr.bf16.mxu0 %v2179_v52 }
 0x2a5   :  { %v2118_v40 = vadd.f32 %v2812_v48, %v3803_v20  ;;  %v2109_v31 = vpop.f32.mrb[91].mxu1  ;;  %2720 = vmatpush3.bf16.msra.mxu0 %v3815_v58  ;;  %v2163_v25 = vmax.f32 %v2115_v12, 0.0 }
 0x2a6   :  { %v2110_v23 = vadd.f32 %v2109_v31, %v3799_v17  ;;  %2721 = vmatprep.subr.bf16.mxu0 %v2180_v47  ;;  %v2161_v39 = vmax.f32 %v2107_v35, 0.0 }
 0x2a7   :  { %v2164_v28 = vmax.f32 %v2118_v40, 0.0 }
 0x2a8   :  { %v2162_v29 = vmax.f32 %v2110_v23, 0.0 }
 0x2a9   :  { %v2182_v19 = vpack.c.bf16 %v2164_v28, %v2163_v25  ;;  %2722 = vmatpush3.bf16.msra.mxu0 %v3813_v57 }
 0x2aa   :  { %v2181_v22 = vpack.c.bf16 %v2162_v29, %v2161_v39  ;;  %v2815_v32 = vpop.f32.mrb[92].mxu1 }
 0x2ab   :  { %v2131_v16 = vadd.f32 %v2815_v32, %v3817_v61  ;;  %v2122_v24 = vpop.f32.mrb[93].mxu1 }
 0x2ac   :  { %v2123_v20 = vadd.f32 %v2122_v24, %v3805_v36  ;;  %v2816_v51 = vpop.f32.mrb[94].mxu1  ;;  %2723 = vmatprep.subr.bf16.mxu0 %v2181_v22 }
 0x2ad   :  { %v2134_v58 = vadd.f32 %v2816_v51, %v3819_v27  ;;  %v2125_v17 = vpop.f32.mrb[95].mxu1  ;;  %2724 = vmatpush3.bf16.msra.mxu0 %v3823_v44  ;;  %v2167_v33 = vmax.f32 %v2131_v16, 0.0 }
 0x2ae   :  { %v2126_v53 = vadd.f32 %v2125_v17, %v3809_v38  ;;  %2725 = vmatprep.subr.bf16.mxu0 %v2182_v19  ;;  %v2165_v57 = vmax.f32 %v2123_v20, 0.0 }
 0x2af   :  { %v2168_v41 = vmax.f32 %v2134_v58, 0.0 }
 0x2b0   :  { %v2166_v14 = vmax.f32 %v2126_v53, 0.0 }
 0x2b1   :  { %v2184_v37 = vpack.c.bf16 %v2168_v41, %v2167_v33  ;;  %2726 = vmatpush3.bf16.msra.mxu0 %v3821_v15  ;;  %v2244_v15 = vshrl.u32 %v2243_v46, 7 }
 0x2b2   :  { %v2183_v61 = vpack.c.bf16 %v2166_v14, %v2165_v57 }
 0x2b3   :  { %vm2249_vm0 = vcmp.eq.s32.totalorder %v2244_v15, 0 }
 0x2b4   :  { %2727 = vmatprep.subr.bf16.mxu0 %v2183_v61 }
 0x2b5   :  { %2728 = vmatpush3.bf16.msra.mxu0 %v3827_v21 }
 0x2b6   :  { %2729 = vmatprep.subr.bf16.mxu0 %v2184_v37 }
 0x2b9   :  { %2730 = vmatpush3.bf16.msra.mxu0 %v3825_v60 }
 0x2bc   :  { %2236 = vmatmul.mubr.bf16.vlgmr.msra.gmra.mrb[80].mxu0 %v3781_v30 }
 0x38f   :  { %v2731_v36 = vpop.f32.mrb[80].mxu0 }
 0x390   :  { %v2732_v27 = vpop.f32.mrb[81].mxu0 }
 0x391   :  { %v2733_v38 = vadd.f32 %v2732_v27, %v2731_v36  ;;  %v2734_v44 = vpop.f32.mrb[82].mxu0 }
 0x392   :  { %v2735_v43 = vpop.f32.mrb[83].mxu0 }
 0x393   :  { %v2238_v4 = vadd.f32 %v2733_v38, %v2190_v42 }
 0x395   :  { %v2245_v45 = vmul.f32 0.5, %v2238_v4 }
 0x397   :  { %3012 = vtanh.f32 %v2245_v45 }
 0x398   :  { %3014 = vtanh.f32 %v2238_v4 }
 0x3a1   :  { %v3013_v49 = vpop.eup %3012 }
 0x3a2   :  { %v2247_v34 = vadd.f32 1.0, %v3013_v49  ;;  %v3015_v60 = vpop.eup %3014 }
 0x3a4   :  { %v2248_v21 = vmul.f32 0.5, %v2247_v34 }
 0x3a6   :  { %v2251_v56 = vsel %vm2249_vm0, %v3015_v60, %v2248_v21 }
 0x3a7   :  { %2253 = vst.msk [vmem:[%s3864_s7] sm:$0x7] %vm2252_vm1, %v2251_v56 }

</bundles_post_ra>
